<compile_context>
chip_gen: v7x
topology: tpu7x:2x2x1
jax: 0.10.0
libtpu: 0.0.40
codegen_flags: <defaults>
</compile_context>

<pallas_src>
import jax
import jax.numpy as jnp
from jax import lax
from jax.experimental import pallas as pl
from jax.experimental.pallas import tpu as pltpu

BN_EPS = 1e-5


def _conv_bn_relu_pool(x, col_ref, w_ref, p_ref, *, pool, pad_ref=None):
    """One fused layer, fully in VMEM.

    x:       (N, Hin, Win, Cin) f32 value (un-padded layer input)
    col_ref: (N, Hout, Wout, 9*Cin) f32 VMEM scratch (im2col buffer)
    w_ref:   (9*Cin, Cout) bf16 VMEM (flattened HWIO conv weight)
    p_ref:   (3, 1, Cout) f32 VMEM, rows = [bias, gamma, beta]
    pad_ref: optional (N, Hin+2, Win+2, Cin) f32 VMEM scratch with zeroed borders,
             used to realize padding=1 inside the kernel.
    Returns the (optionally pooled) activation as an f32 value.
    """
    if pad_ref is not None:
        n, hin, win, _ = x.shape
        pad_ref[:, 1:1 + hin, 1:1 + win, :] = x          # borders stay zero
        x = pad_ref[...]

    N, Hin, Win, Cin = x.shape
    Hout, Wout = Hin - 2, Win - 2
    Cout = w_ref.shape[-1]
    M = N * Hout * Wout

    # --- im2col: write each shifted tap once into the lane-stacked buffer ----
    for ky in range(3):
        for kx in range(3):
            c0 = (3 * ky + kx) * Cin
            col_ref[:, :, :, c0:c0 + Cin] = x[:, ky:ky + Hout, kx:kx + Wout, :]

    # --- single MXU matmul: bf16 operands, f32 accumulation -------------------
    patches = col_ref[...].reshape(M, 9 * Cin).astype(jnp.bfloat16)
    acc = jnp.dot(patches, w_ref[...], preferred_element_type=jnp.float32)

    p = p_ref[...]
    bias, gamma, beta = p[0], p[1], p[2]                 # each (1, Cout) f32
    acc = acc + bias

    # --- BatchNorm2d (training mode, biased batch stats), folded, + ReLU -----
    mean = jnp.mean(acc, axis=0, keepdims=True)
    var = jnp.mean(jnp.square(acc - mean), axis=0, keepdims=True)
    scale = gamma * lax.rsqrt(var + BN_EPS)
    shift = beta - mean * scale
    y = jnp.maximum(acc * scale + shift, 0.0)
    y = y.reshape(N, Hout, Wout, Cout)

    # --- optional MaxPool2d(2, stride=2), floor semantics like PyTorch -------
    if pool:
        Hp, Wp = Hout // 2, Wout // 2
        y = y[:, :2 * Hp].reshape(N, Hp, 2, Wout, Cout)   # lane/sublane untouched
        y = jnp.maximum(y[:, :, 0], y[:, :, 1])
        y = y[:, :, :2 * Wp].reshape(N, Hp, Wp, 2, Cout)
        y = jnp.maximum(y[:, :, :, 0], y[:, :, :, 1])
    return y


def _encoder_kernel(x_ref, w1_ref, p1_ref, w2_ref, p2_ref, w3_ref, p3_ref,
                    w4_ref, p4_ref, o_ref,
                    col1_ref, col2_ref, col34_ref, pad_ref):
    x = x_ref[...]                                                     # (N,H,W,3) f32
    y = _conv_bn_relu_pool(x, col1_ref, w1_ref, p1_ref, pool=True)     # layer1
    y = _conv_bn_relu_pool(y, col2_ref, w2_ref, p2_ref, pool=True)     # layer2
    # zero the shared padded buffer once; layers 3/4 rewrite only its interior
    pad_ref[...] = jnp.zeros(pad_ref.shape, pad_ref.dtype)
    y = _conv_bn_relu_pool(y, col34_ref, w3_ref, p3_ref, pool=False,
                           pad_ref=pad_ref)                            # layer3
    y = _conv_bn_relu_pool(y, col34_ref, w4_ref, p4_ref, pool=False,
                           pad_ref=pad_ref)                            # layer4
    o_ref[...] = y.astype(o_ref.dtype)


# ---------------------------------------------------------------------------
# Parameter construction (deterministic, mimics PyTorch default inits).
# ---------------------------------------------------------------------------
def init_params(key):
    """Returns a list of 4 tuples (w, b, gamma, beta), w in HWIO (3,3,Cin,Cout)."""
    layer_cfg = [(3, 64), (64, 64), (64, 64), (64, 64)]
    params = []
    for cin, cout in layer_cfg:
        key, kw, kb = jax.random.split(key, 3)
        fan_in = cin * 3 * 3
        bound = 1.0 / (fan_in ** 0.5)            # kaiming_uniform(a=sqrt(5)) bound
        w = jax.random.uniform(kw, (3, 3, cin, cout), jnp.float32, -bound, bound)
        b = jax.random.uniform(kb, (cout,), jnp.float32, -bound, bound)
        params.append((w, b, jnp.ones((cout,), jnp.float32),
                       jnp.zeros((cout,), jnp.float32)))
    return params


@jax.jit
def cnn_encoder_forward(x_nchw, params):
    """Matches CNNEncoder.forward (training-mode BN): NCHW in -> NCHW out."""
    N, _, H, W = x_nchw.shape
    x = jnp.transpose(x_nchw, (0, 2, 3, 1)).astype(jnp.float32)        # -> NHWC

    # Static per-layer output sizes.
    h1, w1 = H - 2, W - 2                    # conv1 (valid)
    h1p, w1p = h1 // 2, w1 // 2              # pool1
    h2, w2 = h1p - 2, w1p - 2                # conv2 (valid)
    h2p, w2p = h2 // 2, w2 // 2              # pool2
    h3, w3 = h2p, w2p                        # conv3 / conv4 ("same", pad=1)
    cout = params[0][0].shape[3]

    # Flatten conv weights to (9*Cin, Cout) bf16 (matches im2col channel order),
    # stack conv bias + BN affine as f32 (3, 1, Cout) = [bias, gamma, beta].
    flat_args = []
    for (w, b, g, beta) in params:
        kk = w.shape[0] * w.shape[1] * w.shape[2]
        flat_args.append(w.reshape(kk, w.shape[3]).astype(jnp.bfloat16))
        flat_args.append(jnp.stack([b, g, beta]).reshape(3, 1, -1)
                         .astype(jnp.float32))

    vmem = pl.BlockSpec(memory_space=pltpu.MemorySpace.VMEM)
    out_nhwc = pl.pallas_call(
        _encoder_kernel,
        out_shape=jax.ShapeDtypeStruct((N, h3, w3, cout), jnp.float32),
        in_specs=[vmem] * 9,
        out_specs=vmem,
        scratch_shapes=[
            pltpu.VMEM((N, h1, w1, 9 * 3), jnp.float32),        # im2col layer1
            pltpu.VMEM((N, h2, w2, 9 * cout), jnp.float32),     # im2col layer2
            pltpu.VMEM((N, h3, w3, 9 * cout), jnp.float32),     # im2col layers 3/4
            pltpu.VMEM((N, h3 + 2, w3 + 2, cout), jnp.float32),  # pad=1 buffer 3/4
        ],
        compiler_params=pltpu.CompilerParams(
            vmem_limit_bytes=48 * 1024 * 1024),   # above the 16/32 MiB scoped defaults
    )(x, *flat_args)
    return jnp.transpose(out_nhwc, (0, 3, 1, 2))                       # -> NCHW


# ---------------------------------------------------------------------------
# Pure-JAX references for correctness checks.
# ---------------------------------------------------------------------------
def _ref_layer(x, w, b, g, beta, padding, pool, matmul_dtype):
    y = lax.conv_general_dilated(
        x.astype(matmul_dtype), w.astype(matmul_dtype),
        window_strides=(1, 1),
        padding=[(padding, padding), (padding, padding)],
        dimension_numbers=('NHWC', 'HWIO', 'NHWC'),
        preferred_element_type=jnp.float32)
    y = y + b
    mean = jnp.mean(y, axis=(0, 1, 2), keepdims=True)
    var = jnp.mean((y - mean) ** 2, axis=(0, 1, 2), keepdims=True)
    y = (y - mean) * lax.rsqrt(var + BN_EPS) * g + beta
    y = jnp.maximum(y, 0.0)
    if pool:
        N, H, W, C = y.shape
        Hp, Wp = H // 2, W // 2
        y = y[:, :2 * Hp, :2 * Wp, :].reshape(N, Hp, 2, Wp, 2, C).max(axis=(2, 4))
    return y


def _ref_forward(x_nchw, params, matmul_dtype=jnp.float32):
    x = jnp.transpose(x_nchw, (0, 2, 3, 1)).astype(jnp.float32)
    x = _ref_layer(x, *params[0], 0, True, matmul_dtype)
    x = _ref_layer(x, *params[1], 0, True, matmul_dtype)
    x = _ref_layer(x, *params[2], 1, False, matmul_dtype)
    x = _ref_layer(x, *params[3], 1, False, matmul_dtype)
    return jnp.transpose(x, (0, 3, 1, 2))


if __name__ == "__main__":
    key = jax.random.PRNGKey(0)
    kx, kp = jax.random.split(key)

    # Small NCHW input consistent with the module (Conv2d expects 3 channels).
    x = jax.random.normal(kx, (2, 3, 16, 16), jnp.float32)
    params = init_params(kp)

    out = jax.block_until_ready(cnn_encoder_forward(x, params))

    # Tight check against a reference with the same bf16-operand / f32-accumulate
    # MXU rounding, plus a loose check against the exact f32 module semantics
    # (the only intended deviation is the bf16 cast of the matmul operands).
    ref_bf16 = _ref_forward(x, params, matmul_dtype=jnp.bfloat16)
    ref_f32 = _ref_forward(x, params, matmul_dtype=jnp.float32)

    assert out.shape == ref_f32.shape, (out.shape, ref_f32.shape)
    assert jnp.allclose(out, ref_bf16, rtol=1e-3, atol=1e-3), \
        float(jnp.max(jnp.abs(out - ref_bf16)))
    max_err = float(jnp.max(jnp.abs(out - ref_f32)))
    rel_err = float(jnp.linalg.norm(out - ref_f32) / jnp.linalg.norm(ref_f32))
    assert max_err < 0.1 and rel_err < 0.05, (max_err, rel_err)

    print("KERNEL_OK")
</pallas_src>

<mosaic_0001>
module attributes {stable_mosaic.version = 11 : i64} {
  func.func @_encoder_kernel(%arg0: memref<2x16x16x3xf32, #tpu.memory_space<vmem>>, %arg1: memref<27x64xbf16, #tpu.memory_space<vmem>>, %arg2: memref<3x1x64xf32, #tpu.memory_space<vmem>>, %arg3: memref<576x64xbf16, #tpu.memory_space<vmem>>, %arg4: memref<3x1x64xf32, #tpu.memory_space<vmem>>, %arg5: memref<576x64xbf16, #tpu.memory_space<vmem>>, %arg6: memref<3x1x64xf32, #tpu.memory_space<vmem>>, %arg7: memref<576x64xbf16, #tpu.memory_space<vmem>>, %arg8: memref<3x1x64xf32, #tpu.memory_space<vmem>>, %arg9: memref<2x2x2x64xf32, #tpu.memory_space<vmem>>, %arg10: memref<2x14x14x27xf32, #tpu.memory_space<vmem>>, %arg11: memref<2x5x5x576xf32, #tpu.memory_space<vmem>>, %arg12: memref<2x2x2x576xf32, #tpu.memory_space<vmem>>, %arg13: memref<2x4x4x64xf32, #tpu.memory_space<vmem>>) attributes {dimension_semantics = [], scalar_prefetch = 0 : i64, scratch_operands = 4 : i64, tpu.core_type = #tpu.core_type<tc>} {
    %c0 = arith.constant 0 : index
    %c0_0 = arith.constant 0 : index
    %c0_1 = arith.constant 0 : index
    %c0_2 = arith.constant 0 : index
    %0 = vector.load %arg0[%c0, %c0_0, %c0_1, %c0_2] : memref<2x16x16x3xf32, #tpu.memory_space<vmem>>, vector<2x16x16x3xf32>
    %1 = vector.extract_strided_slice %0 {offsets = [0, 0, 0, 0], sizes = [2, 14, 14, 3], strides = [1, 1, 1, 1]} : vector<2x16x16x3xf32> to vector<2x14x14x3xf32>
    %c0_3 = arith.constant 0 : index
    %c0_4 = arith.constant 0 : index
    %c0_5 = arith.constant 0 : index
    %c0_6 = arith.constant 0 : index
    %2 = vector.load %arg10[%c0_3, %c0_4, %c0_5, %c0_6] : memref<2x14x14x27xf32, #tpu.memory_space<vmem>>, vector<2x14x14x3xf32>
    tpu.vector_store %arg10[%c0_3, %c0_4, %c0_5, %c0_6], %1 {strides = array<i32>} : memref<2x14x14x27xf32, #tpu.memory_space<vmem>>, vector<2x14x14x3xf32>,
    %3 = vector.extract_strided_slice %0 {offsets = [0, 0, 1, 0], sizes = [2, 14, 14, 3], strides = [1, 1, 1, 1]} : vector<2x16x16x3xf32> to vector<2x14x14x3xf32>
    %c0_7 = arith.constant 0 : index
    %c0_8 = arith.constant 0 : index
    %c0_9 = arith.constant 0 : index
    %c3 = arith.constant 3 : index
    %4 = vector.load %arg10[%c0_7, %c0_8, %c0_9, %c3] : memref<2x14x14x27xf32, #tpu.memory_space<vmem>>, vector<2x14x14x3xf32>
    tpu.vector_store %arg10[%c0_7, %c0_8, %c0_9, %c3], %3 {strides = array<i32>} : memref<2x14x14x27xf32, #tpu.memory_space<vmem>>, vector<2x14x14x3xf32>,
    %5 = vector.extract_strided_slice %0 {offsets = [0, 0, 2, 0], sizes = [2, 14, 14, 3], strides = [1, 1, 1, 1]} : vector<2x16x16x3xf32> to vector<2x14x14x3xf32>
    %c0_10 = arith.constant 0 : index
    %c0_11 = arith.constant 0 : index
    %c0_12 = arith.constant 0 : index
    %c6 = arith.constant 6 : index
    %6 = vector.load %arg10[%c0_10, %c0_11, %c0_12, %c6] : memref<2x14x14x27xf32, #tpu.memory_space<vmem>>, vector<2x14x14x3xf32>
    tpu.vector_store %arg10[%c0_10, %c0_11, %c0_12, %c6], %5 {strides = array<i32>} : memref<2x14x14x27xf32, #tpu.memory_space<vmem>>, vector<2x14x14x3xf32>,
    %7 = vector.extract_strided_slice %0 {offsets = [0, 1, 0, 0], sizes = [2, 14, 14, 3], strides = [1, 1, 1, 1]} : vector<2x16x16x3xf32> to vector<2x14x14x3xf32>
    %c0_13 = arith.constant 0 : index
    %c0_14 = arith.constant 0 : index
    %c0_15 = arith.constant 0 : index
    %c9 = arith.constant 9 : index
    %8 = vector.load %arg10[%c0_13, %c0_14, %c0_15, %c9] : memref<2x14x14x27xf32, #tpu.memory_space<vmem>>, vector<2x14x14x3xf32>
    tpu.vector_store %arg10[%c0_13, %c0_14, %c0_15, %c9], %7 {strides = array<i32>} : memref<2x14x14x27xf32, #tpu.memory_space<vmem>>, vector<2x14x14x3xf32>,
    %9 = vector.extract_strided_slice %0 {offsets = [0, 1, 1, 0], sizes = [2, 14, 14, 3], strides = [1, 1, 1, 1]} : vector<2x16x16x3xf32> to vector<2x14x14x3xf32>
    %c0_16 = arith.constant 0 : index
    %c0_17 = arith.constant 0 : index
    %c0_18 = arith.constant 0 : index
    %c12 = arith.constant 12 : index
    %10 = vector.load %arg10[%c0_16, %c0_17, %c0_18, %c12] : memref<2x14x14x27xf32, #tpu.memory_space<vmem>>, vector<2x14x14x3xf32>
    tpu.vector_store %arg10[%c0_16, %c0_17, %c0_18, %c12], %9 {strides = array<i32>} : memref<2x14x14x27xf32, #tpu.memory_space<vmem>>, vector<2x14x14x3xf32>,
    %11 = vector.extract_strided_slice %0 {offsets = [0, 1, 2, 0], sizes = [2, 14, 14, 3], strides = [1, 1, 1, 1]} : vector<2x16x16x3xf32> to vector<2x14x14x3xf32>
    %c0_19 = arith.constant 0 : index
    %c0_20 = arith.constant 0 : index
    %c0_21 = arith.constant 0 : index
    %c15 = arith.constant 15 : index
    %12 = vector.load %arg10[%c0_19, %c0_20, %c0_21, %c15] : memref<2x14x14x27xf32, #tpu.memory_space<vmem>>, vector<2x14x14x3xf32>
    tpu.vector_store %arg10[%c0_19, %c0_20, %c0_21, %c15], %11 {strides = array<i32>} : memref<2x14x14x27xf32, #tpu.memory_space<vmem>>, vector<2x14x14x3xf32>,
    %13 = vector.extract_strided_slice %0 {offsets = [0, 2, 0, 0], sizes = [2, 14, 14, 3], strides = [1, 1, 1, 1]} : vector<2x16x16x3xf32> to vector<2x14x14x3xf32>
    %c0_22 = arith.constant 0 : index
    %c0_23 = arith.constant 0 : index
    %c0_24 = arith.constant 0 : index
    %c18 = arith.constant 18 : index
    %14 = vector.load %arg10[%c0_22, %c0_23, %c0_24, %c18] : memref<2x14x14x27xf32, #tpu.memory_space<vmem>>, vector<2x14x14x3xf32>
    tpu.vector_store %arg10[%c0_22, %c0_23, %c0_24, %c18], %13 {strides = array<i32>} : memref<2x14x14x27xf32, #tpu.memory_space<vmem>>, vector<2x14x14x3xf32>,
    %15 = vector.extract_strided_slice %0 {offsets = [0, 2, 1, 0], sizes = [2, 14, 14, 3], strides = [1, 1, 1, 1]} : vector<2x16x16x3xf32> to vector<2x14x14x3xf32>
    %c0_25 = arith.constant 0 : index
    %c0_26 = arith.constant 0 : index
    %c0_27 = arith.constant 0 : index
    %c21 = arith.constant 21 : index
    %16 = vector.load %arg10[%c0_25, %c0_26, %c0_27, %c21] : memref<2x14x14x27xf32, #tpu.memory_space<vmem>>, vector<2x14x14x3xf32>
    tpu.vector_store %arg10[%c0_25, %c0_26, %c0_27, %c21], %15 {strides = array<i32>} : memref<2x14x14x27xf32, #tpu.memory_space<vmem>>, vector<2x14x14x3xf32>,
    %17 = vector.extract_strided_slice %0 {offsets = [0, 2, 2, 0], sizes = [2, 14, 14, 3], strides = [1, 1, 1, 1]} : vector<2x16x16x3xf32> to vector<2x14x14x3xf32>
    %c0_28 = arith.constant 0 : index
    %c0_29 = arith.constant 0 : index
    %c0_30 = arith.constant 0 : index
    %c24 = arith.constant 24 : index
    %18 = vector.load %arg10[%c0_28, %c0_29, %c0_30, %c24] : memref<2x14x14x27xf32, #tpu.memory_space<vmem>>, vector<2x14x14x3xf32>
    tpu.vector_store %arg10[%c0_28, %c0_29, %c0_30, %c24], %17 {strides = array<i32>} : memref<2x14x14x27xf32, #tpu.memory_space<vmem>>, vector<2x14x14x3xf32>,
    %c0_31 = arith.constant 0 : index
    %c0_32 = arith.constant 0 : index
    %c0_33 = arith.constant 0 : index
    %c0_34 = arith.constant 0 : index
    %19 = vector.load %arg10[%c0_31, %c0_32, %c0_33, %c0_34] : memref<2x14x14x27xf32, #tpu.memory_space<vmem>>, vector<2x14x14x27xf32>
    %20 = vector.shape_cast %19 : vector<2x14x14x27xf32> to vector<392x27xf32>
    %21 = arith.truncf %20 : vector<392x27xf32> to vector<392x27xbf16>
    %c0_35 = arith.constant 0 : index
    %c0_36 = arith.constant 0 : index
    %22 = vector.load %arg1[%c0_35, %c0_36] : memref<27x64xbf16, #tpu.memory_space<vmem>>, vector<27x64xbf16>
    %cst = arith.constant dense<0.000000e+00> : vector<392x64xf32>
    %23 = tpu.matmul %21, %22, %cst {dimension_numbers = #tpu.dot_dimension_numbers<[1], [0], [0], [1], [0, 0, 1, 1], [], []>} : vector<392x27xbf16>, vector<27x64xbf16>, vector<392x64xf32> -> vector<392x64xf32>
    %c0_37 = arith.constant 0 : index
    %c0_38 = arith.constant 0 : index
    %c0_39 = arith.constant 0 : index
    %24 = vector.load %arg2[%c0_37, %c0_38, %c0_39] : memref<3x1x64xf32, #tpu.memory_space<vmem>>, vector<3x1x64xf32>
    %25 = vector.extract_strided_slice %24 {offsets = [0, 0, 0], sizes = [1, 1, 64], strides = [1, 1, 1]} : vector<3x1x64xf32> to vector<1x1x64xf32>
    %26 = vector.shape_cast %25 : vector<1x1x64xf32> to vector<1x64xf32>
    %27 = vector.extract_strided_slice %24 {offsets = [1, 0, 0], sizes = [1, 1, 64], strides = [1, 1, 1]} : vector<3x1x64xf32> to vector<1x1x64xf32>
    %28 = vector.shape_cast %27 : vector<1x1x64xf32> to vector<1x64xf32>
    %29 = vector.extract_strided_slice %24 {offsets = [2, 0, 0], sizes = [1, 1, 64], strides = [1, 1, 1]} : vector<3x1x64xf32> to vector<1x1x64xf32>
    %30 = vector.shape_cast %29 : vector<1x1x64xf32> to vector<1x64xf32>
    %31 = vector.broadcast %26 : vector<1x64xf32> to vector<392x64xf32>
    %32 = arith.addf %23, %31 : vector<392x64xf32>
    %cst_40 = arith.constant dense<0.000000e+00> : vector<64xf32>
    %33 = vector.multi_reduction <add>, %32, %cst_40 [0] : vector<392x64xf32> to vector<64xf32>
    %34 = vector.shape_cast %33 : vector<64xf32> to vector<1x64xf32>
    %cst_41 = arith.constant 3.920000e+02 : f32
    %35 = vector.broadcast %cst_41 : f32 to vector<1x64xf32>
    %36 = arith.divf %34, %35 : vector<1x64xf32>
    %37 = vector.broadcast %36 : vector<1x64xf32> to vector<392x64xf32>
    %38 = arith.subf %32, %37 : vector<392x64xf32>
    %39 = arith.mulf %38, %38 : vector<392x64xf32>
    %cst_42 = arith.constant dense<0.000000e+00> : vector<64xf32>
    %40 = vector.multi_reduction <add>, %39, %cst_42 [0] : vector<392x64xf32> to vector<64xf32>
    %41 = vector.shape_cast %40 : vector<64xf32> to vector<1x64xf32>
    %cst_43 = arith.constant 3.920000e+02 : f32
    %42 = vector.broadcast %cst_43 : f32 to vector<1x64xf32>
    %43 = arith.divf %41, %42 : vector<1x64xf32>
    %cst_44 = arith.constant 9.99999974E-6 : f32
    %44 = vector.broadcast %cst_44 : f32 to vector<1x64xf32>
    %45 = arith.addf %43, %44 : vector<1x64xf32>
    %46 = math.rsqrt %45 : vector<1x64xf32>
    %47 = arith.mulf %28, %46 : vector<1x64xf32>
    %48 = arith.mulf %36, %47 : vector<1x64xf32>
    %49 = arith.subf %30, %48 : vector<1x64xf32>
    %50 = vector.broadcast %47 : vector<1x64xf32> to vector<392x64xf32>
    %51 = arith.mulf %32, %50 : vector<392x64xf32>
    %52 = vector.broadcast %49 : vector<1x64xf32> to vector<392x64xf32>
    %53 = arith.addf %51, %52 : vector<392x64xf32>
    %cst_45 = arith.constant 0.000000e+00 : f32
    %54 = vector.broadcast %cst_45 : f32 to vector<392x64xf32>
    %55 = arith.maximumf %53, %54 : vector<392x64xf32>
    %56 = vector.shape_cast %55 : vector<392x64xf32> to vector<2x14x14x64xf32>
    %57 = vector.shape_cast %56 : vector<2x14x14x64xf32> to vector<2x7x2x14x64xf32>
    %58 = vector.extract_strided_slice %57 {offsets = [0, 0, 0, 0, 0], sizes = [2, 7, 1, 14, 64], strides = [1, 1, 1, 1, 1]} : vector<2x7x2x14x64xf32> to vector<2x7x1x14x64xf32>
    %59 = vector.shape_cast %58 : vector<2x7x1x14x64xf32> to vector<2x7x14x64xf32>
    %60 = vector.extract_strided_slice %57 {offsets = [0, 0, 1, 0, 0], sizes = [2, 7, 1, 14, 64], strides = [1, 1, 1, 1, 1]} : vector<2x7x2x14x64xf32> to vector<2x7x1x14x64xf32>
    %61 = vector.shape_cast %60 : vector<2x7x1x14x64xf32> to vector<2x7x14x64xf32>
    %62 = arith.maximumf %59, %61 : vector<2x7x14x64xf32>
    %63 = vector.shape_cast %62 : vector<2x7x14x64xf32> to vector<2x7x7x2x64xf32>
    %64 = vector.extract_strided_slice %63 {offsets = [0, 0, 0, 0, 0], sizes = [2, 7, 7, 1, 64], strides = [1, 1, 1, 1, 1]} : vector<2x7x7x2x64xf32> to vector<2x7x7x1x64xf32>
    %65 = vector.shape_cast %64 : vector<2x7x7x1x64xf32> to vector<2x7x7x64xf32>
    %66 = vector.extract_strided_slice %63 {offsets = [0, 0, 0, 1, 0], sizes = [2, 7, 7, 1, 64], strides = [1, 1, 1, 1, 1]} : vector<2x7x7x2x64xf32> to vector<2x7x7x1x64xf32>
    %67 = vector.shape_cast %66 : vector<2x7x7x1x64xf32> to vector<2x7x7x64xf32>
    %68 = arith.maximumf %65, %67 : vector<2x7x7x64xf32>
    %69 = vector.extract_strided_slice %68 {offsets = [0, 0, 0, 0], sizes = [2, 5, 5, 64], strides = [1, 1, 1, 1]} : vector<2x7x7x64xf32> to vector<2x5x5x64xf32>
    %c0_46 = arith.constant 0 : index
    %c0_47 = arith.constant 0 : index
    %c0_48 = arith.constant 0 : index
    %c0_49 = arith.constant 0 : index
    %70 = vector.load %arg11[%c0_46, %c0_47, %c0_48, %c0_49] : memref<2x5x5x576xf32, #tpu.memory_space<vmem>>, vector<2x5x5x64xf32>
    tpu.vector_store %arg11[%c0_46, %c0_47, %c0_48, %c0_49], %69 {strides = array<i32>} : memref<2x5x5x576xf32, #tpu.memory_space<vmem>>, vector<2x5x5x64xf32>,
    %71 = vector.extract_strided_slice %68 {offsets = [0, 0, 1, 0], sizes = [2, 5, 5, 64], strides = [1, 1, 1, 1]} : vector<2x7x7x64xf32> to vector<2x5x5x64xf32>
    %c0_50 = arith.constant 0 : index
    %c0_51 = arith.constant 0 : index
    %c0_52 = arith.constant 0 : index
    %c64 = arith.constant 64 : index
    %72 = vector.load %arg11[%c0_50, %c0_51, %c0_52, %c64] : memref<2x5x5x576xf32, #tpu.memory_space<vmem>>, vector<2x5x5x64xf32>
    tpu.vector_store %arg11[%c0_50, %c0_51, %c0_52, %c64], %71 {strides = array<i32>} : memref<2x5x5x576xf32, #tpu.memory_space<vmem>>, vector<2x5x5x64xf32>,
    %73 = vector.extract_strided_slice %68 {offsets = [0, 0, 2, 0], sizes = [2, 5, 5, 64], strides = [1, 1, 1, 1]} : vector<2x7x7x64xf32> to vector<2x5x5x64xf32>
    %c0_53 = arith.constant 0 : index
    %c0_54 = arith.constant 0 : index
    %c0_55 = arith.constant 0 : index
    %c128 = arith.constant 128 : index
    %74 = vector.load %arg11[%c0_53, %c0_54, %c0_55, %c128] : memref<2x5x5x576xf32, #tpu.memory_space<vmem>>, vector<2x5x5x64xf32>
    tpu.vector_store %arg11[%c0_53, %c0_54, %c0_55, %c128], %73 {strides = array<i32>} : memref<2x5x5x576xf32, #tpu.memory_space<vmem>>, vector<2x5x5x64xf32>,
    %75 = vector.extract_strided_slice %68 {offsets = [0, 1, 0, 0], sizes = [2, 5, 5, 64], strides = [1, 1, 1, 1]} : vector<2x7x7x64xf32> to vector<2x5x5x64xf32>
    %c0_56 = arith.constant 0 : index
    %c0_57 = arith.constant 0 : index
    %c0_58 = arith.constant 0 : index
    %c192 = arith.constant 192 : index
    %76 = vector.load %arg11[%c0_56, %c0_57, %c0_58, %c192] : memref<2x5x5x576xf32, #tpu.memory_space<vmem>>, vector<2x5x5x64xf32>
    tpu.vector_store %arg11[%c0_56, %c0_57, %c0_58, %c192], %75 {strides = array<i32>} : memref<2x5x5x576xf32, #tpu.memory_space<vmem>>, vector<2x5x5x64xf32>,
    %77 = vector.extract_strided_slice %68 {offsets = [0, 1, 1, 0], sizes = [2, 5, 5, 64], strides = [1, 1, 1, 1]} : vector<2x7x7x64xf32> to vector<2x5x5x64xf32>
    %c0_59 = arith.constant 0 : index
    %c0_60 = arith.constant 0 : index
    %c0_61 = arith.constant 0 : index
    %c256 = arith.constant 256 : index
    %78 = vector.load %arg11[%c0_59, %c0_60, %c0_61, %c256] : memref<2x5x5x576xf32, #tpu.memory_space<vmem>>, vector<2x5x5x64xf32>
    tpu.vector_store %arg11[%c0_59, %c0_60, %c0_61, %c256], %77 {strides = array<i32>} : memref<2x5x5x576xf32, #tpu.memory_space<vmem>>, vector<2x5x5x64xf32>,
    %79 = vector.extract_strided_slice %68 {offsets = [0, 1, 2, 0], sizes = [2, 5, 5, 64], strides = [1, 1, 1, 1]} : vector<2x7x7x64xf32> to vector<2x5x5x64xf32>
    %c0_62 = arith.constant 0 : index
    %c0_63 = arith.constant 0 : index
    %c0_64 = arith.constant 0 : index
    %c320 = arith.constant 320 : index
    %80 = vector.load %arg11[%c0_62, %c0_63, %c0_64, %c320] : memref<2x5x5x576xf32, #tpu.memory_space<vmem>>, vector<2x5x5x64xf32>
    tpu.vector_store %arg11[%c0_62, %c0_63, %c0_64, %c320], %79 {strides = array<i32>} : memref<2x5x5x576xf32, #tpu.memory_space<vmem>>, vector<2x5x5x64xf32>,
    %81 = vector.extract_strided_slice %68 {offsets = [0, 2, 0, 0], sizes = [2, 5, 5, 64], strides = [1, 1, 1, 1]} : vector<2x7x7x64xf32> to vector<2x5x5x64xf32>
    %c0_65 = arith.constant 0 : index
    %c0_66 = arith.constant 0 : index
    %c0_67 = arith.constant 0 : index
    %c384 = arith.constant 384 : index
    %82 = vector.load %arg11[%c0_65, %c0_66, %c0_67, %c384] : memref<2x5x5x576xf32, #tpu.memory_space<vmem>>, vector<2x5x5x64xf32>
    tpu.vector_store %arg11[%c0_65, %c0_66, %c0_67, %c384], %81 {strides = array<i32>} : memref<2x5x5x576xf32, #tpu.memory_space<vmem>>, vector<2x5x5x64xf32>,
    %83 = vector.extract_strided_slice %68 {offsets = [0, 2, 1, 0], sizes = [2, 5, 5, 64], strides = [1, 1, 1, 1]} : vector<2x7x7x64xf32> to vector<2x5x5x64xf32>
    %c0_68 = arith.constant 0 : index
    %c0_69 = arith.constant 0 : index
    %c0_70 = arith.constant 0 : index
    %c448 = arith.constant 448 : index
    %84 = vector.load %arg11[%c0_68, %c0_69, %c0_70, %c448] : memref<2x5x5x576xf32, #tpu.memory_space<vmem>>, vector<2x5x5x64xf32>
    tpu.vector_store %arg11[%c0_68, %c0_69, %c0_70, %c448], %83 {strides = array<i32>} : memref<2x5x5x576xf32, #tpu.memory_space<vmem>>, vector<2x5x5x64xf32>,
    %85 = vector.extract_strided_slice %68 {offsets = [0, 2, 2, 0], sizes = [2, 5, 5, 64], strides = [1, 1, 1, 1]} : vector<2x7x7x64xf32> to vector<2x5x5x64xf32>
    %c0_71 = arith.constant 0 : index
    %c0_72 = arith.constant 0 : index
    %c0_73 = arith.constant 0 : index
    %c512 = arith.constant 512 : index
    %86 = vector.load %arg11[%c0_71, %c0_72, %c0_73, %c512] : memref<2x5x5x576xf32, #tpu.memory_space<vmem>>, vector<2x5x5x64xf32>
    tpu.vector_store %arg11[%c0_71, %c0_72, %c0_73, %c512], %85 {strides = array<i32>} : memref<2x5x5x576xf32, #tpu.memory_space<vmem>>, vector<2x5x5x64xf32>,
    %c0_74 = arith.constant 0 : index
    %c0_75 = arith.constant 0 : index
    %c0_76 = arith.constant 0 : index
    %c0_77 = arith.constant 0 : index
    %87 = vector.load %arg11[%c0_74, %c0_75, %c0_76, %c0_77] : memref<2x5x5x576xf32, #tpu.memory_space<vmem>>, vector<2x5x5x576xf32>
    %88 = vector.shape_cast %87 : vector<2x5x5x576xf32> to vector<50x576xf32>
    %89 = arith.truncf %88 : vector<50x576xf32> to vector<50x576xbf16>
    %c0_78 = arith.constant 0 : index
    %c0_79 = arith.constant 0 : index
    %90 = vector.load %arg3[%c0_78, %c0_79] : memref<576x64xbf16, #tpu.memory_space<vmem>>, vector<576x64xbf16>
    %cst_80 = arith.constant dense<0.000000e+00> : vector<50x64xf32>
    %91 = tpu.matmul %89, %90, %cst_80 {dimension_numbers = #tpu.dot_dimension_numbers<[1], [0], [0], [1], [0, 0, 1, 1], [], []>} : vector<50x576xbf16>, vector<576x64xbf16>, vector<50x64xf32> -> vector<50x64xf32>
    %c0_81 = arith.constant 0 : index
    %c0_82 = arith.constant 0 : index
    %c0_83 = arith.constant 0 : index
    %92 = vector.load %arg4[%c0_81, %c0_82, %c0_83] : memref<3x1x64xf32, #tpu.memory_space<vmem>>, vector<3x1x64xf32>
    %93 = vector.extract_strided_slice %92 {offsets = [0, 0, 0], sizes = [1, 1, 64], strides = [1, 1, 1]} : vector<3x1x64xf32> to vector<1x1x64xf32>
    %94 = vector.shape_cast %93 : vector<1x1x64xf32> to vector<1x64xf32>
    %95 = vector.extract_strided_slice %92 {offsets = [1, 0, 0], sizes = [1, 1, 64], strides = [1, 1, 1]} : vector<3x1x64xf32> to vector<1x1x64xf32>
    %96 = vector.shape_cast %95 : vector<1x1x64xf32> to vector<1x64xf32>
    %97 = vector.extract_strided_slice %92 {offsets = [2, 0, 0], sizes = [1, 1, 64], strides = [1, 1, 1]} : vector<3x1x64xf32> to vector<1x1x64xf32>
    %98 = vector.shape_cast %97 : vector<1x1x64xf32> to vector<1x64xf32>
    %99 = vector.broadcast %94 : vector<1x64xf32> to vector<50x64xf32>
    %100 = arith.addf %91, %99 : vector<50x64xf32>
    %cst_84 = arith.constant dense<0.000000e+00> : vector<64xf32>
    %101 = vector.multi_reduction <add>, %100, %cst_84 [0] : vector<50x64xf32> to vector<64xf32>
    %102 = vector.shape_cast %101 : vector<64xf32> to vector<1x64xf32>
    %cst_85 = arith.constant 5.000000e+01 : f32
    %103 = vector.broadcast %cst_85 : f32 to vector<1x64xf32>
    %104 = arith.divf %102, %103 : vector<1x64xf32>
    %105 = vector.broadcast %104 : vector<1x64xf32> to vector<50x64xf32>
    %106 = arith.subf %100, %105 : vector<50x64xf32>
    %107 = arith.mulf %106, %106 : vector<50x64xf32>
    %cst_86 = arith.constant dense<0.000000e+00> : vector<64xf32>
    %108 = vector.multi_reduction <add>, %107, %cst_86 [0] : vector<50x64xf32> to vector<64xf32>
    %109 = vector.shape_cast %108 : vector<64xf32> to vector<1x64xf32>
    %cst_87 = arith.constant 5.000000e+01 : f32
    %110 = vector.broadcast %cst_87 : f32 to vector<1x64xf32>
    %111 = arith.divf %109, %110 : vector<1x64xf32>
    %cst_88 = arith.constant 9.99999974E-6 : f32
    %112 = vector.broadcast %cst_88 : f32 to vector<1x64xf32>
    %113 = arith.addf %111, %112 : vector<1x64xf32>
    %114 = math.rsqrt %113 : vector<1x64xf32>
    %115 = arith.mulf %96, %114 : vector<1x64xf32>
    %116 = arith.mulf %104, %115 : vector<1x64xf32>
    %117 = arith.subf %98, %116 : vector<1x64xf32>
    %118 = vector.broadcast %115 : vector<1x64xf32> to vector<50x64xf32>
    %119 = arith.mulf %100, %118 : vector<50x64xf32>
    %120 = vector.broadcast %117 : vector<1x64xf32> to vector<50x64xf32>
    %121 = arith.addf %119, %120 : vector<50x64xf32>
    %cst_89 = arith.constant 0.000000e+00 : f32
    %122 = vector.broadcast %cst_89 : f32 to vector<50x64xf32>
    %123 = arith.maximumf %121, %122 : vector<50x64xf32>
    %124 = vector.shape_cast %123 : vector<50x64xf32> to vector<2x5x5x64xf32>
    %125 = vector.extract_strided_slice %124 {offsets = [0, 0, 0, 0], sizes = [2, 4, 5, 64], strides = [1, 1, 1, 1]} : vector<2x5x5x64xf32> to vector<2x4x5x64xf32>
    %126 = vector.shape_cast %125 : vector<2x4x5x64xf32> to vector<2x2x2x5x64xf32>
    %127 = vector.extract_strided_slice %126 {offsets = [0, 0, 0, 0, 0], sizes = [2, 2, 1, 5, 64], strides = [1, 1, 1, 1, 1]} : vector<2x2x2x5x64xf32> to vector<2x2x1x5x64xf32>
    %128 = vector.shape_cast %127 : vector<2x2x1x5x64xf32> to vector<2x2x5x64xf32>
    %129 = vector.extract_strided_slice %126 {offsets = [0, 0, 1, 0, 0], sizes = [2, 2, 1, 5, 64], strides = [1, 1, 1, 1, 1]} : vector<2x2x2x5x64xf32> to vector<2x2x1x5x64xf32>
    %130 = vector.shape_cast %129 : vector<2x2x1x5x64xf32> to vector<2x2x5x64xf32>
    %131 = arith.maximumf %128, %130 : vector<2x2x5x64xf32>
    %132 = vector.extract_strided_slice %131 {offsets = [0, 0, 0, 0], sizes = [2, 2, 4, 64], strides = [1, 1, 1, 1]} : vector<2x2x5x64xf32> to vector<2x2x4x64xf32>
    %133 = vector.shape_cast %132 : vector<2x2x4x64xf32> to vector<2x2x2x2x64xf32>
    %134 = vector.extract_strided_slice %133 {offsets = [0, 0, 0, 0, 0], sizes = [2, 2, 2, 1, 64], strides = [1, 1, 1, 1, 1]} : vector<2x2x2x2x64xf32> to vector<2x2x2x1x64xf32>
    %135 = vector.shape_cast %134 : vector<2x2x2x1x64xf32> to vector<2x2x2x64xf32>
    %136 = vector.extract_strided_slice %133 {offsets = [0, 0, 0, 1, 0], sizes = [2, 2, 2, 1, 64], strides = [1, 1, 1, 1, 1]} : vector<2x2x2x2x64xf32> to vector<2x2x2x1x64xf32>
    %137 = vector.shape_cast %136 : vector<2x2x2x1x64xf32> to vector<2x2x2x64xf32>
    %138 = arith.maximumf %135, %137 : vector<2x2x2x64xf32>
    %cst_90 = arith.constant 0.000000e+00 : f32
    %139 = vector.broadcast %cst_90 : f32 to vector<2x4x4x64xf32>
    %c0_91 = arith.constant 0 : index
    %c0_92 = arith.constant 0 : index
    %c0_93 = arith.constant 0 : index
    %c0_94 = arith.constant 0 : index
    %140 = vector.load %arg13[%c0_91, %c0_92, %c0_93, %c0_94] : memref<2x4x4x64xf32, #tpu.memory_space<vmem>>, vector<2x4x4x64xf32>
    tpu.vector_store %arg13[%c0_91, %c0_92, %c0_93, %c0_94], %139 {strides = array<i32>} : memref<2x4x4x64xf32, #tpu.memory_space<vmem>>, vector<2x4x4x64xf32>,
    %c0_95 = arith.constant 0 : index
    %c1 = arith.constant 1 : index
    %c1_96 = arith.constant 1 : index
    %c0_97 = arith.constant 0 : index
    %141 = vector.load %arg13[%c0_95, %c1, %c1_96, %c0_97] : memref<2x4x4x64xf32, #tpu.memory_space<vmem>>, vector<2x2x2x64xf32>
    tpu.vector_store %arg13[%c0_95, %c1, %c1_96, %c0_97], %138 {strides = array<i32>} : memref<2x4x4x64xf32, #tpu.memory_space<vmem>>, vector<2x2x2x64xf32>,
    %c0_98 = arith.constant 0 : index
    %c0_99 = arith.constant 0 : index
    %c0_100 = arith.constant 0 : index
    %c0_101 = arith.constant 0 : index
    %142 = vector.load %arg13[%c0_98, %c0_99, %c0_100, %c0_101] : memref<2x4x4x64xf32, #tpu.memory_space<vmem>>, vector<2x4x4x64xf32>
    %143 = vector.extract_strided_slice %142 {offsets = [0, 0, 0, 0], sizes = [2, 2, 2, 64], strides = [1, 1, 1, 1]} : vector<2x4x4x64xf32> to vector<2x2x2x64xf32>
    %c0_102 = arith.constant 0 : index
    %c0_103 = arith.constant 0 : index
    %c0_104 = arith.constant 0 : index
    %c0_105 = arith.constant 0 : index
    %144 = vector.load %arg12[%c0_102, %c0_103, %c0_104, %c0_105] : memref<2x2x2x576xf32, #tpu.memory_space<vmem>>, vector<2x2x2x64xf32>
    tpu.vector_store %arg12[%c0_102, %c0_103, %c0_104, %c0_105], %143 {strides = array<i32>} : memref<2x2x2x576xf32, #tpu.memory_space<vmem>>, vector<2x2x2x64xf32>,
    %145 = vector.extract_strided_slice %142 {offsets = [0, 0, 1, 0], sizes = [2, 2, 2, 64], strides = [1, 1, 1, 1]} : vector<2x4x4x64xf32> to vector<2x2x2x64xf32>
    %c0_106 = arith.constant 0 : index
    %c0_107 = arith.constant 0 : index
    %c0_108 = arith.constant 0 : index
    %c64_109 = arith.constant 64 : index
    %146 = vector.load %arg12[%c0_106, %c0_107, %c0_108, %c64_109] : memref<2x2x2x576xf32, #tpu.memory_space<vmem>>, vector<2x2x2x64xf32>
    tpu.vector_store %arg12[%c0_106, %c0_107, %c0_108, %c64_109], %145 {strides = array<i32>} : memref<2x2x2x576xf32, #tpu.memory_space<vmem>>, vector<2x2x2x64xf32>,
    %147 = vector.extract_strided_slice %142 {offsets = [0, 0, 2, 0], sizes = [2, 2, 2, 64], strides = [1, 1, 1, 1]} : vector<2x4x4x64xf32> to vector<2x2x2x64xf32>
    %c0_110 = arith.constant 0 : index
    %c0_111 = arith.constant 0 : index
    %c0_112 = arith.constant 0 : index
    %c128_113 = arith.constant 128 : index
    %148 = vector.load %arg12[%c0_110, %c0_111, %c0_112, %c128_113] : memref<2x2x2x576xf32, #tpu.memory_space<vmem>>, vector<2x2x2x64xf32>
    tpu.vector_store %arg12[%c0_110, %c0_111, %c0_112, %c128_113], %147 {strides = array<i32>} : memref<2x2x2x576xf32, #tpu.memory_space<vmem>>, vector<2x2x2x64xf32>,
    %149 = vector.extract_strided_slice %142 {offsets = [0, 1, 0, 0], sizes = [2, 2, 2, 64], strides = [1, 1, 1, 1]} : vector<2x4x4x64xf32> to vector<2x2x2x64xf32>
    %c0_114 = arith.constant 0 : index
    %c0_115 = arith.constant 0 : index
    %c0_116 = arith.constant 0 : index
    %c192_117 = arith.constant 192 : index
    %150 = vector.load %arg12[%c0_114, %c0_115, %c0_116, %c192_117] : memref<2x2x2x576xf32, #tpu.memory_space<vmem>>, vector<2x2x2x64xf32>
    tpu.vector_store %arg12[%c0_114, %c0_115, %c0_116, %c192_117], %149 {strides = array<i32>} : memref<2x2x2x576xf32, #tpu.memory_space<vmem>>, vector<2x2x2x64xf32>,
    %151 = vector.extract_strided_slice %142 {offsets = [0, 1, 1, 0], sizes = [2, 2, 2, 64], strides = [1, 1, 1, 1]} : vector<2x4x4x64xf32> to vector<2x2x2x64xf32>
    %c0_118 = arith.constant 0 : index
    %c0_119 = arith.constant 0 : index
    %c0_120 = arith.constant 0 : index
    %c256_121 = arith.constant 256 : index
    %152 = vector.load %arg12[%c0_118, %c0_119, %c0_120, %c256_121] : memref<2x2x2x576xf32, #tpu.memory_space<vmem>>, vector<2x2x2x64xf32>
    tpu.vector_store %arg12[%c0_118, %c0_119, %c0_120, %c256_121], %151 {strides = array<i32>} : memref<2x2x2x576xf32, #tpu.memory_space<vmem>>, vector<2x2x2x64xf32>,
    %153 = vector.extract_strided_slice %142 {offsets = [0, 1, 2, 0], sizes = [2, 2, 2, 64], strides = [1, 1, 1, 1]} : vector<2x4x4x64xf32> to vector<2x2x2x64xf32>
    %c0_122 = arith.constant 0 : index
    %c0_123 = arith.constant 0 : index
    %c0_124 = arith.constant 0 : index
    %c320_125 = arith.constant 320 : index
    %154 = vector.load %arg12[%c0_122, %c0_123, %c0_124, %c320_125] : memref<2x2x2x576xf32, #tpu.memory_space<vmem>>, vector<2x2x2x64xf32>
    tpu.vector_store %arg12[%c0_122, %c0_123, %c0_124, %c320_125], %153 {strides = array<i32>} : memref<2x2x2x576xf32, #tpu.memory_space<vmem>>, vector<2x2x2x64xf32>,
    %155 = vector.extract_strided_slice %142 {offsets = [0, 2, 0, 0], sizes = [2, 2, 2, 64], strides = [1, 1, 1, 1]} : vector<2x4x4x64xf32> to vector<2x2x2x64xf32>
    %c0_126 = arith.constant 0 : index
    %c0_127 = arith.constant 0 : index
    %c0_128 = arith.constant 0 : index
    %c384_129 = arith.constant 384 : index
    %156 = vector.load %arg12[%c0_126, %c0_127, %c0_128, %c384_129] : memref<2x2x2x576xf32, #tpu.memory_space<vmem>>, vector<2x2x2x64xf32>
    tpu.vector_store %arg12[%c0_126, %c0_127, %c0_128, %c384_129], %155 {strides = array<i32>} : memref<2x2x2x576xf32, #tpu.memory_space<vmem>>, vector<2x2x2x64xf32>,
    %157 = vector.extract_strided_slice %142 {offsets = [0, 2, 1, 0], sizes = [2, 2, 2, 64], strides = [1, 1, 1, 1]} : vector<2x4x4x64xf32> to vector<2x2x2x64xf32>
    %c0_130 = arith.constant 0 : index
    %c0_131 = arith.constant 0 : index
    %c0_132 = arith.constant 0 : index
    %c448_133 = arith.constant 448 : index
    %158 = vector.load %arg12[%c0_130, %c0_131, %c0_132, %c448_133] : memref<2x2x2x576xf32, #tpu.memory_space<vmem>>, vector<2x2x2x64xf32>
    tpu.vector_store %arg12[%c0_130, %c0_131, %c0_132, %c448_133], %157 {strides = array<i32>} : memref<2x2x2x576xf32, #tpu.memory_space<vmem>>, vector<2x2x2x64xf32>,
    %159 = vector.extract_strided_slice %142 {offsets = [0, 2, 2, 0], sizes = [2, 2, 2, 64], strides = [1, 1, 1, 1]} : vector<2x4x4x64xf32> to vector<2x2x2x64xf32>
    %c0_134 = arith.constant 0 : index
    %c0_135 = arith.constant 0 : index
    %c0_136 = arith.constant 0 : index
    %c512_137 = arith.constant 512 : index
    %160 = vector.load %arg12[%c0_134, %c0_135, %c0_136, %c512_137] : memref<2x2x2x576xf32, #tpu.memory_space<vmem>>, vector<2x2x2x64xf32>
    tpu.vector_store %arg12[%c0_134, %c0_135, %c0_136, %c512_137], %159 {strides = array<i32>} : memref<2x2x2x576xf32, #tpu.memory_space<vmem>>, vector<2x2x2x64xf32>,
    %c0_138 = arith.constant 0 : index
    %c0_139 = arith.constant 0 : index
    %c0_140 = arith.constant 0 : index
    %c0_141 = arith.constant 0 : index
    %161 = vector.load %arg12[%c0_138, %c0_139, %c0_140, %c0_141] : memref<2x2x2x576xf32, #tpu.memory_space<vmem>>, vector<2x2x2x576xf32>
    %162 = vector.shape_cast %161 : vector<2x2x2x576xf32> to vector<8x576xf32>
    %163 = arith.truncf %162 : vector<8x576xf32> to vector<8x576xbf16>
    %c0_142 = arith.constant 0 : index
    %c0_143 = arith.constant 0 : index
    %164 = vector.load %arg5[%c0_142, %c0_143] : memref<576x64xbf16, #tpu.memory_space<vmem>>, vector<576x64xbf16>
    %cst_144 = arith.constant dense<0.000000e+00> : vector<8x64xf32>
    %165 = tpu.matmul %163, %164, %cst_144 {dimension_numbers = #tpu.dot_dimension_numbers<[1], [0], [0], [1], [0, 0, 1, 1], [], []>} : vector<8x576xbf16>, vector<576x64xbf16>, vector<8x64xf32> -> vector<8x64xf32>
    %c0_145 = arith.constant 0 : index
    %c0_146 = arith.constant 0 : index
    %c0_147 = arith.constant 0 : index
    %166 = vector.load %arg6[%c0_145, %c0_146, %c0_147] : memref<3x1x64xf32, #tpu.memory_space<vmem>>, vector<3x1x64xf32>
    %167 = vector.extract_strided_slice %166 {offsets = [0, 0, 0], sizes = [1, 1, 64], strides = [1, 1, 1]} : vector<3x1x64xf32> to vector<1x1x64xf32>
    %168 = vector.shape_cast %167 : vector<1x1x64xf32> to vector<1x64xf32>
    %169 = vector.extract_strided_slice %166 {offsets = [1, 0, 0], sizes = [1, 1, 64], strides = [1, 1, 1]} : vector<3x1x64xf32> to vector<1x1x64xf32>
    %170 = vector.shape_cast %169 : vector<1x1x64xf32> to vector<1x64xf32>
    %171 = vector.extract_strided_slice %166 {offsets = [2, 0, 0], sizes = [1, 1, 64], strides = [1, 1, 1]} : vector<3x1x64xf32> to vector<1x1x64xf32>
    %172 = vector.shape_cast %171 : vector<1x1x64xf32> to vector<1x64xf32>
    %173 = vector.broadcast %168 : vector<1x64xf32> to vector<8x64xf32>
    %174 = arith.addf %165, %173 : vector<8x64xf32>
    %cst_148 = arith.constant dense<0.000000e+00> : vector<64xf32>
    %175 = vector.multi_reduction <add>, %174, %cst_148 [0] : vector<8x64xf32> to vector<64xf32>
    %176 = vector.shape_cast %175 : vector<64xf32> to vector<1x64xf32>
    %cst_149 = arith.constant 8.000000e+00 : f32
    %177 = vector.broadcast %cst_149 : f32 to vector<1x64xf32>
    %178 = arith.divf %176, %177 : vector<1x64xf32>
    %179 = vector.broadcast %178 : vector<1x64xf32> to vector<8x64xf32>
    %180 = arith.subf %174, %179 : vector<8x64xf32>
    %181 = arith.mulf %180, %180 : vector<8x64xf32>
    %cst_150 = arith.constant dense<0.000000e+00> : vector<64xf32>
    %182 = vector.multi_reduction <add>, %181, %cst_150 [0] : vector<8x64xf32> to vector<64xf32>
    %183 = vector.shape_cast %182 : vector<64xf32> to vector<1x64xf32>
    %cst_151 = arith.constant 8.000000e+00 : f32
    %184 = vector.broadcast %cst_151 : f32 to vector<1x64xf32>
    %185 = arith.divf %183, %184 : vector<1x64xf32>
    %cst_152 = arith.constant 9.99999974E-6 : f32
    %186 = vector.broadcast %cst_152 : f32 to vector<1x64xf32>
    %187 = arith.addf %185, %186 : vector<1x64xf32>
    %188 = math.rsqrt %187 : vector<1x64xf32>
    %189 = arith.mulf %170, %188 : vector<1x64xf32>
    %190 = arith.mulf %178, %189 : vector<1x64xf32>
    %191 = arith.subf %172, %190 : vector<1x64xf32>
    %192 = vector.broadcast %189 : vector<1x64xf32> to vector<8x64xf32>
    %193 = arith.mulf %174, %192 : vector<8x64xf32>
    %194 = vector.broadcast %191 : vector<1x64xf32> to vector<8x64xf32>
    %195 = arith.addf %193, %194 : vector<8x64xf32>
    %cst_153 = arith.constant 0.000000e+00 : f32
    %196 = vector.broadcast %cst_153 : f32 to vector<8x64xf32>
    %197 = arith.maximumf %195, %196 : vector<8x64xf32>
    %198 = vector.shape_cast %197 : vector<8x64xf32> to vector<2x2x2x64xf32>
    %c0_154 = arith.constant 0 : index
    %c1_155 = arith.constant 1 : index
    %c1_156 = arith.constant 1 : index
    %c0_157 = arith.constant 0 : index
    %199 = vector.load %arg13[%c0_154, %c1_155, %c1_156, %c0_157] : memref<2x4x4x64xf32, #tpu.memory_space<vmem>>, vector<2x2x2x64xf32>
    tpu.vector_store %arg13[%c0_154, %c1_155, %c1_156, %c0_157], %198 {strides = array<i32>} : memref<2x4x4x64xf32, #tpu.memory_space<vmem>>, vector<2x2x2x64xf32>,
    %c0_158 = arith.constant 0 : index
    %c0_159 = arith.constant 0 : index
    %c0_160 = arith.constant 0 : index
    %c0_161 = arith.constant 0 : index
    %200 = vector.load %arg13[%c0_158, %c0_159, %c0_160, %c0_161] : memref<2x4x4x64xf32, #tpu.memory_space<vmem>>, vector<2x4x4x64xf32>
    %201 = vector.extract_strided_slice %200 {offsets = [0, 0, 0, 0], sizes = [2, 2, 2, 64], strides = [1, 1, 1, 1]} : vector<2x4x4x64xf32> to vector<2x2x2x64xf32>
    %c0_162 = arith.constant 0 : index
    %c0_163 = arith.constant 0 : index
    %c0_164 = arith.constant 0 : index
    %c0_165 = arith.constant 0 : index
    %202 = vector.load %arg12[%c0_162, %c0_163, %c0_164, %c0_165] : memref<2x2x2x576xf32, #tpu.memory_space<vmem>>, vector<2x2x2x64xf32>
    tpu.vector_store %arg12[%c0_162, %c0_163, %c0_164, %c0_165], %201 {strides = array<i32>} : memref<2x2x2x576xf32, #tpu.memory_space<vmem>>, vector<2x2x2x64xf32>,
    %203 = vector.extract_strided_slice %200 {offsets = [0, 0, 1, 0], sizes = [2, 2, 2, 64], strides = [1, 1, 1, 1]} : vector<2x4x4x64xf32> to vector<2x2x2x64xf32>
    %c0_166 = arith.constant 0 : index
    %c0_167 = arith.constant 0 : index
    %c0_168 = arith.constant 0 : index
    %c64_169 = arith.constant 64 : index
    %204 = vector.load %arg12[%c0_166, %c0_167, %c0_168, %c64_169] : memref<2x2x2x576xf32, #tpu.memory_space<vmem>>, vector<2x2x2x64xf32>
    tpu.vector_store %arg12[%c0_166, %c0_167, %c0_168, %c64_169], %203 {strides = array<i32>} : memref<2x2x2x576xf32, #tpu.memory_space<vmem>>, vector<2x2x2x64xf32>,
    %205 = vector.extract_strided_slice %200 {offsets = [0, 0, 2, 0], sizes = [2, 2, 2, 64], strides = [1, 1, 1, 1]} : vector<2x4x4x64xf32> to vector<2x2x2x64xf32>
    %c0_170 = arith.constant 0 : index
    %c0_171 = arith.constant 0 : index
    %c0_172 = arith.constant 0 : index
    %c128_173 = arith.constant 128 : index
    %206 = vector.load %arg12[%c0_170, %c0_171, %c0_172, %c128_173] : memref<2x2x2x576xf32, #tpu.memory_space<vmem>>, vector<2x2x2x64xf32>
    tpu.vector_store %arg12[%c0_170, %c0_171, %c0_172, %c128_173], %205 {strides = array<i32>} : memref<2x2x2x576xf32, #tpu.memory_space<vmem>>, vector<2x2x2x64xf32>,
    %207 = vector.extract_strided_slice %200 {offsets = [0, 1, 0, 0], sizes = [2, 2, 2, 64], strides = [1, 1, 1, 1]} : vector<2x4x4x64xf32> to vector<2x2x2x64xf32>
    %c0_174 = arith.constant 0 : index
    %c0_175 = arith.constant 0 : index
    %c0_176 = arith.constant 0 : index
    %c192_177 = arith.constant 192 : index
    %208 = vector.load %arg12[%c0_174, %c0_175, %c0_176, %c192_177] : memref<2x2x2x576xf32, #tpu.memory_space<vmem>>, vector<2x2x2x64xf32>
    tpu.vector_store %arg12[%c0_174, %c0_175, %c0_176, %c192_177], %207 {strides = array<i32>} : memref<2x2x2x576xf32, #tpu.memory_space<vmem>>, vector<2x2x2x64xf32>,
    %209 = vector.extract_strided_slice %200 {offsets = [0, 1, 1, 0], sizes = [2, 2, 2, 64], strides = [1, 1, 1, 1]} : vector<2x4x4x64xf32> to vector<2x2x2x64xf32>
    %c0_178 = arith.constant 0 : index
    %c0_179 = arith.constant 0 : index
    %c0_180 = arith.constant 0 : index
    %c256_181 = arith.constant 256 : index
    %210 = vector.load %arg12[%c0_178, %c0_179, %c0_180, %c256_181] : memref<2x2x2x576xf32, #tpu.memory_space<vmem>>, vector<2x2x2x64xf32>
    tpu.vector_store %arg12[%c0_178, %c0_179, %c0_180, %c256_181], %209 {strides = array<i32>} : memref<2x2x2x576xf32, #tpu.memory_space<vmem>>, vector<2x2x2x64xf32>,
    %211 = vector.extract_strided_slice %200 {offsets = [0, 1, 2, 0], sizes = [2, 2, 2, 64], strides = [1, 1, 1, 1]} : vector<2x4x4x64xf32> to vector<2x2x2x64xf32>
    %c0_182 = arith.constant 0 : index
    %c0_183 = arith.constant 0 : index
    %c0_184 = arith.constant 0 : index
    %c320_185 = arith.constant 320 : index
    %212 = vector.load %arg12[%c0_182, %c0_183, %c0_184, %c320_185] : memref<2x2x2x576xf32, #tpu.memory_space<vmem>>, vector<2x2x2x64xf32>
    tpu.vector_store %arg12[%c0_182, %c0_183, %c0_184, %c320_185], %211 {strides = array<i32>} : memref<2x2x2x576xf32, #tpu.memory_space<vmem>>, vector<2x2x2x64xf32>,
    %213 = vector.extract_strided_slice %200 {offsets = [0, 2, 0, 0], sizes = [2, 2, 2, 64], strides = [1, 1, 1, 1]} : vector<2x4x4x64xf32> to vector<2x2x2x64xf32>
    %c0_186 = arith.constant 0 : index
    %c0_187 = arith.constant 0 : index
    %c0_188 = arith.constant 0 : index
    %c384_189 = arith.constant 384 : index
    %214 = vector.load %arg12[%c0_186, %c0_187, %c0_188, %c384_189] : memref<2x2x2x576xf32, #tpu.memory_space<vmem>>, vector<2x2x2x64xf32>
    tpu.vector_store %arg12[%c0_186, %c0_187, %c0_188, %c384_189], %213 {strides = array<i32>} : memref<2x2x2x576xf32, #tpu.memory_space<vmem>>, vector<2x2x2x64xf32>,
    %215 = vector.extract_strided_slice %200 {offsets = [0, 2, 1, 0], sizes = [2, 2, 2, 64], strides = [1, 1, 1, 1]} : vector<2x4x4x64xf32> to vector<2x2x2x64xf32>
    %c0_190 = arith.constant 0 : index
    %c0_191 = arith.constant 0 : index
    %c0_192 = arith.constant 0 : index
    %c448_193 = arith.constant 448 : index
    %216 = vector.load %arg12[%c0_190, %c0_191, %c0_192, %c448_193] : memref<2x2x2x576xf32, #tpu.memory_space<vmem>>, vector<2x2x2x64xf32>
    tpu.vector_store %arg12[%c0_190, %c0_191, %c0_192, %c448_193], %215 {strides = array<i32>} : memref<2x2x2x576xf32, #tpu.memory_space<vmem>>, vector<2x2x2x64xf32>,
    %217 = vector.extract_strided_slice %200 {offsets = [0, 2, 2, 0], sizes = [2, 2, 2, 64], strides = [1, 1, 1, 1]} : vector<2x4x4x64xf32> to vector<2x2x2x64xf32>
    %c0_194 = arith.constant 0 : index
    %c0_195 = arith.constant 0 : index
    %c0_196 = arith.constant 0 : index
    %c512_197 = arith.constant 512 : index
    %218 = vector.load %arg12[%c0_194, %c0_195, %c0_196, %c512_197] : memref<2x2x2x576xf32, #tpu.memory_space<vmem>>, vector<2x2x2x64xf32>
    tpu.vector_store %arg12[%c0_194, %c0_195, %c0_196, %c512_197], %217 {strides = array<i32>} : memref<2x2x2x576xf32, #tpu.memory_space<vmem>>, vector<2x2x2x64xf32>,
    %c0_198 = arith.constant 0 : index
    %c0_199 = arith.constant 0 : index
    %c0_200 = arith.constant 0 : index
    %c0_201 = arith.constant 0 : index
    %219 = vector.load %arg12[%c0_198, %c0_199, %c0_200, %c0_201] : memref<2x2x2x576xf32, #tpu.memory_space<vmem>>, vector<2x2x2x576xf32>
    %220 = vector.shape_cast %219 : vector<2x2x2x576xf32> to vector<8x576xf32>
    %221 = arith.truncf %220 : vector<8x576xf32> to vector<8x576xbf16>
    %c0_202 = arith.constant 0 : index
    %c0_203 = arith.constant 0 : index
    %222 = vector.load %arg7[%c0_202, %c0_203] : memref<576x64xbf16, #tpu.memory_space<vmem>>, vector<576x64xbf16>
    %cst_204 = arith.constant dense<0.000000e+00> : vector<8x64xf32>
    %223 = tpu.matmul %221, %222, %cst_204 {dimension_numbers = #tpu.dot_dimension_numbers<[1], [0], [0], [1], [0, 0, 1, 1], [], []>} : vector<8x576xbf16>, vector<576x64xbf16>, vector<8x64xf32> -> vector<8x64xf32>
    %c0_205 = arith.constant 0 : index
    %c0_206 = arith.constant 0 : index
    %c0_207 = arith.constant 0 : index
    %224 = vector.load %arg8[%c0_205, %c0_206, %c0_207] : memref<3x1x64xf32, #tpu.memory_space<vmem>>, vector<3x1x64xf32>
    %225 = vector.extract_strided_slice %224 {offsets = [0, 0, 0], sizes = [1, 1, 64], strides = [1, 1, 1]} : vector<3x1x64xf32> to vector<1x1x64xf32>
    %226 = vector.shape_cast %225 : vector<1x1x64xf32> to vector<1x64xf32>
    %227 = vector.extract_strided_slice %224 {offsets = [1, 0, 0], sizes = [1, 1, 64], strides = [1, 1, 1]} : vector<3x1x64xf32> to vector<1x1x64xf32>
    %228 = vector.shape_cast %227 : vector<1x1x64xf32> to vector<1x64xf32>
    %229 = vector.extract_strided_slice %224 {offsets = [2, 0, 0], sizes = [1, 1, 64], strides = [1, 1, 1]} : vector<3x1x64xf32> to vector<1x1x64xf32>
    %230 = vector.shape_cast %229 : vector<1x1x64xf32> to vector<1x64xf32>
    %231 = vector.broadcast %226 : vector<1x64xf32> to vector<8x64xf32>
    %232 = arith.addf %223, %231 : vector<8x64xf32>
    %cst_208 = arith.constant dense<0.000000e+00> : vector<64xf32>
    %233 = vector.multi_reduction <add>, %232, %cst_208 [0] : vector<8x64xf32> to vector<64xf32>
    %234 = vector.shape_cast %233 : vector<64xf32> to vector<1x64xf32>
    %cst_209 = arith.constant 8.000000e+00 : f32
    %235 = vector.broadcast %cst_209 : f32 to vector<1x64xf32>
    %236 = arith.divf %234, %235 : vector<1x64xf32>
    %237 = vector.broadcast %236 : vector<1x64xf32> to vector<8x64xf32>
    %238 = arith.subf %232, %237 : vector<8x64xf32>
    %239 = arith.mulf %238, %238 : vector<8x64xf32>
    %cst_210 = arith.constant dense<0.000000e+00> : vector<64xf32>
    %240 = vector.multi_reduction <add>, %239, %cst_210 [0] : vector<8x64xf32> to vector<64xf32>
    %241 = vector.shape_cast %240 : vector<64xf32> to vector<1x64xf32>
    %cst_211 = arith.constant 8.000000e+00 : f32
    %242 = vector.broadcast %cst_211 : f32 to vector<1x64xf32>
    %243 = arith.divf %241, %242 : vector<1x64xf32>
    %cst_212 = arith.constant 9.99999974E-6 : f32
    %244 = vector.broadcast %cst_212 : f32 to vector<1x64xf32>
    %245 = arith.addf %243, %244 : vector<1x64xf32>
    %246 = math.rsqrt %245 : vector<1x64xf32>
    %247 = arith.mulf %228, %246 : vector<1x64xf32>
    %248 = arith.mulf %236, %247 : vector<1x64xf32>
    %249 = arith.subf %230, %248 : vector<1x64xf32>
    %250 = vector.broadcast %247 : vector<1x64xf32> to vector<8x64xf32>
    %251 = arith.mulf %232, %250 : vector<8x64xf32>
    %252 = vector.broadcast %249 : vector<1x64xf32> to vector<8x64xf32>
    %253 = arith.addf %251, %252 : vector<8x64xf32>
    %cst_213 = arith.constant 0.000000e+00 : f32
    %254 = vector.broadcast %cst_213 : f32 to vector<8x64xf32>
    %255 = arith.maximumf %253, %254 : vector<8x64xf32>
    %256 = vector.shape_cast %255 : vector<8x64xf32> to vector<2x2x2x64xf32>
    %c0_214 = arith.constant 0 : index
    %c0_215 = arith.constant 0 : index
    %c0_216 = arith.constant 0 : index
    %c0_217 = arith.constant 0 : index
    %257 = vector.load %arg9[%c0_214, %c0_215, %c0_216, %c0_217] : memref<2x2x2x64xf32, #tpu.memory_space<vmem>>, vector<2x2x2x64xf32>
    tpu.vector_store %arg9[%c0_214, %c0_215, %c0_216, %c0_217], %256 {strides = array<i32>} : memref<2x2x2x64xf32, #tpu.memory_space<vmem>>, vector<2x2x2x64xf32>,
    return
  }
}

</mosaic_0001>

<bundles_post_ra>
// kernel: cnn_encoder_forward.1
= control target key start
LH: loop header
LB: loop body
LE: loop exit
PB: predicated region body
PF: predicated region fallthrough
CT: control target
= control target key end

     0   :  { %vm19066_vm0 = vcmask 21504   ;;  %s12714_s15 = smov 6   ;;  %s12715_s16 = smov 3   ;;  %vm19065_vm1 = vcmask 23552   ;;  %v19067_v17 = vmov 0.0   ;;  %vm4071_vm2 = vcmask 1044480   ;;  %s19047_s0 = inlined_call_operand.vmem [shape: f32[2,16,16,3], index: 0, kind: input, shape index: {}]   ;;  %s19048_s1 = inlined_call_operand.vmem [shape: bf16[27,64], index: 1, kind: input, shape index: {}]   ;;  %s19049_s2 = inlined_call_operand.vmem [shape: f32[3,1,64], index: 2, kind: input, shape index: {}]   ;;  %s19050_s3 = inlined_call_operand.vmem [shape: bf16[576,64], index: 3, kind: input, shape index: {}]   ;;  %s19051_s4 = inlined_call_operand.vmem [shape: f32[3,1,64], index: 4, kind: input, shape index: {}]   ;;  %s19052_s5 = inlined_call_operand.vmem [shape: bf16[576,64], index: 5, kind: input, shape index: {}]   ;;  %s19053_s6 = inlined_call_operand.vmem [shape: f32[3,1,64], index: 6, kind: input, shape index: {}]   ;;  %s19054_s7 = inlined_call_operand.vmem [shape: bf16[576,64], index: 7, kind: input, shape index: {}]   ;;  %s19055_s8 = inlined_call_operand.vmem [shape: f32[3,1,64], index: 8, kind: input, shape index: {}]   ;;  %s19056_s9 = inlined_call_operand.hbm [shape: f32[2,2,2,64], index: 9, kind: output, shape index: {}]  }
   0x1   :  { %v34_v0 = vld [vmem:[%s19047_s0] sm:$0xff]  ;;  %v35_v1 = vld [vmem:[%s19047_s0 + $0x8] sm:$0xff]  ;;  %v37_v2 = vld [vmem:[%s19047_s0 + $0x18] sm:$0xff]  ;;  %s12716_s14 = smov 9   ;;  %s12717_s17 = smov 12   ;;  %12286 = vmatprep.subr.bf16.mxu0 %v19067_v17  ;;  %vm4072_vm3 = vcmask 1045504  }
   0x2   :  { %438 = vrot.lane.b32.xlu1 %v34_v0, %s12714_s15  ;;  %212 = vrot.lane.b32.xlu0 %v34_v0, %s12715_s16  ;;  %101 = vst.msk [vmem:[#allocation2 + $0x8] sm:$0x3f] %vm19066_vm0, %v35_v1  ;;  %103 = vst.msk [vmem:[#allocation2 + $0x18] sm:$0x3f] %vm19066_vm0, %v37_v2  ;;  %v36_v3 = vld [vmem:[%s19047_s0 + $0x10] sm:$0xff]  ;;  %v39_v4 = vld [vmem:[%s19047_s0 + $0x28] sm:$0xff] }
   0x3   :  { %105 = vst.msk [vmem:[#allocation2 + $0x28] sm:$0x3f] %vm19066_vm0, %v39_v4  ;;  %v38_v5 = vld [vmem:[%s19047_s0 + $0x20] sm:$0xff]  ;;  %v12807_v6 = vld [vmem:[%s19047_s0 + $0x38] sm:$0xff]  ;;  %v12812_v7 = vld [vmem:[%s19047_s0 + $0x30] sm:$0xff]  ;;  %s12718_s22 = smov 15  }
   0x4   :  { %99 = vst.msk [vmem:[#allocation2] sm:$0xff] %vm19065_vm1, %v34_v0  ;;  %102 = vst.msk [vmem:[#allocation2 + $0x10] sm:$0xff] %vm19065_vm1, %v36_v3  ;;  %v12821_v8 = vld [vmem:[%s19047_s0 + $0x48] sm:$0xff]  ;;  %v12826_v9 = vld [vmem:[%s19047_s0 + $0x40] sm:$0xff]  ;;  %s12719_s23 = smov 18   ;;  %s12720_s24 = smov 21  }
   0x5   :  { %107 = vst.msk [vmem:[#allocation2 + $0x38] sm:$0x3f] %vm19066_vm0, %v12807_v6  ;;  %v12834_v10 = vld [vmem:[%s19047_s0 + $0x58] sm:$0xff]  ;;  %109 = vst.msk [vmem:[#allocation2 + $0x48] sm:$0x3f] %vm19066_vm0, %v12821_v8  ;;  %v12845_v11 = vld [vmem:[%s19047_s0 + $0x50] sm:$0xff] }
   0x6   :  { %104 = vst.msk [vmem:[#allocation2 + $0x20] sm:$0xff] %vm19065_vm1, %v38_v5  ;;  %106 = vst.msk [vmem:[#allocation2 + $0x30] sm:$0xff] %vm19065_vm1, %v12812_v7  ;;  %440 = vrot.lane.b32.xlu1 %v35_v1, %s12714_s15  ;;  %214 = vrot.lane.b32.xlu0 %v35_v1, %s12715_s16  ;;  %v12860_v12 = vld [vmem:[%s19047_s0 + $0x68] sm:$0xff]  ;;  %v12865_v13 = vld [vmem:[%s19047_s0 + $0x60] sm:$0xff]  ;;  %s12721_s25 = smov 24   ;;  %v12723_v19 = vmov 65535  }
   0x7   :  { %108 = vst.msk [vmem:[#allocation2 + $0x40] sm:$0xff] %vm19065_vm1, %v12826_v9  ;;  %110 = vst.msk [vmem:[#allocation2 + $0x50] sm:$0xff] %vm19065_vm1, %v12845_v11  ;;  %v12890_v14 = vld [vmem:[%s19047_s0 + $0x78] sm:$0xff]  ;;  %v12895_v15 = vld [vmem:[%s19047_s0 + $0x70] sm:$0xff]  ;;  %v4073_v20 = vsel %vm4071_vm2, 4294967295, %v12723_v19  ;;  %vm19057_vm4 = vmmov 0  }
   0x8   :  { %111 = vst.msk [vmem:[#allocation2 + $0x58] sm:$0x3f] %vm19066_vm0, %v12834_v10  ;;  %113 = vst.msk [vmem:[#allocation2 + $0x68] sm:$0x3f] %vm19066_vm0, %v12860_v12  ;;  %v12447_v16 = vld [vmem:[%s19048_s1] sm:$0xff]   ;;  %v4074_v21 = vsel %vm4072_vm3, %v4073_v20, 0  ;;  %12290 = vmatprep.mubr.msk.bf16.mxu0 %vm19057_vm4, %v19067_v17 }
   0x9   :  { %112 = vst.msk [vmem:[#allocation2 + $0x60] sm:$0xff] %vm19065_vm1, %v12865_v13  ;;  %114 = vst.msk [vmem:[#allocation2 + $0x70] sm:$0xff] %vm19065_vm1, %v12895_v15  ;;  %12287 = vmatpush3.bf16.msra.mxu0 %v12447_v16  ;;  %v12448_v18 = vld [vmem:[%s19048_s1 + $0x8] sm:$0x3f]   ;;  %v12947_v24 = vld [vmem:[%s19047_s0 + $0x80] sm:$0xff] }
   0xa   :  { %670 = vrot.lane.b32.xlu1 %v37_v2, %s12716_s14  ;;  %668 = vrot.lane.b32.xlu0 %v36_v3, %s12716_s14  ;;  %115 = vst.msk [vmem:[#allocation2 + $0x78] sm:$0x3f] %vm19066_vm0, %v12890_v14  ;;  %v4076_v22 = vand.u32 %v12448_v18, %v4074_v21  ;;  %v12942_v23 = vld [vmem:[%s19047_s0 + $0x88] sm:$0xff] }
   0xb   :  { %12288 = vmatprep.subr.bf16.mxu0 %v19067_v17  ;;  %117 = vst.msk [vmem:[#allocation2 + $0x88] sm:$0x3f] %vm19066_vm0, %v12942_v23 }
   0xc   :  { %116 = vst.msk [vmem:[#allocation2 + $0x80] sm:$0xff] %vm19065_vm1, %v12947_v24 }
   0xd   :  { %12289 = vmatpush3.bf16.msra.mxu0 %v4076_v22 }
   0xe   :  { %896 = vrot.lane.b32.xlu1 %v37_v2, %s12717_s17  ;;  %894 = vrot.lane.b32.xlu0 %v36_v3, %s12717_s17 }
  0x12   :  { %218 = vrot.lane.b32.xlu1 %v37_v2, %s12715_s16  ;;  %216 = vrot.lane.b32.xlu0 %v36_v3, %s12715_s16 }
  0x16   :  { %1122 = vrot.lane.b32.xlu1 %v37_v2, %s12718_s22  ;;  %1120 = vrot.lane.b32.xlu0 %v36_v3, %s12718_s22 }
  0x1a   :  { %444 = vrot.lane.b32.xlu1 %v37_v2, %s12714_s15  ;;  %442 = vrot.lane.b32.xlu0 %v36_v3, %s12714_s15 }
  0x1e   :  { %1352 = vrot.lane.b32.xlu1 %v39_v4, %s12719_s23  ;;  %1350 = vrot.lane.b32.xlu0 %v38_v5, %s12719_s23 }
  0x22   :  { %674 = vrot.lane.b32.xlu1 %v39_v4, %s12716_s14  ;;  %672 = vrot.lane.b32.xlu0 %v38_v5, %s12716_s14 }
  0x26   :  { %1578 = vrot.lane.b32.xlu1 %v39_v4, %s12720_s24  ;;  %1576 = vrot.lane.b32.xlu0 %v38_v5, %s12720_s24 }
  0x2a   :  { %900 = vrot.lane.b32.xlu1 %v39_v4, %s12717_s17  ;;  %898 = vrot.lane.b32.xlu0 %v38_v5, %s12717_s17 }
  0x2e   :  { %1804 = vrot.lane.b32.xlu1 %v39_v4, %s12721_s25  ;;  %1802 = vrot.lane.b32.xlu0 %v38_v5, %s12721_s25 }
  0x32   :  { %1126 = vrot.lane.b32.xlu1 %v39_v4, %s12718_s22  ;;  %1124 = vrot.lane.b32.xlu0 %v38_v5, %s12718_s22 }
  0x36   :  { %1356 = vrot.lane.b32.xlu1 %v12807_v6, %s12719_s23  ;;  %1354 = vrot.lane.b32.xlu0 %v12812_v7, %s12719_s23 }
  0x3a   :  { %222 = vrot.lane.b32.xlu1 %v39_v4, %s12715_s16  ;;  %220 = vrot.lane.b32.xlu0 %v38_v5, %s12715_s16 }
  0x3e   :  { %1582 = vrot.lane.b32.xlu1 %v12807_v6, %s12720_s24  ;;  %1580 = vrot.lane.b32.xlu0 %v12812_v7, %s12720_s24 }
  0x42   :  { %448 = vrot.lane.b32.xlu1 %v39_v4, %s12714_s15  ;;  %446 = vrot.lane.b32.xlu0 %v38_v5, %s12714_s15 }
  0x46   :  { %1808 = vrot.lane.b32.xlu1 %v12807_v6, %s12721_s25  ;;  %1806 = vrot.lane.b32.xlu0 %v12812_v7, %s12721_s25 }
  0x4a   :  { %678 = vrot.lane.b32.xlu1 %v12807_v6, %s12716_s14  ;;  %676 = vrot.lane.b32.xlu0 %v12812_v7, %s12716_s14 }
  0x4e   :  { %904 = vrot.lane.b32.xlu1 %v12807_v6, %s12717_s17  ;;  %902 = vrot.lane.b32.xlu0 %v12812_v7, %s12717_s17 }
  0x52   :  { %1130 = vrot.lane.b32.xlu1 %v12807_v6, %s12718_s22  ;;  %1128 = vrot.lane.b32.xlu0 %v12812_v7, %s12718_s22 }
  0x56   :  { %1360 = vrot.lane.b32.xlu1 %v12821_v8, %s12719_s23  ;;  %1358 = vrot.lane.b32.xlu0 %v12826_v9, %s12719_s23 }
  0x5a   :  { %1586 = vrot.lane.b32.xlu1 %v12821_v8, %s12720_s24  ;;  %1584 = vrot.lane.b32.xlu0 %v12826_v9, %s12720_s24 }
  0x5b   :  { %14 = vsyncpa [#allocation7], 0  ;;  %vm380_vm5 = vcmask 48153   ;;  %vm19061_vm6 = vcmask 72754   ;;  %v12989_v27 = vld [vmem:[%s19047_s0 + $0x98] sm:$0xff]  ;;  %vm382_vm7 = vcmask 47128   ;;  %v2144_v61 = vlaneseq }
  0x5c   :  { %119 = vst.msk [vmem:[#allocation2 + $0x98] sm:$0x3f] %vm19066_vm0, %v12989_v27  ;;  %v13001_v28 = vld [vmem:[%s19047_s0 + $0x90] sm:$0xff]  ;;  %vm19062_vm8 = vcmask 72752   ;;  %vm19060_vm9 = vcmask 95304   ;;  %vm19059_vm10 = vcmask 97352  }
  0x5d   :  { %118 = vst.msk [vmem:[#allocation2 + $0x90] sm:$0xff] %vm19065_vm1, %v13001_v28  ;;  %vm1064_vm11 = vcmask 120928   ;;  %vm1062_vm12 = vcmask 121953   ;;  %vm1290_vm13 = vcmask 146552   ;;  %vm1288_vm14 = vcmask 146554   ;;  %v13064_v49 = vld [vmem:[%s19047_s0 + $0xa8] sm:$0xff] }
  0x5e   :  { %1812 = vrot.lane.b32.xlu1 %v12821_v8, %s12721_s25  ;;  %1810 = vrot.lane.b32.xlu0 %v12826_v9, %s12721_s25  ;;  %vm1520_vm15 = vcmask 169104   ;;  %vm1518_vm2 = vcmask 171152   ;;  %vm1746_vm3 = vcmask 194728   ;;  %vm1744_vm4 = vcmask 195753   ;;  %121 = vst.msk [vmem:[#allocation2 + $0xa8] sm:$0x3f] %vm19066_vm0, %v13064_v49 }
  0x5f   :  { %v13075_v50 = vld [vmem:[%s19047_s0 + $0xa0] sm:$0xff]  ;;  %v12725_v59 = vmov 1983009808   ;;  %v13105_v2 = vshrl.u32 %v2144_v61, 7  ;;  %s12728_s18 = smov [#allocation6]  }
  0x60   :  { %120 = vst.msk [vmem:[#allocation2 + $0xa0] sm:$0xff] %vm19065_vm1, %v13075_v50  ;;  %v2142_v60 = vunpack.c.l.s4 %v12725_v59 }
  0x61   :  { %19270 = vst [vmem:[#allocation9_spill] sm:$0xff] %v13105_v2 }
  0x62   :  { %226 = vrot.lane.b32.xlu1 %v12807_v6, %s12715_s16  ;;  %224 = vrot.lane.b32.xlu0 %v12812_v7, %s12715_s16  ;;  %v2143_v1 = vunpack.c.0.s8 %v2142_v60 }
  0x66   :  { %452 = vrot.lane.b32.xlu1 %v12807_v6, %s12714_s15  ;;  %450 = vrot.lane.b32.xlu0 %v12812_v7, %s12714_s15  ;;  %v13114_v6 = vsub.s32 %v2143_v1, %v13105_v2  ;;  %v13119_v7 = vld [vmem:[%s19047_s0 + $0xb8] sm:$0xff] }
  0x67   :  { %123 = vst.msk [vmem:[#allocation2 + $0xb8] sm:$0x3f] %vm19066_vm0, %v13119_v7 }
  0x68   :  { %19271 = vst [vmem:[#allocation10_spill] sm:$0xff] %v13114_v6 }
  0x6a   :  { %682 = vrot.lane.b32.xlu1 %v12821_v8, %s12716_s14  ;;  %680 = vrot.lane.b32.xlu0 %v12826_v9, %s12716_s14 }
  0x6e   :  { %908 = vrot.lane.b32.xlu1 %v12821_v8, %s12717_s17  ;;  %906 = vrot.lane.b32.xlu0 %v12826_v9, %s12717_s17 }
  0x72   :  { %1134 = vrot.lane.b32.xlu1 %v12821_v8, %s12718_s22  ;;  %1132 = vrot.lane.b32.xlu0 %v12826_v9, %s12718_s22 }
  0x74   :  { %v439_v25 = vpop.permute.xlu1 %438  ;;  %v213_v26 = vpop.permute.xlu0 %212 }
  0x75   :  { %381 = vst.msk [vmem:[#allocation2 - $0x1] sm:$0xfe] %vm380_vm5, %v213_v26 }
  0x76   :  { %607 = vst.msk [vmem:[#allocation2 - $0x2] sm:$0xfc] %vm19061_vm6, %v439_v25  ;;  %1364 = vrot.lane.b32.xlu1 %v12834_v10, %s12719_s23  ;;  %1362 = vrot.lane.b32.xlu0 %v12845_v11, %s12719_s23 }
  0x78   :  { %v441_v29 = vpop.permute.xlu1 %440  ;;  %v215_v30 = vpop.permute.xlu0 %214 }
  0x79   :  { %383 = vst.msk [vmem:[#allocation2 + $0x7] sm:$0x7f] %vm382_vm7, %v215_v30 }
  0x7a   :  { %230 = vrot.lane.b32.xlu1 %v12821_v8, %s12715_s16  ;;  %228 = vrot.lane.b32.xlu0 %v12826_v9, %s12715_s16  ;;  %609 = vst.msk [vmem:[#allocation2 + $0x6] sm:$0xff] %vm19062_vm8, %v441_v29 }
  0x7c   :  { %v671_v31 = vpop.permute.xlu1 %670  ;;  %v669_v32 = vpop.permute.xlu0 %668 }
  0x7d   :  { %839 = vst.msk [vmem:[#allocation2 + $0x8] sm:$0x3f] %vm19060_vm9, %v671_v31 }
  0x7e   :  { %837 = vst.msk [vmem:[#allocation2] sm:$0xff] %vm19059_vm10, %v669_v32  ;;  %1590 = vrot.lane.b32.xlu1 %v12834_v10, %s12720_s24  ;;  %1588 = vrot.lane.b32.xlu0 %v12845_v11, %s12720_s24 }
  0x80   :  { %v897_v33 = vpop.permute.xlu1 %896  ;;  %v895_v34 = vpop.permute.xlu0 %894 }
  0x81   :  { %1065 = vst.msk [vmem:[#allocation2 + $0x7] sm:$0x7f] %vm1064_vm11, %v897_v33 }
  0x82   :  { %1063 = vst.msk [vmem:[#allocation2 - $0x1] sm:$0xfe] %vm1062_vm12, %v895_v34  ;;  %456 = vrot.lane.b32.xlu1 %v12821_v8, %s12714_s15  ;;  %454 = vrot.lane.b32.xlu0 %v12826_v9, %s12714_s15  ;;  %v13130_v9 = vld [vmem:[%s19047_s0 + $0xb0] sm:$0xff] }
  0x83   :  { %122 = vst.msk [vmem:[#allocation2 + $0xb0] sm:$0xff] %vm19065_vm1, %v13130_v9 }
  0x84   :  { %v219_v35 = vpop.permute.xlu1 %218  ;;  %v217_v36 = vpop.permute.xlu0 %216 }
  0x85   :  { %385 = vst.msk [vmem:[#allocation2 + $0x17] sm:$0x7f] %vm382_vm7, %v219_v35 }
  0x86   :  { %384 = vst.msk [vmem:[#allocation2 + $0xf] sm:$0xfe] %vm380_vm5, %v217_v36  ;;  %1816 = vrot.lane.b32.xlu1 %v12834_v10, %s12721_s25  ;;  %1814 = vrot.lane.b32.xlu0 %v12845_v11, %s12721_s25 }
  0x88   :  { %v1123_v37 = vpop.permute.xlu1 %1122  ;;  %v1121_v38 = vpop.permute.xlu0 %1120 }
  0x89   :  { %1291 = vst.msk [vmem:[#allocation2 + $0x6] sm:$0xff] %vm1290_vm13, %v1123_v37 }
  0x8a   :  { %1289 = vst.msk [vmem:[#allocation2 - $0x2] sm:$0xfc] %vm1288_vm14, %v1121_v38  ;;  %686 = vrot.lane.b32.xlu1 %v12834_v10, %s12716_s14  ;;  %684 = vrot.lane.b32.xlu0 %v12845_v11, %s12716_s14 }
  0x8c   :  { %v445_v39 = vpop.permute.xlu1 %444  ;;  %v443_v40 = vpop.permute.xlu0 %442 }
  0x8d   :  { %611 = vst.msk [vmem:[#allocation2 + $0x16] sm:$0xff] %vm19062_vm8, %v445_v39 }
  0x8e   :  { %610 = vst.msk [vmem:[#allocation2 + $0xe] sm:$0xfc] %vm19061_vm6, %v443_v40  ;;  %912 = vrot.lane.b32.xlu1 %v12834_v10, %s12717_s17  ;;  %910 = vrot.lane.b32.xlu0 %v12845_v11, %s12717_s17 }
  0x90   :  { %v1353_v41 = vpop.permute.xlu1 %1352  ;;  %v1351_v42 = vpop.permute.xlu0 %1350 }
  0x91   :  { %1521 = vst.msk [vmem:[#allocation2 + $0x8] sm:$0x3f] %vm1520_vm15, %v1353_v41 }
  0x92   :  { %1519 = vst.msk [vmem:[#allocation2] sm:$0xff] %vm1518_vm2, %v1351_v42  ;;  %1138 = vrot.lane.b32.xlu1 %v12834_v10, %s12718_s22  ;;  %1136 = vrot.lane.b32.xlu0 %v12845_v11, %s12718_s22 }
  0x94   :  { %v675_v43 = vpop.permute.xlu1 %674  ;;  %v673_v44 = vpop.permute.xlu0 %672 }
  0x95   :  { %841 = vst.msk [vmem:[#allocation2 + $0x18] sm:$0x3f] %vm19060_vm9, %v675_v43  ;;  %vm19063_vm9 = vcmask 220354  }
  0x96   :  { %840 = vst.msk [vmem:[#allocation2 + $0x10] sm:$0xff] %vm19059_vm10, %v673_v44  ;;  %1368 = vrot.lane.b32.xlu1 %v12860_v12, %s12719_s23  ;;  %1366 = vrot.lane.b32.xlu0 %v12865_v13, %s12719_s23  ;;  %vm19064_vm10 = vcmask 220352  }
  0x98   :  { %v1579_v45 = vpop.permute.xlu1 %1578  ;;  %v1577_v46 = vpop.permute.xlu0 %1576 }
  0x99   :  { %1747 = vst.msk [vmem:[#allocation2 + $0x7] sm:$0x7f] %vm1746_vm3, %v1579_v45 }
  0x9a   :  { %1745 = vst.msk [vmem:[#allocation2 - $0x1] sm:$0xfe] %vm1744_vm4, %v1577_v46  ;;  %1594 = vrot.lane.b32.xlu1 %v12860_v12, %s12720_s24  ;;  %1592 = vrot.lane.b32.xlu0 %v12865_v13, %s12720_s24 }
  0x9c   :  { %v901_v47 = vpop.permute.xlu1 %900  ;;  %v899_v48 = vpop.permute.xlu0 %898 }
  0x9d   :  { %1067 = vst.msk [vmem:[#allocation2 + $0x17] sm:$0x7f] %vm1064_vm11, %v901_v47 }
  0x9e   :  { %1066 = vst.msk [vmem:[#allocation2 + $0xf] sm:$0xfe] %vm1062_vm12, %v899_v48  ;;  %1820 = vrot.lane.b32.xlu1 %v12860_v12, %s12721_s25  ;;  %1818 = vrot.lane.b32.xlu0 %v12865_v13, %s12721_s25 }
  0xa0   :  { %v1805_v51 = vpop.permute.xlu1 %1804  ;;  %v1803_v52 = vpop.permute.xlu0 %1802 }
  0xa1   :  { %1973 = vst.msk [vmem:[#allocation2 + $0x6] sm:$0xff] %vm19064_vm10, %v1805_v51 }
  0xa2   :  { %1971 = vst.msk [vmem:[#allocation2 - $0x2] sm:$0xfc] %vm19063_vm9, %v1803_v52  ;;  %234 = vrot.lane.b32.xlu1 %v12834_v10, %s12715_s16  ;;  %232 = vrot.lane.b32.xlu0 %v12845_v11, %s12715_s16 }
  0xa4   :  { %v1127_v53 = vpop.permute.xlu1 %1126  ;;  %v1125_v54 = vpop.permute.xlu0 %1124 }
  0xa5   :  { %1293 = vst.msk [vmem:[#allocation2 + $0x16] sm:$0xff] %vm1290_vm13, %v1127_v53 }
  0xa6   :  { %1292 = vst.msk [vmem:[#allocation2 + $0xe] sm:$0xfc] %vm1288_vm14, %v1125_v54  ;;  %460 = vrot.lane.b32.xlu1 %v12834_v10, %s12714_s15  ;;  %458 = vrot.lane.b32.xlu0 %v12845_v11, %s12714_s15 }
  0xa8   :  { %v1357_v55 = vpop.permute.xlu1 %1356  ;;  %v1355_v56 = vpop.permute.xlu0 %1354  ;;  %v2029_v8 = vld [vmem:[#allocation2 + $0x8] sm:$0x3f] }
  0xa9   :  { %1523 = vst.msk [vmem:[#allocation2 + $0x18] sm:$0x3f] %vm1520_vm15, %v1357_v55  ;;  %v2028_v0 = vld [vmem:[#allocation2] sm:$0xff]  ;;  %v2164_v19 = vrot.slane %v2029_v8, %v13114_v6  ;;  %v2157_v26 = vcombine.high %v2029_v8, %v2029_v8 }
  0xaa   :  { %1522 = vst.msk [vmem:[#allocation2 + $0x10] sm:$0xff] %vm1518_vm2, %v1355_v56  ;;  %690 = vrot.lane.b32.xlu1 %v12860_v12, %s12716_s14  ;;  %688 = vrot.lane.b32.xlu0 %v12865_v13, %s12716_s14  ;;  %v2140_v3 = vcombine.high %v2028_v0, %v2028_v0  ;;  %v2147_v18 = vrot.slane %v2028_v0, %v13114_v6 }
  0xab   :  { %v2172_v29 = vcombine.high %v2164_v19, %v2164_v19  ;;  %v2171_v34 = vrot.slane %v2157_v26, %v13114_v6 }
  0xac   :  { %v223_v57 = vpop.permute.xlu1 %222  ;;  %v221_v58 = vpop.permute.xlu0 %220  ;;  %v2154_v10 = vrot.slane %v2140_v3, %v13114_v6  ;;  %v2155_v25 = vcombine.high %v2147_v18, %v2147_v18 }
  0xad   :  { %387 = vst.msk [vmem:[#allocation2 + $0x27] sm:$0x7f] %vm382_vm7, %v223_v57  ;;  %v3081_v37 = vcombine.low %v2164_v19, %v2172_v29 }
  0xae   :  { %386 = vst.msk [vmem:[#allocation2 + $0x1f] sm:$0xfe] %vm380_vm5, %v221_v58  ;;  %916 = vrot.lane.b32.xlu1 %v12860_v12, %s12717_s17  ;;  %914 = vrot.lane.b32.xlu0 %v12865_v13, %s12717_s17  ;;  %v2156_v20 = vcombine.high %v2154_v10, %v2154_v10  ;;  %v3064_v36 = vcombine.low %v2147_v18, %v2155_v25 }
  0xaf   :  { %v3089_v43 = vrot.slane %v3081_v37, %v13114_v6 }
  0xb0   :  { %v1583_v62 = vpop.permute.xlu1 %1582  ;;  %v1581_v63 = vpop.permute.xlu0 %1580  ;;  %v3065_v30 = vcombine.low %v2154_v10, %v2156_v20  ;;  %v3072_v42 = vrot.slane %v3064_v36, %v13114_v6 }
  0xb1   :  { %1749 = vst.msk [vmem:[#allocation2 + $0x17] sm:$0x7f] %vm1746_vm3, %v1583_v62  ;;  %v13198_v62 = vld [vmem:[%s19047_s0 + $0xc8] sm:$0xff] }
  0xb2   :  { %1748 = vst.msk [vmem:[#allocation2 + $0xf] sm:$0xfe] %vm1744_vm4, %v1581_v63  ;;  %1142 = vrot.lane.b32.xlu1 %v12860_v12, %s12718_s22  ;;  %1140 = vrot.lane.b32.xlu0 %v12865_v13, %s12718_s22  ;;  %v3079_v38 = vrot.slane %v3065_v30, %v13114_v6  ;;  %v13209_v63 = vld [vmem:[%s19047_s0 + $0xc0] sm:$0xff] }
  0xb3   :  { %125 = vst.msk [vmem:[#allocation2 + $0xc8] sm:$0x3f] %vm19066_vm0, %v13198_v62 }
  0xb4   :  { %v449_v4 = vpop.permute.xlu1 %448  ;;  %v447_v5 = vpop.permute.xlu0 %446  ;;  %v3080_v45 = vcombine.low %v3072_v42, %v3079_v38  ;;  %124 = vst.msk [vmem:[#allocation2 + $0xc0] sm:$0xff] %vm19065_vm1, %v13209_v63  ;;  %vm19277_vm1 = vcmask 95304  }
  0xb5   :  { %613 = vst.msk [vmem:[#allocation2 + $0x26] sm:$0xff] %vm19062_vm8, %v449_v4  ;;  %vm19273_vm8 = vcmask 97352  }
  0xb6   :  { %612 = vst.msk [vmem:[#allocation2 + $0x1e] sm:$0xfc] %vm19061_vm6, %v447_v5  ;;  %1372 = vrot.lane.b32.xlu1 %v12890_v14, %s12719_s23  ;;  %1370 = vrot.lane.b32.xlu0 %v12895_v15, %s12719_s23  ;;  %vm19272_vm6 = vcmask 95304  }
  0xb8   :  { %v1809_v11 = vpop.permute.xlu1 %1808  ;;  %v1807_v16 = vpop.permute.xlu0 %1806 }
  0xb9   :  { %1975 = vst.msk [vmem:[#allocation2 + $0x16] sm:$0xff] %vm19064_vm10, %v1809_v11 }
  0xba   :  { %1974 = vst.msk [vmem:[#allocation2 + $0xe] sm:$0xfc] %vm19063_vm9, %v1807_v16  ;;  %1598 = vrot.lane.b32.xlu1 %v12890_v14, %s12720_s24  ;;  %1596 = vrot.lane.b32.xlu0 %v12895_v15, %s12720_s24 }
  0xbc   :  { %v679_v21 = vpop.permute.xlu1 %678  ;;  %v677_v22 = vpop.permute.xlu0 %676 }
  0xbd   :  { %843 = vst.msk [vmem:[#allocation2 + $0x28] sm:$0x3f] %vm19272_vm6, %v679_v21  ;;  %vm3995_vm6 = vcmask 220160  }
  0xbe   :  { %842 = vst.msk [vmem:[#allocation2 + $0x20] sm:$0xff] %vm19273_vm8, %v677_v22  ;;  %1824 = vrot.lane.b32.xlu1 %v12890_v14, %s12721_s25  ;;  %1822 = vrot.lane.b32.xlu0 %v12895_v15, %s12721_s25  ;;  %vm19274_vm8 = vmmov 0  }
  0xc0   :  { %v905_v31 = vpop.permute.xlu1 %904  ;;  %v903_v32 = vpop.permute.xlu0 %902  ;;  %v2031_v55 = vld [vmem:[#allocation2 + $0x18] sm:$0x3f] }
  0xc1   :  { %v2030_v33 = vld [vmem:[#allocation2 + $0x10] sm:$0xff]  ;;  %1069 = vst.msk [vmem:[#allocation2 + $0x27] sm:$0x7f] %vm1064_vm11, %v905_v31  ;;  %v2190_v57 = vcombine.high %v2031_v55, %v2031_v55  ;;  %v2197_v58 = vrot.slane %v2031_v55, %v13114_v6 }
  0xc2   :  { %1068 = vst.msk [vmem:[#allocation2 + $0x1f] sm:$0xfe] %vm1062_vm12, %v903_v32  ;;  %v13153_v35 = vrot.slane %v2030_v33, %v13114_v6  ;;  %238 = vrot.lane.b32.xlu1 %v12860_v12, %s12715_s16  ;;  %236 = vrot.lane.b32.xlu0 %v12865_v13, %s12715_s16  ;;  %v2173_v52 = vcombine.high %v2030_v33, %v2030_v33 }
  0xc3   :  { %v2204_v1 = vrot.slane %v2190_v57, %v13114_v6  ;;  %v2205_v3 = vcombine.high %v2197_v58, %v2197_v58 }
  0xc4   :  { %v3082_v39 = vcombine.low %v2171_v34, %v13153_v35  ;;  %v1131_v40 = vpop.permute.xlu1 %1130  ;;  %v1129_v41 = vpop.permute.xlu0 %1128  ;;  %v2187_v56 = vrot.slane %v2173_v52, %v13114_v6  ;;  %v2188_v0 = vcombine.high %v13153_v35, %v13153_v35 }
  0xc5   :  { %1295 = vst.msk [vmem:[#allocation2 + $0x26] sm:$0xff] %vm1290_vm13, %v1131_v40  ;;  %v3115_v19 = vcombine.low %v2205_v3, %v2204_v1 }
  0xc6   :  { %1294 = vst.msk [vmem:[#allocation2 + $0x1e] sm:$0xfc] %vm1288_vm14, %v1129_v41  ;;  %v3096_v44 = vrot.slane %v3082_v39, %v13114_v6  ;;  %464 = vrot.lane.b32.xlu1 %v12860_v12, %s12714_s15  ;;  %462 = vrot.lane.b32.xlu0 %v12865_v13, %s12714_s15  ;;  %v2189_v61 = vcombine.high %v2187_v56, %v2187_v56 }
  0xc7   :  { %v3098_v18 = vcombine.low %v2188_v0, %v2187_v56  ;;  %v3123_v29 = vrot.slane %v3115_v19, %v13114_v6 }
  0xc8   :  { %v3097_v46 = vcombine.low %v3089_v43, %v3096_v44  ;;  %v1361_v47 = vpop.permute.xlu1 %1360  ;;  %v1359_v48 = vpop.permute.xlu0 %1358  ;;  %v3099_v11 = vcombine.low %v2189_v61, %v2197_v58 }
  0xc9   :  { %1525 = vst.msk [vmem:[#allocation2 + $0x28] sm:$0x3f] %vm1520_vm15, %v1361_v47  ;;  %v3106_v26 = vrot.slane %v3098_v18, %v13114_v6 }
  0xca   :  { %1524 = vst.msk [vmem:[#allocation2 + $0x20] sm:$0xff] %vm1518_vm2, %v1359_v48  ;;  %v3946_v51 = vpack.c.bf16 %v3097_v46, %v3080_v45  ;;  %694 = vrot.lane.b32.xlu1 %v12890_v14, %s12716_s14  ;;  %692 = vrot.lane.b32.xlu0 %v12895_v15, %s12716_s14  ;;  %v3113_v22 = vrot.slane %v3099_v11, %v13114_v6  ;;  %v13276_v45 = vld [vmem:[%s19047_s0 + $0xd8] sm:$0xff]  ;;  %v13287_v46 = vld [vmem:[%s19047_s0 + $0xd0] sm:$0xff] }
  0xcb   :  { %127 = vst.msk [vmem:[#allocation2 + $0xd8] sm:$0x3f] %vm19066_vm0, %v13276_v45  ;;  %vm19284_vm0 = vcmask 97352  }
  0xcc   :  { %12291 = vmatmul.mubr.msk.bf16.vlgmr.msra.gmra.mrb[0].mxu0 %vm3995_vm6, %v3946_v51  ;;  %v1587_v12 = vpop.permute.xlu1 %1586  ;;  %v1585_v13 = vpop.permute.xlu0 %1584  ;;  %v3114_v33 = vcombine.low %v3106_v26, %v3113_v22 }
  0xcd   :  { %12294 = vmatprep.mubr.msk.bf16.mxu0 %vm19274_vm8, %v19067_v17  ;;  %1751 = vst.msk [vmem:[#allocation2 + $0x27] sm:$0x7f] %vm1746_vm3, %v1587_v12 }
  0xce   :  { %1750 = vst.msk [vmem:[#allocation2 + $0x1f] sm:$0xfe] %vm1744_vm4, %v1585_v13  ;;  %920 = vrot.lane.b32.xlu1 %v12890_v14, %s12717_s17  ;;  %918 = vrot.lane.b32.xlu0 %v12895_v15, %s12717_s17 }
  0xd0   :  { %v1813_v53 = vpop.permute.xlu1 %1812  ;;  %v1811_v54 = vpop.permute.xlu0 %1810 }
  0xd1   :  { %1977 = vst.msk [vmem:[#allocation2 + $0x26] sm:$0xff] %vm19064_vm10, %v1813_v53  ;;  %vm19276_vm10 = vcmask 72754  }
  0xd2   :  { %1976 = vst.msk [vmem:[#allocation2 + $0x1e] sm:$0xfc] %vm19063_vm9, %v1811_v54  ;;  %1146 = vrot.lane.b32.xlu1 %v12890_v14, %s12718_s22  ;;  %1144 = vrot.lane.b32.xlu0 %v12895_v15, %s12718_s22  ;;  %vm19275_vm9 = vcmask 72752  }
  0xd4   :  { %v227_v59 = vpop.permute.xlu1 %226  ;;  %v225_v60 = vpop.permute.xlu0 %224 }
  0xd5   :  { %389 = vst.msk [vmem:[#allocation2 + $0x37] sm:$0x7f] %vm382_vm7, %v227_v59 }
  0xd6   :  { %388 = vst.msk [vmem:[#allocation2 + $0x2f] sm:$0xfe] %vm380_vm5, %v225_v60  ;;  %1376 = vrot.lane.b32.xlu1 %v12942_v23, %s12719_s23  ;;  %1374 = vrot.lane.b32.xlu0 %v12947_v24, %s12719_s23 }
  0xd8   :  { %v453_v4 = vpop.permute.xlu1 %452  ;;  %v451_v5 = vpop.permute.xlu0 %450  ;;  %v2033_v51 = vld [vmem:[#allocation2 + $0x28] sm:$0x3f] }
  0xd9   :  { %v13216_v8 = vld [vmem:[#allocation2 + $0x20] sm:$0xff]  ;;  %615 = vst.msk [vmem:[#allocation2 + $0x36] sm:$0xff] %vm19275_vm9, %v453_v4  ;;  %vm19278_vm9 = vcmask 97352   ;;  %v2230_v13 = vrot.slane %v2033_v51, %v13114_v6  ;;  %v2223_v55 = vcombine.high %v2033_v51, %v2033_v51 }
  0xda   :  { %614 = vst.msk [vmem:[#allocation2 + $0x2e] sm:$0xfc] %vm19276_vm10, %v451_v5  ;;  %v2213_v10 = vrot.slane %v13216_v8, %v13114_v6  ;;  %1602 = vrot.lane.b32.xlu1 %v12942_v23, %s12720_s24  ;;  %1600 = vrot.lane.b32.xlu0 %v12947_v24, %s12720_s24  ;;  %v2206_v44 = vcombine.high %v13216_v8, %v13216_v8 }
  0xdb   :  { %v2238_v56 = vcombine.high %v2230_v13, %v2230_v13  ;;  %v2237_v60 = vrot.slane %v2223_v55, %v13114_v6 }
  0xdc   :  { %v2221_v16 = vcombine.high %v2213_v10, %v2213_v10  ;;  %v683_v20 = vpop.permute.xlu1 %682  ;;  %v681_v21 = vpop.permute.xlu0 %680  ;;  %v2220_v12 = vrot.slane %v2206_v44, %v13114_v6 }
  0xdd   :  { %845 = vst.msk [vmem:[#allocation2 + $0x38] sm:$0x3f] %vm19277_vm1, %v683_v20  ;;  %vm19279_vm1 = vcmask 72752   ;;  %v3133_v5 = vcombine.low %v2230_v13, %v2238_v56 }
  0xde   :  { %844 = vst.msk [vmem:[#allocation2 + $0x30] sm:$0xff] %vm19278_vm9, %v681_v21  ;;  %v3116_v25 = vcombine.low %v2213_v10, %v2221_v16  ;;  %1828 = vrot.lane.b32.xlu1 %v12942_v23, %s12721_s25  ;;  %1826 = vrot.lane.b32.xlu0 %v12947_v24, %s12721_s25  ;;  %vm19280_vm9 = vcmask 23552   ;;  %v2222_v54 = vcombine.high %v2220_v12, %v2220_v12 }
  0xdf   :  { %126 = vst.msk [vmem:[#allocation2 + $0xd0] sm:$0xff] %vm19280_vm9, %v13287_v46  ;;  %vm19283_vm9 = vcmask 95304   ;;  %v3147_v19 = vrot.slane %v3133_v5, %v13114_v6 }
  0xe0   :  { %v3130_v30 = vrot.slane %v3116_v25, %v13114_v6  ;;  %v909_v31 = vpop.permute.xlu1 %908  ;;  %v907_v32 = vpop.permute.xlu0 %906  ;;  %v3132_v1 = vcombine.low %v2220_v12, %v2222_v54 }
  0xe1   :  { %1071 = vst.msk [vmem:[#allocation2 + $0x37] sm:$0x7f] %vm1064_vm11, %v909_v31 }
  0xe2   :  { %1070 = vst.msk [vmem:[#allocation2 + $0x2f] sm:$0xfe] %vm1062_vm12, %v907_v32  ;;  %v3131_v34 = vcombine.low %v3123_v29, %v3130_v30  ;;  %242 = vrot.lane.b32.xlu1 %v12890_v14, %s12715_s16  ;;  %240 = vrot.lane.b32.xlu0 %v12895_v15, %s12715_s16  ;;  %v3140_v16 = vrot.slane %v3132_v1, %v13114_v6 }
  0xe4   :  { %v3947_v35 = vpack.c.bf16 %v3131_v34, %v3114_v33  ;;  %v1135_v36 = vpop.permute.xlu1 %1134  ;;  %v1133_v37 = vpop.permute.xlu0 %1132  ;;  %v3148_v26 = vcombine.low %v3140_v16, %v3147_v19 }
  0xe5   :  { %1297 = vst.msk [vmem:[#allocation2 + $0x36] sm:$0xff] %vm1290_vm13, %v1135_v36 }
  0xe6   :  { %1296 = vst.msk [vmem:[#allocation2 + $0x2e] sm:$0xfc] %vm1288_vm14, %v1133_v37  ;;  %12295 = vmatmul.mubr.msk.bf16.gmra.mrb[4].mxu0 %vm3995_vm6, %v3947_v35  ;;  %468 = vrot.lane.b32.xlu1 %v12890_v14, %s12714_s15 }
  0xe7   :  { %466 = vrot.lane.b32.xlu0 %v12895_v15, %s12714_s15  ;;  %12298 = vmatprep.mubr.msk.bf16.mxu0 %vm19274_vm8, %v19067_v17 }
  0xe8   :  { %v1365_v38 = vpop.permute.xlu1 %1364  ;;  %v1363_v39 = vpop.permute.xlu0 %1362 }
  0xe9   :  { %1527 = vst.msk [vmem:[#allocation2 + $0x38] sm:$0x3f] %vm1520_vm15, %v1365_v38 }
  0xea   :  { %1526 = vst.msk [vmem:[#allocation2 + $0x30] sm:$0xff] %vm1518_vm2, %v1363_v39  ;;  %698 = vrot.lane.b32.xlu1 %v12942_v23, %s12716_s14 }
  0xeb   :  { %696 = vrot.lane.b32.xlu0 %v12947_v24, %s12716_s14 }
  0xec   :  { %v231_v40 = vpop.permute.xlu1 %230  ;;  %v229_v14 = vpop.permute.xlu0 %228 }
  0xed   :  { %391 = vst.msk [vmem:[#allocation2 + $0x47] sm:$0x7f] %vm382_vm7, %v231_v40 }
  0xee   :  { %390 = vst.msk [vmem:[#allocation2 + $0x3f] sm:$0xfe] %vm380_vm5, %v229_v14  ;;  %924 = vrot.lane.b32.xlu1 %v12942_v23, %s12717_s17 }
  0xef   :  { %922 = vrot.lane.b32.xlu0 %v12947_v24, %s12717_s17 }
  0xf0   :  { %v1591_v15 = vpop.permute.xlu1 %1590  ;;  %v1589_v41 = vpop.permute.xlu0 %1588 }
  0xf1   :  { %1753 = vst.msk [vmem:[#allocation2 + $0x37] sm:$0x7f] %vm1746_vm3, %v1591_v15 }
  0xf2   :  { %1752 = vst.msk [vmem:[#allocation2 + $0x2f] sm:$0xfe] %vm1744_vm4, %v1589_v41  ;;  %1150 = vrot.lane.b32.xlu1 %v12942_v23, %s12718_s22 }
  0xf3   :  { %1148 = vrot.lane.b32.xlu0 %v12947_v24, %s12718_s22 }
  0xf4   :  { %v457_v42 = vpop.permute.xlu1 %456  ;;  %v455_v43 = vpop.permute.xlu0 %454 }
  0xf5   :  { %617 = vst.msk [vmem:[#allocation2 + $0x46] sm:$0xff] %vm19279_vm1, %v457_v42  ;;  %vm19281_vm1 = vcmask 220352  }
  0xf6   :  { %616 = vst.msk [vmem:[#allocation2 + $0x3e] sm:$0xfc] %vm19276_vm10, %v455_v43  ;;  %1380 = vrot.lane.b32.xlu1 %v12989_v27, %s12719_s23  ;;  %vm19282_vm10 = vcmask 220354  }
  0xf7   :  { %1378 = vrot.lane.b32.xlu0 %v13001_v28, %s12719_s23 }
  0xf8   :  { %v1817_v47 = vpop.permute.xlu1 %1816  ;;  %v1815_v48 = vpop.permute.xlu0 %1814 }
  0xf9   :  { %1979 = vst.msk [vmem:[#allocation2 + $0x36] sm:$0xff] %vm19281_vm1, %v1817_v47 }
  0xfa   :  { %1978 = vst.msk [vmem:[#allocation2 + $0x2e] sm:$0xfc] %vm19282_vm10, %v1815_v48  ;;  %1606 = vrot.lane.b32.xlu1 %v12989_v27, %s12720_s24 }
  0xfb   :  { %1604 = vrot.lane.b32.xlu0 %v13001_v28, %s12720_s24 }
  0xfc   :  { %v687_v52 = vpop.permute.xlu1 %686  ;;  %v685_v53 = vpop.permute.xlu0 %684 }
  0xfd   :  { %847 = vst.msk [vmem:[#allocation2 + $0x48] sm:$0x3f] %vm19283_vm9, %v687_v52  ;;  %vm19288_vm9 = vcmask 72754  }
  0xfe   :  { %846 = vst.msk [vmem:[#allocation2 + $0x40] sm:$0xff] %vm19284_vm0, %v685_v53  ;;  %1832 = vrot.lane.b32.xlu1 %v12989_v27, %s12721_s25  ;;  %vm19285_vm0 = vmmov %vm19281_vm1 }
  0xff   :  { %1830 = vrot.lane.b32.xlu0 %v13001_v28, %s12721_s25  ;;  %vm19286_vm1 = vmmov %vm19282_vm10  ;;  %vm19287_vm10 = vcmask 72752  }
 0x100   :  { %v913_v57 = vpop.permute.xlu1 %912  ;;  %v911_v58 = vpop.permute.xlu0 %910  ;;  %v2035_v33 = vld [vmem:[#allocation2 + $0x38] sm:$0x3f] }
 0x101   :  { %v2034_v59 = vld [vmem:[#allocation2 + $0x30] sm:$0xff]  ;;  %1073 = vst.msk [vmem:[#allocation2 + $0x47] sm:$0x7f] %vm1064_vm11, %v913_v57  ;;  %v2256_v36 = vcombine.high %v2035_v33, %v2035_v33  ;;  %v2263_v37 = vrot.slane %v2035_v33, %v13114_v6 }
 0x102   :  { %1072 = vst.msk [vmem:[#allocation2 + $0x3f] sm:$0xfe] %vm1062_vm12, %v911_v58  ;;  %v2239_v61 = vcombine.high %v2034_v59, %v2034_v59  ;;  %v2246_v0 = vrot.slane %v2034_v59, %v13114_v6  ;;  %246 = vrot.lane.b32.xlu1 %v12942_v23, %s12715_s16 }
 0x103   :  { %244 = vrot.lane.b32.xlu0 %v12947_v24, %s12715_s16  ;;  %v2270_v15 = vrot.slane %v2256_v36, %v13114_v6  ;;  %v2271_v41 = vcombine.high %v2263_v37, %v2263_v37 }
 0x104   :  { %v2253_v3 = vrot.slane %v2239_v61, %v13114_v6  ;;  %v2254_v4 = vcombine.high %v2246_v0, %v2246_v0  ;;  %v3149_v8 = vcombine.low %v2237_v60, %v2246_v0  ;;  %v1139_v10 = vpop.permute.xlu1 %1138  ;;  %v1137_v11 = vpop.permute.xlu0 %1136 }
 0x105   :  { %1299 = vst.msk [vmem:[#allocation2 + $0x46] sm:$0xff] %vm1290_vm13, %v1139_v10  ;;  %v3167_v52 = vcombine.low %v2271_v41, %v2270_v15 }
 0x106   :  { %1298 = vst.msk [vmem:[#allocation2 + $0x3e] sm:$0xfc] %vm1288_vm14, %v1137_v11  ;;  %v3150_v18 = vcombine.low %v2254_v4, %v2253_v3  ;;  %472 = vrot.lane.b32.xlu1 %v12942_v23, %s12714_s15  ;;  %v3157_v20 = vrot.slane %v3149_v8, %v13114_v6  ;;  %v2255_v38 = vcombine.high %v2253_v3, %v2253_v3 }
 0x107   :  { %470 = vrot.lane.b32.xlu0 %v12947_v24, %s12714_s15  ;;  %v3181_v56 = vrot.slane %v3167_v52, %v13114_v6 }
 0x108   :  { %v3164_v21 = vrot.slane %v3150_v18, %v13114_v6  ;;  %v1369_v22 = vpop.permute.xlu1 %1368  ;;  %v1367_v25 = vpop.permute.xlu0 %1366  ;;  %v3166_v48 = vcombine.low %v2255_v38, %v2263_v37 }
 0x109   :  { %1529 = vst.msk [vmem:[#allocation2 + $0x48] sm:$0x3f] %vm1520_vm15, %v1369_v22 }
 0x10a   :  { %1528 = vst.msk [vmem:[#allocation2 + $0x40] sm:$0xff] %vm1518_vm2, %v1367_v25  ;;  %v3165_v29 = vcombine.low %v3157_v20, %v3164_v21  ;;  %702 = vrot.lane.b32.xlu1 %v12989_v27, %s12716_s14 }
 0x10b   :  { %700 = vrot.lane.b32.xlu0 %v13001_v28, %s12716_s14 }
 0x10c   :  { %v3948_v23 = vpack.c.bf16 %v3165_v29, %v3148_v26  ;;  %v1595_v24 = vpop.permute.xlu1 %1594  ;;  %v1593_v30 = vpop.permute.xlu0 %1592 }
 0x10d   :  { %1755 = vst.msk [vmem:[#allocation2 + $0x47] sm:$0x7f] %vm1746_vm3, %v1595_v24 }
 0x10e   :  { %1754 = vst.msk [vmem:[#allocation2 + $0x3f] sm:$0xfe] %vm1744_vm4, %v1593_v30  ;;  %12299 = vmatmul.mubr.msk.bf16.gmra.mrb[8].mxu0 %vm3995_vm6, %v3948_v23  ;;  %928 = vrot.lane.b32.xlu1 %v12989_v27, %s12717_s17 }
 0x10f   :  { %926 = vrot.lane.b32.xlu0 %v13001_v28, %s12717_s17  ;;  %12302 = vmatprep.mubr.msk.bf16.mxu0 %vm19274_vm8, %v19067_v17 }
 0x110   :  { %v1821_v31 = vpop.permute.xlu1 %1820  ;;  %v1819_v32 = vpop.permute.xlu0 %1818 }
 0x111   :  { %1981 = vst.msk [vmem:[#allocation2 + $0x46] sm:$0xff] %vm19285_vm0, %v1821_v31  ;;  %vm19289_vm0 = vcmask 95304  }
 0x112   :  { %1980 = vst.msk [vmem:[#allocation2 + $0x3e] sm:$0xfc] %vm19286_vm1, %v1819_v32  ;;  %250 = vrot.lane.b32.xlu1 %v12989_v27, %s12715_s16  ;;  %vm19290_vm1 = vcmask 97352  }
 0x113   :  { %248 = vrot.lane.b32.xlu0 %v13001_v28, %s12715_s16 }
 0x114   :  { %v235_v34 = vpop.permute.xlu1 %234  ;;  %v233_v35 = vpop.permute.xlu0 %232 }
 0x115   :  { %393 = vst.msk [vmem:[#allocation2 + $0x57] sm:$0x7f] %vm382_vm7, %v235_v34 }
 0x116   :  { %392 = vst.msk [vmem:[#allocation2 + $0x4f] sm:$0xfe] %vm380_vm5, %v233_v35  ;;  %1154 = vrot.lane.b32.xlu1 %v12989_v27, %s12718_s22 }
 0x117   :  { %1152 = vrot.lane.b32.xlu0 %v13001_v28, %s12718_s22 }
 0x118   :  { %v461_v39 = vpop.permute.xlu1 %460  ;;  %v459_v40 = vpop.permute.xlu0 %458  ;;  %v2037_v16 = vld [vmem:[#allocation2 + $0x48] sm:$0x3f] }
 0x119   :  { %v2036_v14 = vld [vmem:[#allocation2 + $0x40] sm:$0xff]  ;;  %619 = vst.msk [vmem:[#allocation2 + $0x56] sm:$0xff] %vm19287_vm10, %v461_v39  ;;  %vm19291_vm10 = vcmask 220352   ;;  %v2289_v20 = vcombine.high %v2037_v16, %v2037_v16  ;;  %v2296_v21 = vrot.slane %v2037_v16, %v13114_v6 }
 0x11a   :  { %618 = vst.msk [vmem:[#allocation2 + $0x4e] sm:$0xfc] %vm19288_vm9, %v459_v40  ;;  %v2272_v42 = vcombine.high %v2036_v14, %v2036_v14  ;;  %v2279_v43 = vrot.slane %v2036_v14, %v13114_v6  ;;  %476 = vrot.lane.b32.xlu1 %v12989_v27, %s12714_s15  ;;  %v3174_v27 = vrot.slane %v3166_v48, %v13114_v6  ;;  %vm19292_vm9 = vcmask 220354   ;;  %v13446_v48 = vld [vmem:[%s19047_s0 + $0x108] sm:$0xff] }
 0x11b   :  { %474 = vrot.lane.b32.xlu0 %v13001_v28, %s12714_s15  ;;  %v2303_v29 = vrot.slane %v2289_v20, %v13114_v6  ;;  %v2304_v23 = vcombine.high %v2296_v21, %v2296_v21 }
 0x11c   :  { %v2286_v44 = vrot.slane %v2272_v42, %v13114_v6  ;;  %v2287_v47 = vcombine.high %v2279_v43, %v2279_v43  ;;  %v691_v51 = vpop.permute.xlu1 %690  ;;  %v689_v12 = vpop.permute.xlu0 %688  ;;  %v3182_v59 = vcombine.low %v3174_v27, %v3181_v56 }
 0x11d   :  { %849 = vst.msk [vmem:[#allocation2 + $0x58] sm:$0x3f] %vm19289_vm0, %v691_v51  ;;  %vm19293_vm0 = vcmask 72752   ;;  %v3200_v39 = vcombine.low %v2296_v21, %v2304_v23  ;;  %v13451_v51 = vld [vmem:[%s19047_s0 + $0x100] sm:$0xff] }
 0x11e   :  { %848 = vst.msk [vmem:[#allocation2 + $0x50] sm:$0xff] %vm19290_vm1, %v689_v12  ;;  %v2288_v13 = vcombine.high %v2286_v44, %v2286_v44  ;;  %v3183_v53 = vcombine.low %v2279_v43, %v2287_v47  ;;  %1384 = vrot.lane.b32.xlu1 %v13064_v49, %s12719_s23  ;;  %vm19294_vm1 = vcmask 72754  }
 0x11f   :  { %1382 = vrot.lane.b32.xlu0 %v13075_v50, %s12719_s23  ;;  %v3208_v43 = vrot.slane %v3200_v39, %v13114_v6 }
 0x120   :  { %v3184_v28 = vcombine.low %v2286_v44, %v2288_v13  ;;  %v917_v54 = vpop.permute.xlu1 %916  ;;  %v915_v55 = vpop.permute.xlu0 %914  ;;  %v3191_v57 = vrot.slane %v3183_v53, %v13114_v6 }
 0x121   :  { %1075 = vst.msk [vmem:[#allocation2 + $0x57] sm:$0x7f] %vm1064_vm11, %v917_v54  ;;  %v13480_v54 = vld [vmem:[%s19047_s0 + $0x110] sm:$0xff] }
 0x122   :  { %1074 = vst.msk [vmem:[#allocation2 + $0x4f] sm:$0xfe] %vm1062_vm12, %v915_v55  ;;  %v3198_v58 = vrot.slane %v3184_v28, %v13114_v6  ;;  %706 = vrot.lane.b32.xlu1 %v13064_v49, %s12716_s14  ;;  %v13475_v28 = vld [vmem:[%s19047_s0 + $0x118] sm:$0xff] }
 0x123   :  { %704 = vrot.lane.b32.xlu0 %v13075_v50, %s12716_s14 }
 0x124   :  { %v3199_v60 = vcombine.low %v3191_v57, %v3198_v58  ;;  %v1143_v61 = vpop.permute.xlu1 %1142  ;;  %v1141_v0 = vpop.permute.xlu0 %1140 }
 0x125   :  { %1301 = vst.msk [vmem:[#allocation2 + $0x56] sm:$0xff] %vm1290_vm13, %v1143_v61 }
 0x126   :  { %1300 = vst.msk [vmem:[#allocation2 + $0x4e] sm:$0xfc] %vm1288_vm14, %v1141_v0  ;;  %v3949_v1 = vpack.c.bf16 %v3199_v60, %v3182_v59  ;;  %1610 = vrot.lane.b32.xlu1 %v13064_v49, %s12720_s24  ;;  %v13509_v0 = vld [vmem:[%s19047_s0 + $0x128] sm:$0xff] }
 0x127   :  { %1608 = vrot.lane.b32.xlu0 %v13075_v50, %s12720_s24 }
 0x128   :  { %12303 = vmatmul.mubr.msk.bf16.gmra.mrb[12].mxu0 %vm3995_vm6, %v3949_v1  ;;  %v1373_v3 = vpop.permute.xlu1 %1372  ;;  %v1371_v4 = vpop.permute.xlu0 %1370  ;;  %v13514_v1 = vld [vmem:[%s19047_s0 + $0x120] sm:$0xff] }
 0x129   :  { %12306 = vmatprep.mubr.msk.bf16.mxu0 %vm19274_vm8, %v19067_v17  ;;  %1531 = vst.msk [vmem:[#allocation2 + $0x58] sm:$0x3f] %vm1520_vm15, %v1373_v3 }
 0x12a   :  { %1530 = vst.msk [vmem:[#allocation2 + $0x50] sm:$0xff] %vm1518_vm2, %v1371_v4  ;;  %932 = vrot.lane.b32.xlu1 %v13064_v49, %s12717_s17 }
 0x12b   :  { %930 = vrot.lane.b32.xlu0 %v13075_v50, %s12717_s17 }
 0x12c   :  { %v1599_v5 = vpop.permute.xlu1 %1598  ;;  %v1597_v8 = vpop.permute.xlu0 %1596 }
 0x12d   :  { %1757 = vst.msk [vmem:[#allocation2 + $0x57] sm:$0x7f] %vm1746_vm3, %v1599_v5 }
 0x12e   :  { %1756 = vst.msk [vmem:[#allocation2 + $0x4f] sm:$0xfe] %vm1744_vm4, %v1597_v8  ;;  %1836 = vrot.lane.b32.xlu1 %v13064_v49, %s12721_s25 }
 0x12f   :  { %1834 = vrot.lane.b32.xlu0 %v13075_v50, %s12721_s25 }
 0x130   :  { %v1825_v10 = vpop.permute.xlu1 %1824  ;;  %v1823_v11 = vpop.permute.xlu0 %1822 }
 0x131   :  { %1983 = vst.msk [vmem:[#allocation2 + $0x56] sm:$0xff] %vm19291_vm10, %v1825_v10  ;;  %vm19295_vm10 = vcmask 95304  }
 0x132   :  { %1982 = vst.msk [vmem:[#allocation2 + $0x4e] sm:$0xfc] %vm19292_vm9, %v1823_v11  ;;  %1158 = vrot.lane.b32.xlu1 %v13064_v49, %s12718_s22  ;;  %vm19296_vm9 = vcmask 97352  }
 0x133   :  { %1156 = vrot.lane.b32.xlu0 %v13075_v50, %s12718_s22 }
 0x134   :  { %v239_v18 = vpop.permute.xlu1 %238  ;;  %v237_v19 = vpop.permute.xlu0 %236 }
 0x135   :  { %395 = vst.msk [vmem:[#allocation2 + $0x67] sm:$0x7f] %vm382_vm7, %v239_v18 }
 0x136   :  { %394 = vst.msk [vmem:[#allocation2 + $0x5f] sm:$0xfe] %vm380_vm5, %v237_v19  ;;  %1388 = vrot.lane.b32.xlu1 %v13119_v7, %s12719_s23 }
 0x137   :  { %1386 = vrot.lane.b32.xlu0 %v13130_v9, %s12719_s23 }
 0x138   :  { %v465_v22 = vpop.permute.xlu1 %464  ;;  %v463_v25 = vpop.permute.xlu0 %462  ;;  %v13419_v31 = vld [vmem:[#allocation2 + $0x58] sm:$0x3f] }
 0x139   :  { %v2038_v26 = vld [vmem:[#allocation2 + $0x50] sm:$0xff]  ;;  %621 = vst.msk [vmem:[#allocation2 + $0x66] sm:$0xff] %vm19293_vm0, %v465_v22  ;;  %v13426_v38 = vrot.slane %v13419_v31, %v13114_v6  ;;  %vm19297_vm0 = vcmask 21504   ;;  %v2322_v61 = vcombine.high %v13419_v31, %v13419_v31 }
 0x13a   :  { %620 = vst.msk [vmem:[#allocation2 + $0x5e] sm:$0xfc] %vm19294_vm1, %v463_v25  ;;  %v2305_v24 = vcombine.high %v2038_v26, %v2038_v26  ;;  %v2312_v30 = vrot.slane %v2038_v26, %v13114_v6  ;;  %254 = vrot.lane.b32.xlu1 %v13064_v49, %s12715_s16  ;;  %vm19298_vm1 = vcmask 23552  }
 0x13b   :  { %252 = vrot.lane.b32.xlu0 %v13075_v50, %s12715_s16  ;;  %129 = vst.msk [vmem:[#allocation2 + $0xe8] sm:$0x3f] %vm19297_vm0, %v13446_v48  ;;  %v2336_v10 = vrot.slane %v2322_v61, %v13114_v6  ;;  %v2337_v11 = vcombine.high %v13426_v38, %v13426_v38 }
 0x13c   :  { %v2319_v32 = vrot.slane %v2305_v24, %v13114_v6  ;;  %v2320_v33 = vcombine.high %v2312_v30, %v2312_v30  ;;  %v3201_v34 = vcombine.low %v2303_v29, %v2312_v30  ;;  %v695_v35 = vpop.permute.xlu1 %694  ;;  %v693_v36 = vpop.permute.xlu0 %692  ;;  %128 = vst.msk [vmem:[#allocation2 + $0xe0] sm:$0xff] %vm19298_vm1, %v13451_v51 }
 0x13d   :  { %851 = vst.msk [vmem:[#allocation2 + $0x68] sm:$0x3f] %vm19295_vm10, %v695_v35  ;;  %vm19299_vm10 = vmmov %vm19297_vm0  ;;  %vm19301_vm0 = vcmask 220352   ;;  %v3234_v23 = vcombine.low %v2337_v11, %v2336_v10 }
 0x13e   :  { %850 = vst.msk [vmem:[#allocation2 + $0x60] sm:$0xff] %vm19296_vm9, %v693_v36  ;;  %v2321_v37 = vcombine.high %v2319_v32, %v2319_v32  ;;  %v3217_v40 = vcombine.low %v2320_v33, %v2319_v32  ;;  %1614 = vrot.lane.b32.xlu1 %v13119_v7, %s12720_s24  ;;  %v3215_v14 = vrot.slane %v3201_v34, %v13114_v6  ;;  %vm19300_vm9 = vmmov %vm19298_vm1  ;;  %vm19302_vm1 = vcmask 220354  }
 0x13f   :  { %1612 = vrot.lane.b32.xlu0 %v13130_v9, %s12720_s24  ;;  %131 = vst.msk [vmem:[#allocation2 + $0xf8] sm:$0x3f] %vm19299_vm10, %v13475_v28  ;;  %133 = vst.msk [vmem:[#allocation2 + $0x108] sm:$0x3f] %vm19299_vm10, %v13509_v0  ;;  %vm19305_vm10 = vcmask 95304   ;;  %v3242_v35 = vrot.slane %v3234_v23, %v13114_v6 }
 0x140   :  { %v3218_v15 = vcombine.low %v2321_v37, %v13426_v38  ;;  %v921_v41 = vpop.permute.xlu1 %920  ;;  %v919_v42 = vpop.permute.xlu0 %918  ;;  %v3225_v44 = vrot.slane %v3217_v40, %v13114_v6  ;;  %v3216_v12 = vcombine.low %v3208_v43, %v3215_v14  ;;  %130 = vst.msk [vmem:[#allocation2 + $0xf0] sm:$0xff] %vm19300_vm9, %v13480_v54  ;;  %132 = vst.msk [vmem:[#allocation2 + $0x100] sm:$0xff] %vm19300_vm9, %v13514_v1  ;;  %vm19306_vm9 = vcmask 97352  }
 0x141   :  { %1077 = vst.msk [vmem:[#allocation2 + $0x67] sm:$0x7f] %vm1064_vm11, %v921_v41 }
 0x142   :  { %1076 = vst.msk [vmem:[#allocation2 + $0x5f] sm:$0xfe] %vm1062_vm12, %v919_v42  ;;  %v3232_v47 = vrot.slane %v3218_v15, %v13114_v6  ;;  %480 = vrot.lane.b32.xlu1 %v13064_v49, %s12714_s15 }
 0x143   :  { %478 = vrot.lane.b32.xlu0 %v13075_v50, %s12714_s15 }
 0x144   :  { %v3233_v13 = vcombine.low %v3225_v44, %v3232_v47  ;;  %v1147_v49 = vpop.permute.xlu1 %1146  ;;  %v1145_v50 = vpop.permute.xlu0 %1144 }
 0x145   :  { %1303 = vst.msk [vmem:[#allocation2 + $0x66] sm:$0xff] %vm1290_vm13, %v1147_v49  ;;  %v13589_v49 = vld [vmem:[%s19047_s0 + $0x138] sm:$0xff] }
 0x146   :  { %1302 = vst.msk [vmem:[#allocation2 + $0x5e] sm:$0xfc] %vm1288_vm14, %v1145_v50  ;;  %v3950_v52 = vpack.c.bf16 %v3233_v13, %v3216_v12  ;;  %1840 = vrot.lane.b32.xlu1 %v13119_v7, %s12721_s25  ;;  %v13594_v50 = vld [vmem:[%s19047_s0 + $0x130] sm:$0xff] }
 0x147   :  { %1838 = vrot.lane.b32.xlu0 %v13130_v9, %s12721_s25 }
 0x148   :  { %12307 = vmatmul.mubr.msk.bf16.gmra.mrb[16].mxu0 %vm3995_vm6, %v3950_v52  ;;  %v1377_v53 = vpop.permute.xlu1 %1376  ;;  %v1375_v27 = vpop.permute.xlu0 %1374 }
 0x149   :  { %12310 = vmatprep.mubr.msk.bf16.mxu0 %vm19274_vm8, %v19067_v17  ;;  %1533 = vst.msk [vmem:[#allocation2 + $0x68] sm:$0x3f] %vm1520_vm15, %v1377_v53 }
 0x14a   :  { %1532 = vst.msk [vmem:[#allocation2 + $0x60] sm:$0xff] %vm1518_vm2, %v1375_v27  ;;  %710 = vrot.lane.b32.xlu1 %v13119_v7, %s12716_s14 }
 0x14b   :  { %708 = vrot.lane.b32.xlu0 %v13130_v9, %s12716_s14 }
 0x14c   :  { %v1603_v55 = vpop.permute.xlu1 %1602  ;;  %v1601_v56 = vpop.permute.xlu0 %1600 }
 0x14d   :  { %1759 = vst.msk [vmem:[#allocation2 + $0x67] sm:$0x7f] %vm1746_vm3, %v1603_v55 }
 0x14e   :  { %1758 = vst.msk [vmem:[#allocation2 + $0x5f] sm:$0xfe] %vm1744_vm4, %v1601_v56  ;;  %936 = vrot.lane.b32.xlu1 %v13119_v7, %s12717_s17 }
 0x14f   :  { %934 = vrot.lane.b32.xlu0 %v13130_v9, %s12717_s17 }
 0x150   :  { %v1829_v57 = vpop.permute.xlu1 %1828  ;;  %v1827_v58 = vpop.permute.xlu0 %1826 }
 0x151   :  { %1985 = vst.msk [vmem:[#allocation2 + $0x66] sm:$0xff] %vm19301_vm0, %v1829_v57  ;;  %vm19303_vm0 = vcmask 72752  }
 0x152   :  { %1984 = vst.msk [vmem:[#allocation2 + $0x5e] sm:$0xfc] %vm19302_vm1, %v1827_v58  ;;  %1162 = vrot.lane.b32.xlu1 %v13119_v7, %s12718_s22  ;;  %vm19304_vm1 = vcmask 72754  }
 0x153   :  { %1160 = vrot.lane.b32.xlu0 %v13130_v9, %s12718_s22 }
 0x154   :  { %v243_v59 = vpop.permute.xlu1 %242  ;;  %v241_v60 = vpop.permute.xlu0 %240 }
 0x155   :  { %397 = vst.msk [vmem:[#allocation2 + $0x77] sm:$0x7f] %vm382_vm7, %v243_v59 }
 0x156   :  { %396 = vst.msk [vmem:[#allocation2 + $0x6f] sm:$0xfe] %vm380_vm5, %v241_v60  ;;  %1392 = vrot.lane.b32.xlu1 %v13198_v62, %s12719_s23 }
 0x157   :  { %1390 = vrot.lane.b32.xlu0 %v13209_v63, %s12719_s23 }
 0x158   :  { %v469_v3 = vpop.permute.xlu1 %468  ;;  %v13520_v8 = vld [vmem:[#allocation2 + $0x68] sm:$0x3f] }
 0x159   :  { %v467_v4 = vpop.permute.xlu0 %466  ;;  %v2040_v5 = vld [vmem:[#allocation2 + $0x60] sm:$0xff]  ;;  %623 = vst.msk [vmem:[#allocation2 + $0x76] sm:$0xff] %vm19303_vm0, %v469_v3  ;;  %v2362_v19 = vrot.slane %v13520_v8, %v13114_v6  ;;  %vm19307_vm0 = vcmask 220352   ;;  %v2355_v13 = vcombine.high %v13520_v8, %v13520_v8 }
 0x15a   :  { %622 = vst.msk [vmem:[#allocation2 + $0x6e] sm:$0xfc] %vm19304_vm1, %v467_v4  ;;  %v2338_v16 = vcombine.high %v2040_v5, %v2040_v5  ;;  %v2345_v18 = vrot.slane %v2040_v5, %v13114_v6  ;;  %1618 = vrot.lane.b32.xlu1 %v13198_v62, %s12720_s24  ;;  %vm19308_vm1 = vcmask 220354  }
 0x15b   :  { %1616 = vrot.lane.b32.xlu0 %v13209_v63, %s12720_s24  ;;  %v2370_v22 = vcombine.high %v2362_v19, %v2362_v19  ;;  %v2369_v60 = vrot.slane %v2355_v13, %v13114_v6 }
 0x15c   :  { %v2352_v20 = vrot.slane %v2338_v16, %v13114_v6  ;;  %v2353_v21 = vcombine.high %v2345_v18, %v2345_v18  ;;  %v699_v25 = vpop.permute.xlu1 %698 }
 0x15d   :  { %v697_v26 = vpop.permute.xlu0 %696  ;;  %853 = vst.msk [vmem:[#allocation2 + $0x78] sm:$0x3f] %vm19305_vm10, %v699_v25  ;;  %v3252_v30 = vcombine.low %v2362_v19, %v2370_v22  ;;  %vm19309_vm10 = vcmask 21504  }
 0x15e   :  { %852 = vst.msk [vmem:[#allocation2 + $0x70] sm:$0xff] %vm19306_vm9, %v697_v26  ;;  %v2354_v29 = vcombine.high %v2352_v20, %v2352_v20  ;;  %v3235_v24 = vcombine.low %v2345_v18, %v2353_v21  ;;  %1844 = vrot.lane.b32.xlu1 %v13198_v62, %s12721_s25  ;;  %vm19310_vm9 = vcmask 23552  }
 0x15f   :  { %1842 = vrot.lane.b32.xlu0 %v13209_v63, %s12721_s25  ;;  %v3266_v37 = vrot.slane %v3252_v30, %v13114_v6  ;;  %135 = vst.msk [vmem:[#allocation2 + $0x118] sm:$0x3f] %vm19309_vm10, %v13589_v49  ;;  %vm19313_vm10 = vcmask 95304  }
 0x160   :  { %v3249_v31 = vrot.slane %v3235_v24, %v13114_v6  ;;  %v3251_v32 = vcombine.low %v2352_v20, %v2354_v29  ;;  %v925_v33 = vpop.permute.xlu1 %924  ;;  %134 = vst.msk [vmem:[#allocation2 + $0x110] sm:$0xff] %vm19310_vm9, %v13594_v50  ;;  %vm19314_vm9 = vcmask 97352  }
 0x161   :  { %v923_v34 = vpop.permute.xlu0 %922  ;;  %1079 = vst.msk [vmem:[#allocation2 + $0x77] sm:$0x7f] %vm1064_vm11, %v925_v33 }
 0x162   :  { %1078 = vst.msk [vmem:[#allocation2 + $0x6f] sm:$0xfe] %vm1062_vm12, %v923_v34  ;;  %v3259_v36 = vrot.slane %v3251_v32, %v13114_v6  ;;  %258 = vrot.lane.b32.xlu1 %v13119_v7, %s12715_s16  ;;  %v3250_v38 = vcombine.low %v3242_v35, %v3249_v31 }
 0x163   :  { %256 = vrot.lane.b32.xlu0 %v13130_v9, %s12715_s16 }
 0x164   :  { %v3267_v39 = vcombine.low %v3259_v36, %v3266_v37  ;;  %v1151_v40 = vpop.permute.xlu1 %1150 }
 0x165   :  { %v1149_v14 = vpop.permute.xlu0 %1148  ;;  %1305 = vst.msk [vmem:[#allocation2 + $0x76] sm:$0xff] %vm1290_vm13, %v1151_v40 }
 0x166   :  { %1304 = vst.msk [vmem:[#allocation2 + $0x6e] sm:$0xfc] %vm1288_vm14, %v1149_v14  ;;  %v3951_v15 = vpack.c.bf16 %v3267_v39, %v3250_v38  ;;  %484 = vrot.lane.b32.xlu1 %v13119_v7, %s12714_s15  ;;  %v63_v38 = vld [vmem:[%s19047_s0 + $0xe8] sm:$0xff]  ;;  %v62_v39 = vld [vmem:[%s19047_s0 + $0xe0] sm:$0xff] }
 0x167   :  { %482 = vrot.lane.b32.xlu0 %v13130_v9, %s12714_s15 }
 0x168   :  { %12311 = vmatmul.mubr.msk.bf16.gmra.mrb[20].mxu0 %vm3995_vm6, %v3951_v15  ;;  %v1381_v41 = vpop.permute.xlu1 %1380 }
 0x169   :  { %v1379_v42 = vpop.permute.xlu0 %1378  ;;  %12314 = vmatprep.mubr.msk.bf16.mxu0 %vm19274_vm8, %v19067_v17  ;;  %1535 = vst.msk [vmem:[#allocation2 + $0x78] sm:$0x3f] %vm1520_vm15, %v1381_v41 }
 0x16a   :  { %1534 = vst.msk [vmem:[#allocation2 + $0x70] sm:$0xff] %vm1518_vm2, %v1379_v42  ;;  %714 = vrot.lane.b32.xlu1 %v13198_v62, %s12716_s14 }
 0x16b   :  { %712 = vrot.lane.b32.xlu0 %v13209_v63, %s12716_s14 }
 0x16c   :  { %v1607_v7 = vpop.permute.xlu1 %1606 }
 0x16d   :  { %v1605_v43 = vpop.permute.xlu0 %1604  ;;  %1761 = vst.msk [vmem:[#allocation2 + $0x77] sm:$0x7f] %vm1746_vm3, %v1607_v7 }
 0x16e   :  { %1760 = vst.msk [vmem:[#allocation2 + $0x6f] sm:$0xfe] %vm1744_vm4, %v1605_v43  ;;  %940 = vrot.lane.b32.xlu1 %v13198_v62, %s12717_s17 }
 0x16f   :  { %938 = vrot.lane.b32.xlu0 %v13209_v63, %s12717_s17 }
 0x170   :  { %v1833_v9 = vpop.permute.xlu1 %1832 }
 0x171   :  { %v1831_v44 = vpop.permute.xlu0 %1830  ;;  %1987 = vst.msk [vmem:[#allocation2 + $0x76] sm:$0xff] %vm19307_vm0, %v1833_v9  ;;  %vm19311_vm0 = vcmask 72752   ;;  %v13677_v9 = vld [vmem:[%s19047_s0 + $0x148] sm:$0xff] }
 0x172   :  { %1986 = vst.msk [vmem:[#allocation2 + $0x6e] sm:$0xfc] %vm19308_vm1, %v1831_v44  ;;  %1166 = vrot.lane.b32.xlu1 %v13198_v62, %s12718_s22  ;;  %vm19312_vm1 = vcmask 72754   ;;  %v13682_v44 = vld [vmem:[%s19047_s0 + $0x140] sm:$0xff] }
 0x173   :  { %1164 = vrot.lane.b32.xlu0 %v13209_v63, %s12718_s22 }
 0x174   :  { %v247_v47 = vpop.permute.xlu1 %246 }
 0x175   :  { %v245_v12 = vpop.permute.xlu0 %244  ;;  %399 = vst.msk [vmem:[#allocation2 + $0x87] sm:$0x7f] %vm382_vm7, %v247_v47 }
 0x176   :  { %398 = vst.msk [vmem:[#allocation2 + $0x7f] sm:$0xfe] %vm380_vm5, %v245_v12  ;;  %1396 = vrot.lane.b32.xlu1 %v13276_v45, %s12719_s23 }
 0x177   :  { %1394 = vrot.lane.b32.xlu0 %v13287_v46, %s12719_s23 }
 0x178   :  { %v473_v52 = vpop.permute.xlu1 %472  ;;  %v2043_v55 = vld [vmem:[#allocation2 + $0x78] sm:$0x3f] }
 0x179   :  { %v471_v53 = vpop.permute.xlu0 %470  ;;  %v2042_v27 = vld [vmem:[#allocation2 + $0x70] sm:$0xff]  ;;  %625 = vst.msk [vmem:[#allocation2 + $0x86] sm:$0xff] %vm19311_vm0, %v473_v52  ;;  %v2388_v58 = vcombine.high %v2043_v55, %v2043_v55  ;;  %v2395_v59 = vrot.slane %v2043_v55, %v13114_v6 }
 0x17a   :  { %624 = vst.msk [vmem:[#allocation2 + $0x7e] sm:$0xfc] %vm19312_vm1, %v471_v53  ;;  %v2371_v56 = vcombine.high %v2042_v27, %v2042_v27  ;;  %v2378_v57 = vrot.slane %v2042_v27, %v13114_v6  ;;  %262 = vrot.lane.b32.xlu1 %v13198_v62, %s12715_s16 }
 0x17b   :  { %260 = vrot.lane.b32.xlu0 %v13209_v63, %s12715_s16  ;;  %v2402_v4 = vrot.slane %v2388_v58, %v13114_v6  ;;  %v2403_v5 = vcombine.high %v2395_v59, %v2395_v59 }
 0x17c   :  { %v2385_v61 = vrot.slane %v2371_v56, %v13114_v6  ;;  %v2386_v3 = vcombine.high %v2378_v57, %v2378_v57  ;;  %v703_v8 = vpop.permute.xlu1 %702  ;;  %v3268_v16 = vcombine.low %v2369_v60, %v2378_v57 }
 0x17d   :  { %v701_v10 = vpop.permute.xlu0 %700  ;;  %855 = vst.msk [vmem:[#allocation2 + $0x88] sm:$0x3f] %vm19313_vm10, %v703_v8  ;;  %v3286_v19 = vcombine.low %v2403_v5, %v2402_v4 }
 0x17e   :  { %854 = vst.msk [vmem:[#allocation2 + $0x80] sm:$0xff] %vm19314_vm9, %v701_v10  ;;  %v2387_v11 = vcombine.high %v2385_v61, %v2385_v61  ;;  %v3269_v18 = vcombine.low %v2386_v3, %v2385_v61  ;;  %1622 = vrot.lane.b32.xlu1 %v13276_v45, %s12720_s24  ;;  %v3276_v26 = vrot.slane %v3268_v16, %v13114_v6  ;;  %v65_v61 = vld [vmem:[%s19047_s0 + $0xf8] sm:$0xff]  ;;  %v64_v3 = vld [vmem:[%s19047_s0 + $0xf0] sm:$0xff] }
 0x17f   :  { %1620 = vrot.lane.b32.xlu0 %v13287_v46, %s12720_s24  ;;  %v3300_v23 = vrot.slane %v3286_v19, %v13114_v6  ;;  %v13732_v16 = vld [vmem:[%s19047_s0 + $0x150] sm:$0xff] }
 0x180   :  { %v3283_v20 = vrot.slane %v3269_v18, %v13114_v6  ;;  %v3285_v21 = vcombine.low %v2387_v11, %v2395_v59  ;;  %v929_v22 = vpop.permute.xlu1 %928  ;;  %v13727_v11 = vld [vmem:[%s19047_s0 + $0x158] sm:$0xff] }
 0x181   :  { %v927_v25 = vpop.permute.xlu0 %926  ;;  %1081 = vst.msk [vmem:[#allocation2 + $0x87] sm:$0x7f] %vm1064_vm11, %v929_v22 }
 0x182   :  { %1080 = vst.msk [vmem:[#allocation2 + $0x7f] sm:$0xfe] %vm1062_vm12, %v927_v25  ;;  %v3293_v29 = vrot.slane %v3285_v21, %v13114_v6  ;;  %488 = vrot.lane.b32.xlu1 %v13198_v62, %s12714_s15  ;;  %v3284_v24 = vcombine.low %v3276_v26, %v3283_v20 }
 0x183   :  { %486 = vrot.lane.b32.xlu0 %v13209_v63, %s12714_s15 }
 0x184   :  { %v3301_v30 = vcombine.low %v3293_v29, %v3300_v23  ;;  %v251_v31 = vpop.permute.xlu1 %250 }
 0x185   :  { %v249_v32 = vpop.permute.xlu0 %248  ;;  %401 = vst.msk [vmem:[#allocation2 + $0x97] sm:$0x7f] %vm382_vm7, %v251_v31 }
 0x186   :  { %400 = vst.msk [vmem:[#allocation2 + $0x8f] sm:$0xfe] %vm380_vm5, %v249_v32  ;;  %v3952_v33 = vpack.c.bf16 %v3301_v30, %v3284_v24  ;;  %1848 = vrot.lane.b32.xlu1 %v13276_v45, %s12721_s25 }
 0x187   :  { %1846 = vrot.lane.b32.xlu0 %v13287_v46, %s12721_s25 }
 0x188   :  { %12315 = vmatmul.mubr.msk.bf16.gmra.mrb[24].mxu0 %vm3995_vm6, %v3952_v33  ;;  %v1155_v62 = vpop.permute.xlu1 %1154 }
 0x189   :  { %v1153_v34 = vpop.permute.xlu0 %1152  ;;  %12318 = vmatprep.mubr.msk.bf16.mxu0 %vm19274_vm8, %v19067_v17  ;;  %1307 = vst.msk [vmem:[#allocation2 + $0x86] sm:$0xff] %vm1290_vm13, %v1155_v62 }
 0x18a   :  { %1306 = vst.msk [vmem:[#allocation2 + $0x7e] sm:$0xfc] %vm1288_vm14, %v1153_v34  ;;  %718 = vrot.lane.b32.xlu1 %v13276_v45, %s12716_s14 }
 0x18b   :  { %716 = vrot.lane.b32.xlu0 %v13287_v46, %s12716_s14 }
 0x18c   :  { %v477_v63 = vpop.permute.xlu1 %476 }
 0x18d   :  { %v475_v35 = vpop.permute.xlu0 %474  ;;  %627 = vst.msk [vmem:[#allocation2 + $0x96] sm:$0xff] %vm19311_vm0, %v477_v63  ;;  %vm19315_vm0 = vcmask 21504  }
 0x18e   :  { %626 = vst.msk [vmem:[#allocation2 + $0x8e] sm:$0xfc] %vm19312_vm1, %v475_v35  ;;  %944 = vrot.lane.b32.xlu1 %v13276_v45, %s12717_s17  ;;  %vm19316_vm1 = vcmask 23552  }
 0x18f   :  { %942 = vrot.lane.b32.xlu0 %v13287_v46, %s12717_s17  ;;  %137 = vst.msk [vmem:[#allocation2 + $0x128] sm:$0x3f] %vm19315_vm0, %v13677_v9  ;;  %vm19319_vm0 = vcmask 72752  }
 0x190   :  { %v1385_v36 = vpop.permute.xlu1 %1384  ;;  %136 = vst.msk [vmem:[#allocation2 + $0x120] sm:$0xff] %vm19316_vm1, %v13682_v44  ;;  %vm19320_vm1 = vcmask 72754  }
 0x191   :  { %v1383_v37 = vpop.permute.xlu0 %1382  ;;  %1537 = vst.msk [vmem:[#allocation2 + $0x88] sm:$0x3f] %vm1520_vm15, %v1385_v36 }
 0x192   :  { %1536 = vst.msk [vmem:[#allocation2 + $0x80] sm:$0xff] %vm1518_vm2, %v1383_v37  ;;  %1170 = vrot.lane.b32.xlu1 %v13276_v45, %s12718_s22 }
 0x193   :  { %1168 = vrot.lane.b32.xlu0 %v13287_v46, %s12718_s22 }
 0x194   :  { %v707_v40 = vpop.permute.xlu1 %706 }
 0x195   :  { %v705_v14 = vpop.permute.xlu0 %704  ;;  %857 = vst.msk [vmem:[#allocation2 + $0x98] sm:$0x3f] %vm19313_vm10, %v707_v40  ;;  %vm19317_vm10 = vcmask 220352  }
 0x196   :  { %856 = vst.msk [vmem:[#allocation2 + $0x90] sm:$0xff] %vm19314_vm9, %v705_v14  ;;  %1400 = vrot.lane.b32.xlu1 %v63_v38, %s12719_s23  ;;  %vm19318_vm9 = vcmask 220354  }
 0x197   :  { %1398 = vrot.lane.b32.xlu0 %v62_v39, %s12719_s23 }
 0x198   :  { %v1611_v15 = vpop.permute.xlu1 %1610 }
 0x199   :  { %v1609_v41 = vpop.permute.xlu0 %1608  ;;  %1763 = vst.msk [vmem:[#allocation2 + $0x87] sm:$0x7f] %vm1746_vm3, %v1611_v15 }
 0x19a   :  { %1762 = vst.msk [vmem:[#allocation2 + $0x7f] sm:$0xfe] %vm1744_vm4, %v1609_v41  ;;  %1626 = vrot.lane.b32.xlu1 %v63_v38, %s12720_s24 }
 0x19b   :  { %1624 = vrot.lane.b32.xlu0 %v62_v39, %s12720_s24 }
 0x19c   :  { %v933_v42 = vpop.permute.xlu1 %932 }
 0x19d   :  { %v931_v7 = vpop.permute.xlu0 %930  ;;  %1083 = vst.msk [vmem:[#allocation2 + $0x97] sm:$0x7f] %vm1064_vm11, %v933_v42 }
 0x19e   :  { %1082 = vst.msk [vmem:[#allocation2 + $0x8f] sm:$0xfe] %vm1062_vm12, %v931_v7  ;;  %1852 = vrot.lane.b32.xlu1 %v63_v38, %s12721_s25 }
 0x19f   :  { %1850 = vrot.lane.b32.xlu0 %v62_v39, %s12721_s25  ;;  %v13672_v43 = vpop.f32.mrb[0].mxu0 }
 0x1a0   :  { %v12292_v47 = vpop.f32.mrb[1].mxu0  ;;  %v1837_v12 = vpop.permute.xlu1 %1836 }
 0x1a1   :  { %v1835_v13 = vpop.permute.xlu0 %1834  ;;  %1989 = vst.msk [vmem:[#allocation2 + $0x86] sm:$0xff] %vm19317_vm10, %v1837_v12  ;;  %v13690_v52 = vpop.f32.mrb[2].mxu0  ;;  %vm19321_vm10 = vcmask 21504  }
 0x1a2   :  { %1988 = vst.msk [vmem:[#allocation2 + $0x7e] sm:$0xfc] %vm19318_vm9, %v1835_v13  ;;  %v12293_v53 = vpop.f32.mrb[3].mxu0  ;;  %266 = vrot.lane.b32.xlu1 %v13276_v45, %s12715_s16  ;;  %vm19322_vm9 = vcmask 23552  }
 0x1a3   :  { %264 = vrot.lane.b32.xlu0 %v13287_v46, %s12715_s16  ;;  %139 = vst.msk [vmem:[#allocation2 + $0x138] sm:$0x3f] %vm19321_vm10, %v13727_v11  ;;  %vm19325_vm10 = vcmask 95304  }
 0x1a4   :  { %v1159_v27 = vpop.permute.xlu1 %1158  ;;  %138 = vst.msk [vmem:[#allocation2 + $0x130] sm:$0xff] %vm19322_vm9, %v13732_v16  ;;  %vm19326_vm9 = vcmask 97352  }
 0x1a5   :  { %v1157_v55 = vpop.permute.xlu0 %1156  ;;  %1309 = vst.msk [vmem:[#allocation2 + $0x96] sm:$0xff] %vm1290_vm13, %v1159_v27 }
 0x1a6   :  { %1308 = vst.msk [vmem:[#allocation2 + $0x8e] sm:$0xfc] %vm1288_vm14, %v1157_v55  ;;  %492 = vrot.lane.b32.xlu1 %v13276_v45, %s12714_s15 }
 0x1a7   :  { %490 = vrot.lane.b32.xlu0 %v13287_v46, %s12714_s15 }
 0x1a8   :  { %v1389_v56 = vpop.permute.xlu1 %1388  ;;  %v2045_v10 = vld [vmem:[#allocation2 + $0x88] sm:$0x3f] }
 0x1a9   :  { %v1387_v57 = vpop.permute.xlu0 %1386  ;;  %1539 = vst.msk [vmem:[#allocation2 + $0x98] sm:$0x3f] %vm1520_vm15, %v1389_v56  ;;  %v2044_v60 = vld [vmem:[#allocation2 + $0x80] sm:$0xff]  ;;  %v2428_v25 = vrot.slane %v2045_v10, %v13114_v6  ;;  %v2421_v33 = vcombine.high %v2045_v10, %v2045_v10 }
 0x1aa   :  { %1538 = vst.msk [vmem:[#allocation2 + $0x90] sm:$0xff] %vm1518_vm2, %v1387_v57  ;;  %722 = vrot.lane.b32.xlu1 %v63_v38, %s12716_s14  ;;  %v2404_v4 = vcombine.high %v2044_v60, %v2044_v60  ;;  %v2411_v22 = vrot.slane %v2044_v60, %v13114_v6  ;;  %v13811_v10 = vld [vmem:[%s19047_s0 + $0x160] sm:$0xff] }
 0x1ab   :  { %720 = vrot.lane.b32.xlu0 %v62_v39, %s12716_s14  ;;  %v2436_v62 = vcombine.high %v2428_v25, %v2428_v25  ;;  %v2435_v37 = vrot.slane %v2421_v33, %v13114_v6 }
 0x1ac   :  { %v255_v58 = vpop.permute.xlu1 %254  ;;  %v2418_v18 = vrot.slane %v2404_v4, %v13114_v6  ;;  %v2419_v32 = vcombine.high %v2411_v22, %v2411_v22 }
 0x1ad   :  { %v253_v59 = vpop.permute.xlu0 %252  ;;  %403 = vst.msk [vmem:[#allocation2 + $0xa7] sm:$0x7f] %vm382_vm7, %v255_v58  ;;  %v3319_v40 = vcombine.low %v2428_v25, %v2436_v62 }
 0x1ae   :  { %402 = vst.msk [vmem:[#allocation2 + $0x9f] sm:$0xfe] %vm380_vm5, %v253_v59  ;;  %948 = vrot.lane.b32.xlu1 %v63_v38, %s12717_s17  ;;  %v2420_v23 = vcombine.high %v2418_v18, %v2418_v18 }
 0x1af   :  { %946 = vrot.lane.b32.xlu0 %v62_v39, %s12717_s17  ;;  %v3327_v47 = vrot.slane %v3319_v40, %v13114_v6 }
 0x1b0   :  { %v1615_v45 = vpop.permute.xlu1 %1614  ;;  %v3303_v34 = vcombine.low %v2418_v18, %v2420_v23 }
 0x1b1   :  { %v1613_v46 = vpop.permute.xlu0 %1612  ;;  %1765 = vst.msk [vmem:[#allocation2 + $0x97] sm:$0x7f] %vm1746_vm3, %v1615_v45 }
 0x1b2   :  { %1764 = vst.msk [vmem:[#allocation2 + $0x8f] sm:$0xfe] %vm1744_vm4, %v1613_v46  ;;  %1174 = vrot.lane.b32.xlu1 %v63_v38, %s12718_s22  ;;  %v3317_v14 = vrot.slane %v3303_v34, %v13114_v6 }
 0x1b3   :  { %1172 = vrot.lane.b32.xlu0 %v62_v39, %s12718_s22  ;;  %v3302_v39 = vcombine.low %v2411_v22, %v2419_v32 }
 0x1b4   :  { %v481_v5 = vpop.permute.xlu1 %480 }
 0x1b5   :  { %v479_v8 = vpop.permute.xlu0 %478  ;;  %629 = vst.msk [vmem:[#allocation2 + $0xa6] sm:$0xff] %vm19319_vm0, %v481_v5  ;;  %vm19323_vm0 = vcmask 220352   ;;  %v3310_v7 = vrot.slane %v3302_v39, %v13114_v6 }
 0x1b6   :  { %628 = vst.msk [vmem:[#allocation2 + $0x9e] sm:$0xfc] %vm19320_vm1, %v479_v8  ;;  %1404 = vrot.lane.b32.xlu1 %v65_v61, %s12719_s23  ;;  %vm19324_vm1 = vcmask 220354   ;;  %v13806_v8 = vld [vmem:[%s19047_s0 + $0x168] sm:$0xff] }
 0x1b7   :  { %1402 = vrot.lane.b32.xlu0 %v64_v3, %s12719_s23  ;;  %v3318_v13 = vcombine.low %v3310_v7, %v3317_v14 }
 0x1b8   :  { %v1841_v19 = vpop.permute.xlu1 %1840 }
 0x1b9   :  { %v1839_v20 = vpop.permute.xlu0 %1838  ;;  %1991 = vst.msk [vmem:[#allocation2 + $0x96] sm:$0xff] %vm19323_vm0, %v1841_v19  ;;  %v13741_v21 = vpop.f32.mrb[4].mxu0 }
 0x1ba   :  { %1990 = vst.msk [vmem:[#allocation2 + $0x8e] sm:$0xfc] %vm19324_vm1, %v1839_v20  ;;  %v12296_v26 = vpop.f32.mrb[5].mxu0  ;;  %1630 = vrot.lane.b32.xlu1 %v65_v61, %s12720_s24 }
 0x1bb   :  { %1628 = vrot.lane.b32.xlu0 %v64_v3, %s12720_s24  ;;  %v13747_v29 = vpop.f32.mrb[6].mxu0 }
 0x1bc   :  { %v12297_v24 = vpop.f32.mrb[7].mxu0  ;;  %v711_v30 = vpop.permute.xlu1 %710 }
 0x1bd   :  { %859 = vst.msk [vmem:[#allocation2 + $0xa8] sm:$0x3f] %vm19325_vm10, %v711_v30  ;;  %v709_v31 = vpop.permute.xlu0 %708  ;;  %vm19327_vm10 = vcmask 21504  }
 0x1be   :  { %858 = vst.msk [vmem:[#allocation2 + $0xa0] sm:$0xff] %vm19326_vm9, %v709_v31  ;;  %1856 = vrot.lane.b32.xlu1 %v65_v61, %s12721_s25  ;;  %vm19328_vm9 = vcmask 23552  }
 0x1bf   :  { %1854 = vrot.lane.b32.xlu0 %v64_v3, %s12721_s25  ;;  %141 = vst.msk [vmem:[#allocation2 + $0x148] sm:$0x3f] %vm19327_vm10, %v13806_v8  ;;  %vm19331_vm10 = vcmask 95304  }
 0x1c0   :  { %v937_v63 = vpop.permute.xlu1 %936  ;;  %v2047_v45 = vld [vmem:[#allocation2 + $0x98] sm:$0x3f]  ;;  %140 = vst.msk [vmem:[#allocation2 + $0x140] sm:$0xff] %vm19328_vm9, %v13811_v10  ;;  %vm19332_vm9 = vcmask 97352  }
 0x1c1   :  { %v2046_v35 = vld [vmem:[#allocation2 + $0x90] sm:$0xff]  ;;  %1085 = vst.msk [vmem:[#allocation2 + $0xa7] sm:$0x7f] %vm1064_vm11, %v937_v63  ;;  %v935_v36 = vpop.permute.xlu0 %934  ;;  %v2454_v61 = vcombine.high %v2047_v45, %v2047_v45  ;;  %v2461_v3 = vrot.slane %v2047_v45, %v13114_v6 }
 0x1c2   :  { %v13756_v38 = vrot.slane %v2046_v35, %v13114_v6  ;;  %1084 = vst.msk [vmem:[#allocation2 + $0x9f] sm:$0xfe] %vm1062_vm12, %v935_v36  ;;  %270 = vrot.lane.b32.xlu1 %v13446_v48, %s12715_s16  ;;  %v2437_v57 = vcombine.high %v2046_v35, %v2046_v35 }
 0x1c3   :  { %268 = vrot.lane.b32.xlu0 %v13451_v51, %s12715_s16  ;;  %v2468_v20 = vrot.slane %v2454_v61, %v13114_v6  ;;  %v2469_v22 = vcombine.high %v2461_v3, %v2461_v3 }
 0x1c4   :  { %v3320_v15 = vcombine.low %v2435_v37, %v13756_v38  ;;  %v1163_v41 = vpop.permute.xlu1 %1162  ;;  %v2451_v46 = vrot.slane %v2437_v57, %v13114_v6  ;;  %v2452_v19 = vcombine.high %v13756_v38, %v13756_v38 }
 0x1c5   :  { %1311 = vst.msk [vmem:[#allocation2 + $0xa6] sm:$0xff] %vm1290_vm13, %v1163_v41  ;;  %v1161_v42 = vpop.permute.xlu0 %1160  ;;  %v3353_v33 = vcombine.low %v2469_v22, %v2468_v20 }
 0x1c6   :  { %v3334_v12 = vrot.slane %v3320_v15, %v13114_v6  ;;  %1310 = vst.msk [vmem:[#allocation2 + $0x9e] sm:$0xfc] %vm1288_vm14, %v1161_v42  ;;  %496 = vrot.lane.b32.xlu1 %v13446_v48, %s12714_s15  ;;  %v2453_v5 = vcombine.high %v2451_v46, %v2451_v46  ;;  %v3336_v32 = vcombine.low %v2452_v19, %v2451_v46 }
 0x1c7   :  { %494 = vrot.lane.b32.xlu0 %v13451_v51, %s12714_s15  ;;  %v3361_v38 = vrot.slane %v3353_v33, %v13114_v6 }
 0x1c8   :  { %v3335_v53 = vcombine.low %v3327_v47, %v3334_v12  ;;  %v1393_v27 = vpop.permute.xlu1 %1392  ;;  %v3337_v24 = vcombine.low %v2453_v5, %v2461_v3  ;;  %v3344_v37 = vrot.slane %v3336_v32, %v13114_v6 }
 0x1c9   :  { %1541 = vst.msk [vmem:[#allocation2 + $0xa8] sm:$0x3f] %vm1520_vm15, %v1393_v27  ;;  %v1391_v55 = vpop.permute.xlu0 %1390 }
 0x1ca   :  { %v3953_v56 = vpack.c.bf16 %v3335_v53, %v3318_v13  ;;  %1540 = vst.msk [vmem:[#allocation2 + $0xa0] sm:$0xff] %vm1518_vm2, %v1391_v55  ;;  %726 = vrot.lane.b32.xlu1 %v13475_v28, %s12716_s14  ;;  %v3351_v34 = vrot.slane %v3337_v24, %v13114_v6 }
 0x1cb   :  { %724 = vrot.lane.b32.xlu0 %v13480_v54, %s12716_s14 }
 0x1cc   :  { %12319 = vmatmul.mubr.msk.bf16.gmra.mrb[28].mxu0 %vm3995_vm6, %v3953_v56  ;;  %v1619_v48 = vpop.permute.xlu1 %1618  ;;  %v3352_v41 = vcombine.low %v3344_v37, %v3351_v34 }
 0x1cd   :  { %12322 = vmatprep.mubr.msk.bf16.mxu0 %vm19274_vm8, %v19067_v17  ;;  %1767 = vst.msk [vmem:[#allocation2 + $0xa7] sm:$0x7f] %vm1746_vm3, %v1619_v48  ;;  %v1617_v51 = vpop.permute.xlu0 %1616 }
 0x1ce   :  { %1766 = vst.msk [vmem:[#allocation2 + $0x9f] sm:$0xfe] %vm1744_vm4, %v1617_v51  ;;  %952 = vrot.lane.b32.xlu1 %v13475_v28, %s12717_s17 }
 0x1cf   :  { %950 = vrot.lane.b32.xlu0 %v13480_v54, %s12717_s17 }
 0x1d0   :  { %v1845_v58 = vpop.permute.xlu1 %1844 }
 0x1d1   :  { %1993 = vst.msk [vmem:[#allocation2 + $0xa6] sm:$0xff] %vm19323_vm0, %v1845_v58  ;;  %v1843_v59 = vpop.permute.xlu0 %1842  ;;  %vm19329_vm0 = vcmask 72752   ;;  %v13886_v58 = vld [vmem:[%s19047_s0 + $0x178] sm:$0xff] }
 0x1d2   :  { %1992 = vst.msk [vmem:[#allocation2 + $0x9e] sm:$0xfc] %vm19324_vm1, %v1843_v59  ;;  %1178 = vrot.lane.b32.xlu1 %v13475_v28, %s12718_s22  ;;  %vm19330_vm1 = vcmask 72754   ;;  %v13891_v59 = vld [vmem:[%s19047_s0 + $0x170] sm:$0xff] }
 0x1d3   :  { %1176 = vrot.lane.b32.xlu0 %v13480_v54, %s12718_s22 }
 0x1d4   :  { %v259_v60 = vpop.permute.xlu1 %258 }
 0x1d5   :  { %405 = vst.msk [vmem:[#allocation2 + $0xb7] sm:$0x7f] %vm382_vm7, %v259_v60  ;;  %v257_v4 = vpop.permute.xlu0 %256 }
 0x1d6   :  { %404 = vst.msk [vmem:[#allocation2 + $0xaf] sm:$0xfe] %vm380_vm5, %v257_v4  ;;  %1408 = vrot.lane.b32.xlu1 %v13509_v0, %s12719_s23 }
 0x1d7   :  { %1406 = vrot.lane.b32.xlu0 %v13514_v1, %s12719_s23 }
 0x1d8   :  { %v485_v18 = vpop.permute.xlu1 %484  ;;  %v2049_v60 = vld [vmem:[#allocation2 + $0xa8] sm:$0x3f] }
 0x1d9   :  { %631 = vst.msk [vmem:[#allocation2 + $0xb6] sm:$0xff] %vm19329_vm0, %v485_v18  ;;  %v483_v25 = vpop.permute.xlu0 %482  ;;  %v13821_v26 = vld [vmem:[#allocation2 + $0xa0] sm:$0xff]  ;;  %v2494_v19 = vrot.slane %v2049_v60, %v13114_v6 }
 0x1da   :  { %630 = vst.msk [vmem:[#allocation2 + $0xae] sm:$0xfc] %vm19330_vm1, %v483_v25  ;;  %1634 = vrot.lane.b32.xlu1 %v13509_v0, %s12720_s24  ;;  %v2477_v23 = vrot.slane %v13821_v26, %v13114_v6  ;;  %v2470_v57 = vcombine.high %v13821_v26, %v13821_v26  ;;  %v2487_v26 = vcombine.high %v2049_v60, %v2049_v60  ;;  %v13973_v60 = vld [vmem:[%s19047_s0 + $0x180] sm:$0xff] }
 0x1db   :  { %1632 = vrot.lane.b32.xlu0 %v13514_v1, %s12720_s24  ;;  %v2502_v24 = vcombine.high %v2494_v19, %v2494_v19 }
 0x1dc   :  { %v715_v30 = vpop.permute.xlu1 %714  ;;  %v2485_v31 = vcombine.high %v2477_v23, %v2477_v23  ;;  %v2484_v3 = vrot.slane %v2470_v57, %v13114_v6  ;;  %v2501_v32 = vrot.slane %v2487_v26, %v13114_v6 }
 0x1dd   :  { %861 = vst.msk [vmem:[#allocation2 + $0xb8] sm:$0x3f] %vm19331_vm10, %v715_v30  ;;  %v713_v62 = vpop.permute.xlu0 %712  ;;  %vm19333_vm10 = vcmask 21504  }
 0x1de   :  { %860 = vst.msk [vmem:[#allocation2 + $0xb0] sm:$0xff] %vm19332_vm9, %v713_v62  ;;  %1860 = vrot.lane.b32.xlu1 %v13509_v0, %s12721_s25  ;;  %v3354_v63 = vcombine.low %v2477_v23, %v2485_v31  ;;  %vm19334_vm9 = vcmask 23552   ;;  %v2486_v25 = vcombine.high %v2484_v3, %v2484_v3 }
 0x1df   :  { %1858 = vrot.lane.b32.xlu0 %v13514_v1, %s12721_s25  ;;  %143 = vst.msk [vmem:[#allocation2 + $0x158] sm:$0x3f] %vm19333_vm10, %v13886_v58  ;;  %vm19337_vm10 = vcmask 95304  }
 0x1e0   :  { %v941_v35 = vpop.permute.xlu1 %940  ;;  %v3368_v39 = vrot.slane %v3354_v63, %v13114_v6  ;;  %142 = vst.msk [vmem:[#allocation2 + $0x150] sm:$0xff] %vm19334_vm9, %v13891_v59  ;;  %vm19338_vm9 = vcmask 97352   ;;  %v3370_v34 = vcombine.low %v2484_v3, %v2486_v25 }
 0x1e1   :  { %v13837_v36 = vpop.f32.mrb[8].mxu0  ;;  %1087 = vst.msk [vmem:[#allocation2 + $0xb7] sm:$0x7f] %vm1064_vm11, %v941_v35  ;;  %v939_v40 = vpop.permute.xlu0 %938 }
 0x1e2   :  { %v12300_v14 = vpop.f32.mrb[9].mxu0  ;;  %1086 = vst.msk [vmem:[#allocation2 + $0xaf] sm:$0xfe] %vm1062_vm12, %v939_v40  ;;  %274 = vrot.lane.b32.xlu1 %v13475_v28, %s12715_s16  ;;  %v3369_v42 = vcombine.low %v3361_v38, %v3368_v39  ;;  %v3371_v38 = vcombine.low %v2494_v19, %v2502_v24 }
 0x1e3   :  { %272 = vrot.lane.b32.xlu0 %v13480_v54, %s12715_s16  ;;  %v13848_v15 = vpop.f32.mrb[10].mxu0  ;;  %v3378_v14 = vrot.slane %v3370_v34, %v13114_v6 }
 0x1e4   :  { %v12301_v7 = vpop.f32.mrb[11].mxu0  ;;  %v1167_v47 = vpop.permute.xlu1 %1166  ;;  %v3954_v12 = vpack.c.bf16 %v3369_v42, %v3352_v41 }
 0x1e5   :  { %1313 = vst.msk [vmem:[#allocation2 + $0xb6] sm:$0xff] %vm1290_vm13, %v1167_v47  ;;  %v1165_v13 = vpop.permute.xlu0 %1164  ;;  %v3385_v7 = vrot.slane %v3371_v38, %v13114_v6 }
 0x1e6   :  { %1312 = vst.msk [vmem:[#allocation2 + $0xae] sm:$0xfc] %vm1288_vm14, %v1165_v13  ;;  %12323 = vmatmul.mubr.msk.bf16.gmra.mrb[32].mxu0 %vm3995_vm6, %v3954_v12  ;;  %500 = vrot.lane.b32.xlu1 %v13475_v28, %s12714_s15 }
 0x1e7   :  { %498 = vrot.lane.b32.xlu0 %v13480_v54, %s12714_s15  ;;  %12326 = vmatprep.mubr.msk.bf16.mxu0 %vm19274_vm8, %v19067_v17 }
 0x1e8   :  { %v1397_v53 = vpop.permute.xlu1 %1396 }
 0x1e9   :  { %1543 = vst.msk [vmem:[#allocation2 + $0xb8] sm:$0x3f] %vm1520_vm15, %v1397_v53  ;;  %v1395_v27 = vpop.permute.xlu0 %1394 }
 0x1ea   :  { %1542 = vst.msk [vmem:[#allocation2 + $0xb0] sm:$0xff] %vm1518_vm2, %v1395_v27  ;;  %730 = vrot.lane.b32.xlu1 %v13509_v0, %s12716_s14 }
 0x1eb   :  { %728 = vrot.lane.b32.xlu0 %v13514_v1, %s12716_s14 }
 0x1ec   :  { %v263_v55 = vpop.permute.xlu1 %262 }
 0x1ed   :  { %407 = vst.msk [vmem:[#allocation2 + $0xc7] sm:$0x7f] %vm382_vm7, %v263_v55  ;;  %v261_v28 = vpop.permute.xlu0 %260 }
 0x1ee   :  { %406 = vst.msk [vmem:[#allocation2 + $0xbf] sm:$0xfe] %vm380_vm5, %v261_v28  ;;  %956 = vrot.lane.b32.xlu1 %v13509_v0, %s12717_s17 }
 0x1ef   :  { %954 = vrot.lane.b32.xlu0 %v13514_v1, %s12717_s17 }
 0x1f0   :  { %v1623_v54 = vpop.permute.xlu1 %1622 }
 0x1f1   :  { %1769 = vst.msk [vmem:[#allocation2 + $0xb7] sm:$0x7f] %vm1746_vm3, %v1623_v54  ;;  %v1621_v56 = vpop.permute.xlu0 %1620 }
 0x1f2   :  { %1768 = vst.msk [vmem:[#allocation2 + $0xaf] sm:$0xfe] %vm1744_vm4, %v1621_v56  ;;  %1182 = vrot.lane.b32.xlu1 %v13509_v0, %s12718_s22 }
 0x1f3   :  { %1180 = vrot.lane.b32.xlu0 %v13514_v1, %s12718_s22 }
 0x1f4   :  { %v489_v48 = vpop.permute.xlu1 %488 }
 0x1f5   :  { %633 = vst.msk [vmem:[#allocation2 + $0xc6] sm:$0xff] %vm19329_vm0, %v489_v48  ;;  %v487_v51 = vpop.permute.xlu0 %486  ;;  %vm19335_vm0 = vcmask 220352  }
 0x1f6   :  { %632 = vst.msk [vmem:[#allocation2 + $0xbe] sm:$0xfc] %vm19330_vm1, %v487_v51  ;;  %1412 = vrot.lane.b32.xlu1 %v13589_v49, %s12719_s23  ;;  %vm19336_vm1 = vcmask 220354  }
 0x1f7   :  { %1410 = vrot.lane.b32.xlu0 %v13594_v50, %s12719_s23 }
 0x1f8   :  { %v1849_v45 = vpop.permute.xlu1 %1848 }
 0x1f9   :  { %1995 = vst.msk [vmem:[#allocation2 + $0xb6] sm:$0xff] %vm19335_vm0, %v1849_v45  ;;  %v1847_v46 = vpop.permute.xlu0 %1846 }
 0x1fa   :  { %1994 = vst.msk [vmem:[#allocation2 + $0xae] sm:$0xfc] %vm19336_vm1, %v1847_v46  ;;  %1638 = vrot.lane.b32.xlu1 %v13589_v49, %s12720_s24  ;;  %v13968_v46 = vld [vmem:[%s19047_s0 + $0x188] sm:$0xff] }
 0x1fb   :  { %v13903_v61 = vpop.f32.mrb[12].mxu0  ;;  %1636 = vrot.lane.b32.xlu0 %v13594_v50, %s12720_s24 }
 0x1fc   :  { %v12304_v4 = vpop.f32.mrb[13].mxu0  ;;  %v719_v5 = vpop.permute.xlu1 %718 }
 0x1fd   :  { %v13908_v18 = vpop.f32.mrb[14].mxu0  ;;  %863 = vst.msk [vmem:[#allocation2 + $0xc8] sm:$0x3f] %vm19337_vm10, %v719_v5  ;;  %v717_v20 = vpop.permute.xlu0 %716  ;;  %vm19339_vm10 = vcmask 21504  }
 0x1fe   :  { %v12305_v22 = vpop.f32.mrb[15].mxu0  ;;  %862 = vst.msk [vmem:[#allocation2 + $0xc0] sm:$0xff] %vm19338_vm9, %v717_v20  ;;  %1864 = vrot.lane.b32.xlu1 %v13589_v49, %s12721_s25  ;;  %vm19340_vm9 = vcmask 23552  }
 0x1ff   :  { %1862 = vrot.lane.b32.xlu0 %v13594_v50, %s12721_s25  ;;  %145 = vst.msk [vmem:[#allocation2 + $0x168] sm:$0x3f] %vm19339_vm10, %v13968_v46  ;;  %vm19343_vm10 = vcmask 95304  }
 0x200   :  { %v945_v23 = vpop.permute.xlu1 %944  ;;  %v2051_v56 = vld [vmem:[#allocation2 + $0xb8] sm:$0x3f]  ;;  %144 = vst.msk [vmem:[#allocation2 + $0x160] sm:$0xff] %vm19340_vm9, %v13973_v60  ;;  %vm19344_vm9 = vcmask 97352  }
 0x201   :  { %1089 = vst.msk [vmem:[#allocation2 + $0xc7] sm:$0x7f] %vm1064_vm11, %v945_v23  ;;  %v943_v30 = vpop.permute.xlu0 %942  ;;  %v2050_v31 = vld [vmem:[#allocation2 + $0xb0] sm:$0xff]  ;;  %v2520_v57 = vcombine.high %v2051_v56, %v2051_v56  ;;  %v2527_v45 = vrot.slane %v2051_v56, %v13114_v6 }
 0x202   :  { %1088 = vst.msk [vmem:[#allocation2 + $0xbf] sm:$0xfe] %vm1062_vm12, %v943_v30  ;;  %278 = vrot.lane.b32.xlu1 %v13509_v0, %s12715_s16  ;;  %v2503_v33 = vcombine.high %v2050_v31, %v2050_v31  ;;  %v2510_v62 = vrot.slane %v2050_v31, %v13114_v6 }
 0x203   :  { %276 = vrot.lane.b32.xlu0 %v13514_v1, %s12715_s16  ;;  %v2534_v22 = vrot.slane %v2520_v57, %v13114_v6  ;;  %v2535_v25 = vcombine.high %v2527_v45, %v2527_v45 }
 0x204   :  { %v1171_v63 = vpop.permute.xlu1 %1170  ;;  %v13926_v35 = vrot.slane %v2503_v33, %v13114_v6  ;;  %v2518_v37 = vcombine.high %v2510_v62, %v2510_v62  ;;  %v3387_v39 = vcombine.low %v2501_v32, %v2510_v62 }
 0x205   :  { %1315 = vst.msk [vmem:[#allocation2 + $0xc6] sm:$0xff] %vm1290_vm13, %v1171_v63  ;;  %v1169_v40 = vpop.permute.xlu0 %1168 }
 0x206   :  { %1314 = vst.msk [vmem:[#allocation2 + $0xbe] sm:$0xfc] %vm1288_vm14, %v1169_v40  ;;  %504 = vrot.lane.b32.xlu1 %v13509_v0, %s12714_s15  ;;  %v3388_v41 = vcombine.low %v2518_v37, %v13926_v35  ;;  %v3395_v47 = vrot.slane %v3387_v39, %v13114_v6  ;;  %v3386_v0 = vcombine.low %v3378_v14, %v3385_v7 }
 0x207   :  { %502 = vrot.lane.b32.xlu0 %v13514_v1, %s12714_s15  ;;  %v2519_v4 = vcombine.high %v13926_v35, %v13926_v35  ;;  %v3405_v35 = vcombine.low %v2535_v25, %v2534_v22 }
 0x208   :  { %v1401_v42 = vpop.permute.xlu1 %1400  ;;  %v3402_v12 = vrot.slane %v3388_v41, %v13114_v6 }
 0x209   :  { %1545 = vst.msk [vmem:[#allocation2 + $0xc8] sm:$0x3f] %vm1520_vm15, %v1401_v42  ;;  %v1399_v13 = vpop.permute.xlu0 %1398  ;;  %v3404_v62 = vcombine.low %v2519_v4, %v2527_v45  ;;  %v3419_v14 = vrot.slane %v3405_v35, %v13114_v6  ;;  %v14052_v4 = vld [vmem:[%s19047_s0 + $0x190] sm:$0xff] }
 0x20a   :  { %1544 = vst.msk [vmem:[#allocation2 + $0xc0] sm:$0xff] %vm1518_vm2, %v1399_v13  ;;  %734 = vrot.lane.b32.xlu1 %v13589_v49, %s12716_s14  ;;  %v3403_v53 = vcombine.low %v3395_v47, %v3402_v12 }
 0x20b   :  { %732 = vrot.lane.b32.xlu0 %v13594_v50, %s12716_s14  ;;  %v3412_v38 = vrot.slane %v3404_v62, %v13114_v6 }
 0x20c   :  { %v1627_v1 = vpop.permute.xlu1 %1626  ;;  %v3955_v27 = vpack.c.bf16 %v3403_v53, %v3386_v0 }
 0x20d   :  { %1771 = vst.msk [vmem:[#allocation2 + $0xc7] sm:$0x7f] %vm1746_vm3, %v1627_v1  ;;  %v1625_v55 = vpop.permute.xlu0 %1624  ;;  %v3420_v47 = vcombine.low %v3412_v38, %v3419_v14 }
 0x20e   :  { %1770 = vst.msk [vmem:[#allocation2 + $0xbf] sm:$0xfe] %vm1744_vm4, %v1625_v55  ;;  %12327 = vmatmul.mubr.msk.bf16.gmra.mrb[36].mxu0 %vm3995_vm6, %v3955_v27  ;;  %960 = vrot.lane.b32.xlu1 %v13589_v49, %s12717_s17 }
 0x20f   :  { %958 = vrot.lane.b32.xlu0 %v13594_v50, %s12717_s17  ;;  %12330 = vmatprep.mubr.msk.bf16.mxu0 %vm19274_vm8, %v19067_v17 }
 0x210   :  { %v1853_v28 = vpop.permute.xlu1 %1852 }
 0x211   :  { %1997 = vst.msk [vmem:[#allocation2 + $0xc6] sm:$0xff] %vm19335_vm0, %v1853_v28  ;;  %v1851_v54 = vpop.permute.xlu0 %1850  ;;  %vm19341_vm0 = vcmask 72752  }
 0x212   :  { %1996 = vst.msk [vmem:[#allocation2 + $0xbe] sm:$0xfc] %vm19336_vm1, %v1851_v54  ;;  %282 = vrot.lane.b32.xlu1 %v13589_v49, %s12715_s16  ;;  %vm19342_vm1 = vcmask 72754  }
 0x213   :  { %280 = vrot.lane.b32.xlu0 %v13594_v50, %s12715_s16 }
 0x214   :  { %v267_v48 = vpop.permute.xlu1 %266 }
 0x215   :  { %409 = vst.msk [vmem:[#allocation2 + $0xd7] sm:$0x7f] %vm382_vm7, %v267_v48  ;;  %v265_v51 = vpop.permute.xlu0 %264 }
 0x216   :  { %408 = vst.msk [vmem:[#allocation2 + $0xcf] sm:$0xfe] %vm380_vm5, %v265_v51  ;;  %1186 = vrot.lane.b32.xlu1 %v13589_v49, %s12718_s22 }
 0x217   :  { %1184 = vrot.lane.b32.xlu0 %v13594_v50, %s12718_s22 }
 0x218   :  { %v493_v3 = vpop.permute.xlu1 %492  ;;  %v2053_v56 = vld [vmem:[#allocation2 + $0xc8] sm:$0x3f] }
 0x219   :  { %635 = vst.msk [vmem:[#allocation2 + $0xd6] sm:$0xff] %vm19341_vm0, %v493_v3  ;;  %v491_v5 = vpop.permute.xlu0 %490  ;;  %v2052_v19 = vld [vmem:[#allocation2 + $0xc0] sm:$0xff]  ;;  %vm19345_vm0 = vcmask 220352   ;;  %v2553_v57 = vcombine.high %v2053_v56, %v2053_v56  ;;  %v2560_v45 = vrot.slane %v2053_v56, %v13114_v6  ;;  %v14047_v3 = vld [vmem:[%s19047_s0 + $0x198] sm:$0xff] }
 0x21a   :  { %634 = vst.msk [vmem:[#allocation2 + $0xce] sm:$0xfc] %vm19342_vm1, %v491_v5  ;;  %508 = vrot.lane.b32.xlu1 %v13589_v49, %s12714_s15  ;;  %v2536_v26 = vcombine.high %v2052_v19, %v2052_v19  ;;  %v2543_v23 = vrot.slane %v2052_v19, %v13114_v6  ;;  %vm19346_vm1 = vcmask 220354  }
 0x21b   :  { %v13987_v20 = vpop.f32.mrb[16].mxu0  ;;  %506 = vrot.lane.b32.xlu0 %v13594_v50, %s12714_s15 }
 0x21c   :  { %v12308_v24 = vpop.f32.mrb[17].mxu0  ;;  %v723_v30 = vpop.permute.xlu1 %722  ;;  %v2550_v32 = vrot.slane %v2536_v26, %v13114_v6  ;;  %v2551_v33 = vcombine.high %v2543_v23, %v2543_v23  ;;  %v2567_v26 = vrot.slane %v2553_v57, %v13114_v6 }
 0x21d   :  { %v13993_v31 = vpop.f32.mrb[18].mxu0  ;;  %865 = vst.msk [vmem:[#allocation2 + $0xd8] sm:$0x3f] %vm19343_vm10, %v723_v30  ;;  %v721_v49 = vpop.permute.xlu0 %720  ;;  %vm19347_vm10 = vcmask 21504  }
 0x21e   :  { %v12309_v34 = vpop.f32.mrb[19].mxu0  ;;  %864 = vst.msk [vmem:[#allocation2 + $0xd0] sm:$0xff] %vm19344_vm9, %v721_v49  ;;  %1416 = vrot.lane.b32.xlu1 %v13677_v9, %s12719_s23  ;;  %v2552_v63 = vcombine.high %v2550_v32, %v2550_v32  ;;  %v3421_v50 = vcombine.low %v2543_v23, %v2551_v33  ;;  %vm19348_vm9 = vcmask 23552   ;;  %v2568_v23 = vcombine.high %v2560_v45, %v2560_v45 }
 0x21f   :  { %1414 = vrot.lane.b32.xlu0 %v13682_v44, %s12719_s23  ;;  %147 = vst.msk [vmem:[#allocation2 + $0x178] sm:$0x3f] %vm19347_vm10, %v14047_v3  ;;  %vm19351_vm10 = vcmask 95304  }
 0x220   :  { %v949_v37 = vpop.permute.xlu1 %948  ;;  %v3422_v39 = vcombine.low %v2550_v32, %v2552_v63  ;;  %v3429_v41 = vrot.slane %v3421_v50, %v13114_v6  ;;  %146 = vst.msk [vmem:[#allocation2 + $0x170] sm:$0xff] %vm19348_vm9, %v14052_v4  ;;  %vm19352_vm9 = vcmask 97352  }
 0x221   :  { %1091 = vst.msk [vmem:[#allocation2 + $0xd7] sm:$0x7f] %vm1064_vm11, %v949_v37  ;;  %v947_v40 = vpop.permute.xlu0 %946 }
 0x222   :  { %1090 = vst.msk [vmem:[#allocation2 + $0xcf] sm:$0xfe] %vm1062_vm12, %v947_v40  ;;  %738 = vrot.lane.b32.xlu1 %v13677_v9, %s12716_s14  ;;  %v3436_v42 = vrot.slane %v3422_v39, %v13114_v6  ;;  %v3438_v40 = vcombine.low %v2560_v45, %v2568_v23 }
 0x223   :  { %736 = vrot.lane.b32.xlu0 %v13682_v44, %s12716_s14 }
 0x224   :  { %v1175_v7 = vpop.permute.xlu1 %1174  ;;  %v3437_v12 = vcombine.low %v3429_v41, %v3436_v42 }
 0x225   :  { %1317 = vst.msk [vmem:[#allocation2 + $0xd6] sm:$0xff] %vm1290_vm13, %v1175_v7  ;;  %v1173_v13 = vpop.permute.xlu0 %1172 }
 0x226   :  { %1316 = vst.msk [vmem:[#allocation2 + $0xce] sm:$0xfc] %vm1288_vm14, %v1173_v13  ;;  %1642 = vrot.lane.b32.xlu1 %v13677_v9, %s12720_s24  ;;  %v3956_v0 = vpack.c.bf16 %v3437_v12, %v3420_v47  ;;  %v3446_v12 = vrot.slane %v3438_v40, %v13114_v6 }
 0x227   :  { %1640 = vrot.lane.b32.xlu0 %v13682_v44, %s12720_s24 }
 0x228   :  { %12331 = vmatmul.mubr.msk.bf16.gmra.mrb[40].mxu0 %vm3995_vm6, %v3956_v0  ;;  %v1405_v53 = vpop.permute.xlu1 %1404 }
 0x229   :  { %1547 = vst.msk [vmem:[#allocation2 + $0xd8] sm:$0x3f] %vm1520_vm15, %v1405_v53  ;;  %v1403_v1 = vpop.permute.xlu0 %1402  ;;  %12334 = vmatprep.mubr.msk.bf16.mxu0 %vm19274_vm8, %v19067_v17 }
 0x22a   :  { %1546 = vst.msk [vmem:[#allocation2 + $0xd0] sm:$0xff] %vm1518_vm2, %v1403_v1  ;;  %964 = vrot.lane.b32.xlu1 %v13677_v9, %s12717_s17 }
 0x22b   :  { %962 = vrot.lane.b32.xlu0 %v13682_v44, %s12717_s17 }
 0x22c   :  { %v1631_v27 = vpop.permute.xlu1 %1630 }
 0x22d   :  { %1773 = vst.msk [vmem:[#allocation2 + $0xd7] sm:$0x7f] %vm1746_vm3, %v1631_v27  ;;  %v1629_v55 = vpop.permute.xlu0 %1628 }
 0x22e   :  { %1772 = vst.msk [vmem:[#allocation2 + $0xcf] sm:$0xfe] %vm1744_vm4, %v1629_v55  ;;  %1868 = vrot.lane.b32.xlu1 %v13677_v9, %s12721_s25 }
 0x22f   :  { %1866 = vrot.lane.b32.xlu0 %v13682_v44, %s12721_s25 }
 0x230   :  { %v1857_v28 = vpop.permute.xlu1 %1856 }
 0x231   :  { %1999 = vst.msk [vmem:[#allocation2 + $0xd6] sm:$0xff] %vm19345_vm0, %v1857_v28  ;;  %v1855_v54 = vpop.permute.xlu0 %1854  ;;  %vm19349_vm0 = vcmask 72752  }
 0x232   :  { %1998 = vst.msk [vmem:[#allocation2 + $0xce] sm:$0xfc] %vm19346_vm1, %v1855_v54  ;;  %1190 = vrot.lane.b32.xlu1 %v13677_v9, %s12718_s22  ;;  %vm19350_vm1 = vcmask 72754  }
 0x233   :  { %1188 = vrot.lane.b32.xlu0 %v13682_v44, %s12718_s22 }
 0x234   :  { %v271_v48 = vpop.permute.xlu1 %270 }
 0x235   :  { %411 = vst.msk [vmem:[#allocation2 + $0xe7] sm:$0x7f] %vm382_vm7, %v271_v48  ;;  %v269_v51 = vpop.permute.xlu0 %268 }
 0x236   :  { %410 = vst.msk [vmem:[#allocation2 + $0xdf] sm:$0xfe] %vm380_vm5, %v269_v51  ;;  %1420 = vrot.lane.b32.xlu1 %v13727_v11, %s12719_s23 }
 0x237   :  { %1418 = vrot.lane.b32.xlu0 %v13732_v16, %s12719_s23 }
 0x238   :  { %v497_v5 = vpop.permute.xlu1 %496  ;;  %v14070_v33 = vld [vmem:[#allocation2 + $0xd8] sm:$0x3f] }
 0x239   :  { %637 = vst.msk [vmem:[#allocation2 + $0xe6] sm:$0xff] %vm19349_vm0, %v497_v5  ;;  %v495_v19 = vpop.permute.xlu0 %494  ;;  %v2054_v22 = vld [vmem:[#allocation2 + $0xd0] sm:$0xff]  ;;  %v14081_v39 = vrot.slane %v14070_v33, %v13114_v6  ;;  %vm19353_vm0 = vcmask 220352   ;;  %v2586_v5 = vcombine.high %v14070_v33, %v14070_v33 }
 0x23a   :  { %636 = vst.msk [vmem:[#allocation2 + $0xde] sm:$0xfc] %vm19350_vm1, %v495_v19  ;;  %286 = vrot.lane.b32.xlu1 %v13677_v9, %s12715_s16  ;;  %v2569_v24 = vcombine.high %v2054_v22, %v2054_v22  ;;  %v2576_v30 = vrot.slane %v2054_v22, %v13114_v6  ;;  %vm19354_vm1 = vcmask 220354   ;;  %v14132_v19 = vld [vmem:[%s19047_s0 + $0x1a8] sm:$0xff]  ;;  %v14137_v22 = vld [vmem:[%s19047_s0 + $0x1a0] sm:$0xff] }
 0x23b   :  { %v14064_v25 = vpop.f32.mrb[20].mxu0  ;;  %284 = vrot.lane.b32.xlu0 %v13682_v44, %s12715_s16 }
 0x23c   :  { %v12312_v32 = vpop.f32.mrb[21].mxu0  ;;  %v727_v62 = vpop.permute.xlu1 %726  ;;  %v2583_v34 = vrot.slane %v2569_v24, %v13114_v6  ;;  %v2584_v63 = vcombine.high %v2576_v30, %v2576_v30  ;;  %v3439_v35 = vcombine.low %v2567_v26, %v2576_v30 }
 0x23d   :  { %v14072_v49 = vpop.f32.mrb[22].mxu0  ;;  %867 = vst.msk [vmem:[#allocation2 + $0xe8] sm:$0x3f] %vm19351_vm10, %v727_v62  ;;  %v725_v50 = vpop.permute.xlu0 %724  ;;  %vm19355_vm10 = vcmask 21504   ;;  %v2600_v62 = vrot.slane %v2586_v5, %v13114_v6 }
 0x23e   :  { %v12313_v37 = vpop.f32.mrb[23].mxu0  ;;  %866 = vst.msk [vmem:[#allocation2 + $0xe0] sm:$0xff] %vm19352_vm9, %v725_v50  ;;  %1646 = vrot.lane.b32.xlu1 %v13727_v11, %s12720_s24  ;;  %v2585_v38 = vcombine.high %v2583_v34, %v2583_v34  ;;  %v3455_v14 = vcombine.low %v2584_v63, %v2583_v34  ;;  %v3453_v42 = vrot.slane %v3439_v35, %v13114_v6  ;;  %vm19356_vm9 = vcmask 23552  }
 0x23f   :  { %1644 = vrot.lane.b32.xlu0 %v13732_v16, %s12720_s24  ;;  %149 = vst.msk [vmem:[#allocation2 + $0x188] sm:$0x3f] %vm19355_vm10, %v14132_v19  ;;  %v2601_v34 = vcombine.high %v14081_v39, %v14081_v39  ;;  %vm19359_vm10 = vcmask 95304  }
 0x240   :  { %v953_v41 = vpop.permute.xlu1 %952  ;;  %v3456_v7 = vcombine.low %v2585_v38, %v14081_v39  ;;  %v3463_v13 = vrot.slane %v3455_v14, %v13114_v6  ;;  %v3454_v1 = vcombine.low %v3446_v12, %v3453_v42  ;;  %148 = vst.msk [vmem:[#allocation2 + $0x180] sm:$0xff] %vm19356_vm9, %v14137_v22  ;;  %vm19360_vm9 = vcmask 97352  }
 0x241   :  { %1093 = vst.msk [vmem:[#allocation2 + $0xe7] sm:$0x7f] %vm1064_vm11, %v953_v41  ;;  %v951_v47 = vpop.permute.xlu0 %950 }
 0x242   :  { %1092 = vst.msk [vmem:[#allocation2 + $0xdf] sm:$0xfe] %vm1062_vm12, %v951_v47  ;;  %512 = vrot.lane.b32.xlu1 %v13677_v9, %s12714_s15  ;;  %v3470_v0 = vrot.slane %v3456_v7, %v13114_v6  ;;  %v3472_v47 = vcombine.low %v2601_v34, %v2600_v62  ;;  %v14219_v62 = vld [vmem:[%s19047_s0 + $0x1b0] sm:$0xff] }
 0x243   :  { %510 = vrot.lane.b32.xlu0 %v13682_v44, %s12714_s15 }
 0x244   :  { %v1179_v53 = vpop.permute.xlu1 %1178  ;;  %v3471_v27 = vcombine.low %v3463_v13, %v3470_v0 }
 0x245   :  { %1319 = vst.msk [vmem:[#allocation2 + $0xe6] sm:$0xff] %vm1290_vm13, %v1179_v53  ;;  %v1177_v55 = vpop.permute.xlu0 %1176 }
 0x246   :  { %1318 = vst.msk [vmem:[#allocation2 + $0xde] sm:$0xfc] %vm1288_vm14, %v1177_v55  ;;  %1872 = vrot.lane.b32.xlu1 %v13727_v11, %s12721_s25  ;;  %v3957_v9 = vpack.c.bf16 %v3471_v27, %v3454_v1  ;;  %v3480_v55 = vrot.slane %v3472_v47, %v13114_v6 }
 0x247   :  { %1870 = vrot.lane.b32.xlu0 %v13732_v16, %s12721_s25 }
 0x248   :  { %12335 = vmatmul.mubr.msk.bf16.gmra.mrb[44].mxu0 %vm3995_vm6, %v3957_v9  ;;  %v1409_v28 = vpop.permute.xlu1 %1408 }
 0x249   :  { %1549 = vst.msk [vmem:[#allocation2 + $0xe8] sm:$0x3f] %vm1520_vm15, %v1409_v28  ;;  %v1407_v44 = vpop.permute.xlu0 %1406  ;;  %12338 = vmatprep.mubr.msk.bf16.mxu0 %vm19274_vm8, %v19067_v17 }
 0x24a   :  { %1548 = vst.msk [vmem:[#allocation2 + $0xe0] sm:$0xff] %vm1518_vm2, %v1407_v44  ;;  %742 = vrot.lane.b32.xlu1 %v13727_v11, %s12716_s14 }
 0x24b   :  { %740 = vrot.lane.b32.xlu0 %v13732_v16, %s12716_s14 }
 0x24c   :  { %v1635_v54 = vpop.permute.xlu1 %1634 }
 0x24d   :  { %1775 = vst.msk [vmem:[#allocation2 + $0xe7] sm:$0x7f] %vm1746_vm3, %v1635_v54  ;;  %v1633_v56 = vpop.permute.xlu0 %1632 }
 0x24e   :  { %1774 = vst.msk [vmem:[#allocation2 + $0xdf] sm:$0xfe] %vm1744_vm4, %v1633_v56  ;;  %968 = vrot.lane.b32.xlu1 %v13727_v11, %s12717_s17 }
 0x24f   :  { %966 = vrot.lane.b32.xlu0 %v13732_v16, %s12717_s17 }
 0x250   :  { %v1861_v48 = vpop.permute.xlu1 %1860 }
 0x251   :  { %2001 = vst.msk [vmem:[#allocation2 + $0xe6] sm:$0xff] %vm19353_vm0, %v1861_v48  ;;  %v1859_v51 = vpop.permute.xlu0 %1858  ;;  %vm19357_vm0 = vcmask 72752  }
 0x252   :  { %2000 = vst.msk [vmem:[#allocation2 + $0xde] sm:$0xfc] %vm19354_vm1, %v1859_v51  ;;  %1194 = vrot.lane.b32.xlu1 %v13727_v11, %s12718_s22  ;;  %vm19358_vm1 = vcmask 72754  }
 0x253   :  { %1192 = vrot.lane.b32.xlu0 %v13732_v16, %s12718_s22 }
 0x254   :  { %v275_v57 = vpop.permute.xlu1 %274 }
 0x255   :  { %413 = vst.msk [vmem:[#allocation2 + $0xf7] sm:$0x7f] %vm382_vm7, %v275_v57  ;;  %v273_v45 = vpop.permute.xlu0 %272 }
 0x256   :  { %412 = vst.msk [vmem:[#allocation2 + $0xef] sm:$0xfe] %vm380_vm5, %v273_v45  ;;  %1424 = vrot.lane.b32.xlu1 %v13806_v8, %s12719_s23 }
 0x257   :  { %1422 = vrot.lane.b32.xlu0 %v13811_v10, %s12719_s23 }
 0x258   :  { %v501_v26 = vpop.permute.xlu1 %500  ;;  %v14145_v23 = vld [vmem:[#allocation2 + $0xe8] sm:$0x3f] }
 0x259   :  { %639 = vst.msk [vmem:[#allocation2 + $0xf6] sm:$0xff] %vm19357_vm0, %v501_v26  ;;  %v499_v24 = vpop.permute.xlu0 %498  ;;  %v2056_v30 = vld [vmem:[#allocation2 + $0xe0] sm:$0xff]  ;;  %v2626_v32 = vrot.slane %v14145_v23, %v13114_v6  ;;  %vm19361_vm0 = vcmask 220352  }
 0x25a   :  { %638 = vst.msk [vmem:[#allocation2 + $0xee] sm:$0xfc] %vm19358_vm1, %v499_v24  ;;  %1650 = vrot.lane.b32.xlu1 %v13806_v8, %s12720_s24  ;;  %v2602_v63 = vcombine.high %v2056_v30, %v2056_v30  ;;  %v2609_v35 = vrot.slane %v2056_v30, %v13114_v6  ;;  %vm19362_vm1 = vcmask 220354  }
 0x25b   :  { %v14153_v33 = vpop.f32.mrb[24].mxu0  ;;  %1648 = vrot.lane.b32.xlu0 %v13811_v10, %s12720_s24  ;;  %v2634_v37 = vcombine.high %v2626_v32, %v2626_v32 }
 0x25c   :  { %v12316_v50 = vpop.f32.mrb[25].mxu0  ;;  %v731_v38 = vpop.permute.xlu1 %730  ;;  %v2616_v14 = vrot.slane %v2602_v63, %v13114_v6  ;;  %v2617_v41 = vcombine.high %v2609_v35, %v2609_v35 }
 0x25d   :  { %v14161_v40 = vpop.f32.mrb[26].mxu0  ;;  %869 = vst.msk [vmem:[#allocation2 + $0xf8] sm:$0x3f] %vm19359_vm10, %v731_v38  ;;  %v729_v42 = vpop.permute.xlu0 %728  ;;  %v3490_v13 = vcombine.low %v2626_v32, %v2634_v37  ;;  %v14214_v32 = vld [vmem:[%s19047_s0 + $0x1b8] sm:$0xff]  ;;  %vm19363_vm10 = vcmask 21504  }
 0x25e   :  { %v12317_v7 = vpop.f32.mrb[27].mxu0  ;;  %868 = vst.msk [vmem:[#allocation2 + $0xf0] sm:$0xff] %vm19360_vm9, %v729_v42  ;;  %1876 = vrot.lane.b32.xlu1 %v13806_v8, %s12721_s25  ;;  %v2618_v39 = vcombine.high %v2616_v14, %v2616_v14  ;;  %v3473_v12 = vcombine.low %v2609_v35, %v2617_v41  ;;  %vm19364_vm9 = vcmask 23552   ;;  %v2619_v35 = vcombine.high %v14145_v23, %v14145_v23 }
 0x25f   :  { %1874 = vrot.lane.b32.xlu0 %v13811_v10, %s12721_s25  ;;  %v3504_v28 = vrot.slane %v3490_v13, %v13114_v6  ;;  %151 = vst.msk [vmem:[#allocation2 + $0x198] sm:$0x3f] %vm19363_vm10, %v14214_v32  ;;  %vm19367_vm10 = vcmask 95304  }
 0x260   :  { %v957_v0 = vpop.permute.xlu1 %956  ;;  %v3487_v53 = vrot.slane %v3473_v12, %v13114_v6  ;;  %v3489_v1 = vcombine.low %v2616_v14, %v2618_v39  ;;  %150 = vst.msk [vmem:[#allocation2 + $0x190] sm:$0xff] %vm19364_vm9, %v14219_v62  ;;  %v2633_v47 = vrot.slane %v2619_v35, %v13114_v6  ;;  %vm19368_vm9 = vcmask 97352  }
 0x261   :  { %1095 = vst.msk [vmem:[#allocation2 + $0xf7] sm:$0x7f] %vm1064_vm11, %v957_v0  ;;  %v955_v27 = vpop.permute.xlu0 %954 }
 0x262   :  { %1094 = vst.msk [vmem:[#allocation2 + $0xef] sm:$0xfe] %vm1062_vm12, %v955_v27  ;;  %290 = vrot.lane.b32.xlu1 %v13727_v11, %s12715_s16  ;;  %v3497_v9 = vrot.slane %v3489_v1, %v13114_v6  ;;  %v3488_v54 = vcombine.low %v3480_v55, %v3487_v53 }
 0x263   :  { %288 = vrot.lane.b32.xlu0 %v13732_v16, %s12715_s16 }
 0x264   :  { %v1183_v44 = vpop.permute.xlu1 %1182  ;;  %v3505_v56 = vcombine.low %v3497_v9, %v3504_v28 }
 0x265   :  { %1321 = vst.msk [vmem:[#allocation2 + $0xf6] sm:$0xff] %vm1290_vm13, %v1183_v44  ;;  %v1181_v48 = vpop.permute.xlu0 %1180 }
 0x266   :  { %1320 = vst.msk [vmem:[#allocation2 + $0xee] sm:$0xfc] %vm1288_vm14, %v1181_v48  ;;  %516 = vrot.lane.b32.xlu1 %v13727_v11, %s12714_s15  ;;  %v3958_v51 = vpack.c.bf16 %v3505_v56, %v3488_v54 }
 0x267   :  { %514 = vrot.lane.b32.xlu0 %v13732_v16, %s12714_s15 }
 0x268   :  { %12339 = vmatmul.mubr.msk.bf16.gmra.mrb[48].mxu0 %vm3995_vm6, %v3958_v51  ;;  %v1413_v57 = vpop.permute.xlu1 %1412 }
 0x269   :  { %1551 = vst.msk [vmem:[#allocation2 + $0xf8] sm:$0x3f] %vm1520_vm15, %v1413_v57  ;;  %v1411_v45 = vpop.permute.xlu0 %1410  ;;  %12342 = vmatprep.mubr.msk.bf16.mxu0 %vm19274_vm8, %v19067_v17 }
 0x26a   :  { %1550 = vst.msk [vmem:[#allocation2 + $0xf0] sm:$0xff] %vm1518_vm2, %v1411_v45  ;;  %746 = vrot.lane.b32.xlu1 %v13806_v8, %s12716_s14 }
 0x26b   :  { %744 = vrot.lane.b32.xlu0 %v13811_v10, %s12716_s14 }
 0x26c   :  { %v1639_v11 = vpop.permute.xlu1 %1638 }
 0x26d   :  { %1777 = vst.msk [vmem:[#allocation2 + $0xf7] sm:$0x7f] %vm1746_vm3, %v1639_v11  ;;  %v1637_v16 = vpop.permute.xlu0 %1636 }
 0x26e   :  { %1776 = vst.msk [vmem:[#allocation2 + $0xef] sm:$0xfe] %vm1744_vm4, %v1637_v16  ;;  %972 = vrot.lane.b32.xlu1 %v13806_v8, %s12717_s17 }
 0x26f   :  { %970 = vrot.lane.b32.xlu0 %v13811_v10, %s12717_s17 }
 0x270   :  { %v1865_v5 = vpop.permute.xlu1 %1864 }
 0x271   :  { %2003 = vst.msk [vmem:[#allocation2 + $0xf6] sm:$0xff] %vm19361_vm0, %v1865_v5  ;;  %v1863_v26 = vpop.permute.xlu0 %1862  ;;  %vm19365_vm0 = vcmask 72752  }
 0x272   :  { %2002 = vst.msk [vmem:[#allocation2 + $0xee] sm:$0xfc] %vm19362_vm1, %v1863_v26  ;;  %1198 = vrot.lane.b32.xlu1 %v13806_v8, %s12718_s22  ;;  %vm19366_vm1 = vcmask 72754  }
 0x273   :  { %1196 = vrot.lane.b32.xlu0 %v13811_v10, %s12718_s22 }
 0x274   :  { %v279_v24 = vpop.permute.xlu1 %278 }
 0x275   :  { %415 = vst.msk [vmem:[#allocation2 + $0x107] sm:$0x7f] %vm382_vm7, %v279_v24  ;;  %v277_v30 = vpop.permute.xlu0 %276 }
 0x276   :  { %414 = vst.msk [vmem:[#allocation2 + $0xff] sm:$0xfe] %vm380_vm5, %v277_v30  ;;  %1428 = vrot.lane.b32.xlu1 %v13886_v58, %s12719_s23 }
 0x277   :  { %1426 = vrot.lane.b32.xlu0 %v13891_v59, %s12719_s23 }
 0x278   :  { %v505_v34 = vpop.permute.xlu1 %504  ;;  %v2059_v63 = vld [vmem:[#allocation2 + $0xf8] sm:$0x3f] }
 0x279   :  { %641 = vst.msk [vmem:[#allocation2 + $0x106] sm:$0xff] %vm19365_vm0, %v505_v34  ;;  %v503_v50 = vpop.permute.xlu0 %502  ;;  %v2058_v37 = vld [vmem:[#allocation2 + $0xf0] sm:$0xff]  ;;  %v2652_v38 = vcombine.high %v2059_v63, %v2059_v63  ;;  %v2659_v14 = vrot.slane %v2059_v63, %v13114_v6 }
 0x27a   :  { %640 = vst.msk [vmem:[#allocation2 + $0xfe] sm:$0xfc] %vm19366_vm1, %v503_v50  ;;  %294 = vrot.lane.b32.xlu1 %v13806_v8, %s12715_s16  ;;  %v2635_v41 = vcombine.high %v2058_v37, %v2058_v37  ;;  %v2642_v42 = vrot.slane %v2058_v37, %v13114_v6 }
 0x27b   :  { %292 = vrot.lane.b32.xlu0 %v13811_v10, %s12715_s16  ;;  %v2666_v23 = vrot.slane %v2652_v38, %v13114_v6  ;;  %v2667_v7 = vcombine.high %v2659_v14, %v2659_v14 }
 0x27c   :  { %v735_v39 = vpop.permute.xlu1 %734  ;;  %v2649_v12 = vrot.slane %v2635_v41, %v13114_v6  ;;  %v2650_v13 = vcombine.high %v2642_v42, %v2642_v42  ;;  %v3506_v1 = vcombine.low %v2633_v47, %v2642_v42  ;;  %v14304_v42 = vld [vmem:[%s19047_s0 + $0x1c8] sm:$0xff] }
 0x27d   :  { %871 = vst.msk [vmem:[#allocation2 + $0x108] sm:$0x3f] %vm19367_vm10, %v735_v39  ;;  %v733_v0 = vpop.permute.xlu0 %732  ;;  %v3524_v55 = vcombine.low %v2667_v7, %v2666_v23  ;;  %v14309_v23 = vld [vmem:[%s19047_s0 + $0x1c0] sm:$0xff] }
 0x27e   :  { %870 = vst.msk [vmem:[#allocation2 + $0x100] sm:$0xff] %vm19368_vm9, %v733_v0  ;;  %1654 = vrot.lane.b32.xlu1 %v13886_v58, %s12720_s24  ;;  %v2651_v53 = vcombine.high %v2649_v12, %v2649_v12  ;;  %v3507_v27 = vcombine.low %v2650_v13, %v2649_v12  ;;  %v3514_v56 = vrot.slane %v3506_v1, %v13114_v6 }
 0x27f   :  { %1652 = vrot.lane.b32.xlu0 %v13891_v59, %s12720_s24  ;;  %v3538_v51 = vrot.slane %v3524_v55, %v13114_v6 }
 0x280   :  { %v961_v9 = vpop.permute.xlu1 %960  ;;  %v3521_v28 = vrot.slane %v3507_v27, %v13114_v6  ;;  %v3523_v44 = vcombine.low %v2651_v53, %v2659_v14 }
 0x281   :  { %1097 = vst.msk [vmem:[#allocation2 + $0x107] sm:$0x7f] %vm1064_vm11, %v961_v9  ;;  %v959_v54 = vpop.permute.xlu0 %958 }
 0x282   :  { %1096 = vst.msk [vmem:[#allocation2 + $0xff] sm:$0xfe] %vm1062_vm12, %v959_v54  ;;  %520 = vrot.lane.b32.xlu1 %v13806_v8, %s12714_s15  ;;  %v3531_v48 = vrot.slane %v3523_v44, %v13114_v6  ;;  %v3522_v45 = vcombine.low %v3514_v56, %v3521_v28 }
 0x283   :  { %518 = vrot.lane.b32.xlu0 %v13811_v10, %s12714_s15 }
 0x284   :  { %v283_v57 = vpop.permute.xlu1 %282  ;;  %v3539_v11 = vcombine.low %v3531_v48, %v3538_v51  ;;  %v14356_v48 = vld [vmem:[%s19047_s0 + $0x1d8] sm:$0xff]  ;;  %v14361_v51 = vld [vmem:[%s19047_s0 + $0x1d0] sm:$0xff] }
 0x285   :  { %417 = vst.msk [vmem:[#allocation2 + $0x117] sm:$0x7f] %vm382_vm7, %v283_v57  ;;  %v281_v16 = vpop.permute.xlu0 %280 }
 0x286   :  { %416 = vst.msk [vmem:[#allocation2 + $0x10f] sm:$0xfe] %vm380_vm5, %v281_v16  ;;  %1880 = vrot.lane.b32.xlu1 %v13886_v58, %s12721_s25  ;;  %v3959_v8 = vpack.c.bf16 %v3539_v11, %v3522_v45 }
 0x287   :  { %1878 = vrot.lane.b32.xlu0 %v13891_v59, %s12721_s25 }
 0x288   :  { %12343 = vmatmul.mubr.msk.bf16.gmra.mrb[52].mxu0 %vm3995_vm6, %v3959_v8  ;;  %v1187_v5 = vpop.permute.xlu1 %1186 }
 0x289   :  { %1323 = vst.msk [vmem:[#allocation2 + $0x106] sm:$0xff] %vm1290_vm13, %v1187_v5  ;;  %v1185_v10 = vpop.permute.xlu0 %1184  ;;  %12346 = vmatprep.mubr.msk.bf16.mxu0 %vm19274_vm8, %v19067_v17 }
 0x28a   :  { %1322 = vst.msk [vmem:[#allocation2 + $0xfe] sm:$0xfc] %vm1288_vm14, %v1185_v10  ;;  %750 = vrot.lane.b32.xlu1 %v13886_v58, %s12716_s14 }
 0x28b   :  { %748 = vrot.lane.b32.xlu0 %v13891_v59, %s12716_s14 }
 0x28c   :  { %v509_v26 = vpop.permute.xlu1 %508 }
 0x28d   :  { %643 = vst.msk [vmem:[#allocation2 + $0x116] sm:$0xff] %vm19365_vm0, %v509_v26  ;;  %v507_v24 = vpop.permute.xlu0 %506  ;;  %vm19369_vm0 = vcmask 21504  }
 0x28e   :  { %642 = vst.msk [vmem:[#allocation2 + $0x10e] sm:$0xfc] %vm19366_vm1, %v507_v24  ;;  %976 = vrot.lane.b32.xlu1 %v13886_v58, %s12717_s17  ;;  %vm19370_vm1 = vcmask 23552  }
 0x28f   :  { %974 = vrot.lane.b32.xlu0 %v13891_v59, %s12717_s17  ;;  %153 = vst.msk [vmem:[#allocation2 + $0x1a8] sm:$0x3f] %vm19369_vm0, %v14304_v42  ;;  %vm19373_vm0 = vcmask 72752  }
 0x290   :  { %v1417_v30 = vpop.permute.xlu1 %1416  ;;  %152 = vst.msk [vmem:[#allocation2 + $0x1a0] sm:$0xff] %vm19370_vm1, %v14309_v23  ;;  %vm19374_vm1 = vcmask 72754  }
 0x291   :  { %1553 = vst.msk [vmem:[#allocation2 + $0x108] sm:$0x3f] %vm1520_vm15, %v1417_v30  ;;  %v1415_v34 = vpop.permute.xlu0 %1414 }
 0x292   :  { %1552 = vst.msk [vmem:[#allocation2 + $0x100] sm:$0xff] %vm1518_vm2, %v1415_v34  ;;  %1202 = vrot.lane.b32.xlu1 %v13886_v58, %s12718_s22 }
 0x293   :  { %1200 = vrot.lane.b32.xlu0 %v13891_v59, %s12718_s22 }
 0x294   :  { %v739_v63 = vpop.permute.xlu1 %738 }
 0x295   :  { %873 = vst.msk [vmem:[#allocation2 + $0x118] sm:$0x3f] %vm19367_vm10, %v739_v63  ;;  %v737_v35 = vpop.permute.xlu0 %736  ;;  %vm19371_vm10 = vcmask 220352  }
 0x296   :  { %872 = vst.msk [vmem:[#allocation2 + $0x110] sm:$0xff] %vm19368_vm9, %v737_v35  ;;  %1432 = vrot.lane.b32.xlu1 %v13968_v46, %s12719_s23  ;;  %vm19372_vm9 = vcmask 220354  }
 0x297   :  { %1430 = vrot.lane.b32.xlu0 %v13973_v60, %s12719_s23 }
 0x298   :  { %v1643_v50 = vpop.permute.xlu1 %1642 }
 0x299   :  { %1779 = vst.msk [vmem:[#allocation2 + $0x107] sm:$0x7f] %vm1746_vm3, %v1643_v50  ;;  %v1641_v37 = vpop.permute.xlu0 %1640 }
 0x29a   :  { %1778 = vst.msk [vmem:[#allocation2 + $0xff] sm:$0xfe] %vm1744_vm4, %v1641_v37  ;;  %1658 = vrot.lane.b32.xlu1 %v13968_v46, %s12720_s24 }
 0x29b   :  { %1656 = vrot.lane.b32.xlu0 %v13973_v60, %s12720_s24 }
 0x29c   :  { %v965_v38 = vpop.permute.xlu1 %964 }
 0x29d   :  { %1099 = vst.msk [vmem:[#allocation2 + $0x117] sm:$0x7f] %vm1064_vm11, %v965_v38  ;;  %v963_v14 = vpop.permute.xlu0 %962 }
 0x29e   :  { %1098 = vst.msk [vmem:[#allocation2 + $0x10f] sm:$0xfe] %vm1062_vm12, %v963_v14  ;;  %1884 = vrot.lane.b32.xlu1 %v13968_v46, %s12721_s25 }
 0x29f   :  { %v14299_v41 = vpop.f32.mrb[28].mxu0  ;;  %1882 = vrot.lane.b32.xlu0 %v13973_v60, %s12721_s25 }
 0x2a0   :  { %v12320_v7 = vpop.f32.mrb[29].mxu0  ;;  %v1869_v39 = vpop.permute.xlu1 %1868 }
 0x2a1   :  { %v14317_v47 = vpop.f32.mrb[30].mxu0  ;;  %2005 = vst.msk [vmem:[#allocation2 + $0x106] sm:$0xff] %vm19371_vm10, %v1869_v39  ;;  %v1867_v12 = vpop.permute.xlu0 %1866  ;;  %vm19375_vm10 = vcmask 21504  }
 0x2a2   :  { %v12321_v13 = vpop.f32.mrb[31].mxu0  ;;  %2004 = vst.msk [vmem:[#allocation2 + $0xfe] sm:$0xfc] %vm19372_vm9, %v1867_v12  ;;  %298 = vrot.lane.b32.xlu1 %v13886_v58, %s12715_s16  ;;  %vm19376_vm9 = vcmask 23552  }
 0x2a3   :  { %296 = vrot.lane.b32.xlu0 %v13891_v59, %s12715_s16  ;;  %155 = vst.msk [vmem:[#allocation2 + $0x1b8] sm:$0x3f] %vm19375_vm10, %v14356_v48  ;;  %vm19379_vm10 = vcmask 95304  }
 0x2a4   :  { %v1191_v0 = vpop.permute.xlu1 %1190  ;;  %154 = vst.msk [vmem:[#allocation2 + $0x1b0] sm:$0xff] %vm19376_vm9, %v14361_v51  ;;  %vm19380_vm9 = vcmask 97352  }
 0x2a5   :  { %1325 = vst.msk [vmem:[#allocation2 + $0x116] sm:$0xff] %vm1290_vm13, %v1191_v0  ;;  %v1189_v53 = vpop.permute.xlu0 %1188 }
 0x2a6   :  { %1324 = vst.msk [vmem:[#allocation2 + $0x10e] sm:$0xfc] %vm1288_vm14, %v1189_v53  ;;  %524 = vrot.lane.b32.xlu1 %v13886_v58, %s12714_s15 }
 0x2a7   :  { %522 = vrot.lane.b32.xlu0 %v13891_v59, %s12714_s15 }
 0x2a8   :  { %v1421_v1 = vpop.permute.xlu1 %1420  ;;  %v2061_v57 = vld [vmem:[#allocation2 + $0x108] sm:$0x3f] }
 0x2a9   :  { %1555 = vst.msk [vmem:[#allocation2 + $0x118] sm:$0x3f] %vm1520_vm15, %v1421_v1  ;;  %v1419_v27 = vpop.permute.xlu0 %1418  ;;  %v2060_v28 = vld [vmem:[#allocation2 + $0x100] sm:$0xff]  ;;  %v2692_v26 = vrot.slane %v2061_v57, %v13114_v6  ;;  %v2685_v37 = vcombine.high %v2061_v57, %v2061_v57 }
 0x2aa   :  { %1554 = vst.msk [vmem:[#allocation2 + $0x110] sm:$0xff] %vm1518_vm2, %v1419_v27  ;;  %754 = vrot.lane.b32.xlu1 %v13968_v46, %s12716_s14  ;;  %v2668_v54 = vcombine.high %v2060_v28, %v2060_v28  ;;  %v2675_v10 = vrot.slane %v2060_v28, %v13114_v6 }
 0x2ab   :  { %752 = vrot.lane.b32.xlu0 %v13973_v60, %s12716_s14  ;;  %v2700_v38 = vcombine.high %v2692_v26, %v2692_v26  ;;  %v2699_v13 = vrot.slane %v2685_v37, %v13114_v6 }
 0x2ac   :  { %v287_v55 = vpop.permute.xlu1 %286  ;;  %v2682_v11 = vrot.slane %v2668_v54, %v13114_v6  ;;  %v2683_v50 = vcombine.high %v2675_v10, %v2675_v10 }
 0x2ad   :  { %419 = vst.msk [vmem:[#allocation2 + $0x127] sm:$0x7f] %vm382_vm7, %v287_v55  ;;  %v285_v9 = vpop.permute.xlu0 %284  ;;  %v3557_v1 = vcombine.low %v2692_v26, %v2700_v38 }
 0x2ae   :  { %418 = vst.msk [vmem:[#allocation2 + $0x11f] sm:$0xfe] %vm380_vm5, %v285_v9  ;;  %980 = vrot.lane.b32.xlu1 %v13968_v46, %s12717_s17  ;;  %v2684_v63 = vcombine.high %v2682_v11, %v2682_v11  ;;  %v3540_v53 = vcombine.low %v2675_v10, %v2683_v50 }
 0x2af   :  { %978 = vrot.lane.b32.xlu0 %v13973_v60, %s12717_s17  ;;  %v3565_v28 = vrot.slane %v3557_v1, %v13114_v6 }
 0x2b0   :  { %v1647_v58 = vpop.permute.xlu1 %1646  ;;  %v3541_v7 = vcombine.low %v2682_v11, %v2684_v63 }
 0x2b1   :  { %1781 = vst.msk [vmem:[#allocation2 + $0x117] sm:$0x7f] %vm1746_vm3, %v1647_v58  ;;  %v1645_v59 = vpop.permute.xlu0 %1644 }
 0x2b2   :  { %1780 = vst.msk [vmem:[#allocation2 + $0x10f] sm:$0xfe] %vm1744_vm4, %v1645_v59  ;;  %1206 = vrot.lane.b32.xlu1 %v13968_v46, %s12718_s22  ;;  %v3555_v55 = vrot.slane %v3541_v7, %v13114_v6  ;;  %v3548_v59 = vrot.slane %v3540_v53, %v13114_v6 }
 0x2b3   :  { %1204 = vrot.lane.b32.xlu0 %v13973_v60, %s12718_s22 }
 0x2b4   :  { %v513_v44 = vpop.permute.xlu1 %512 }
 0x2b5   :  { %645 = vst.msk [vmem:[#allocation2 + $0x126] sm:$0xff] %vm19373_vm0, %v513_v44  ;;  %v511_v56 = vpop.permute.xlu0 %510  ;;  %vm19377_vm0 = vcmask 220352  }
 0x2b6   :  { %644 = vst.msk [vmem:[#allocation2 + $0x11e] sm:$0xfc] %vm19374_vm1, %v511_v56  ;;  %1436 = vrot.lane.b32.xlu1 %v14047_v3, %s12719_s23  ;;  %vm19378_vm1 = vcmask 220354   ;;  %v3556_v56 = vcombine.low %v3548_v59, %v3555_v55 }
 0x2b7   :  { %1434 = vrot.lane.b32.xlu0 %v14052_v4, %s12719_s23 }
 0x2b8   :  { %v1873_v45 = vpop.permute.xlu1 %1872 }
 0x2b9   :  { %2007 = vst.msk [vmem:[#allocation2 + $0x116] sm:$0xff] %vm19377_vm0, %v1873_v45  ;;  %v1871_v16 = vpop.permute.xlu0 %1870  ;;  %v14371_v8 = vpop.f32.mrb[32].mxu0 }
 0x2ba   :  { %2006 = vst.msk [vmem:[#allocation2 + $0x10e] sm:$0xfc] %vm19378_vm1, %v1871_v16  ;;  %v12324_v5 = vpop.f32.mrb[33].mxu0  ;;  %1662 = vrot.lane.b32.xlu1 %v14047_v3, %s12720_s24 }
 0x2bb   :  { %1660 = vrot.lane.b32.xlu0 %v14052_v4, %s12720_s24  ;;  %v14380_v24 = vpop.f32.mrb[34].mxu0 }
 0x2bc   :  { %v12325_v30 = vpop.f32.mrb[35].mxu0  ;;  %v743_v34 = vpop.permute.xlu1 %742 }
 0x2bd   :  { %875 = vst.msk [vmem:[#allocation2 + $0x128] sm:$0x3f] %vm19379_vm10, %v743_v34  ;;  %v741_v35 = vpop.permute.xlu0 %740  ;;  %vm19381_vm10 = vcmask 72752  }
 0x2be   :  { %874 = vst.msk [vmem:[#allocation2 + $0x120] sm:$0xff] %vm19380_vm9, %v741_v35  ;;  %1888 = vrot.lane.b32.xlu1 %v14047_v3, %s12721_s25  ;;  %vm19382_vm9 = vcmask 72754  }
 0x2bf   :  { %1886 = vrot.lane.b32.xlu0 %v14052_v4, %s12721_s25 }
 0x2c0   :  { %v969_v14 = vpop.permute.xlu1 %968  ;;  %v2063_v26 = vld [vmem:[#allocation2 + $0x118] sm:$0x3f] }
 0x2c1   :  { %1101 = vst.msk [vmem:[#allocation2 + $0x127] sm:$0x7f] %vm1064_vm11, %v969_v14  ;;  %v967_v39 = vpop.permute.xlu0 %966  ;;  %v2062_v12 = vld [vmem:[#allocation2 + $0x110] sm:$0xff]  ;;  %v2718_v63 = vcombine.high %v2063_v26, %v2063_v26  ;;  %v2725_v35 = vrot.slane %v2063_v26, %v13114_v6 }
 0x2c2   :  { %1100 = vst.msk [vmem:[#allocation2 + $0x11f] sm:$0xfe] %vm1062_vm12, %v967_v39  ;;  %302 = vrot.lane.b32.xlu1 %v13968_v46, %s12715_s16  ;;  %v14394_v0 = vrot.slane %v2062_v12, %v13114_v6  ;;  %v2701_v16 = vcombine.high %v2062_v12, %v2062_v12 }
 0x2c3   :  { %300 = vrot.lane.b32.xlu0 %v13973_v60, %s12715_s16  ;;  %v2732_v7 = vrot.slane %v2718_v63, %v13114_v6  ;;  %v2733_v39 = vcombine.high %v2725_v35, %v2725_v35 }
 0x2c4   :  { %v1195_v27 = vpop.permute.xlu1 %1194  ;;  %v3558_v9 = vcombine.low %v2699_v13, %v14394_v0  ;;  %v2715_v30 = vrot.slane %v2701_v16, %v13114_v6  ;;  %v2716_v14 = vcombine.high %v14394_v0, %v14394_v0 }
 0x2c5   :  { %1327 = vst.msk [vmem:[#allocation2 + $0x126] sm:$0xff] %vm1290_vm13, %v1195_v27  ;;  %v1193_v58 = vpop.permute.xlu0 %1192 }
 0x2c6   :  { %1326 = vst.msk [vmem:[#allocation2 + $0x11e] sm:$0xfc] %vm1288_vm14, %v1193_v58  ;;  %528 = vrot.lane.b32.xlu1 %v13968_v46, %s12714_s15  ;;  %v3572_v44 = vrot.slane %v3558_v9, %v13114_v6  ;;  %v2717_v37 = vcombine.high %v2715_v30, %v2715_v30  ;;  %v3574_v55 = vcombine.low %v2716_v14, %v2715_v30 }
 0x2c7   :  { %526 = vrot.lane.b32.xlu0 %v13973_v60, %s12714_s15  ;;  %v3591_v9 = vcombine.low %v2733_v39, %v2732_v7 }
 0x2c8   :  { %v1425_v54 = vpop.permute.xlu1 %1424  ;;  %v3573_v57 = vcombine.low %v3565_v28, %v3572_v44  ;;  %v3575_v1 = vcombine.low %v2717_v37, %v2725_v35 }
 0x2c9   :  { %1557 = vst.msk [vmem:[#allocation2 + $0x128] sm:$0x3f] %vm1520_vm15, %v1425_v54  ;;  %v1423_v45 = vpop.permute.xlu0 %1422  ;;  %v3582_v54 = vrot.slane %v3574_v55, %v13114_v6 }
 0x2ca   :  { %1556 = vst.msk [vmem:[#allocation2 + $0x120] sm:$0xff] %vm1518_vm2, %v1423_v45  ;;  %758 = vrot.lane.b32.xlu1 %v14047_v3, %s12716_s14  ;;  %v3960_v46 = vpack.c.bf16 %v3573_v57, %v3556_v56  ;;  %v3589_v59 = vrot.slane %v3575_v1, %v13114_v6  ;;  %v3599_v56 = vrot.slane %v3591_v9, %v13114_v6 }
 0x2cb   :  { %756 = vrot.lane.b32.xlu0 %v14052_v4, %s12716_s14 }
 0x2cc   :  { %12347 = vmatmul.mubr.msk.bf16.gmra.mrb[56].mxu0 %vm3995_vm6, %v3960_v46  ;;  %v1651_v11 = vpop.permute.xlu1 %1650 }
 0x2cd   :  { %1783 = vst.msk [vmem:[#allocation2 + $0x127] sm:$0x7f] %vm1746_vm3, %v1651_v11  ;;  %v1649_v60 = vpop.permute.xlu0 %1648  ;;  %12350 = vmatprep.mubr.msk.bf16.mxu0 %vm19274_vm8, %v19067_v17 }
 0x2ce   :  { %1782 = vst.msk [vmem:[#allocation2 + $0x11f] sm:$0xfe] %vm1744_vm4, %v1649_v60  ;;  %984 = vrot.lane.b32.xlu1 %v14047_v3, %s12717_s17  ;;  %v3590_v60 = vcombine.low %v3582_v54, %v3589_v59 }
 0x2cf   :  { %982 = vrot.lane.b32.xlu0 %v14052_v4, %s12717_s17 }
 0x2d0   :  { %v1877_v5 = vpop.permute.xlu1 %1876 }
 0x2d1   :  { %2009 = vst.msk [vmem:[#allocation2 + $0x126] sm:$0xff] %vm19377_vm0, %v1877_v5  ;;  %v1875_v10 = vpop.permute.xlu0 %1874  ;;  %vm19383_vm0 = vcmask 95304  }
 0x2d2   :  { %2008 = vst.msk [vmem:[#allocation2 + $0x11e] sm:$0xfc] %vm19378_vm1, %v1875_v10  ;;  %1210 = vrot.lane.b32.xlu1 %v14047_v3, %s12718_s22  ;;  %vm19384_vm1 = vcmask 97352  }
 0x2d3   :  { %1208 = vrot.lane.b32.xlu0 %v14052_v4, %s12718_s22 }
 0x2d4   :  { %v291_v34 = vpop.permute.xlu1 %290 }
 0x2d5   :  { %421 = vst.msk [vmem:[#allocation2 + $0x137] sm:$0x7f] %vm382_vm7, %v291_v34  ;;  %v289_v50 = vpop.permute.xlu0 %288 }
 0x2d6   :  { %420 = vst.msk [vmem:[#allocation2 + $0x12f] sm:$0xfe] %vm380_vm5, %v289_v50  ;;  %1440 = vrot.lane.b32.xlu1 %v14132_v19, %s12719_s23 }
 0x2d7   :  { %1438 = vrot.lane.b32.xlu0 %v14137_v22, %s12719_s23 }
 0x2d8   :  { %v517_v38 = vpop.permute.xlu1 %516 }
 0x2d9   :  { %647 = vst.msk [vmem:[#allocation2 + $0x136] sm:$0xff] %vm19381_vm10, %v517_v38  ;;  %v515_v12 = vpop.permute.xlu0 %514  ;;  %v14442_v13 = vld [vmem:[#allocation2 + $0x120] sm:$0xff] }
 0x2da   :  { %646 = vst.msk [vmem:[#allocation2 + $0x12e] sm:$0xfc] %vm19382_vm9, %v515_v12  ;;  %1666 = vrot.lane.b32.xlu1 %v14132_v19, %s12720_s24  ;;  %v2741_v53 = vrot.slane %v14442_v13, %v13114_v6  ;;  %v2734_v7 = vcombine.high %v14442_v13, %v14442_v13 }
 0x2db   :  { %1664 = vrot.lane.b32.xlu0 %v14137_v22, %s12720_s24 }
 0x2dc   :  { %v747_v0 = vpop.permute.xlu1 %746  ;;  %v2749_v27 = vcombine.high %v2741_v53, %v2741_v53  ;;  %v2748_v1 = vrot.slane %v2734_v7, %v13114_v6 }
 0x2dd   :  { %877 = vst.msk [vmem:[#allocation2 + $0x138] sm:$0x3f] %vm19383_vm0, %v747_v0  ;;  %v745_v58 = vpop.permute.xlu0 %744  ;;  %vm19385_vm0 = vcmask 220352  }
 0x2de   :  { %876 = vst.msk [vmem:[#allocation2 + $0x130] sm:$0xff] %vm19384_vm1, %v745_v58  ;;  %1892 = vrot.lane.b32.xlu1 %v14132_v19, %s12721_s25  ;;  %v3592_v28 = vcombine.low %v2741_v53, %v2749_v27  ;;  %v2065_v53 = vld [vmem:[#allocation2 + $0x128] sm:$0x3f]  ;;  %vm19386_vm1 = vcmask 220354  }
 0x2df   :  { %1890 = vrot.lane.b32.xlu0 %v14137_v22, %s12721_s25  ;;  %v2758_v55 = vrot.slane %v2065_v53, %v13114_v6 }
 0x2e0   :  { %v973_v44 = vpop.permute.xlu1 %972  ;;  %v3606_v57 = vrot.slane %v3592_v28, %v13114_v6  ;;  %v2750_v28 = vcombine.high %v2748_v1, %v2748_v1 }
 0x2e1   :  { %1103 = vst.msk [vmem:[#allocation2 + $0x137] sm:$0x7f] %vm1064_vm11, %v973_v44  ;;  %v971_v45 = vpop.permute.xlu0 %970  ;;  %v14462_v46 = vpop.f32.mrb[36].mxu0  ;;  %v2751_v44 = vcombine.high %v2065_v53, %v2065_v53 }
 0x2e2   :  { %1102 = vst.msk [vmem:[#allocation2 + $0x12f] sm:$0xfe] %vm1062_vm12, %v971_v45  ;;  %v12328_v11 = vpop.f32.mrb[37].mxu0  ;;  %306 = vrot.lane.b32.xlu1 %v14047_v3, %s12715_s16  ;;  %v3607_v16 = vcombine.low %v3599_v56, %v3606_v57  ;;  %v2766_v56 = vcombine.high %v2758_v55, %v2758_v55 }
 0x2e3   :  { %304 = vrot.lane.b32.xlu0 %v14052_v4, %s12715_s16  ;;  %v14469_v5 = vpop.f32.mrb[38].mxu0  ;;  %v2765_v11 = vrot.slane %v2751_v44, %v13114_v6 }
 0x2e4   :  { %v12329_v10 = vpop.f32.mrb[39].mxu0  ;;  %v1199_v26 = vpop.permute.xlu1 %1198  ;;  %v3961_v30 = vpack.c.bf16 %v3607_v16, %v3590_v60 }
 0x2e5   :  { %1329 = vst.msk [vmem:[#allocation2 + $0x136] sm:$0xff] %vm1290_vm13, %v1199_v26  ;;  %v1197_v34 = vpop.permute.xlu0 %1196  ;;  %v3608_v10 = vcombine.low %v2748_v1, %v2750_v28 }
 0x2e6   :  { %1328 = vst.msk [vmem:[#allocation2 + $0x12e] sm:$0xfc] %vm1288_vm14, %v1197_v34  ;;  %12351 = vmatmul.mubr.msk.bf16.gmra.mrb[60].mxu0 %vm3995_vm6, %v3961_v30  ;;  %532 = vrot.lane.b32.xlu1 %v14047_v3, %s12714_s15 }
 0x2e7   :  { %530 = vrot.lane.b32.xlu0 %v14052_v4, %s12714_s15  ;;  %12354 = vmatprep.mubr.msk.bf16.mxu0 %vm19274_vm8, %v19067_v17 }
 0x2e8   :  { %v1429_v63 = vpop.permute.xlu1 %1428 }
 0x2e9   :  { %1559 = vst.msk [vmem:[#allocation2 + $0x138] sm:$0x3f] %vm1520_vm15, %v1429_v63  ;;  %v1427_v35 = vpop.permute.xlu0 %1426  ;;  %v3609_v63 = vcombine.low %v2758_v55, %v2766_v56 }
 0x2ea   :  { %1558 = vst.msk [vmem:[#allocation2 + $0x130] sm:$0xff] %vm1518_vm2, %v1427_v35  ;;  %762 = vrot.lane.b32.xlu1 %v14132_v19, %s12716_s14 }
 0x2eb   :  { %760 = vrot.lane.b32.xlu0 %v14137_v22, %s12716_s14 }
 0x2ec   :  { %v295_v50 = vpop.permute.xlu1 %294 }
 0x2ed   :  { %423 = vst.msk [vmem:[#allocation2 + $0x147] sm:$0x7f] %vm382_vm7, %v295_v50  ;;  %v293_v3 = vpop.permute.xlu0 %292 }
 0x2ee   :  { %422 = vst.msk [vmem:[#allocation2 + $0x13f] sm:$0xfe] %vm380_vm5, %v293_v3  ;;  %988 = vrot.lane.b32.xlu1 %v14132_v19, %s12717_s17  ;;  %v3616_v3 = vrot.slane %v3608_v10, %v13114_v6 }
 0x2ef   :  { %986 = vrot.lane.b32.xlu0 %v14137_v22, %s12717_s17 }
 0x2f0   :  { %v1655_v4 = vpop.permute.xlu1 %1654 }
 0x2f1   :  { %1785 = vst.msk [vmem:[#allocation2 + $0x137] sm:$0x7f] %vm1746_vm3, %v1655_v4  ;;  %v1653_v37 = vpop.permute.xlu0 %1652 }
 0x2f2   :  { %1784 = vst.msk [vmem:[#allocation2 + $0x12f] sm:$0xfe] %vm1744_vm4, %v1653_v37  ;;  %1214 = vrot.lane.b32.xlu1 %v14132_v19, %s12718_s22 }
 0x2f3   :  { %1212 = vrot.lane.b32.xlu0 %v14137_v22, %s12718_s22 }
 0x2f4   :  { %v521_v38 = vpop.permute.xlu1 %520 }
 0x2f5   :  { %649 = vst.msk [vmem:[#allocation2 + $0x146] sm:$0xff] %vm19381_vm10, %v521_v38  ;;  %v519_v14 = vpop.permute.xlu0 %518  ;;  %vm19387_vm10 = vcmask 95304   ;;  %v3623_v38 = vrot.slane %v3609_v63, %v13114_v6 }
 0x2f6   :  { %648 = vst.msk [vmem:[#allocation2 + $0x13e] sm:$0xfc] %vm19382_vm9, %v519_v14  ;;  %1444 = vrot.lane.b32.xlu1 %v14214_v32, %s12719_s23  ;;  %vm19388_vm9 = vcmask 97352  }
 0x2f7   :  { %1442 = vrot.lane.b32.xlu0 %v14219_v62, %s12719_s23 }
 0x2f8   :  { %v1881_v39 = vpop.permute.xlu1 %1880 }
 0x2f9   :  { %2011 = vst.msk [vmem:[#allocation2 + $0x136] sm:$0xff] %vm19385_vm0, %v1881_v39  ;;  %v1879_v12 = vpop.permute.xlu0 %1878 }
 0x2fa   :  { %2010 = vst.msk [vmem:[#allocation2 + $0x12e] sm:$0xfc] %vm19386_vm1, %v1879_v12  ;;  %1670 = vrot.lane.b32.xlu1 %v14214_v32, %s12720_s24 }
 0x2fb   :  { %1668 = vrot.lane.b32.xlu0 %v14219_v62, %s12720_s24  ;;  %v14513_v0 = vpop.f32.mrb[40].mxu0 }
 0x2fc   :  { %v12332_v13 = vpop.f32.mrb[41].mxu0  ;;  %v751_v27 = vpop.permute.xlu1 %750 }
 0x2fd   :  { %879 = vst.msk [vmem:[#allocation2 + $0x148] sm:$0x3f] %vm19387_vm10, %v751_v27  ;;  %v749_v9 = vpop.permute.xlu0 %748  ;;  %v14517_v58 = vpop.f32.mrb[42].mxu0  ;;  %vm19389_vm10 = vcmask 72752  }
 0x2fe   :  { %878 = vst.msk [vmem:[#allocation2 + $0x140] sm:$0xff] %vm19388_vm9, %v749_v9  ;;  %v12333_v59 = vpop.f32.mrb[43].mxu0  ;;  %1896 = vrot.lane.b32.xlu1 %v14214_v32, %s12721_s25  ;;  %vm19390_vm9 = vcmask 72754  }
 0x2ff   :  { %1894 = vrot.lane.b32.xlu0 %v14219_v62, %s12721_s25 }
 0x300   :  { %v977_v54 = vpop.permute.xlu1 %976  ;;  %v2067_v55 = vld [vmem:[#allocation2 + $0x138] sm:$0x3f] }
 0x301   :  { %1105 = vst.msk [vmem:[#allocation2 + $0x147] sm:$0x7f] %vm1064_vm11, %v977_v54  ;;  %v975_v57 = vpop.permute.xlu0 %974  ;;  %v2066_v45 = vld [vmem:[#allocation2 + $0x130] sm:$0xff]  ;;  %v2784_v28 = vcombine.high %v2067_v55, %v2067_v55  ;;  %v2791_v44 = vrot.slane %v2067_v55, %v13114_v6 }
 0x302   :  { %1104 = vst.msk [vmem:[#allocation2 + $0x13f] sm:$0xfe] %vm1062_vm12, %v975_v57  ;;  %310 = vrot.lane.b32.xlu1 %v14132_v19, %s12715_s16  ;;  %v2767_v60 = vcombine.high %v2066_v45, %v2066_v45  ;;  %v2774_v16 = vrot.slane %v2066_v45, %v13114_v6 }
 0x303   :  { %308 = vrot.lane.b32.xlu0 %v14137_v22, %s12715_s16 }
 0x304   :  { %v1203_v26 = vpop.permute.xlu1 %1202  ;;  %v14533_v30 = vrot.slane %v2767_v60, %v13114_v6  ;;  %v2782_v34 = vcombine.high %v2774_v16, %v2774_v16  ;;  %v3625_v35 = vcombine.low %v2765_v11, %v2774_v16  ;;  %v2798_v11 = vrot.slane %v2784_v28, %v13114_v6 }
 0x305   :  { %1331 = vst.msk [vmem:[#allocation2 + $0x146] sm:$0xff] %vm1290_vm13, %v1203_v26  ;;  %v1201_v50 = vpop.permute.xlu0 %1200  ;;  %v2799_v60 = vcombine.high %v2791_v44, %v2791_v44 }
 0x306   :  { %1330 = vst.msk [vmem:[#allocation2 + $0x13e] sm:$0xfc] %vm1288_vm14, %v1201_v50  ;;  %536 = vrot.lane.b32.xlu1 %v14132_v19, %s12714_s15  ;;  %v3626_v4 = vcombine.low %v2782_v34, %v14533_v30  ;;  %v3633_v14 = vrot.slane %v3625_v35, %v13114_v6  ;;  %v3624_v19 = vcombine.low %v3616_v3, %v3623_v38 }
 0x307   :  { %534 = vrot.lane.b32.xlu0 %v14137_v22, %s12714_s15  ;;  %v2783_v56 = vcombine.high %v14533_v30, %v14533_v30 }
 0x308   :  { %v1433_v37 = vpop.permute.xlu1 %1432  ;;  %v3640_v7 = vrot.slane %v3626_v4, %v13114_v6 }
 0x309   :  { %1561 = vst.msk [vmem:[#allocation2 + $0x148] sm:$0x3f] %vm1520_vm15, %v1433_v37  ;;  %v1431_v39 = vpop.permute.xlu0 %1430  ;;  %v3642_v50 = vcombine.low %v2783_v56, %v2791_v44  ;;  %v3643_v37 = vcombine.low %v2799_v60, %v2798_v11 }
 0x30a   :  { %1560 = vst.msk [vmem:[#allocation2 + $0x140] sm:$0xff] %vm1518_vm2, %v1431_v39  ;;  %766 = vrot.lane.b32.xlu1 %v14214_v32, %s12716_s14  ;;  %v3641_v12 = vcombine.low %v3633_v14, %v3640_v7 }
 0x30b   :  { %764 = vrot.lane.b32.xlu0 %v14219_v62, %s12716_s14  ;;  %v3650_v7 = vrot.slane %v3642_v50, %v13114_v6 }
 0x30c   :  { %v1659_v22 = vpop.permute.xlu1 %1658  ;;  %v3962_v53 = vpack.c.bf16 %v3641_v12, %v3624_v19  ;;  %v3657_v12 = vrot.slane %v3643_v37, %v13114_v6 }
 0x30d   :  { %1787 = vst.msk [vmem:[#allocation2 + $0x147] sm:$0x7f] %vm1746_vm3, %v1659_v22  ;;  %v1657_v1 = vpop.permute.xlu0 %1656 }
 0x30e   :  { %1786 = vst.msk [vmem:[#allocation2 + $0x13f] sm:$0xfe] %vm1744_vm4, %v1657_v1  ;;  %12355 = vmatmul.mubr.msk.bf16.gmra.mrb[64].mxu0 %vm3995_vm6, %v3962_v53  ;;  %992 = vrot.lane.b32.xlu1 %v14214_v32, %s12717_s17 }
 0x30f   :  { %990 = vrot.lane.b32.xlu0 %v14219_v62, %s12717_s17  ;;  %12358 = vmatprep.mubr.msk.bf16.mxu0 %vm19274_vm8, %v19067_v17 }
 0x310   :  { %v1885_v13 = vpop.permute.xlu1 %1884 }
 0x311   :  { %2013 = vst.msk [vmem:[#allocation2 + $0x146] sm:$0xff] %vm19385_vm0, %v1885_v13  ;;  %v1883_v27 = vpop.permute.xlu0 %1882  ;;  %vm19391_vm0 = vcmask 95304   ;;  %v3658_v13 = vcombine.low %v3650_v7, %v3657_v12 }
 0x312   :  { %2012 = vst.msk [vmem:[#allocation2 + $0x13e] sm:$0xfc] %vm19386_vm1, %v1883_v27  ;;  %314 = vrot.lane.b32.xlu1 %v14214_v32, %s12715_s16  ;;  %vm19392_vm1 = vcmask 97352  }
 0x313   :  { %312 = vrot.lane.b32.xlu0 %v14219_v62, %s12715_s16 }
 0x314   :  { %v299_v9 = vpop.permute.xlu1 %298 }
 0x315   :  { %425 = vst.msk [vmem:[#allocation2 + $0x157] sm:$0x7f] %vm382_vm7, %v299_v9  ;;  %v297_v59 = vpop.permute.xlu0 %296 }
 0x316   :  { %424 = vst.msk [vmem:[#allocation2 + $0x14f] sm:$0xfe] %vm380_vm5, %v297_v59  ;;  %1218 = vrot.lane.b32.xlu1 %v14214_v32, %s12718_s22 }
 0x317   :  { %1216 = vrot.lane.b32.xlu0 %v14219_v62, %s12718_s22 }
 0x318   :  { %v525_v54 = vpop.permute.xlu1 %524 }
 0x319   :  { %651 = vst.msk [vmem:[#allocation2 + $0x156] sm:$0xff] %vm19389_vm10, %v525_v54  ;;  %v523_v57 = vpop.permute.xlu0 %522  ;;  %v2068_v45 = vld [vmem:[#allocation2 + $0x140] sm:$0xff]  ;;  %vm19393_vm10 = vcmask 220352  }
 0x31a   :  { %650 = vst.msk [vmem:[#allocation2 + $0x14e] sm:$0xfc] %vm19390_vm9, %v523_v57  ;;  %540 = vrot.lane.b32.xlu1 %v14214_v32, %s12714_s15  ;;  %v2800_v16 = vcombine.high %v2068_v45, %v2068_v45  ;;  %v2807_v10 = vrot.slane %v2068_v45, %v13114_v6  ;;  %vm19394_vm9 = vcmask 220354   ;;  %v2069_v45 = vld [vmem:[#allocation2 + $0x148] sm:$0x3f] }
 0x31b   :  { %538 = vrot.lane.b32.xlu0 %v14219_v62, %s12714_s15  ;;  %v14584_v26 = vpop.f32.mrb[44].mxu0 }
 0x31c   :  { %v12336_v30 = vpop.f32.mrb[45].mxu0  ;;  %v755_v34 = vpop.permute.xlu1 %754  ;;  %v2814_v63 = vrot.slane %v2800_v16, %v13114_v6  ;;  %v2815_v35 = vcombine.high %v2807_v10, %v2807_v10  ;;  %v2817_v16 = vcombine.high %v2069_v45, %v2069_v45 }
 0x31d   :  { %881 = vst.msk [vmem:[#allocation2 + $0x158] sm:$0x3f] %vm19391_vm0, %v755_v34  ;;  %v753_v32 = vpop.permute.xlu0 %752  ;;  %v14588_v3 = vpop.f32.mrb[46].mxu0  ;;  %vm19395_vm0 = vcmask 72752  }
 0x31e   :  { %880 = vst.msk [vmem:[#allocation2 + $0x150] sm:$0xff] %vm19392_vm1, %v753_v32  ;;  %v12337_v4 = vpop.f32.mrb[47].mxu0  ;;  %1448 = vrot.lane.b32.xlu1 %v14304_v42, %s12719_s23  ;;  %v2816_v62 = vcombine.high %v2814_v63, %v2814_v63  ;;  %v3659_v38 = vcombine.low %v2807_v10, %v2815_v35  ;;  %v2824_v10 = vrot.slane %v2069_v45, %v13114_v6  ;;  %vm19396_vm1 = vcmask 72754  }
 0x31f   :  { %1446 = vrot.lane.b32.xlu0 %v14309_v23, %s12719_s23  ;;  %v2831_v35 = vrot.slane %v2817_v16, %v13114_v6 }
 0x320   :  { %v981_v14 = vpop.permute.xlu1 %980  ;;  %v3660_v39 = vcombine.low %v2814_v63, %v2816_v62  ;;  %v3667_v22 = vrot.slane %v3659_v38, %v13114_v6  ;;  %v2832_v50 = vcombine.high %v2824_v10, %v2824_v10 }
 0x321   :  { %1107 = vst.msk [vmem:[#allocation2 + $0x157] sm:$0x7f] %vm1064_vm11, %v981_v14  ;;  %v979_v19 = vpop.permute.xlu0 %978 }
 0x322   :  { %1106 = vst.msk [vmem:[#allocation2 + $0x14f] sm:$0xfe] %vm1062_vm12, %v979_v19  ;;  %770 = vrot.lane.b32.xlu1 %v14304_v42, %s12716_s14  ;;  %v3674_v53 = vrot.slane %v3660_v39, %v13114_v6 }
 0x323   :  { %768 = vrot.lane.b32.xlu0 %v14309_v23, %s12716_s14 }
 0x324   :  { %v1207_v1 = vpop.permute.xlu1 %1206  ;;  %v3675_v27 = vcombine.low %v3667_v22, %v3674_v53 }
 0x325   :  { %1333 = vst.msk [vmem:[#allocation2 + $0x156] sm:$0xff] %vm1290_vm13, %v1207_v1  ;;  %v1205_v55 = vpop.permute.xlu0 %1204 }
 0x326   :  { %1332 = vst.msk [vmem:[#allocation2 + $0x14e] sm:$0xfc] %vm1288_vm14, %v1205_v55  ;;  %1674 = vrot.lane.b32.xlu1 %v14304_v42, %s12720_s24  ;;  %v3963_v9 = vpack.c.bf16 %v3675_v27, %v3658_v13  ;;  %v3676_v27 = vcombine.low %v2824_v10, %v2832_v50  ;;  %v14705_v50 = vld [vmem:[%s19047_s0 + $0x1e8] sm:$0xff] }
 0x327   :  { %1672 = vrot.lane.b32.xlu0 %v14309_v23, %s12720_s24 }
 0x328   :  { %12359 = vmatmul.mubr.msk.bf16.gmra.mrb[68].mxu0 %vm3995_vm6, %v3963_v9  ;;  %v1437_v59 = vpop.permute.xlu1 %1436 }
 0x329   :  { %1563 = vst.msk [vmem:[#allocation2 + $0x158] sm:$0x3f] %vm1520_vm15, %v1437_v59  ;;  %v1435_v28 = vpop.permute.xlu0 %1434  ;;  %12362 = vmatprep.mubr.msk.bf16.mxu0 %vm19274_vm8, %v19067_v17 }
 0x32a   :  { %1562 = vst.msk [vmem:[#allocation2 + $0x150] sm:$0xff] %vm1518_vm2, %v1435_v28  ;;  %996 = vrot.lane.b32.xlu1 %v14304_v42, %s12717_s17 }
 0x32b   :  { %994 = vrot.lane.b32.xlu0 %v14309_v23, %s12717_s17 }
 0x32c   :  { %v1663_v44 = vpop.permute.xlu1 %1662 }
 0x32d   :  { %1789 = vst.msk [vmem:[#allocation2 + $0x157] sm:$0x7f] %vm1746_vm3, %v1663_v44  ;;  %v1661_v54 = vpop.permute.xlu0 %1660 }
 0x32e   :  { %1788 = vst.msk [vmem:[#allocation2 + $0x14f] sm:$0xfe] %vm1744_vm4, %v1661_v54  ;;  %1900 = vrot.lane.b32.xlu1 %v14304_v42, %s12721_s25  ;;  %v3684_v54 = vrot.slane %v3676_v27, %v13114_v6 }
 0x32f   :  { %1898 = vrot.lane.b32.xlu0 %v14309_v23, %s12721_s25 }
 0x330   :  { %v1889_v56 = vpop.permute.xlu1 %1888 }
 0x331   :  { %2015 = vst.msk [vmem:[#allocation2 + $0x156] sm:$0xff] %vm19393_vm10, %v1889_v56  ;;  %v1887_v57 = vpop.permute.xlu0 %1886  ;;  %vm19397_vm10 = vcmask 95304  }
 0x332   :  { %2014 = vst.msk [vmem:[#allocation2 + $0x14e] sm:$0xfc] %vm19394_vm9, %v1887_v57  ;;  %1222 = vrot.lane.b32.xlu1 %v14304_v42, %s12718_s22  ;;  %vm19398_vm9 = vcmask 97352  }
 0x333   :  { %1220 = vrot.lane.b32.xlu0 %v14309_v23, %s12718_s22 }
 0x334   :  { %v303_v11 = vpop.permute.xlu1 %302 }
 0x335   :  { %427 = vst.msk [vmem:[#allocation2 + $0x167] sm:$0x7f] %vm382_vm7, %v303_v11  ;;  %v301_v60 = vpop.permute.xlu0 %300 }
 0x336   :  { %426 = vst.msk [vmem:[#allocation2 + $0x15f] sm:$0xfe] %vm380_vm5, %v301_v60  ;;  %1452 = vrot.lane.b32.xlu1 %v14356_v48, %s12719_s23 }
 0x337   :  { %1450 = vrot.lane.b32.xlu0 %v14361_v51, %s12719_s23 }
 0x338   :  { %v529_v30 = vpop.permute.xlu1 %528  ;;  %v14649_v37 = vld [vmem:[#allocation2 + $0x158] sm:$0x3f] }
 0x339   :  { %653 = vst.msk [vmem:[#allocation2 + $0x166] sm:$0xff] %vm19395_vm0, %v529_v30  ;;  %v527_v34 = vpop.permute.xlu0 %526  ;;  %v2070_v63 = vld [vmem:[#allocation2 + $0x150] sm:$0xff]  ;;  %v14660_v13 = vrot.slane %v14649_v37, %v13114_v6  ;;  %vm19399_vm0 = vcmask 220352  }
 0x33a   :  { %652 = vst.msk [vmem:[#allocation2 + $0x15e] sm:$0xfc] %vm19396_vm1, %v527_v34  ;;  %318 = vrot.lane.b32.xlu1 %v14304_v42, %s12715_s16  ;;  %v2833_v32 = vcombine.high %v2070_v63, %v2070_v63  ;;  %v2840_v4 = vrot.slane %v2070_v63, %v13114_v6  ;;  %vm19400_vm1 = vcmask 220354  }
 0x33b   :  { %316 = vrot.lane.b32.xlu0 %v14309_v23, %s12715_s16  ;;  %v14647_v62 = vpop.f32.mrb[48].mxu0 }
 0x33c   :  { %v12340_v38 = vpop.f32.mrb[49].mxu0  ;;  %v759_v14 = vpop.permute.xlu1 %758  ;;  %v2847_v7 = vrot.slane %v2833_v32, %v13114_v6  ;;  %v2848_v39 = vcombine.high %v2840_v4, %v2840_v4  ;;  %v3677_v19 = vcombine.low %v2831_v35, %v2840_v4  ;;  %v14710_v4 = vld [vmem:[%s19047_s0 + $0x1e0] sm:$0xff] }
 0x33d   :  { %883 = vst.msk [vmem:[#allocation2 + $0x168] sm:$0x3f] %vm19397_vm10, %v759_v14  ;;  %v757_v12 = vpop.permute.xlu0 %756  ;;  %v14653_v22 = vpop.f32.mrb[50].mxu0  ;;  %v2850_v14 = vcombine.high %v14649_v37, %v14649_v37  ;;  %vm19401_vm10 = vcmask 72752  }
 0x33e   :  { %882 = vst.msk [vmem:[#allocation2 + $0x160] sm:$0xff] %vm19398_vm9, %v757_v12  ;;  %v12341_v53 = vpop.f32.mrb[51].mxu0  ;;  %1678 = vrot.lane.b32.xlu1 %v14356_v48, %s12720_s24  ;;  %v2849_v1 = vcombine.high %v2847_v7, %v2847_v7  ;;  %v3693_v55 = vcombine.low %v2848_v39, %v2847_v7  ;;  %v3691_v59 = vrot.slane %v3677_v19, %v13114_v6  ;;  %vm19402_vm9 = vcmask 72754  }
 0x33f   :  { %1676 = vrot.lane.b32.xlu0 %v14361_v51, %s12720_s24  ;;  %v2864_v37 = vrot.slane %v2850_v14, %v13114_v6 }
 0x340   :  { %v985_v9 = vpop.permute.xlu1 %984  ;;  %v3694_v28 = vcombine.low %v2849_v1, %v14660_v13  ;;  %v3701_v56 = vrot.slane %v3693_v55, %v13114_v6  ;;  %v3692_v11 = vcombine.low %v3684_v54, %v3691_v59  ;;  %v2865_v1 = vcombine.high %v14660_v13, %v14660_v13 }
 0x341   :  { %1109 = vst.msk [vmem:[#allocation2 + $0x167] sm:$0x7f] %vm1064_vm11, %v985_v9  ;;  %v983_v44 = vpop.permute.xlu0 %982 }
 0x342   :  { %1108 = vst.msk [vmem:[#allocation2 + $0x15f] sm:$0xfe] %vm1062_vm12, %v983_v44  ;;  %544 = vrot.lane.b32.xlu1 %v14304_v42, %s12714_s15  ;;  %v3708_v57 = vrot.slane %v3694_v28, %v13114_v6 }
 0x343   :  { %542 = vrot.lane.b32.xlu0 %v14309_v23, %s12714_s15 }
 0x344   :  { %v1211_v45 = vpop.permute.xlu1 %1210  ;;  %v3709_v60 = vcombine.low %v3701_v56, %v3708_v57 }
 0x345   :  { %1335 = vst.msk [vmem:[#allocation2 + $0x166] sm:$0xff] %vm1290_vm13, %v1211_v45  ;;  %v1209_v16 = vpop.permute.xlu0 %1208 }
 0x346   :  { %1334 = vst.msk [vmem:[#allocation2 + $0x15e] sm:$0xfc] %vm1288_vm14, %v1209_v16  ;;  %1904 = vrot.lane.b32.xlu1 %v14356_v48, %s12721_s25  ;;  %v3964_v42 = vpack.c.bf16 %v3709_v60, %v3692_v11  ;;  %v3710_v60 = vcombine.low %v2865_v1, %v2864_v37 }
 0x347   :  { %1902 = vrot.lane.b32.xlu0 %v14361_v51, %s12721_s25 }
 0x348   :  { %12363 = vmatmul.mubr.msk.bf16.gmra.mrb[72].mxu0 %vm3995_vm6, %v3964_v42  ;;  %v1441_v10 = vpop.permute.xlu1 %1440 }
 0x349   :  { %1565 = vst.msk [vmem:[#allocation2 + $0x168] sm:$0x3f] %vm1520_vm15, %v1441_v10  ;;  %v1439_v23 = vpop.permute.xlu0 %1438  ;;  %12366 = vmatprep.mubr.msk.bf16.mxu0 %vm19274_vm8, %v19067_v17 }
 0x34a   :  { %1564 = vst.msk [vmem:[#allocation2 + $0x160] sm:$0xff] %vm1518_vm2, %v1439_v23  ;;  %774 = vrot.lane.b32.xlu1 %v14356_v48, %s12716_s14 }
 0x34b   :  { %772 = vrot.lane.b32.xlu0 %v14361_v51, %s12716_s14 }
 0x34c   :  { %v1667_v30 = vpop.permute.xlu1 %1666 }
 0x34d   :  { %1791 = vst.msk [vmem:[#allocation2 + $0x167] sm:$0x7f] %vm1746_vm3, %v1667_v30  ;;  %v1665_v34 = vpop.permute.xlu0 %1664 }
 0x34e   :  { %1790 = vst.msk [vmem:[#allocation2 + $0x15f] sm:$0xfe] %vm1744_vm4, %v1665_v34  ;;  %1000 = vrot.lane.b32.xlu1 %v14356_v48, %s12717_s17 }
 0x34f   :  { %998 = vrot.lane.b32.xlu0 %v14361_v51, %s12717_s17 }
 0x350   :  { %v1893_v63 = vpop.permute.xlu1 %1892 }
 0x351   :  { %2017 = vst.msk [vmem:[#allocation2 + $0x166] sm:$0xff] %vm19399_vm0, %v1893_v63  ;;  %v1891_v35 = vpop.permute.xlu0 %1890  ;;  %vm19403_vm0 = vcmask 95304   ;;  %v3718_v63 = vrot.slane %v3710_v60, %v13114_v6 }
 0x352   :  { %2016 = vst.msk [vmem:[#allocation2 + $0x15e] sm:$0xfc] %vm19400_vm1, %v1891_v35  ;;  %1226 = vrot.lane.b32.xlu1 %v14356_v48, %s12718_s22  ;;  %vm19404_vm1 = vcmask 97352  }
 0x353   :  { %1224 = vrot.lane.b32.xlu0 %v14361_v51, %s12718_s22 }
 0x354   :  { %v307_v32 = vpop.permute.xlu1 %306 }
 0x355   :  { %429 = vst.msk [vmem:[#allocation2 + $0x177] sm:$0x7f] %vm382_vm7, %v307_v32  ;;  %v305_v38 = vpop.permute.xlu0 %304 }
 0x356   :  { %428 = vst.msk [vmem:[#allocation2 + $0x16f] sm:$0xfe] %vm380_vm5, %v305_v38  ;;  %1456 = vrot.lane.b32.xlu1 %v14705_v50, %s12719_s23 }
 0x357   :  { %1454 = vrot.lane.b32.xlu0 %v14710_v4, %s12719_s23 }
 0x358   :  { %v533_v7 = vpop.permute.xlu1 %532  ;;  %v14720_v39 = vld [vmem:[#allocation2 + $0x168] sm:$0x3f] }
 0x359   :  { %655 = vst.msk [vmem:[#allocation2 + $0x176] sm:$0xff] %vm19401_vm10, %v533_v7  ;;  %v531_v19 = vpop.permute.xlu0 %530  ;;  %v2072_v12 = vld [vmem:[#allocation2 + $0x160] sm:$0xff]  ;;  %v2890_v53 = vrot.slane %v14720_v39, %v13114_v6  ;;  %vm19405_vm10 = vcmask 220352  }
 0x35a   :  { %654 = vst.msk [vmem:[#allocation2 + $0x16e] sm:$0xfc] %vm19402_vm9, %v531_v19  ;;  %1682 = vrot.lane.b32.xlu1 %v14705_v50, %s12720_s24  ;;  %v2866_v27 = vcombine.high %v2072_v12, %v2072_v12  ;;  %v2873_v55 = vrot.slane %v2072_v12, %v13114_v6  ;;  %vm19406_vm9 = vcmask 220354  }
 0x35b   :  { %1680 = vrot.lane.b32.xlu0 %v14710_v4, %s12720_s24  ;;  %v14734_v9 = vpop.f32.mrb[52].mxu0  ;;  %v2898_v59 = vcombine.high %v2890_v53, %v2890_v53 }
 0x35c   :  { %v12344_v28 = vpop.f32.mrb[53].mxu0  ;;  %v763_v44 = vpop.permute.xlu1 %762  ;;  %v2880_v54 = vrot.slane %v2866_v27, %v13114_v6  ;;  %v2881_v56 = vcombine.high %v2873_v55, %v2873_v55 }
 0x35d   :  { %885 = vst.msk [vmem:[#allocation2 + $0x178] sm:$0x3f] %vm19403_vm0, %v763_v44  ;;  %v761_v57 = vpop.permute.xlu0 %760  ;;  %v14738_v45 = vpop.f32.mrb[54].mxu0  ;;  %v3728_v42 = vcombine.low %v2890_v53, %v2898_v59  ;;  %v96_v28 = vld [vmem:[%s19047_s0 + $0x1f0] sm:$0xff]  ;;  %vm19407_vm0 = vcmask 72752  }
 0x35e   :  { %884 = vst.msk [vmem:[#allocation2 + $0x170] sm:$0xff] %vm19404_vm1, %v761_v57  ;;  %v12345_v13 = vpop.f32.mrb[55].mxu0  ;;  %1908 = vrot.lane.b32.xlu1 %v14705_v50, %s12721_s25  ;;  %v2882_v11 = vcombine.high %v2880_v54, %v2880_v54  ;;  %v3711_v16 = vcombine.low %v2873_v55, %v2881_v56  ;;  %v97_v55 = vld [vmem:[%s19047_s0 + $0x1f8] sm:$0xff]  ;;  %vm19408_vm1 = vcmask 72754  }
 0x35f   :  { %1906 = vrot.lane.b32.xlu0 %v14710_v4, %s12721_s25  ;;  %v3742_v32 = vrot.slane %v3728_v42, %v13114_v6 }
 0x360   :  { %v989_v10 = vpop.permute.xlu1 %988  ;;  %v3725_v23 = vrot.slane %v3711_v16, %v13114_v6  ;;  %v3727_v30 = vcombine.low %v2880_v54, %v2882_v11  ;;  %v2883_v54 = vcombine.high %v14720_v39, %v14720_v39 }
 0x361   :  { %1111 = vst.msk [vmem:[#allocation2 + $0x177] sm:$0x7f] %vm1064_vm11, %v989_v10  ;;  %v987_v34 = vpop.permute.xlu0 %986 }
 0x362   :  { %1110 = vst.msk [vmem:[#allocation2 + $0x16f] sm:$0xfe] %vm1062_vm12, %v987_v34  ;;  %322 = vrot.lane.b32.xlu1 %v14356_v48, %s12715_s16  ;;  %v3735_v35 = vrot.slane %v3727_v30, %v13114_v6  ;;  %v3726_v14 = vcombine.low %v3718_v63, %v3725_v23  ;;  %v2897_v23 = vrot.slane %v2883_v54, %v13114_v6 }
 0x363   :  { %320 = vrot.lane.b32.xlu0 %v14361_v51, %s12715_s16 }
 0x364   :  { %v1215_v38 = vpop.permute.xlu1 %1214  ;;  %v3743_v7 = vcombine.low %v3735_v35, %v3742_v32 }
 0x365   :  { %1337 = vst.msk [vmem:[#allocation2 + $0x176] sm:$0xff] %vm1290_vm13, %v1215_v38  ;;  %v1213_v19 = vpop.permute.xlu0 %1212 }
 0x366   :  { %1336 = vst.msk [vmem:[#allocation2 + $0x16e] sm:$0xfc] %vm1288_vm14, %v1213_v19  ;;  %548 = vrot.lane.b32.xlu1 %v14356_v48, %s12714_s15  ;;  %v3965_v12 = vpack.c.bf16 %v3743_v7, %v3726_v14 }
 0x367   :  { %546 = vrot.lane.b32.xlu0 %v14361_v51, %s12714_s15 }
 0x368   :  { %12367 = vmatmul.mubr.msk.bf16.gmra.mrb[76].mxu0 %vm3995_vm6, %v3965_v12  ;;  %v1445_v53 = vpop.permute.xlu1 %1444 }
 0x369   :  { %1567 = vst.msk [vmem:[#allocation2 + $0x178] sm:$0x3f] %vm1520_vm15, %v1445_v53  ;;  %v1443_v37 = vpop.permute.xlu0 %1442  ;;  %12370 = vmatprep.mubr.msk.bf16.mxu0 %vm19274_vm8, %v19067_v17 }
 0x36a   :  { %1566 = vst.msk [vmem:[#allocation2 + $0x170] sm:$0xff] %vm1518_vm2, %v1443_v37  ;;  %778 = vrot.lane.b32.xlu1 %v14705_v50, %s12716_s14 }
 0x36b   :  { %776 = vrot.lane.b32.xlu0 %v14710_v4, %s12716_s14 }
 0x36c   :  { %v1671_v48 = vpop.permute.xlu1 %1670 }
 0x36d   :  { %1793 = vst.msk [vmem:[#allocation2 + $0x177] sm:$0x7f] %vm1746_vm3, %v1671_v48  ;;  %v1669_v51 = vpop.permute.xlu0 %1668 }
 0x36e   :  { %1792 = vst.msk [vmem:[#allocation2 + $0x16f] sm:$0xfe] %vm1744_vm4, %v1669_v51  ;;  %1004 = vrot.lane.b32.xlu1 %v14705_v50, %s12717_s17 }
 0x36f   :  { %1002 = vrot.lane.b32.xlu0 %v14710_v4, %s12717_s17 }
 0x370   :  { %v1897_v1 = vpop.permute.xlu1 %1896 }
 0x371   :  { %2019 = vst.msk [vmem:[#allocation2 + $0x176] sm:$0xff] %vm19405_vm10, %v1897_v1  ;;  %v1895_v27 = vpop.permute.xlu0 %1894  ;;  %vm19409_vm10 = vcmask 95304  }
 0x372   :  { %2018 = vst.msk [vmem:[#allocation2 + $0x16e] sm:$0xfc] %vm19406_vm9, %v1895_v27  ;;  %1230 = vrot.lane.b32.xlu1 %v14705_v50, %s12718_s22  ;;  %vm19410_vm9 = vcmask 97352  }
 0x373   :  { %1228 = vrot.lane.b32.xlu0 %v14710_v4, %s12718_s22 }
 0x374   :  { %v311_v59 = vpop.permute.xlu1 %310 }
 0x375   :  { %431 = vst.msk [vmem:[#allocation2 + $0x187] sm:$0x7f] %vm382_vm7, %v311_v59  ;;  %v309_v44 = vpop.permute.xlu0 %308 }
 0x376   :  { %430 = vst.msk [vmem:[#allocation2 + $0x17f] sm:$0xfe] %vm380_vm5, %v309_v44  ;;  %1460 = vrot.lane.b32.xlu1 %v97_v55, %s12719_s23 }
 0x377   :  { %1458 = vrot.lane.b32.xlu0 %v96_v28, %s12719_s23 }
 0x378   :  { %v537_v50 = vpop.permute.xlu1 %536  ;;  %v2075_v4 = vld [vmem:[#allocation2 + $0x178] sm:$0x3f] }
 0x379   :  { %657 = vst.msk [vmem:[#allocation2 + $0x186] sm:$0xff] %vm19407_vm0, %v537_v50  ;;  %v535_v56 = vpop.permute.xlu0 %534  ;;  %v2074_v57 = vld [vmem:[#allocation2 + $0x170] sm:$0xff]  ;;  %v2916_v13 = vcombine.high %v2075_v4, %v2075_v4  ;;  %v2923_v11 = vrot.slane %v2075_v4, %v13114_v6 }
 0x37a   :  { %656 = vst.msk [vmem:[#allocation2 + $0x17e] sm:$0xfc] %vm19408_vm1, %v535_v56  ;;  %1686 = vrot.lane.b32.xlu1 %v97_v55, %s12720_s24  ;;  %v2899_v60 = vcombine.high %v2074_v57, %v2074_v57  ;;  %v2906_v16 = vrot.slane %v2074_v57, %v13114_v6 }
 0x37b   :  { %1684 = vrot.lane.b32.xlu0 %v96_v28, %s12720_s24  ;;  %v2930_v42 = vrot.slane %v2916_v13, %v13114_v6  ;;  %v2931_v10 = vcombine.high %v2923_v11, %v2923_v11 }
 0x37c   :  { %v767_v39 = vpop.permute.xlu1 %766  ;;  %v2913_v30 = vrot.slane %v2899_v60, %v13114_v6  ;;  %v2914_v34 = vcombine.high %v2906_v16, %v2906_v16  ;;  %v3744_v32 = vcombine.low %v2897_v23, %v2906_v16 }
 0x37d   :  { %887 = vst.msk [vmem:[#allocation2 + $0x188] sm:$0x3f] %vm19409_vm10, %v767_v39  ;;  %v765_v63 = vpop.permute.xlu0 %764  ;;  %v3762_v14 = vcombine.low %v2931_v10, %v2930_v42 }
 0x37e   :  { %886 = vst.msk [vmem:[#allocation2 + $0x180] sm:$0xff] %vm19410_vm9, %v765_v63  ;;  %1912 = vrot.lane.b32.xlu1 %v97_v55, %s12721_s25  ;;  %v2915_v35 = vcombine.high %v2913_v30, %v2913_v30  ;;  %v3745_v38 = vcombine.low %v2914_v34, %v2913_v30  ;;  %v3752_v37 = vrot.slane %v3744_v32, %v13114_v6 }
 0x37f   :  { %1910 = vrot.lane.b32.xlu0 %v96_v28, %s12721_s25  ;;  %v3776_v51 = vrot.slane %v3762_v14, %v13114_v6 }
 0x380   :  { %v993_v7 = vpop.permute.xlu1 %992  ;;  %v3759_v19 = vrot.slane %v3745_v38, %v13114_v6  ;;  %v3761_v12 = vcombine.low %v2915_v35, %v2923_v11 }
 0x381   :  { %1113 = vst.msk [vmem:[#allocation2 + $0x187] sm:$0x7f] %vm1064_vm11, %v993_v7  ;;  %v991_v53 = vpop.permute.xlu0 %990 }
 0x382   :  { %1112 = vst.msk [vmem:[#allocation2 + $0x17f] sm:$0xfe] %vm1062_vm12, %v991_v53  ;;  %v3769_v48 = vrot.slane %v3761_v12, %v13114_v6  ;;  %v3760_v27 = vcombine.low %v3752_v37, %v3759_v19 }
 0x384   :  { %v315_v1 = vpop.permute.xlu1 %314  ;;  %v3777_v55 = vcombine.low %v3769_v48, %v3776_v51 }
 0x385   :  { %433 = vst.msk [vmem:[#allocation2 + $0x197] sm:$0x7f] %vm382_vm7, %v315_v1  ;;  %v313_v59 = vpop.permute.xlu0 %312 }
 0x386   :  { %432 = vst.msk [vmem:[#allocation2 + $0x18f] sm:$0xfe] %vm380_vm5, %v313_v59  ;;  %v3966_v28 = vpack.c.bf16 %v3777_v55, %v3760_v27 }
 0x388   :  { %12371 = vmatmul.mubr.msk.bf16.gmra.mrb[80].mxu0 %vm3995_vm6, %v3966_v28  ;;  %v1219_v44 = vpop.permute.xlu1 %1218 }
 0x389   :  { %1339 = vst.msk [vmem:[#allocation2 + $0x186] sm:$0xff] %vm1290_vm13, %v1219_v44  ;;  %v1217_v50 = vpop.permute.xlu0 %1216  ;;  %12374 = vmatprep.mubr.msk.bf16.mxu0 %vm19274_vm8, %v19067_v17 }
 0x38a   :  { %1338 = vst.msk [vmem:[#allocation2 + $0x17e] sm:$0xfc] %vm1288_vm14, %v1217_v50 }
 0x38c   :  { %v541_v4 = vpop.permute.xlu1 %540 }
 0x38d   :  { %659 = vst.msk [vmem:[#allocation2 + $0x196] sm:$0xff] %vm19407_vm0, %v541_v4  ;;  %v539_v54 = vpop.permute.xlu0 %538  ;;  %vm19411_vm0 = vcmask 220352  }
 0x38e   :  { %658 = vst.msk [vmem:[#allocation2 + $0x18e] sm:$0xfc] %vm19408_vm1, %v539_v54  ;;  %vm19412_vm1 = vcmask 220354  }
 0x390   :  { %v1449_v56 = vpop.permute.xlu1 %1448 }
 0x391   :  { %1569 = vst.msk [vmem:[#allocation2 + $0x188] sm:$0x3f] %vm1520_vm15, %v1449_v56  ;;  %v1447_v57 = vpop.permute.xlu0 %1446 }
 0x392   :  { %1568 = vst.msk [vmem:[#allocation2 + $0x180] sm:$0xff] %vm1518_vm2, %v1447_v57 }
 0x394   :  { %v771_v13 = vpop.permute.xlu1 %770 }
 0x395   :  { %889 = vst.msk [vmem:[#allocation2 + $0x198] sm:$0x3f] %vm19409_vm10, %v771_v13  ;;  %v769_v11 = vpop.permute.xlu0 %768  ;;  %vm19413_vm10 = vcmask 72752  }
 0x396   :  { %888 = vst.msk [vmem:[#allocation2 + $0x190] sm:$0xff] %vm19410_vm9, %v769_v11  ;;  %vm19414_vm9 = vcmask 72754  }
 0x398   :  { %v1675_v60 = vpop.permute.xlu1 %1674 }
 0x399   :  { %1795 = vst.msk [vmem:[#allocation2 + $0x187] sm:$0x7f] %vm1746_vm3, %v1675_v60  ;;  %v1673_v16 = vpop.permute.xlu0 %1672 }
 0x39a   :  { %1794 = vst.msk [vmem:[#allocation2 + $0x17f] sm:$0xfe] %vm1744_vm4, %v1673_v16 }
 0x39c   :  { %v997_v42 = vpop.permute.xlu1 %996 }
 0x39d   :  { %1115 = vst.msk [vmem:[#allocation2 + $0x197] sm:$0x7f] %vm1064_vm11, %v997_v42  ;;  %v995_v10 = vpop.permute.xlu0 %994 }
 0x39e   :  { %1114 = vst.msk [vmem:[#allocation2 + $0x18f] sm:$0xfe] %vm1062_vm12, %v995_v10 }
 0x39f   :  { %v14830_v39 = vpop.f32.mrb[56].mxu0 }
 0x3a0   :  { %v12348_v23 = vpop.f32.mrb[57].mxu0  ;;  %v1901_v30 = vpop.permute.xlu1 %1900 }
 0x3a1   :  { %2021 = vst.msk [vmem:[#allocation2 + $0x186] sm:$0xff] %vm19411_vm0, %v1901_v30  ;;  %v1899_v34 = vpop.permute.xlu0 %1898  ;;  %v14833_v63 = vpop.f32.mrb[58].mxu0 }
 0x3a2   :  { %2020 = vst.msk [vmem:[#allocation2 + $0x17e] sm:$0xfc] %vm19412_vm1, %v1899_v34  ;;  %v12349_v35 = vpop.f32.mrb[59].mxu0 }
 0x3a4   :  { %v1223_v32 = vpop.permute.xlu1 %1222 }
 0x3a5   :  { %1341 = vst.msk [vmem:[#allocation2 + $0x196] sm:$0xff] %vm1290_vm13, %v1223_v32  ;;  %v1221_v38 = vpop.permute.xlu0 %1220 }
 0x3a6   :  { %1340 = vst.msk [vmem:[#allocation2 + $0x18e] sm:$0xfc] %vm1288_vm14, %v1221_v38 }
 0x3a8   :  { %v1453_v14 = vpop.permute.xlu1 %1452  ;;  %v2077_v55 = vld [vmem:[#allocation2 + $0x188] sm:$0x3f] }
 0x3a9   :  { %1571 = vst.msk [vmem:[#allocation2 + $0x198] sm:$0x3f] %vm1520_vm15, %v1453_v14  ;;  %v1451_v7 = vpop.permute.xlu0 %1450  ;;  %v2076_v48 = vld [vmem:[#allocation2 + $0x180] sm:$0xff]  ;;  %v2956_v56 = vrot.slane %v2077_v55, %v13114_v6  ;;  %v2949_v10 = vcombine.high %v2077_v55, %v2077_v55 }
 0x3aa   :  { %1570 = vst.msk [vmem:[#allocation2 + $0x190] sm:$0xff] %vm1518_vm2, %v1451_v7  ;;  %v2932_v1 = vcombine.high %v2076_v48, %v2076_v48  ;;  %v2939_v54 = vrot.slane %v2076_v48, %v13114_v6 }
 0x3ab   :  { %v2964_v23 = vcombine.high %v2956_v56, %v2956_v56  ;;  %v2963_v38 = vrot.slane %v2949_v10, %v13114_v6 }
 0x3ac   :  { %v319_v19 = vpop.permute.xlu1 %318  ;;  %v2946_v28 = vrot.slane %v2932_v1, %v13114_v6  ;;  %v2947_v42 = vcombine.high %v2939_v54, %v2939_v54 }
 0x3ad   :  { %435 = vst.msk [vmem:[#allocation2 + $0x1a7] sm:$0x7f] %vm382_vm7, %v319_v19  ;;  %v317_v12 = vpop.permute.xlu0 %316  ;;  %v3795_v19 = vcombine.low %v2956_v56, %v2964_v23 }
 0x3ae   :  { %434 = vst.msk [vmem:[#allocation2 + $0x19f] sm:$0xfe] %vm380_vm5, %v317_v12  ;;  %v2948_v60 = vcombine.high %v2946_v28, %v2946_v28  ;;  %v3778_v7 = vcombine.low %v2939_v54, %v2947_v42 }
 0x3af   :  { %v3803_v1 = vrot.slane %v3795_v19, %v13114_v6 }
 0x3b0   :  { %v1679_v53 = vpop.permute.xlu1 %1678  ;;  %v3779_v34 = vcombine.low %v2946_v28, %v2948_v60 }
 0x3b1   :  { %1797 = vst.msk [vmem:[#allocation2 + $0x197] sm:$0x7f] %vm1746_vm3, %v1679_v53  ;;  %v1677_v37 = vpop.permute.xlu0 %1676 }
 0x3b2   :  { %1796 = vst.msk [vmem:[#allocation2 + $0x18f] sm:$0xfe] %vm1744_vm4, %v1677_v37  ;;  %v3793_v53 = vrot.slane %v3779_v34, %v13114_v6 }
 0x3b4   :  { %v545_v51 = vpop.permute.xlu1 %544 }
 0x3b5   :  { %661 = vst.msk [vmem:[#allocation2 + $0x1a6] sm:$0xff] %vm19413_vm10, %v545_v51  ;;  %v543_v27 = vpop.permute.xlu0 %542  ;;  %vm19415_vm10 = vcmask 95304   ;;  %v3786_v51 = vrot.slane %v3778_v7, %v13114_v6 }
 0x3b6   :  { %660 = vst.msk [vmem:[#allocation2 + $0x19e] sm:$0xfc] %vm19414_vm9, %v543_v27  ;;  %vm19416_vm9 = vcmask 97352  }
 0x3b8   :  { %v1905_v59 = vpop.permute.xlu1 %1904 }
 0x3b9   :  { %2023 = vst.msk [vmem:[#allocation2 + $0x196] sm:$0xff] %vm19411_vm0, %v1905_v59  ;;  %v1903_v44 = vpop.permute.xlu0 %1902  ;;  %v14848_v50 = vpop.f32.mrb[60].mxu0  ;;  %v3794_v59 = vcombine.low %v3786_v51, %v3793_v53 }
 0x3ba   :  { %2022 = vst.msk [vmem:[#allocation2 + $0x18e] sm:$0xfc] %vm19412_vm1, %v1903_v44  ;;  %v12352_v4 = vpop.f32.mrb[61].mxu0 }
 0x3bb   :  { %v14853_v57 = vpop.f32.mrb[62].mxu0 }
 0x3bc   :  { %v12353_v13 = vpop.f32.mrb[63].mxu0  ;;  %v775_v11 = vpop.permute.xlu1 %774 }
 0x3bd   :  { %891 = vst.msk [vmem:[#allocation2 + $0x1a8] sm:$0x3f] %vm19415_vm10, %v775_v11  ;;  %v773_v16 = vpop.permute.xlu0 %772  ;;  %vm19417_vm10 = vcmask 72752  }
 0x3be   :  { %890 = vst.msk [vmem:[#allocation2 + $0x1a0] sm:$0xff] %vm19416_vm9, %v773_v16  ;;  %vm19418_vm9 = vcmask 72754  }
 0x3c0   :  { %v1001_v30 = vpop.permute.xlu1 %1000  ;;  %v2079_v16 = vld [vmem:[#allocation2 + $0x198] sm:$0x3f] }
 0x3c1   :  { %1117 = vst.msk [vmem:[#allocation2 + $0x1a7] sm:$0x7f] %vm1064_vm11, %v1001_v30  ;;  %v999_v35 = vpop.permute.xlu0 %998  ;;  %v2078_v32 = vld [vmem:[#allocation2 + $0x190] sm:$0xff]  ;;  %v2982_v23 = vcombine.high %v2079_v16, %v2079_v16  ;;  %v2989_v30 = vrot.slane %v2079_v16, %v13114_v6 }
 0x3c2   :  { %1116 = vst.msk [vmem:[#allocation2 + $0x19f] sm:$0xfe] %vm1062_vm12, %v999_v35  ;;  %v2972_v14 = vrot.slane %v2078_v32, %v13114_v6  ;;  %v2965_v13 = vcombine.high %v2078_v32, %v2078_v32 }
 0x3c3   :  { %v2996_v7 = vrot.slane %v2982_v23, %v13114_v6  ;;  %v2997_v19 = vcombine.high %v2989_v30, %v2989_v30 }
 0x3c4   :  { %v1227_v12 = vpop.permute.xlu1 %1226  ;;  %v3796_v37 = vcombine.low %v2963_v38, %v2972_v14  ;;  %v2979_v42 = vrot.slane %v2965_v13, %v13114_v6  ;;  %v2980_v38 = vcombine.high %v2972_v14, %v2972_v14 }
 0x3c5   :  { %1343 = vst.msk [vmem:[#allocation2 + $0x1a6] sm:$0xff] %vm1290_vm13, %v1227_v12  ;;  %v1225_v48 = vpop.permute.xlu0 %1224 }
 0x3c6   :  { %1342 = vst.msk [vmem:[#allocation2 + $0x19e] sm:$0xfc] %vm1288_vm14, %v1225_v48  ;;  %v3810_v27 = vrot.slane %v3796_v37, %v13114_v6  ;;  %v2981_v35 = vcombine.high %v2979_v42, %v2979_v42 }
 0x3c8   :  { %v1457_v55 = vpop.permute.xlu1 %1456  ;;  %v3811_v28 = vcombine.low %v3803_v1, %v3810_v27  ;;  %v3813_v48 = vcombine.low %v2981_v35, %v2989_v30  ;;  %v3812_v27 = vcombine.low %v2980_v38, %v2979_v42 }
 0x3c9   :  { %1573 = vst.msk [vmem:[#allocation2 + $0x1a8] sm:$0x3f] %vm1520_vm15, %v1457_v55  ;;  %v1455_v44 = vpop.permute.xlu0 %1454  ;;  %v3829_v55 = vcombine.low %v2997_v19, %v2996_v7 }
 0x3ca   :  { %1572 = vst.msk [vmem:[#allocation2 + $0x1a0] sm:$0xff] %vm1518_vm2, %v1455_v44  ;;  %v3967_v4 = vpack.c.bf16 %v3811_v28, %v3794_v59  ;;  %v3827_v14 = vrot.slane %v3813_v48, %v13114_v6 }
 0x3cc   :  { %12375 = vmatmul.mubr.msk.bf16.gmra.mrb[84].mxu0 %vm3995_vm6, %v3967_v4  ;;  %v1683_v54 = vpop.permute.xlu1 %1682  ;;  %v3820_v4 = vrot.slane %v3812_v27, %v13114_v6 }
 0x3cd   :  { %1799 = vst.msk [vmem:[#allocation2 + $0x1a7] sm:$0x7f] %vm1746_vm3, %v1683_v54  ;;  %v1681_v56 = vpop.permute.xlu0 %1680  ;;  %12378 = vmatprep.mubr.msk.bf16.mxu0 %vm19274_vm8, %v19067_v17  ;;  %v3837_v54 = vrot.slane %v3829_v55, %v13114_v6 }
 0x3ce   :  { %1798 = vst.msk [vmem:[#allocation2 + $0x19f] sm:$0xfe] %vm1744_vm4, %v1681_v56  ;;  %v3828_v16 = vcombine.low %v3820_v4, %v3827_v14 }
 0x3d0   :  { %v1909_v11 = vpop.permute.xlu1 %1908 }
 0x3d1   :  { %2025 = vst.msk [vmem:[#allocation2 + $0x1a6] sm:$0xff] %vm19411_vm0, %v1909_v11  ;;  %v1907_v60 = vpop.permute.xlu0 %1906 }
 0x3d2   :  { %2024 = vst.msk [vmem:[#allocation2 + $0x19e] sm:$0xfc] %vm19412_vm1, %v1907_v60 }
 0x3d4   :  { %v323_v10 = vpop.permute.xlu1 %322 }
 0x3d5   :  { %437 = vst.msk [vmem:[#allocation2 + $0x1b7] sm:$0x7f] %vm382_vm7, %v323_v10  ;;  %v321_v34 = vpop.permute.xlu0 %320  ;;  %vm19420_vm7 = vcmask 97352  }
 0x3d6   :  { %436 = vst.msk [vmem:[#allocation2 + $0x1af] sm:$0xfe] %vm380_vm5, %v321_v34  ;;  %vm19419_vm5 = vcmask 95304  }
 0x3d8   :  { %v549_v32 = vpop.permute.xlu1 %548 }
 0x3d9   :  { %663 = vst.msk [vmem:[#allocation2 + $0x1b6] sm:$0xff] %vm19417_vm10, %v549_v32  ;;  %v547_v12 = vpop.permute.xlu0 %546  ;;  %v2080_v53 = vld [vmem:[#allocation2 + $0x1a0] sm:$0xff]  ;;  %vm10247_vm10 = vcmask 1040384  }
 0x3da   :  { %662 = vst.msk [vmem:[#allocation2 + $0x1ae] sm:$0xfc] %vm19418_vm9, %v547_v12  ;;  %v3005_v37 = vrot.slane %v2080_v53, %v13114_v6  ;;  %v2998_v12 = vcombine.high %v2080_v53, %v2080_v53 }
 0x3dc   :  { %v779_v51 = vpop.permute.xlu1 %778  ;;  %v3013_v1 = vcombine.high %v3005_v37, %v3005_v37 }
 0x3dd   :  { %893 = vst.msk [vmem:[#allocation2 + $0x1b8] sm:$0x3f] %vm19419_vm5, %v779_v51  ;;  %v777_v59 = vpop.permute.xlu0 %776  ;;  %v2081_v51 = vld [vmem:[#allocation2 + $0x1a8] sm:$0x3f]  ;;  %vm10250_vm5 = vcmask 1046534  }
 0x3de   :  { %892 = vst.msk [vmem:[#allocation2 + $0x1b0] sm:$0xff] %vm19420_vm7, %v777_v59  ;;  %v3830_v28 = vcombine.low %v3005_v37, %v3013_v1  ;;  %v3012_v1 = vrot.slane %v2998_v12, %v13114_v6  ;;  %v3022_v27 = vrot.slane %v2081_v51, %v13114_v6  ;;  %v3015_v59 = vcombine.high %v2081_v51, %v2081_v51 }
 0x3e0   :  { %v1005_v44 = vpop.permute.xlu1 %1004  ;;  %v3844_v56 = vrot.slane %v3830_v28, %v13114_v6  ;;  %v3014_v55 = vcombine.high %v3012_v1, %v3012_v1  ;;  %v3030_v14 = vcombine.high %v3022_v27, %v3022_v27  ;;  %v3029_v53 = vrot.slane %v3015_v59, %v13114_v6 }
 0x3e1   :  { %1119 = vst.msk [vmem:[#allocation2 + $0x1b7] sm:$0x7f] %vm1064_vm11, %v1005_v44  ;;  %v1003_v13 = vpop.permute.xlu0 %1002  ;;  %v14891_v11 = vpop.f32.mrb[64].mxu0  ;;  %vm19421_vm11 = vmmov %vm19411_vm0  ;;  %vm10113_vm0 = vcmask 519168  }
 0x3e2   :  { %1118 = vst.msk [vmem:[#allocation2 + $0x1af] sm:$0xfe] %vm1062_vm12, %v1003_v13  ;;  %v12356_v60 = vpop.f32.mrb[65].mxu0  ;;  %v3845_v42 = vcombine.low %v3837_v54, %v3844_v56  ;;  %vm19422_vm12 = vmmov %vm19412_vm1  ;;  %v3846_v4 = vcombine.low %v3012_v1, %v3014_v55  ;;  %vm9731_vm1 = vcmask 517120  }
 0x3e3   :  { %v14894_v10 = vpop.f32.mrb[66].mxu0 }
 0x3e4   :  { %v12357_v23 = vpop.f32.mrb[67].mxu0  ;;  %v1231_v30 = vpop.permute.xlu1 %1230  ;;  %v3968_v34 = vpack.c.bf16 %v3845_v42, %v3828_v16 }
 0x3e5   :  { %1345 = vst.msk [vmem:[#allocation2 + $0x1b6] sm:$0xff] %vm1290_vm13, %v1231_v30  ;;  %v1229_v35 = vpop.permute.xlu0 %1228  ;;  %vm6700_vm13 = vcmask 1042434  }
 0x3e6   :  { %1344 = vst.msk [vmem:[#allocation2 + $0x1ae] sm:$0xfc] %vm1288_vm14, %v1229_v35  ;;  %12379 = vmatmul.mubr.msk.bf16.gmra.mrb[88].mxu0 %vm3995_vm6, %v3968_v34  ;;  %v3847_v34 = vcombine.low %v3022_v27, %v3030_v14  ;;  %vm6698_vm14 = vcmask 1041409   ;;  %vm10248_vm9 = vmor %vm10247_vm10, %vm6700_vm13 }
 0x3e7   :  { %12382 = vmatprep.mubr.msk.bf16.mxu0 %vm19274_vm8, %v19067_v17 }
 0x3e8   :  { %v1461_v32 = vpop.permute.xlu1 %1460  ;;  %v3861_v51 = vrot.slane %v3847_v34, %v13114_v6 }
 0x3e9   :  { %1575 = vst.msk [vmem:[#allocation2 + $0x1b8] sm:$0x3f] %vm1520_vm15, %v1461_v32  ;;  %v1459_v38 = vpop.permute.xlu0 %1458  ;;  %vm6702_vm15 = vcmask 1043459  }
 0x3ea   :  { %1574 = vst.msk [vmem:[#allocation2 + $0x1b0] sm:$0xff] %vm1518_vm2, %v1459_v38  ;;  %vm6704_vm2 = vcmask 1044484  }
 0x3eb   :  { %vm10249_vm7 = vmor %vm10248_vm9, %vm6704_vm2 }
 0x3ec   :  { %v1687_v7 = vpop.permute.xlu1 %1686 }
 0x3ed   :  { %1801 = vst.msk [vmem:[#allocation2 + $0x1b7] sm:$0x7f] %vm1746_vm3, %v1687_v7  ;;  %v1685_v19 = vpop.permute.xlu0 %1684  ;;  %v3854_v7 = vrot.slane %v3846_v4, %v13114_v6  ;;  %vm6752_vm3 = vcmask 520192  }
 0x3ee   :  { %1800 = vst.msk [vmem:[#allocation2 + $0x1af] sm:$0xfe] %vm1744_vm4, %v1685_v19  ;;  %vm4310_vm4 = vcmask 523264  }
 0x3f0   :  { %v1913_v37 = vpop.permute.xlu1 %1912 }
 0x3f1   :  { %2027 = vst.msk [vmem:[#allocation2 + $0x1b6] sm:$0xff] %vm19421_vm11, %v1913_v37  ;;  %v1911_v48 = vpop.permute.xlu0 %1910  ;;  %vm18492_vm11 = vmor %vm10249_vm7, %vm10250_vm5 }
 0x3f2   :  { %2026 = vst.msk [vmem:[#allocation2 + $0x1ae] sm:$0xfc] %vm19422_vm12, %v1911_v48  ;;  %vm10280_vm12 = vcmask 1041920  }
 0x3f8   :  { %v2083_v28 = vld [vmem:[#allocation2 + $0x1b8] sm:$0x3f] }
 0x3f9   :  { %v2082_v44 = vld [vmem:[#allocation2 + $0x1b0] sm:$0xff]  ;;  %v3048_v13 = vcombine.high %v2083_v28, %v2083_v28  ;;  %v3055_v60 = vrot.slane %v2083_v28, %v13114_v6  ;;  %v3862_v28 = vcombine.low %v3854_v7, %v3861_v51  ;;  %v14939_v7 = vld [vmem:[%s19049_s2] ss:$0 sm:$0xff] }
 0x3fa   :  { %v3031_v54 = vcombine.high %v2082_v44, %v2082_v44  ;;  %v3038_v56 = vrot.slane %v2082_v44, %v13114_v6 }
 0x3fb   :  { %v14912_v16 = vpop.f32.mrb[68].mxu0  ;;  %v3062_v12 = vrot.slane %v3048_v13, %v13114_v6  ;;  %v3063_v37 = vcombine.high %v3055_v60, %v3055_v60 }
 0x3fc   :  { %v12360_v42 = vpop.f32.mrb[69].mxu0  ;;  %v3045_v23 = vrot.slane %v3031_v54, %v13114_v6  ;;  %v3046_v30 = vcombine.high %v3038_v56, %v3038_v56  ;;  %v3863_v35 = vcombine.low %v3029_v53, %v3038_v56 }
 0x3fd   :  { %v14915_v32 = vpop.f32.mrb[70].mxu0  ;;  %v3881_v14 = vcombine.low %v3063_v37, %v3062_v12  ;;  %v14947_v12 = vadd.f32 %v14939_v7, %v13672_v43  ;;  %v14951_v37 = vadd.f32 %v14939_v7, %v13741_v21 }
 0x3fe   :  { %v12361_v38 = vpop.f32.mrb[71].mxu0  ;;  %v3864_v19 = vcombine.low %v3046_v30, %v3045_v23  ;;  %v3047_v48 = vcombine.high %v3045_v23, %v3045_v23  ;;  %v3871_v1 = vrot.slane %v3863_v35, %v13114_v6 }
 0x3ff   :  { %v3895_v4 = vrot.slane %v3881_v14, %v13114_v6  ;;  %v4311_v51 = vsel %vm4310_vm4, %v14947_v12, 0.0 }
 0x400   :  { %v3878_v55 = vrot.slane %v3864_v19, %v13114_v6  ;;  %v3880_v59 = vcombine.low %v3047_v48, %v3055_v60  ;;  %v14943_v19 = vadd.f32 %v14939_v7, %v13690_v52  ;;  %v14961_v52 = vadd.f32 %v14939_v7, %v13747_v29 }
 0x401   :  { %v14977_v29 = vadd.f32 %v14939_v7, %v13848_v15  ;;  %v14993_v15 = vadd.f32 %v14939_v7, %v13987_v20 }
 0x402   :  { %v3879_v27 = vcombine.low %v3871_v1, %v3878_v55  ;;  %v3888_v53 = vrot.slane %v3880_v59, %v13114_v6  ;;  %v4312_v48 = vsel %vm4310_vm4, %v14943_v19, 0.0  ;;  %v4314_v1 = vsel %vm4310_vm4, %v14951_v37, 0.0 }
 0x403   :  { %v4313_v43 = vadd.f32 %v4312_v48, %v4311_v51  ;;  %v14965_v55 = vadd.f32 %v14939_v7, %v13837_v36  ;;  %19424 = vst [vmem:[#allocation12_spill] sm:$0xff] %v14977_v29  ;;  %v14981_v36 = vadd.f32 %v14939_v7, %v13903_v61  ;;  %v4326_v48 = vsel %vm4310_vm4, %v14993_v15, 0.0 }
 0x404   :  { %v3969_v44 = vpack.c.bf16 %v3879_v27, %v3862_v28  ;;  %v3896_v54 = vcombine.low %v3888_v53, %v3895_v4  ;;  %v4316_v28 = vsel %vm4310_vm4, %v14961_v52, 0.0  ;;  %v15001_v51 = vadd.f32 %v14939_v7, %v13993_v31 }
 0x405   :  { %19423 = vst [vmem:[#allocation11_spill] sm:$0xff] %v14965_v55  ;;  %v4315_v21 = vadd.f32 %v4314_v1, %v4313_v43  ;;  %v15017_v31 = vadd.f32 %v14939_v7, %v14153_v33 }
 0x406   :  { %12383 = vmatmul.mubr.msk.bf16.gmra.mrb[92].mxu0 %vm3995_vm6, %v3969_v44  ;;  %v3970_v56 = vpack.c.bf16 %v3896_v54, %v3896_v54  ;;  %v4318_v44 = vsel %vm4310_vm4, %v14965_v55, 0.0  ;;  %v4328_v20 = vsel %vm4310_vm4, %v15001_v51, 0.0 }
 0x407   :  { %12386 = vmatprep.mubr.msk.bf16.mxu0 %vm19274_vm8, %v19067_v17  ;;  %v4317_v4 = vadd.f32 %v4316_v28, %v4315_v21  ;;  %v15013_v28 = vadd.f32 %v14939_v7, %v14072_v49  ;;  %v15029_v49 = vadd.f32 %v14939_v7, %v14299_v41 }
 0x409   :  { %v4319_v54 = vadd.f32 %v4318_v44, %v4317_v4  ;;  %v15025_v4 = vadd.f32 %v14939_v7, %v14161_v40  ;;  %v15041_v40 = vadd.f32 %v14939_v7, %v14371_v8 }
 0x40b   :  { %v4336_v33 = vsel %vm4310_vm4, %v15025_v4, 0.0 }
 0x40e   :  { %12387 = vmatmul.mubr.msk.bf16.gmra.mrb[96].mxu0 %vm3995_vm6, %v3970_v56  ;;  %v4320_v56 = vsel %vm4310_vm4, %v14977_v29, 0.0  ;;  %vm6883_vm6 = vcmask 1044992  }
 0x41b   :  { %v14928_v13 = vpop.f32.mrb[72].mxu0 }
 0x41c   :  { %v12364_v60 = vpop.f32.mrb[73].mxu0 }
 0x41d   :  { %v14930_v42 = vpop.f32.mrb[74].mxu0  ;;  %v4322_v60 = vsel %vm4310_vm4, %v14981_v36, 0.0 }
 0x41e   :  { %v12365_v23 = vpop.f32.mrb[75].mxu0 }
 0x41f   :  { %v14989_v23 = vadd.f32 %v14939_v7, %v13908_v18  ;;  %v15005_v18 = vadd.f32 %v14939_v7, %v14064_v25  ;;  %v4332_v25 = vsel %vm4310_vm4, %v15013_v28, 0.0 }
 0x421   :  { %v4324_v61 = vsel %vm4310_vm4, %v14989_v23, 0.0  ;;  %v4330_v21 = vsel %vm4310_vm4, %v15005_v18, 0.0 }
 0x43b   :  { %v14932_v30 = vpop.f32.mrb[76].mxu0 }
 0x43c   :  { %v12368_v34 = vpop.f32.mrb[77].mxu0 }
 0x43d   :  { %v14934_v35 = vpop.f32.mrb[78].mxu0  ;;  %v4321_v34 = vadd.f32 %v4320_v56, %v4319_v54 }
 0x43e   :  { %v12369_v38 = vpop.f32.mrb[79].mxu0 }
 0x43f   :  { %v4323_v38 = vadd.f32 %v4322_v60, %v4321_v34  ;;  %v4338_v60 = vsel %vm4310_vm4, %v15029_v49, 0.0  ;;  %v15037_v34 = vadd.f32 %v14939_v7, %v14317_v47  ;;  %v15053_v47 = vadd.f32 %v14939_v7, %v14462_v46 }
 0x441   :  { %v4325_v1 = vadd.f32 %v4324_v61, %v4323_v38  ;;  %v4340_v41 = vsel %vm4310_vm4, %v15037_v34, 0.0 }
 0x443   :  { %v4327_v43 = vadd.f32 %v4326_v48, %v4325_v1  ;;  %v4342_v48 = vsel %vm4310_vm4, %v15041_v40, 0.0  ;;  %v15049_v1 = vadd.f32 %v14939_v7, %v14380_v24  ;;  %v15065_v24 = vadd.f32 %v14939_v7, %v14513_v0 }
 0x445   :  { %v4344_v8 = vsel %vm4310_vm4, %v15049_v1, 0.0 }
 0x45b   :  { %v14967_v59 = vpop.f32.mrb[80].mxu0 }
 0x45c   :  { %v12372_v27 = vpop.f32.mrb[81].mxu0 }
 0x45d   :  { %v14971_v14 = vpop.f32.mrb[82].mxu0  ;;  %v4329_v27 = vadd.f32 %v4328_v20, %v4327_v43 }
 0x45e   :  { %v12373_v53 = vpop.f32.mrb[83].mxu0 }
 0x45f   :  { %v4331_v44 = vadd.f32 %v4330_v21, %v4329_v27  ;;  %v4334_v53 = vsel %vm4310_vm4, %v15017_v31, 0.0  ;;  %v4346_v21 = vsel %vm4310_vm4, %v15053_v47, 0.0  ;;  %v15061_v27 = vadd.f32 %v14939_v7, %v14469_v5 }
 0x460   :  { %v15077_v5 = vadd.f32 %v14939_v7, %v14584_v26 }
 0x461   :  { %v4333_v54 = vadd.f32 %v4332_v25, %v4331_v44  ;;  %v4348_v46 = vsel %vm4310_vm4, %v15061_v27, 0.0 }
 0x463   :  { %v4335_v56 = vadd.f32 %v4334_v53, %v4333_v54  ;;  %v4350_v53 = vsel %vm4310_vm4, %v15065_v24, 0.0  ;;  %v15073_v54 = vadd.f32 %v14939_v7, %v14517_v58  ;;  %v15089_v58 = vadd.f32 %v14939_v7, %v14647_v62 }
 0x465   :  { %v4337_v38 = vadd.f32 %v4336_v33, %v4335_v56  ;;  %v4352_v0 = vsel %vm4310_vm4, %v15073_v54, 0.0 }
 0x467   :  { %v4339_v61 = vadd.f32 %v4338_v60, %v4337_v38  ;;  %v4354_v60 = vsel %vm4310_vm4, %v15077_v5, 0.0  ;;  %v15085_v38 = vadd.f32 %v14939_v7, %v14588_v3  ;;  %v15101_v3 = vadd.f32 %v14939_v7, %v14734_v9 }
 0x469   :  { %v4341_v43 = vadd.f32 %v4340_v41, %v4339_v61  ;;  %v4356_v26 = vsel %vm4310_vm4, %v15085_v38, 0.0 }
 0x46b   :  { %v4343_v20 = vadd.f32 %v4342_v48, %v4341_v43  ;;  %v4358_v48 = vsel %vm4310_vm4, %v15089_v58, 0.0  ;;  %v15097_v43 = vadd.f32 %v14939_v7, %v14653_v22 }
 0x46d   :  { %v4345_v44 = vadd.f32 %v4344_v8, %v4343_v20  ;;  %v4360_v62 = vsel %vm4310_vm4, %v15097_v43, 0.0 }
 0x46f   :  { %v4347_v25 = vadd.f32 %v4346_v21, %v4345_v44  ;;  %v4362_v44 = vsel %vm4310_vm4, %v15101_v3, 0.0 }
 0x471   :  { %v4349_v56 = vadd.f32 %v4348_v46, %v4347_v25  ;;  %v15109_v25 = vadd.f32 %v14939_v7, %v14738_v45 }
 0x473   :  { %v4351_v33 = vadd.f32 %v4350_v53, %v4349_v56  ;;  %v15113_v56 = vadd.f32 %v14939_v7, %v14830_v39 }
 0x475   :  { %v4353_v61 = vadd.f32 %v4352_v0, %v4351_v33  ;;  %v4364_v0 = vsel %vm4310_vm4, %v15109_v25, 0.0 }
 0x477   :  { %v4355_v41 = vadd.f32 %v4354_v60, %v4353_v61  ;;  %v4366_v60 = vsel %vm4310_vm4, %v15113_v56, 0.0  ;;  %v15121_v61 = vadd.f32 %v14939_v7, %v14833_v63  ;;  %v15137_v63 = vadd.f32 %v14939_v7, %v14891_v11 }
 0x479   :  { %v4357_v20 = vadd.f32 %v4356_v26, %v4355_v41  ;;  %v15125_v41 = vadd.f32 %v14939_v7, %v14848_v50  ;;  %v4368_v39 = vsel %vm4310_vm4, %v15121_v61, 0.0 }
 0x47b   :  { %v4359_v8 = vadd.f32 %v4358_v48, %v4357_v20  ;;  %v4370_v48 = vsel %vm4310_vm4, %v15125_v41, 0.0  ;;  %v15133_v20 = vadd.f32 %v14939_v7, %v14853_v57  ;;  %v15149_v57 = vadd.f32 %v14939_v7, %v14912_v16 }
 0x47d   :  { %v4361_v22 = vadd.f32 %v4360_v62, %v4359_v8  ;;  %v4372_v50 = vsel %vm4310_vm4, %v15133_v20, 0.0 }
 0x47f   :  { %v4363_v33 = vadd.f32 %v4362_v44, %v4361_v22  ;;  %v4374_v44 = vsel %vm4310_vm4, %v15137_v63, 0.0 }
 0x481   :  { %v4365_v45 = vadd.f32 %v4364_v0, %v4363_v33  ;;  %v4378_v33 = vsel %vm4310_vm4, %v15149_v57, 0.0  ;;  %v15157_v0 = vadd.f32 %v14939_v7, %v14915_v32  ;;  %v15169_v32 = vadd.f32 %v14939_v7, %v14930_v42 }
 0x482   :  { %v15185_v42 = vadd.f32 %v14939_v7, %v14967_v59 }
 0x483   :  { %v4367_v26 = vadd.f32 %v4366_v60, %v4365_v45 }
 0x484   :  { %19425 = vst [vmem:[#allocation13_spill] sm:$0xff] %v15185_v42 }
 0x485   :  { %v4369_v8 = vadd.f32 %v4368_v39, %v4367_v26 }
 0x487   :  { %v4371_v62 = vadd.f32 %v4370_v48, %v4369_v8  ;;  %v4380_v48 = vsel %vm4310_vm4, %v15157_v0, 0.0 }
 0x489   :  { %v4373_v22 = vadd.f32 %v4372_v50, %v4371_v62 }
 0x49f   :  { %v4280_v21 = vpop.f32.mrb[84].mxu0 }
 0x4a0   :  { %v12376_v46 = vpop.f32.mrb[85].mxu0 }
 0x4a1   :  { %v4283_v53 = vpop.f32.mrb[86].mxu0  ;;  %v15145_v46 = vadd.f32 %v14939_v7, %v14894_v10  ;;  %v15161_v10 = vadd.f32 %v14939_v7, %v14928_v13 }
 0x4a2   :  { %v12377_v9 = vpop.f32.mrb[87].mxu0 }
 0x4a3   :  { %v4375_v9 = vadd.f32 %v4374_v44, %v4373_v22  ;;  %v4376_v11 = vsel %vm4310_vm4, %v15145_v46, 0.0  ;;  %v4382_v62 = vsel %vm4310_vm4, %v15161_v10, 0.0  ;;  %v15173_v44 = vadd.f32 %v14939_v7, %v14932_v30 }
 0x4a4   :  { %v4384_v22 = vsel %vm4310_vm4, %v15169_v32, 0.0 }
 0x4a5   :  { %v4377_v60 = vadd.f32 %v4376_v11, %v4375_v9  ;;  %v4386_v9 = vsel %vm4310_vm4, %v15173_v44, 0.0  ;;  %v15181_v11 = vadd.f32 %v14939_v7, %v14934_v35  ;;  %v15196_v35 = vadd.f32 %v14939_v7, %v4280_v21 }
 0x4a7   :  { %v4379_v16 = vadd.f32 %v4378_v33, %v4377_v60  ;;  %v4388_v30 = vsel %vm4310_vm4, %v15181_v11, 0.0  ;;  %19427 = vst [vmem:[#allocation15_spill] sm:$0xff] %v15196_v35 }
 0x4a9   :  { %v4381_v50 = vadd.f32 %v4380_v48, %v4379_v16  ;;  %v15193_v16 = vadd.f32 %v14939_v7, %v14971_v14 }
 0x4ab   :  { %v4383_v13 = vadd.f32 %v4382_v62, %v4381_v50  ;;  %19426 = vst [vmem:[#allocation14_spill] sm:$0xff] %v15193_v16  ;;  %v4392_v59 = vsel %vm4310_vm4, %v15193_v16, 0.0  ;;  %v4394_v62 = vsel %vm4310_vm4, %v15196_v35, 0.0  ;;  %v15203_v50 = vadd.f32 %v14939_v7, %v4283_v53 }
 0x4ad   :  { %v4385_v33 = vadd.f32 %v4384_v22, %v4383_v13  ;;  %19428 = vst [vmem:[#allocation16_spill] sm:$0xff] %v15203_v50 }
 0x4af   :  { %v4387_v60 = vadd.f32 %v4386_v9, %v4385_v33  ;;  %v4396_v9 = vsel %vm4310_vm4, %v15203_v50, 0.0 }
 0x4b1   :  { %v4389_v48 = vadd.f32 %v4388_v30, %v4387_v60 }
 0x4b9   :  { %v4288_v45 = vpop.f32.mrb[88].mxu0 }
 0x4ba   :  { %v12380_v26 = vpop.f32.mrb[89].mxu0  ;;  %v15206_v22 = vadd.f32 %v14939_v7, %v4288_v45 }
 0x4bb   :  { %v4291_v39 = vpop.f32.mrb[90].mxu0  ;;  %v4390_v26 = vsel %vm4310_vm4, %v15185_v42, 0.0 }
 0x4bc   :  { %v12381_v8 = vpop.f32.mrb[91].mxu0  ;;  %19429 = vst [vmem:[#allocation17_spill] sm:$0xff] %v15206_v22  ;;  %v4398_v21 = vsel %vm4310_vm4, %v15206_v22, 0.0  ;;  %v15213_v33 = vadd.f32 %v14939_v7, %v4291_v39 }
 0x4bd   :  { %v4391_v8 = vadd.f32 %v4390_v26, %v4389_v48 }
 0x4be   :  { %19430 = vst [vmem:[#allocation18_spill] sm:$0xff] %v15213_v33  ;;  %v4400_v53 = vsel %vm4310_vm4, %v15213_v33, 0.0 }
 0x4bf   :  { %v4393_v13 = vadd.f32 %v4392_v59, %v4391_v8 }
 0x4c1   :  { %v4395_v14 = vadd.f32 %v4394_v62, %v4393_v13 }
 0x4c3   :  { %v4397_v60 = vadd.f32 %v4396_v9, %v4395_v14 }
 0x4c5   :  { %v4399_v30 = vadd.f32 %v4398_v21, %v4397_v60 }
 0x4c7   :  { %v4401_v39 = vadd.f32 %v4400_v53, %v4399_v30 }
 0x4d9   :  { %v4296_v26 = vpop.f32.mrb[92].mxu0 }
 0x4da   :  { %v15218_v48 = vadd.f32 %v14939_v7, %v4296_v26  ;;  %v12384_v45 = vpop.f32.mrb[93].mxu0 }
 0x4db   :  { %v4299_v8 = vpop.f32.mrb[94].mxu0 }
 0x4dc   :  { %19431 = vst [vmem:[#allocation19_spill] sm:$0xff] %v15218_v48  ;;  %v4402_v59 = vsel %vm4310_vm4, %v15218_v48, 0.0  ;;  %v15223_v62 = vadd.f32 %v14939_v7, %v4299_v8  ;;  %v12385_v13 = vpop.f32.mrb[95].mxu0 }
 0x4dd   :  { %v4403_v17 = vadd.f32 %v4402_v59, %v4401_v39 }
 0x4de   :  { %v4404_v14 = vsel %vm4310_vm4, %v15223_v62, 0.0 }
 0x4df   :  { %v4405_v26 = vadd.f32 %v4404_v14, %v4403_v17 }
 0x4e1   :  { %v4304_v9 = vpop.f32.mrb[96].mxu0 }
 0x4e2   :  { %v15228_v21 = vadd.f32 %v14939_v7, %v4304_v9  ;;  %v12388_v60 = vpop.f32.mrb[97].mxu0 }
 0x4e3   :  { %v4307_v45 = vpop.f32.mrb[98].mxu0 }
 0x4e4   :  { %v4406_v6 = vsel %vm4310_vm4, %v15228_v21, 0.0  ;;  %v12389_v2 = vpop.f32.mrb[99].mxu0 }
 0x4e5   :  { %v4407_v48 = vadd.f32 %v4406_v6, %v4405_v26 }
 0x4e7   :  { %v4408_v8 = vrot.slane %v4407_v48, 4 }
 0x4e9   :  { %v4409_v33 = vadd.f32 %v4408_v8, %v4407_v48 }
 0x4eb   :  { %v4410_v13 = vrot.slane %v4409_v33, 2 }
 0x4ed   :  { %v4411_v30 = vadd.f32 %v4410_v13, %v4409_v33 }
 0x4ef   :  { %v4412_v53 = vrot.slane %v4411_v30, 1 }
 0x4f1   :  { %v4413_v59 = vadd.f32 %v4412_v53, %v4411_v30 }
 0x4f3   :  { %v15232_v39 = vmul.f32 0.0025510204, %v4413_v59 }
 0x4f5   :  { %v4416_v7 = vsub.f32 %v14947_v12, %v15232_v39  ;;  %v4417_v17 = vsub.f32 %v14943_v19, %v15232_v39  ;;  %v4418_v14 = vsub.f32 %v14951_v37, %v15232_v39  ;;  %v4419_v2 = vsub.f32 %v14961_v52, %v15232_v39 }
 0x4f6   :  { %v4420_v33 = vsub.f32 %v14965_v55, %v15232_v39  ;;  %v4421_v60 = vsub.f32 %v14977_v29, %v15232_v39  ;;  %v4422_v30 = vsub.f32 %v14981_v36, %v15232_v39 }
 0x4f7   :  { %v4465_v6 = vmul.f32 %v4416_v7, %v4416_v7  ;;  %v4466_v48 = vmul.f32 %v4417_v17, %v4417_v17  ;;  %v4467_v9 = vmul.f32 %v4418_v14, %v4418_v14  ;;  %v4468_v26 = vmul.f32 %v4419_v2, %v4419_v2 }
 0x4f8   :  { %v4469_v53 = vmul.f32 %v4420_v33, %v4420_v33  ;;  %v4423_v17 = vsub.f32 %v14989_v23, %v15232_v39  ;;  %v4470_v14 = vmul.f32 %v4421_v60, %v4421_v60  ;;  %v4424_v2 = vsub.f32 %v14993_v15, %v15232_v39 }
 0x4f9   :  { %v4514_v45 = vsel %vm4310_vm4, %v4465_v6, 0.0  ;;  %v4515_v8 = vsel %vm4310_vm4, %v4466_v48, 0.0  ;;  %v4517_v59 = vsel %vm4310_vm4, %v4467_v9, 0.0  ;;  %v4519_v55 = vsel %vm4310_vm4, %v4468_v26, 0.0 }
 0x4fa   :  { %v4516_v13 = vadd.f32 %v4515_v8, %v4514_v45  ;;  %v4471_v6 = vmul.f32 %v4422_v30, %v4422_v30  ;;  %v4521_v48 = vsel %vm4310_vm4, %v4469_v53, 0.0  ;;  %v4425_v33 = vsub.f32 %v15001_v51, %v15232_v39 }
 0x4fb   :  { %v4472_v8 = vmul.f32 %v4423_v17, %v4423_v17  ;;  %v4523_v9 = vsel %vm4310_vm4, %v4470_v14, 0.0  ;;  %v4426_v60 = vsub.f32 %v15005_v18, %v15232_v39  ;;  %v4427_v30 = vsub.f32 %v15013_v28, %v15232_v39 }
 0x4fc   :  { %v4518_v7 = vadd.f32 %v4517_v59, %v4516_v13  ;;  %v4473_v59 = vmul.f32 %v4424_v2, %v4424_v2  ;;  %v4428_v17 = vsub.f32 %v15017_v31, %v15232_v39  ;;  %v4429_v2 = vsub.f32 %v15025_v4, %v15232_v39 }
 0x4fe   :  { %v4520_v29 = vadd.f32 %v4519_v55, %v4518_v7  ;;  %v4525_v55 = vsel %vm4310_vm4, %v4471_v6, 0.0  ;;  %v4474_v7 = vmul.f32 %v4425_v33, %v4425_v33  ;;  %v4529_v14 = vsel %vm4310_vm4, %v4473_v59, 0.0 }
 0x4ff   :  { %v4430_v33 = vsub.f32 %v15029_v49, %v15232_v39 }
 0x500   :  { %v4522_v45 = vadd.f32 %v4521_v48, %v4520_v29  ;;  %v4527_v29 = vsel %vm4310_vm4, %v4472_v8, 0.0  ;;  %v4475_v48 = vmul.f32 %v4426_v60, %v4426_v60  ;;  %v4531_v6 = vsel %vm4310_vm4, %v4474_v7, 0.0 }
 0x501   :  { %v4431_v60 = vsub.f32 %v15037_v34, %v15232_v39 }
 0x502   :  { %v4524_v13 = vadd.f32 %v4523_v9, %v4522_v45  ;;  %v4476_v9 = vmul.f32 %v4427_v30, %v4427_v30  ;;  %v4533_v8 = vsel %vm4310_vm4, %v4475_v48, 0.0  ;;  %v4432_v30 = vsub.f32 %v15041_v40, %v15232_v39 }
 0x504   :  { %v4526_v26 = vadd.f32 %v4525_v55, %v4524_v13  ;;  %v4477_v55 = vmul.f32 %v4428_v17, %v4428_v17  ;;  %v4535_v59 = vsel %vm4310_vm4, %v4476_v9, 0.0  ;;  %v4433_v17 = vsub.f32 %v15049_v1, %v15232_v39 }
 0x506   :  { %v4528_v53 = vadd.f32 %v4527_v29, %v4526_v26  ;;  %v4478_v29 = vmul.f32 %v4429_v2, %v4429_v2  ;;  %v4537_v7 = vsel %vm4310_vm4, %v4477_v55, 0.0  ;;  %v4434_v2 = vsub.f32 %v15053_v47, %v15232_v39 }
 0x508   :  { %v4530_v45 = vadd.f32 %v4529_v14, %v4528_v53  ;;  %v4479_v14 = vmul.f32 %v4430_v33, %v4430_v33  ;;  %v4539_v48 = vsel %vm4310_vm4, %v4478_v29, 0.0  ;;  %v4435_v33 = vsub.f32 %v15061_v27, %v15232_v39 }
 0x50a   :  { %v4532_v13 = vadd.f32 %v4531_v6, %v4530_v45  ;;  %v4480_v6 = vmul.f32 %v4431_v60, %v4431_v60  ;;  %v4541_v9 = vsel %vm4310_vm4, %v4479_v14, 0.0  ;;  %v4436_v60 = vsub.f32 %v15065_v24, %v15232_v39 }
 0x50c   :  { %v4534_v26 = vadd.f32 %v4533_v8, %v4532_v13  ;;  %v4481_v8 = vmul.f32 %v4432_v30, %v4432_v30  ;;  %v4543_v55 = vsel %vm4310_vm4, %v4480_v6, 0.0  ;;  %v4437_v30 = vsub.f32 %v15073_v54, %v15232_v39 }
 0x50e   :  { %v4536_v53 = vadd.f32 %v4535_v59, %v4534_v26  ;;  %v4482_v59 = vmul.f32 %v4433_v17, %v4433_v17  ;;  %v4545_v29 = vsel %vm4310_vm4, %v4481_v8, 0.0  ;;  %v4438_v17 = vsub.f32 %v15077_v5, %v15232_v39 }
 0x510   :  { %v4538_v45 = vadd.f32 %v4537_v7, %v4536_v53  ;;  %v4483_v7 = vmul.f32 %v4434_v2, %v4434_v2  ;;  %v4547_v14 = vsel %vm4310_vm4, %v4482_v59, 0.0  ;;  %v4439_v2 = vsub.f32 %v15085_v38, %v15232_v39 }
 0x512   :  { %v4540_v13 = vadd.f32 %v4539_v48, %v4538_v45  ;;  %v4484_v48 = vmul.f32 %v4435_v33, %v4435_v33  ;;  %v4549_v6 = vsel %vm4310_vm4, %v4483_v7, 0.0  ;;  %v4440_v33 = vsub.f32 %v15089_v58, %v15232_v39 }
 0x514   :  { %v4542_v26 = vadd.f32 %v4541_v9, %v4540_v13  ;;  %v4485_v9 = vmul.f32 %v4436_v60, %v4436_v60  ;;  %v4551_v8 = vsel %vm4310_vm4, %v4484_v48, 0.0  ;;  %v4441_v60 = vsub.f32 %v15097_v43, %v15232_v39 }
 0x516   :  { %v4544_v53 = vadd.f32 %v4543_v55, %v4542_v26  ;;  %v4486_v55 = vmul.f32 %v4437_v30, %v4437_v30  ;;  %v4553_v59 = vsel %vm4310_vm4, %v4485_v9, 0.0  ;;  %v4442_v30 = vsub.f32 %v15101_v3, %v15232_v39 }
 0x518   :  { %v4546_v45 = vadd.f32 %v4545_v29, %v4544_v53  ;;  %v4487_v29 = vmul.f32 %v4438_v17, %v4438_v17  ;;  %v4555_v7 = vsel %vm4310_vm4, %v4486_v55, 0.0  ;;  %v4443_v17 = vsub.f32 %v15109_v25, %v15232_v39 }
 0x51a   :  { %v4548_v13 = vadd.f32 %v4547_v14, %v4546_v45  ;;  %v4488_v14 = vmul.f32 %v4439_v2, %v4439_v2  ;;  %v4557_v48 = vsel %vm4310_vm4, %v4487_v29, 0.0  ;;  %v4444_v2 = vsub.f32 %v15113_v56, %v15232_v39 }
 0x51c   :  { %v4550_v26 = vadd.f32 %v4549_v6, %v4548_v13  ;;  %v4489_v6 = vmul.f32 %v4440_v33, %v4440_v33  ;;  %v4559_v9 = vsel %vm4310_vm4, %v4488_v14, 0.0  ;;  %v4445_v33 = vsub.f32 %v15121_v61, %v15232_v39 }
 0x51e   :  { %v4552_v53 = vadd.f32 %v4551_v8, %v4550_v26  ;;  %v4490_v8 = vmul.f32 %v4441_v60, %v4441_v60  ;;  %v4561_v55 = vsel %vm4310_vm4, %v4489_v6, 0.0  ;;  %v4446_v60 = vsub.f32 %v15125_v41, %v15232_v39 }
 0x520   :  { %v4554_v45 = vadd.f32 %v4553_v59, %v4552_v53  ;;  %v4491_v59 = vmul.f32 %v4442_v30, %v4442_v30  ;;  %v4563_v29 = vsel %vm4310_vm4, %v4490_v8, 0.0  ;;  %v4447_v30 = vsub.f32 %v15133_v20, %v15232_v39 }
 0x522   :  { %v4556_v13 = vadd.f32 %v4555_v7, %v4554_v45  ;;  %v4492_v7 = vmul.f32 %v4443_v17, %v4443_v17  ;;  %v4565_v14 = vsel %vm4310_vm4, %v4491_v59, 0.0  ;;  %v4448_v17 = vsub.f32 %v15137_v63, %v15232_v39 }
 0x524   :  { %v4558_v26 = vadd.f32 %v4557_v48, %v4556_v13  ;;  %v4493_v48 = vmul.f32 %v4444_v2, %v4444_v2  ;;  %v4567_v6 = vsel %vm4310_vm4, %v4492_v7, 0.0  ;;  %v4449_v2 = vsub.f32 %v15145_v46, %v15232_v39 }
 0x526   :  { %v4560_v53 = vadd.f32 %v4559_v9, %v4558_v26  ;;  %v4494_v9 = vmul.f32 %v4445_v33, %v4445_v33  ;;  %v4569_v8 = vsel %vm4310_vm4, %v4493_v48, 0.0  ;;  %v4450_v33 = vsub.f32 %v15149_v57, %v15232_v39 }
 0x528   :  { %v4562_v45 = vadd.f32 %v4561_v55, %v4560_v53  ;;  %v4495_v55 = vmul.f32 %v4446_v60, %v4446_v60  ;;  %v4571_v59 = vsel %vm4310_vm4, %v4494_v9, 0.0  ;;  %v4451_v60 = vsub.f32 %v15157_v0, %v15232_v39 }
 0x52a   :  { %v4564_v13 = vadd.f32 %v4563_v29, %v4562_v45  ;;  %v4496_v29 = vmul.f32 %v4447_v30, %v4447_v30  ;;  %v4573_v7 = vsel %vm4310_vm4, %v4495_v55, 0.0  ;;  %v4452_v30 = vsub.f32 %v15161_v10, %v15232_v39 }
 0x52c   :  { %v4566_v26 = vadd.f32 %v4565_v14, %v4564_v13  ;;  %v4497_v14 = vmul.f32 %v4448_v17, %v4448_v17  ;;  %v4575_v48 = vsel %vm4310_vm4, %v4496_v29, 0.0  ;;  %v4453_v17 = vsub.f32 %v15169_v32, %v15232_v39 }
 0x52e   :  { %v4568_v53 = vadd.f32 %v4567_v6, %v4566_v26  ;;  %v4498_v6 = vmul.f32 %v4449_v2, %v4449_v2  ;;  %v4577_v9 = vsel %vm4310_vm4, %v4497_v14, 0.0  ;;  %v4454_v2 = vsub.f32 %v15173_v44, %v15232_v39 }
 0x530   :  { %v4570_v45 = vadd.f32 %v4569_v8, %v4568_v53  ;;  %v4499_v8 = vmul.f32 %v4450_v33, %v4450_v33  ;;  %v4579_v55 = vsel %vm4310_vm4, %v4498_v6, 0.0  ;;  %v4455_v33 = vsub.f32 %v15181_v11, %v15232_v39 }
 0x532   :  { %v4572_v13 = vadd.f32 %v4571_v59, %v4570_v45  ;;  %v4500_v59 = vmul.f32 %v4451_v60, %v4451_v60  ;;  %v4581_v29 = vsel %vm4310_vm4, %v4499_v8, 0.0  ;;  %v4456_v60 = vsub.f32 %v15185_v42, %v15232_v39 }
 0x534   :  { %v4574_v26 = vadd.f32 %v4573_v7, %v4572_v13  ;;  %v4501_v7 = vmul.f32 %v4452_v30, %v4452_v30  ;;  %v4583_v14 = vsel %vm4310_vm4, %v4500_v59, 0.0  ;;  %v4457_v30 = vsub.f32 %v15193_v16, %v15232_v39 }
 0x536   :  { %v4576_v53 = vadd.f32 %v4575_v48, %v4574_v26  ;;  %v4502_v48 = vmul.f32 %v4453_v17, %v4453_v17  ;;  %v4585_v6 = vsel %vm4310_vm4, %v4501_v7, 0.0  ;;  %v4458_v17 = vsub.f32 %v15196_v35, %v15232_v39 }
 0x538   :  { %v4578_v45 = vadd.f32 %v4577_v9, %v4576_v53  ;;  %v4503_v9 = vmul.f32 %v4454_v2, %v4454_v2  ;;  %v4587_v8 = vsel %vm4310_vm4, %v4502_v48, 0.0  ;;  %v4459_v2 = vsub.f32 %v15203_v50, %v15232_v39 }
 0x53a   :  { %v4580_v13 = vadd.f32 %v4579_v55, %v4578_v45  ;;  %v4504_v55 = vmul.f32 %v4455_v33, %v4455_v33  ;;  %v4589_v59 = vsel %vm4310_vm4, %v4503_v9, 0.0  ;;  %v4460_v33 = vsub.f32 %v15206_v22, %v15232_v39 }
 0x53b   :  { %v4508_v35 = vmul.f32 %v4459_v2, %v4459_v2  ;;  %v4464_v2 = vsub.f32 %v15228_v21, %v15232_v39 }
 0x53c   :  { %v4582_v26 = vadd.f32 %v4581_v29, %v4580_v13  ;;  %v4505_v29 = vmul.f32 %v4456_v60, %v4456_v60  ;;  %v4591_v7 = vsel %vm4310_vm4, %v4504_v55, 0.0  ;;  %v4509_v50 = vmul.f32 %v4460_v33, %v4460_v33 }
 0x53e   :  { %v4584_v53 = vadd.f32 %v4583_v14, %v4582_v26  ;;  %v4506_v14 = vmul.f32 %v4457_v30, %v4457_v30  ;;  %v4593_v48 = vsel %vm4310_vm4, %v4505_v29, 0.0  ;;  %v4599_v29 = vsel %vm4310_vm4, %v4508_v35, 0.0 }
 0x540   :  { %v4586_v45 = vadd.f32 %v4585_v6, %v4584_v53  ;;  %v4507_v6 = vmul.f32 %v4458_v17, %v4458_v17  ;;  %v4595_v9 = vsel %vm4310_vm4, %v4506_v14, 0.0  ;;  %v4463_v17 = vsub.f32 %v15223_v62, %v15232_v39 }
 0x541   :  { %v4601_v14 = vsel %vm4310_vm4, %v4509_v50, 0.0 }
 0x542   :  { %v4588_v13 = vadd.f32 %v4587_v8, %v4586_v45  ;;  %v19432_v8 = vld [vmem:[#allocation18_spill] sm:$0xff]  ;;  %v4597_v55 = vsel %vm4310_vm4, %v4507_v6, 0.0  ;;  %v4513_v6 = vmul.f32 %v4464_v2, %v4464_v2 }
 0x543   :  { %v4461_v60 = vsub.f32 %v19432_v8, %v15232_v39 }
 0x544   :  { %v4590_v26 = vadd.f32 %v4589_v59, %v4588_v13  ;;  %v19433_v59 = vld [vmem:[#allocation19_spill] sm:$0xff]  ;;  %v4609_v35 = vsel %vm4310_vm4, %v4513_v6, 0.0 }
 0x545   :  { %v4462_v30 = vsub.f32 %v19433_v59, %v15232_v39 }
 0x546   :  { %v4592_v53 = vadd.f32 %v4591_v7, %v4590_v26  ;;  %v4510_v7 = vmul.f32 %v4461_v60, %v4461_v60 }
 0x548   :  { %v4594_v45 = vadd.f32 %v4593_v48, %v4592_v53  ;;  %v4511_v48 = vmul.f32 %v4462_v30, %v4462_v30  ;;  %v4603_v33 = vsel %vm4310_vm4, %v4510_v7, 0.0  ;;  %v3976_v7 = vld [vmem:[%s19049_s2 + $0x1] sm:$0x1] }
 0x54a   :  { %v4596_v13 = vadd.f32 %v4595_v9, %v4594_v45  ;;  %v4512_v9 = vmul.f32 %v4463_v17, %v4463_v17 }
 0x54c   :  { %v4598_v26 = vadd.f32 %v4597_v55, %v4596_v13  ;;  %v4605_v13 = vsel %vm4310_vm4, %v4511_v48, 0.0  ;;  %v4607_v60 = vsel %vm4310_vm4, %v4512_v9, 0.0 }
 0x54e   :  { %v4600_v53 = vadd.f32 %v4599_v29, %v4598_v26 }
 0x550   :  { %v4602_v45 = vadd.f32 %v4601_v14, %v4600_v53 }
 0x552   :  { %v4604_v8 = vadd.f32 %v4603_v33, %v4602_v45 }
 0x554   :  { %v4606_v55 = vadd.f32 %v4605_v13, %v4604_v8  ;;  %v19434_v8 = vld [vmem:[#allocation9_spill] sm:$0xff] }
 0x555   :  { %v15385_v2 = vsub.s32 0, %v19434_v8  ;;  %v19445_v8 = vld [vmem:[#allocation15_spill] sm:$0xff] }
 0x556   :  { %v4608_v22 = vadd.f32 %v4607_v60, %v4606_v55 }
 0x558   :  { %v4610_v26 = vadd.f32 %v4609_v35, %v4608_v22  ;;  %v3977_v22 = vld [vmem:[%s19049_s2 + $0x2] sm:$0x1]  ;;  %s12726_s2 = smov 64  }
 0x55a   :  { %v4611_v29 = vrot.slane %v4610_v26, 4 }
 0x55c   :  { %v4612_v16 = vadd.f32 %v4611_v29, %v4610_v26 }
 0x55e   :  { %v4613_v30 = vrot.slane %v4612_v16, 2 }
 0x560   :  { %v4614_v42 = vadd.f32 %v4613_v30, %v4612_v16 }
 0x562   :  { %v4615_v50 = vrot.slane %v4614_v42, 1 }
 0x564   :  { %v4616_v53 = vadd.f32 %v4615_v50, %v4614_v42 }
 0x566   :  { %v4617_v17 = vmul.f32 0.0025510204, %v4616_v53 }
 0x568   :  { %v4618_v14 = vadd.f32 1e-05, %v4617_v17 }
 0x56a   :  { %12682 = vrsqrt.f32 %v4618_v14 }
 0x574   :  { %v12683_v48 = vpop.eup %12682 }
 0x575   :  { %v4620_v45 = vmul.f32 %v12683_v48, %v3976_v7 }
 0x577   :  { %v4621_v16 = vmul.f32 %v4620_v45, %v15232_v39  ;;  %v15392_v42 = vrot.slane %v4620_v45, %v15385_v2 }
 0x579   :  { %v4622_v9 = vsub.f32 %v3977_v22, %v4621_v16  ;;  %v4675_v33 = vmul.f32 %v15392_v42, %v19433_v59  ;;  %v4676_v6 = vmul.f32 %v15392_v42, %v15223_v62  ;;  %v4677_v13 = vmul.f32 %v15392_v42, %v15228_v21  ;;  %v19435_v21 = vld [vmem:[#allocation11_spill] sm:$0xff]  ;;  %v19437_v22 = vld [vmem:[#allocation10_spill] sm:$0xff] }
 0x57a   :  { %v15402_v55 = vmul.f32 %v15392_v42, %v14947_v12  ;;  %v15406_v39 = vmul.f32 %v15392_v42, %v14943_v19  ;;  %v15410_v60 = vmul.f32 %v15392_v42, %v14951_v37  ;;  %v15414_v59 = vmul.f32 %v15392_v42, %v14961_v52  ;;  %v19436_v12 = vld [vmem:[#allocation12_spill] sm:$0xff] }
 0x57b   :  { %v15417_v62 = vrot.slane %v4622_v9, %v15385_v2  ;;  %v15421_v35 = vmul.f32 %v15392_v42, %v19435_v21  ;;  %v15425_v26 = vmul.f32 %v15392_v42, %v19436_v12  ;;  %v15429_v19 = vmul.f32 %v15392_v42, %v14981_v36 }
 0x57c   :  { %v15433_v37 = vmul.f32 %v15392_v42, %v14989_v23  ;;  %v15437_v52 = vmul.f32 %v15392_v42, %v14993_v15  ;;  %v15441_v29 = vmul.f32 %v15392_v42, %v15001_v51  ;;  %v15445_v30 = vmul.f32 %v15392_v42, %v15005_v18 }
 0x57d   :  { %v4730_v50 = vadd.f32 %v15417_v62, %v4675_v33  ;;  %v4731_v36 = vadd.f32 %v15417_v62, %v4676_v6  ;;  %v4732_v53 = vadd.f32 %v15417_v62, %v4677_v13  ;;  %v15452_v23 = vmul.f32 %v15392_v42, %v15013_v28 }
 0x57e   :  { %v15456_v15 = vmul.f32 %v15392_v42, %v15017_v31  ;;  %v15460_v51 = vmul.f32 %v15392_v42, %v15025_v4  ;;  %v15464_v18 = vmul.f32 %v15392_v42, %v15029_v49  ;;  %v15468_v17 = vmul.f32 %v15392_v42, %v15037_v34 }
 0x57f   :  { %v4779_v14 = vmax.f32 %v4730_v50, 0.0  ;;  %v15470_v7 = vmax.f32 %v4731_v36, 0.0  ;;  %v4781_v28 = vmax.f32 %v4732_v53, 0.0  ;;  %v15474_v31 = vmul.f32 %v15392_v42, %v15041_v40 }
 0x580   :  { %v15478_v4 = vmul.f32 %v15392_v42, %v15049_v1  ;;  %v15482_v49 = vmul.f32 %v15392_v42, %v15053_v47  ;;  %v15486_v34 = vmul.f32 %v15392_v42, %v15061_v27  ;;  %v15490_v48 = vmul.f32 %v15392_v42, %v15065_v24 }
 0x581   :  { %v5613_v45 = vcombine.high %v4779_v14, %v4779_v14  ;;  %v15493_v40 = vrot.slane %v4779_v14, %v19437_v22  ;;  %v15497_v1 = vrot.slane %v15470_v7, %v19437_v22  ;;  %v5647_v16 = vcombine.high %v4781_v28, %v4781_v28 }
 0x582   :  { %v5654_v47 = vrot.slane %v4781_v28, %v19437_v22  ;;  %v4650_v9 = vmul.f32 %v15392_v42, %v15073_v54  ;;  %v4651_v27 = vmul.f32 %v15392_v42, %v15077_v5  ;;  %v4652_v24 = vmul.f32 %v15392_v42, %v15085_v38 }
 0x583   :  { %19438 = vst [vmem:[#allocation19_spill] sm:$0xff] %v15497_v1  ;;  %v15507_v33 = vrot.slane %v5613_v45, %v19437_v22  ;;  %v5628_v6 = vcombine.high %v15493_v40, %v15493_v40  ;;  %v15512_v13 = vrot.slane %v5647_v16, %v19437_v22  ;;  %v4653_v21 = vmul.f32 %v15392_v42, %v15089_v58 }
 0x584   :  { %v5662_v12 = vcombine.high %v5654_v47, %v5654_v47  ;;  %v4654_v54 = vmul.f32 %v15392_v42, %v15097_v43  ;;  %v4655_v5 = vmul.f32 %v15392_v42, %v15101_v3  ;;  %v4656_v38 = vmul.f32 %v15392_v42, %v15109_v25 }
 0x585   :  { %19439 = vst [vmem:[#allocation11_spill] sm:$0xff] %v15507_v33  ;;  %19440 = vst [vmem:[#allocation12_spill] sm:$0xff] %v15512_v13  ;;  %v5663_v50 = vcombine.high %v15512_v13, %v15512_v13  ;;  %v5954_v36 = vmax.f32 %v5628_v6, %v5654_v47  ;;  %v4657_v53 = vmul.f32 %v15392_v42, %v15113_v56  ;;  %v19447_v13 = vld [vmem:[#allocation17_spill] sm:$0xff] }
 0x586   :  { %v4658_v58 = vmul.f32 %v15392_v42, %v15121_v61  ;;  %v15529_v14 = vmax.f32 %v15507_v33, %v5662_v12  ;;  %v4659_v43 = vmul.f32 %v15392_v42, %v15125_v41  ;;  %v4660_v3 = vmul.f32 %v15392_v42, %v15133_v20  ;;  %v19443_v12 = vld [vmem:[#allocation13_spill] sm:$0xff] }
 0x587   :  { %v4661_v25 = vmul.f32 %v15392_v42, %v15137_v63  ;;  %v5957_v28 = vmax.f32 %v15497_v1, %v5663_v50  ;;  %v11886_v45 = vrot.slane %v5954_v36, 9  ;;  %v4662_v56 = vmul.f32 %v15392_v42, %v15145_v46  ;;  %v19444_v50 = vld [vmem:[#allocation14_spill] sm:$0xff] }
 0x588   :  { %19441 = vst [vmem:[#allocation20_spill] sm:$0xff] %v15529_v14  ;;  %v4663_v61 = vmul.f32 %v15392_v42, %v15149_v57  ;;  %v4664_v16 = vmul.f32 %v15392_v42, %v15157_v0  ;;  %v4665_v41 = vmul.f32 %v15392_v42, %v15161_v10  ;;  %v4666_v20 = vmul.f32 %v15392_v42, %v15169_v32  ;;  %v19446_v14 = vld [vmem:[#allocation16_spill] sm:$0xff] }
 0x589   :  { %v4667_v63 = vmul.f32 %v15392_v42, %v15173_v44  ;;  %v11889_v47 = vrot.slane %v5957_v28, 9  ;;  %v15550_v6 = vmax.f32 %v5954_v36, %v11886_v45  ;;  %v4668_v46 = vmul.f32 %v15392_v42, %v15181_v11  ;;  %v19449_v45 = vld [vmem:[#allocation18_spill] sm:$0xff] }
 0x58a   :  { %v4669_v57 = vmul.f32 %v15392_v42, %v19443_v12  ;;  %v4670_v0 = vmul.f32 %v15392_v42, %v19444_v50  ;;  %v4671_v10 = vmul.f32 %v15392_v42, %v19445_v8  ;;  %v4672_v32 = vmul.f32 %v15392_v42, %v19446_v14 }
 0x58b   :  { %19442 = vst [vmem:[#allocation21_spill] sm:$0xff] %v15550_v6  ;;  %v4673_v44 = vmul.f32 %v15392_v42, %v19447_v13  ;;  %v15564_v36 = vmax.f32 %v5957_v28, %v11889_v47  ;;  %v4674_v11 = vmul.f32 %v15392_v42, %v19449_v45  ;;  %v5630_v50 = vcombine.high %v15470_v7, %v15470_v7 }
 0x58c   :  { %v4684_v14 = vadd.f32 %v15417_v62, %v15402_v55  ;;  %v4685_v13 = vadd.f32 %v15417_v62, %v15406_v39  ;;  %v4686_v28 = vadd.f32 %v15417_v62, %v15410_v60  ;;  %v4687_v42 = vadd.f32 %v15417_v62, %v15414_v59 }
 0x58d   :  { %19448 = vst [vmem:[#allocation13_spill] sm:$0xff] %v15564_v36  ;;  %v4688_v47 = vadd.f32 %v15417_v62, %v15421_v35  ;;  %v4689_v7 = vadd.f32 %v15417_v62, %v15425_v26  ;;  %v4690_v45 = vadd.f32 %v15417_v62, %v15429_v19  ;;  %v4691_v55 = vadd.f32 %v15417_v62, %v15433_v37 }
 0x58e   :  { %v4692_v39 = vadd.f32 %v15417_v62, %v15437_v52  ;;  %v4693_v60 = vadd.f32 %v15417_v62, %v15441_v29  ;;  %v4694_v59 = vadd.f32 %v15417_v62, %v15445_v30  ;;  %v4695_v35 = vadd.f32 %v15417_v62, %v15452_v23 }
 0x58f   :  { %v4696_v26 = vadd.f32 %v15417_v62, %v15456_v15  ;;  %v4697_v19 = vadd.f32 %v15417_v62, %v15460_v51  ;;  %v4698_v37 = vadd.f32 %v15417_v62, %v15464_v18  ;;  %v4699_v52 = vadd.f32 %v15417_v62, %v15468_v17 }
 0x590   :  { %v4700_v29 = vadd.f32 %v15417_v62, %v15474_v31  ;;  %v4701_v30 = vadd.f32 %v15417_v62, %v15478_v4  ;;  %v4702_v23 = vadd.f32 %v15417_v62, %v15482_v49  ;;  %v4703_v15 = vadd.f32 %v15417_v62, %v15486_v34 }
 0x591   :  { %v4704_v51 = vadd.f32 %v15417_v62, %v15490_v48  ;;  %v4705_v18 = vadd.f32 %v15417_v62, %v4650_v9  ;;  %v4706_v12 = vadd.f32 %v15417_v62, %v4651_v27  ;;  %v4707_v17 = vadd.f32 %v15417_v62, %v4652_v24 }
 0x592   :  { %v4708_v31 = vadd.f32 %v15417_v62, %v4653_v21  ;;  %v4709_v8 = vadd.f32 %v15417_v62, %v4654_v54  ;;  %v4710_v4 = vadd.f32 %v15417_v62, %v4655_v5  ;;  %v4711_v49 = vadd.f32 %v15417_v62, %v4656_v38 }
 0x593   :  { %v4712_v36 = vadd.f32 %v15417_v62, %v4657_v53  ;;  %v4713_v34 = vadd.f32 %v15417_v62, %v4658_v58  ;;  %v4714_v48 = vadd.f32 %v15417_v62, %v4659_v43  ;;  %v4715_v9 = vadd.f32 %v15417_v62, %v4660_v3 }
 0x594   :  { %v4716_v27 = vadd.f32 %v15417_v62, %v4661_v25  ;;  %v4717_v24 = vadd.f32 %v15417_v62, %v4662_v56  ;;  %v4718_v21 = vadd.f32 %v15417_v62, %v4663_v61  ;;  %v4719_v54 = vadd.f32 %v15417_v62, %v4664_v16 }
 0x595   :  { %v4720_v5 = vadd.f32 %v15417_v62, %v4665_v41  ;;  %v4721_v38 = vadd.f32 %v15417_v62, %v4666_v20  ;;  %v4722_v53 = vadd.f32 %v15417_v62, %v4667_v63  ;;  %v4723_v58 = vadd.f32 %v15417_v62, %v4668_v46 }
 0x596   :  { %v4724_v43 = vadd.f32 %v15417_v62, %v4669_v57  ;;  %v4725_v3 = vadd.f32 %v15417_v62, %v4670_v0  ;;  %v4726_v25 = vadd.f32 %v15417_v62, %v4671_v10  ;;  %v4727_v56 = vadd.f32 %v15417_v62, %v4672_v32 }
 0x597   :  { %v4728_v61 = vadd.f32 %v15417_v62, %v4673_v44  ;;  %v4729_v16 = vadd.f32 %v15417_v62, %v4674_v11  ;;  %v15642_v41 = vrot.slane %v5630_v50, %v19437_v22  ;;  %v15644_v20 = vmax.f32 %v4684_v14, 0.0 }
 0x598   :  { %v15646_v63 = vmax.f32 %v4685_v13, 0.0  ;;  %v15648_v46 = vmax.f32 %v4686_v28, 0.0  ;;  %v15650_v57 = vmax.f32 %v4687_v42, 0.0  ;;  %v15652_v0 = vmax.f32 %v4688_v47, 0.0 }
 0x599   :  { %19450 = vst [vmem:[#allocation14_spill] sm:$0xff] %v15642_v41  ;;  %v15654_v10 = vmax.f32 %v4689_v7, 0.0  ;;  %v15656_v32 = vmax.f32 %v4690_v45, 0.0  ;;  %v15658_v44 = vmax.f32 %v4691_v55, 0.0  ;;  %v15660_v62 = vmax.f32 %v4692_v39, 0.0 }
 0x59a   :  { %v15662_v11 = vmax.f32 %v4693_v60, 0.0  ;;  %v15664_v50 = vmax.f32 %v4694_v59, 0.0  ;;  %v15666_v14 = vmax.f32 %v4695_v35, 0.0  ;;  %v15668_v13 = vmax.f32 %v4696_v26, 0.0 }
 0x59b   :  { %19451 = vst [vmem:[#allocation15_spill] sm:$0xff] %v15660_v62  ;;  %v15670_v28 = vmax.f32 %v4697_v19, 0.0  ;;  %v15672_v42 = vmax.f32 %v4698_v37, 0.0  ;;  %v15674_v47 = vmax.f32 %v4699_v52, 0.0  ;;  %v15676_v7 = vmax.f32 %v4700_v29, 0.0 }
 0x59c   :  { %19452 = vst [vmem:[#allocation16_spill] sm:$0xff] %v15662_v11  ;;  %v15678_v45 = vmax.f32 %v4701_v30, 0.0  ;;  %v15680_v55 = vmax.f32 %v4702_v23, 0.0  ;;  %v15682_v39 = vmax.f32 %v4703_v15, 0.0  ;;  %v15684_v60 = vmax.f32 %v4704_v51, 0.0 }
 0x59d   :  { %v15686_v59 = vmax.f32 %v4705_v18, 0.0  ;;  %v15688_v35 = vmax.f32 %v4706_v12, 0.0  ;;  %v15690_v26 = vmax.f32 %v4707_v17, 0.0  ;;  %v15692_v19 = vmax.f32 %v4708_v31, 0.0 }
 0x59e   :  { %v15694_v37 = vmax.f32 %v4709_v8, 0.0  ;;  %v15696_v52 = vmax.f32 %v4710_v4, 0.0  ;;  %v15698_v29 = vmax.f32 %v4711_v49, 0.0  ;;  %v15700_v30 = vmax.f32 %v4712_v36, 0.0 }
 0x59f   :  { %v15702_v23 = vmax.f32 %v4713_v34, 0.0  ;;  %v15704_v15 = vmax.f32 %v4714_v48, 0.0  ;;  %v15706_v51 = vmax.f32 %v4715_v9, 0.0  ;;  %v15708_v12 = vmax.f32 %v4716_v27, 0.0 }
 0x5a0   :  { %v15710_v18 = vmax.f32 %v4717_v24, 0.0  ;;  %v15712_v17 = vmax.f32 %v4718_v21, 0.0  ;;  %v15714_v8 = vmax.f32 %v4719_v54, 0.0  ;;  %v15716_v31 = vmax.f32 %v4720_v5, 0.0 }
 0x5a1   :  { %v15718_v4 = vmax.f32 %v4721_v38, 0.0  ;;  %v15720_v36 = vmax.f32 %v4722_v53, 0.0  ;;  %v15722_v49 = vmax.f32 %v4723_v58, 0.0  ;;  %v15724_v34 = vmax.f32 %v4724_v43, 0.0 }
 0x5a2   :  { %v15726_v48 = vmax.f32 %v4725_v3, 0.0  ;;  %v15728_v9 = vmax.f32 %v4726_v25, 0.0  ;;  %v15730_v27 = vmax.f32 %v4727_v56, 0.0  ;;  %v15732_v24 = vmax.f32 %v4728_v61, 0.0 }
 0x5a3   :  { %v15734_v21 = vmax.f32 %v4729_v16, 0.0  ;;  %v15742_v38 = vrot.slane %v15644_v20, %v19437_v22  ;;  %v15748_v58 = vrot.slane %v15646_v63, %v19437_v22  ;;  %v15754_v3 = vrot.slane %v15648_v46, %v19437_v22 }
 0x5a4   :  { %19453 = vst [vmem:[#allocation17_spill] sm:$0xff] %v15730_v27  ;;  %v15760_v56 = vrot.slane %v15650_v57, %v19437_v22  ;;  %v15766_v16 = vrot.slane %v15652_v0, %v19437_v22  ;;  %v15772_v53 = vrot.slane %v15654_v10, %v19437_v22  ;;  %v15778_v5 = vrot.slane %v15656_v32, %v19437_v22 }
 0x5a5   :  { %19454 = vst [vmem:[#allocation18_spill] sm:$0xff] %v15734_v21  ;;  %19455 = vst [vmem:[#allocation22_spill] sm:$0xff] %v15742_v38  ;;  %v15784_v54 = vrot.slane %v15658_v44, %v19437_v22  ;;  %v15790_v6 = vrot.slane %v15660_v62, %v19437_v22  ;;  %v15796_v33 = vrot.slane %v15662_v11, %v19437_v22 }
 0x5a6   :  { %19456 = vst [vmem:[#allocation23_spill] sm:$0xff] %v15748_v58  ;;  %19457 = vst [vmem:[#allocation24_spill] sm:$0xff] %v15754_v3  ;;  %v15802_v1 = vrot.slane %v15664_v50, %v19437_v22  ;;  %v15826_v11 = vrot.slane %v15672_v42, %v19437_v22  ;;  %v15838_v62 = vrot.slane %v15676_v7, %v19437_v22 }
 0x5a7   :  { %19458 = vst [vmem:[#allocation25_spill] sm:$0xff] %v15760_v56  ;;  %19459 = vst [vmem:[#allocation26_spill] sm:$0xff] %v15772_v53  ;;  %v19496_v61 = vcombine.high %v15642_v41, %v15642_v41  ;;  %v19498_v43 = vcombine.high %v15664_v50, %v15664_v50  ;;  %v19500_v25 = vcombine.high %v15666_v14, %v15666_v14 }
 0x5a8   :  { %19460 = vst [vmem:[#allocation27_spill] sm:$0xff] %v15790_v6  ;;  %19461 = vst [vmem:[#allocation28_spill] sm:$0xff] %v15796_v33  ;;  %v15808_v6 = vrot.slane %v15666_v14, %v19437_v22  ;;  %v15814_v33 = vrot.slane %v15668_v13, %v19437_v22  ;;  %v19501_v41 = vcombine.high %v15668_v13, %v15668_v13 }
 0x5a9   :  { %19462 = vst [vmem:[#allocation29_spill] sm:$0xff] %v15802_v1  ;;  %v15820_v1 = vrot.slane %v15670_v28, %v19437_v22  ;;  %19464 = vst [vmem:[#allocation31_spill] sm:$0xff] %v15826_v11  ;;  %v15844_v11 = vrot.slane %v15678_v45, %v19437_v22  ;;  %v19504_v14 = vcombine.high %v15644_v20, %v15644_v20 }
 0x5aa   :  { %19463 = vst [vmem:[#allocation30_spill] sm:$0xff] %v15814_v33  ;;  %v15832_v33 = vrot.slane %v15674_v47, %v19437_v22  ;;  %19466 = vst [vmem:[#allocation33_spill] sm:$0xff] %v15838_v62  ;;  %v15856_v62 = vrot.slane %v15682_v39, %v19437_v22  ;;  %v19506_v20 = vcombine.high %v15646_v63, %v15646_v63 }
 0x5ab   :  { %19467 = vst [vmem:[#allocation34_spill] sm:$0xff] %v15844_v11  ;;  %v15862_v11 = vrot.slane %v15684_v60, %v19437_v22 }
 0x5ac   :  { %19465 = vst [vmem:[#allocation32_spill] sm:$0xff] %v15832_v33  ;;  %v15850_v33 = vrot.slane %v15680_v55, %v19437_v22  ;;  %19469 = vst [vmem:[#allocation36_spill] sm:$0xff] %v15856_v62  ;;  %v15874_v62 = vrot.slane %v15688_v35, %v19437_v22 }
 0x5ad   :  { %19470 = vst [vmem:[#allocation37_spill] sm:$0xff] %v15862_v11  ;;  %v15880_v11 = vrot.slane %v15690_v26, %v19437_v22 }
 0x5ae   :  { %19468 = vst [vmem:[#allocation35_spill] sm:$0xff] %v15850_v33  ;;  %v15868_v33 = vrot.slane %v15686_v59, %v19437_v22  ;;  %19472 = vst [vmem:[#allocation39_spill] sm:$0xff] %v15874_v62  ;;  %v15892_v62 = vrot.slane %v15694_v37, %v19437_v22 }
 0x5af   :  { %19473 = vst [vmem:[#allocation40_spill] sm:$0xff] %v15880_v11  ;;  %v15898_v11 = vrot.slane %v15696_v52, %v19437_v22 }
 0x5b0   :  { %19471 = vst [vmem:[#allocation38_spill] sm:$0xff] %v15868_v33  ;;  %v15886_v33 = vrot.slane %v15692_v19, %v19437_v22  ;;  %19475 = vst [vmem:[#allocation42_spill] sm:$0xff] %v15892_v62  ;;  %v15910_v62 = vrot.slane %v15700_v30, %v19437_v22 }
 0x5b1   :  { %19476 = vst [vmem:[#allocation43_spill] sm:$0xff] %v15898_v11  ;;  %v15916_v11 = vrot.slane %v15702_v23, %v19437_v22 }
 0x5b2   :  { %19474 = vst [vmem:[#allocation41_spill] sm:$0xff] %v15886_v33  ;;  %v15904_v33 = vrot.slane %v15698_v29, %v19437_v22  ;;  %19478 = vst [vmem:[#allocation45_spill] sm:$0xff] %v15910_v62  ;;  %v15928_v62 = vrot.slane %v15706_v51, %v19437_v22 }
 0x5b3   :  { %19479 = vst [vmem:[#allocation46_spill] sm:$0xff] %v15916_v11  ;;  %v15934_v11 = vrot.slane %v15708_v12, %v19437_v22 }
 0x5b4   :  { %19477 = vst [vmem:[#allocation44_spill] sm:$0xff] %v15904_v33  ;;  %v15922_v33 = vrot.slane %v15704_v15, %v19437_v22  ;;  %19481 = vst [vmem:[#allocation48_spill] sm:$0xff] %v15928_v62  ;;  %v15946_v62 = vrot.slane %v15712_v17, %v19437_v22 }
 0x5b5   :  { %19482 = vst [vmem:[#allocation49_spill] sm:$0xff] %v15934_v11  ;;  %v15952_v11 = vrot.slane %v15714_v8, %v19437_v22 }
 0x5b6   :  { %19480 = vst [vmem:[#allocation47_spill] sm:$0xff] %v15922_v33  ;;  %v15940_v33 = vrot.slane %v15710_v18, %v19437_v22  ;;  %19484 = vst [vmem:[#allocation51_spill] sm:$0xff] %v15946_v62  ;;  %v15964_v62 = vrot.slane %v15718_v4, %v19437_v22 }
 0x5b7   :  { %19485 = vst [vmem:[#allocation52_spill] sm:$0xff] %v15952_v11  ;;  %v15970_v11 = vrot.slane %v15720_v36, %v19437_v22 }
 0x5b8   :  { %19483 = vst [vmem:[#allocation50_spill] sm:$0xff] %v15940_v33  ;;  %v15958_v33 = vrot.slane %v15716_v31, %v19437_v22  ;;  %19487 = vst [vmem:[#allocation54_spill] sm:$0xff] %v15964_v62  ;;  %v15982_v62 = vrot.slane %v15724_v34, %v19437_v22 }
 0x5b9   :  { %19488 = vst [vmem:[#allocation55_spill] sm:$0xff] %v15970_v11  ;;  %v15988_v11 = vrot.slane %v15726_v48, %v19437_v22 }
 0x5ba   :  { %19486 = vst [vmem:[#allocation53_spill] sm:$0xff] %v15958_v33  ;;  %v15976_v33 = vrot.slane %v15722_v49, %v19437_v22  ;;  %19490 = vst [vmem:[#allocation57_spill] sm:$0xff] %v15982_v62  ;;  %v16000_v62 = vrot.slane %v15730_v27, %v19437_v22  ;;  %v16018_v27 = vmax.f32 %v15493_v40, %v19496_v61 }
 0x5bb   :  { %19491 = vst [vmem:[#allocation58_spill] sm:$0xff] %v15988_v11  ;;  %v16006_v11 = vrot.slane %v15732_v24, %v19437_v22  ;;  %v5049_v40 = vrot.slane %v19501_v41, %v19437_v22  ;;  %v19502_v61 = vcombine.high %v15670_v28, %v15670_v28 }
 0x5bc   :  { %19489 = vst [vmem:[#allocation56_spill] sm:$0xff] %v15976_v33  ;;  %v15994_v33 = vrot.slane %v15728_v9, %v19437_v22  ;;  %19493 = vst [vmem:[#allocation60_spill] sm:$0xff] %v16000_v62  ;;  %v16024_v62 = vrot.slane %v19498_v43, %v19437_v22  ;;  %v5067_v43 = vcombine.high %v15820_v1, %v15820_v1 }
 0x5bd   :  { %19494 = vst [vmem:[#allocation61_spill] sm:$0xff] %v16006_v11  ;;  %19497 = vst [vmem:[#allocation63_spill] sm:$0xff] %v16018_v27  ;;  %v5032_v11 = vrot.slane %v19500_v25, %v19437_v22  ;;  %v16040_v50 = vrot.slane %v19502_v61, %v19437_v22  ;;  %v16048_v25 = vrot.slane %v19504_v14, %v19437_v22 }
 0x5be   :  { %19492 = vst [vmem:[#allocation59_spill] sm:$0xff] %v15994_v33  ;;  %v16012_v33 = vrot.slane %v15734_v21, %v19437_v22  ;;  %19499 = vst [vmem:[#allocation64_spill] sm:$0xff] %v16024_v62  ;;  %v5017_v41 = vcombine.high %v16024_v62, %v16024_v62  ;;  %v5051_v21 = vcombine.high %v5049_v40, %v5049_v40 }
 0x5bf   :  { %19503 = vst [vmem:[#allocation65_spill] sm:$0xff] %v16040_v50  ;;  %19505 = vst [vmem:[#allocation66_spill] sm:$0xff] %v16048_v25  ;;  %v5034_v13 = vcombine.high %v5032_v11, %v5032_v11  ;;  %v5885_v61 = vmax.f32 %v5032_v11, %v5067_v43  ;;  %v16059_v14 = vrot.slane %v19506_v20, %v19437_v22 }
 0x5c0   :  { %19495 = vst [vmem:[#allocation62_spill] sm:$0xff] %v16012_v33  ;;  %v5033_v33 = vcombine.high %v15808_v6, %v15808_v6  ;;  %v19508_v62 = vcombine.high %v15648_v46, %v15648_v46  ;;  %v19510_v20 = vcombine.high %v15650_v57, %v15650_v57  ;;  %v19512_v57 = vcombine.high %v15654_v10, %v15654_v10 }
 0x5c1   :  { %19507 = vst [vmem:[#allocation67_spill] sm:$0xff] %v16059_v14  ;;  %v5886_v11 = vmax.f32 %v5034_v13, %v16040_v50  ;;  %v11817_v25 = vrot.slane %v5885_v61, 9  ;;  %v19511_v13 = vcombine.high %v15652_v0, %v15652_v0  ;;  %v19531_v0 = vcombine.high %v15674_v47, %v15674_v47 }
 0x5c2   :  { %v5884_v28 = vmax.f32 %v5033_v33, %v15820_v1  ;;  %v16067_v38 = vrot.slane %v19508_v62, %v19437_v22  ;;  %v5882_v1 = vmax.f32 %v5017_v41, %v5049_v40  ;;  %v5883_v33 = vmax.f32 %v15808_v6, %v5051_v21 }
 0x5c3   :  { %v16077_v27 = vrot.slane %v19510_v20, %v19437_v22  ;;  %v11818_v6 = vrot.slane %v5886_v11, 9  ;;  %v6375_v41 = vmax.f32 %v5885_v61, %v11817_v25  ;;  %v16085_v58 = vrot.slane %v19511_v13, %v19437_v22 }
 0x5c4   :  { %19509 = vst [vmem:[#allocation68_spill] sm:$0xff] %v16067_v38  ;;  %v11816_v43 = vrot.slane %v5884_v28, 9  ;;  %v11814_v62 = vrot.slane %v5882_v1, 9  ;;  %v11815_v40 = vrot.slane %v5883_v33, 9  ;;  %v16093_v20 = vrot.slane %v19512_v57, %v19437_v22 }
 0x5c5   :  { %v6376_v3 = vmax.f32 %v5886_v11, %v11818_v6  ;;  %v19515_v61 = vcombine.high %v15656_v32, %v15656_v32  ;;  %v19521_v6 = vld [vmem:[#allocation15_spill] sm:$0xff]  ;;  %v19527_v32 = vld [vmem:[#allocation29_spill] sm:$0xff]  ;;  %v19538_v47 = vcombine.high %v15678_v45, %v15678_v45  ;;  %v19543_v45 = vcombine.high %v15682_v39, %v15682_v39 }
 0x5c6   :  { %v6374_v21 = vmax.f32 %v5884_v28, %v11816_v43  ;;  %v6372_v46 = vmax.f32 %v5882_v1, %v11814_v62  ;;  %v6373_v56 = vmax.f32 %v5883_v33, %v11815_v40  ;;  %v16099_v28 = vrot.slane %v6375_v41, %v15385_v2 }
 0x5c7   :  { %v16107_v43 = vrot.slane %v19515_v61, %v19437_v22  ;;  %v16118_v11 = vrot.slane %v6376_v3, %v15385_v2  ;;  %v19520_v62 = vcombine.high %v15658_v44, %v15658_v44  ;;  %v19524_v3 = vld [vmem:[#allocation16_spill] sm:$0xff] }
 0x5c8   :  { %v16096_v25 = vrot.slane %v6374_v21, %v15385_v2  ;;  %19514 = vst [vmem:[#allocation70_spill] sm:$0xff] %v16099_v28  ;;  %v16112_v1 = vrot.slane %v6372_v46, %v15385_v2  ;;  %v16115_v33 = vrot.slane %v6373_v56, %v15385_v2  ;;  %v19522_v46 = vcombine.high %v19521_v6, %v19521_v6  ;;  %v19523_v56 = vld [vmem:[#allocation27_spill] sm:$0xff]  ;;  %v19526_v61 = vld [vmem:[#allocation28_spill] sm:$0xff] }
 0x5c9   :  { %19516 = vst [vmem:[#allocation71_spill] sm:$0xff] %v16107_v43  ;;  %19519 = vst [vmem:[#allocation74_spill] sm:$0xff] %v16118_v11  ;;  %v16124_v40 = vrot.slane %v19520_v62, %v19437_v22  ;;  %v19525_v13 = vcombine.high %v19524_v3, %v19524_v3 }
 0x5ca   :  { %19513 = vst [vmem:[#allocation69_spill] sm:$0xff] %v16096_v25  ;;  %19517 = vst [vmem:[#allocation72_spill] sm:$0xff] %v16112_v1  ;;  %v16132_v21 = vrot.slane %v19522_v46, %v19437_v22  ;;  %v6825_v44 = vsel %vm6698_vm14, %v16115_v33, %v16112_v1  ;;  %v19545_v1 = vcombine.high %v15684_v60, %v15684_v60 }
 0x5cb   :  { %19518 = vst [vmem:[#allocation73_spill] sm:$0xff] %v16115_v33  ;;  %v16140_v57 = vrot.slane %v19525_v13, %v19437_v22  ;;  %v6826_v41 = vsel %vm6700_vm13, %v16096_v25, %v6825_v44  ;;  %v19529_v13 = vcombine.high %v15672_v42, %v15672_v42  ;;  %v16169_v44 = vrot.slane %v19531_v0, %v19437_v22 }
 0x5cc   :  { %v6827_v6 = vsel %vm6702_vm15, %v16099_v28, %v6826_v41  ;;  %v19534_v42 = vcombine.high %v15676_v7, %v15676_v7  ;;  %v16189_v0 = vrot.slane %v19538_v47, %v19437_v22  ;;  %v19540_v7 = vcombine.high %v15680_v55, %v15680_v55 }
 0x5cd   :  { %v16159_v10 = vrot.slane %v19529_v13, %v19437_v22  ;;  %19532 = vst [vmem:[#allocation15_spill] sm:$0xff] %v16169_v44  ;;  %v16181_v62 = vsel %vm6704_vm2, %v16118_v11, %v6827_v6  ;;  %v16207_v47 = vrot.slane %v19543_v45, %v19437_v22  ;;  %v16215_v50 = vrot.slane %v19545_v1, %v19437_v22 }
 0x5ce   :  { %v16177_v13 = vrot.slane %v19534_v42, %v19437_v22  ;;  %19536 = vst [vmem:[#allocation16_spill] sm:$0xff] %v16181_v62  ;;  %6859 = vrot.lane.b32.xlu1 %v16181_v62, %s12726_s2  ;;  %v16199_v6 = vrot.slane %v19540_v7, %v19437_v22  ;;  %v19548_v28 = vcombine.high %v15686_v59, %v15686_v59 }
 0x5cf   :  { %19546 = vst [vmem:[#allocation29_spill] sm:$0xff] %v16215_v50  ;;  %v19550_v11 = vcombine.high %v15688_v35, %v15688_v35  ;;  %v19552_v7 = vcombine.high %v15690_v26, %v15690_v26  ;;  %v19555_v45 = vcombine.high %v15692_v19, %v15692_v19  ;;  %v19557_v1 = vcombine.high %v15694_v37, %v15694_v37 }
 0x5d0   :  { %19535 = vst [vmem:[#allocation27_spill] sm:$0xff] %v16177_v13  ;;  %19541 = vst [vmem:[#allocation28_spill] sm:$0xff] %v16199_v6  ;;  %v16223_v62 = vrot.slane %v19548_v28, %v19437_v22  ;;  %v19560_v28 = vcombine.high %v15696_v52, %v15696_v52 }
 0x5d1   :  { %v16231_v42 = vrot.slane %v19550_v11, %v19437_v22  ;;  %v16239_v55 = vrot.slane %v19552_v7, %v19437_v22  ;;  %v16247_v39 = vrot.slane %v19555_v45, %v19437_v22  ;;  %v16255_v60 = vrot.slane %v19557_v1, %v19437_v22 }
 0x5d2   :  { %v16263_v59 = vrot.slane %v19560_v28, %v19437_v22  ;;  %v19562_v11 = vcombine.high %v15698_v29, %v15698_v29  ;;  %v19565_v7 = vcombine.high %v15700_v30, %v15700_v30  ;;  %v19567_v45 = vcombine.high %v15702_v23, %v15702_v23 }
 0x5d3   :  { %19553 = vst [vmem:[#allocation75_spill] sm:$0xff] %v16239_v55  ;;  %19558 = vst [vmem:[#allocation76_spill] sm:$0xff] %v16255_v60  ;;  %v19570_v1 = vcombine.high %v15704_v15, %v15704_v15  ;;  %v19572_v28 = vcombine.high %v15706_v51, %v15706_v51 }
 0x5d4   :  { %v16271_v35 = vrot.slane %v19562_v11, %v19437_v22  ;;  %v16279_v26 = vrot.slane %v19565_v7, %v19437_v22  ;;  %v16287_v19 = vrot.slane %v19567_v45, %v19437_v22  ;;  %v19574_v11 = vcombine.high %v15708_v12, %v15708_v12 }
 0x5d5   :  { %v16295_v37 = vrot.slane %v19570_v1, %v19437_v22  ;;  %v16303_v52 = vrot.slane %v19572_v28, %v19437_v22  ;;  %v19577_v7 = vcombine.high %v15710_v18, %v15710_v18  ;;  %v19579_v45 = vcombine.high %v15712_v17, %v15712_v17 }
 0x5d6   :  { %19563 = vst [vmem:[#allocation77_spill] sm:$0xff] %v16271_v35  ;;  %19568 = vst [vmem:[#allocation78_spill] sm:$0xff] %v16287_v19  ;;  %v16311_v29 = vrot.slane %v19574_v11, %v19437_v22  ;;  %v19582_v1 = vcombine.high %v15714_v8, %v15714_v8  ;;  %v19584_v28 = vcombine.high %v15716_v31, %v15716_v31  ;;  %v19638_v35 = vld [vmem:[#allocation31_spill] sm:$0xff] }
 0x5d7   :  { %v16319_v30 = vrot.slane %v19577_v7, %v19437_v22  ;;  %v16327_v23 = vrot.slane %v19579_v45, %v19437_v22  ;;  %v19587_v11 = vcombine.high %v15718_v4, %v15718_v4  ;;  %v19590_v7 = vcombine.high %v15720_v36, %v15720_v36 }
 0x5d8   :  { %19575 = vst [vmem:[#allocation79_spill] sm:$0xff] %v16311_v29  ;;  %v16335_v15 = vrot.slane %v19582_v1, %v19437_v22  ;;  %v16343_v51 = vrot.slane %v19584_v28, %v19437_v22  ;;  %v19592_v45 = vcombine.high %v15722_v49, %v15722_v49  ;;  %v19595_v1 = vcombine.high %v15724_v34, %v15724_v34 }
 0x5d9   :  { %19580 = vst [vmem:[#allocation80_spill] sm:$0xff] %v16327_v23  ;;  %v16351_v12 = vrot.slane %v19587_v11, %v19437_v22  ;;  %v16359_v18 = vrot.slane %v19590_v7, %v19437_v22  ;;  %v19597_v28 = vcombine.high %v15726_v48, %v15726_v48  ;;  %v19600_v11 = vcombine.high %v15728_v9, %v15728_v9  ;;  %v19602_v7 = vld [vmem:[#allocation17_spill] sm:$0xff] }
 0x5da   :  { %19585 = vst [vmem:[#allocation81_spill] sm:$0xff] %v16343_v51  ;;  %v16367_v17 = vrot.slane %v19592_v45, %v19437_v22  ;;  %v16375_v8 = vrot.slane %v19595_v1, %v19437_v22  ;;  %v19603_v36 = vcombine.high %v19602_v7, %v19602_v7  ;;  %v19606_v45 = vcombine.high %v15732_v24, %v15732_v24  ;;  %v19609_v1 = vld [vmem:[#allocation18_spill] sm:$0xff] }
 0x5db   :  { %19588 = vst [vmem:[#allocation82_spill] sm:$0xff] %v16351_v12  ;;  %v16383_v31 = vrot.slane %v19597_v28, %v19437_v22  ;;  %v16391_v4 = vrot.slane %v19600_v11, %v19437_v22  ;;  %v19610_v34 = vcombine.high %v19609_v1, %v19609_v1  ;;  %v4898_v48 = vcombine.high %v16077_v27, %v16077_v27  ;;  %v19615_v28 = vld [vmem:[#allocation66_spill] sm:$0xff] }
 0x5dc   :  { %19593 = vst [vmem:[#allocation83_spill] sm:$0xff] %v16367_v17  ;;  %v16399_v33 = vrot.slane %v19603_v36, %v19437_v22  ;;  %v16407_v49 = vrot.slane %v19606_v45, %v19437_v22  ;;  %v4915_v24 = vcombine.high %v16085_v58, %v16085_v58  ;;  %v4932_v45 = vcombine.high %v16093_v20, %v16093_v20 }
 0x5dd   :  { %19598 = vst [vmem:[#allocation84_spill] sm:$0xff] %v16383_v31  ;;  %v16415_v25 = vrot.slane %v19610_v34, %v19437_v22  ;;  %v19613_v1 = vcombine.high %v15766_v16, %v15766_v16  ;;  %v19614_v11 = vcombine.high %v15778_v5, %v15778_v5  ;;  %v5868_v36 = vmax.f32 %v4898_v48, %v16093_v20  ;;  %v19637_v31 = vld [vmem:[#allocation33_spill] sm:$0xff] }
 0x5de   :  { %19604 = vst [vmem:[#allocation17_spill] sm:$0xff] %v16399_v33  ;;  %19607 = vst [vmem:[#allocation85_spill] sm:$0xff] %v16407_v49  ;;  %v5869_v9 = vmax.f32 %v15766_v16, %v4932_v45  ;;  %v5872_v63 = vmax.f32 %v4915_v24, %v16107_v43  ;;  %v19633_v24 = vld [vmem:[#allocation30_spill] sm:$0xff] }
 0x5df   :  { %v5870_v34 = vmax.f32 %v19613_v1, %v15778_v5  ;;  %v5871_v7 = vmax.f32 %v16085_v58, %v19614_v11  ;;  %v11800_v11 = vrot.slane %v5868_v36, 9 }
 0x5e0   :  { %v11801_v22 = vrot.slane %v5869_v9, 9  ;;  %v11804_v3 = vrot.slane %v5872_v63, 9 }
 0x5e1   :  { %v11802_v41 = vrot.slane %v5870_v34, 9  ;;  %v11803_v46 = vrot.slane %v5871_v7, 9  ;;  %v6358_v1 = vmax.f32 %v5868_v36, %v11800_v11 }
 0x5e2   :  { %v6359_v38 = vmax.f32 %v5869_v9, %v11801_v22  ;;  %v6362_v5 = vmax.f32 %v5872_v63, %v11804_v3  ;;  %v19625_v9 = vld [vmem:[#allocation25_spill] sm:$0xff]  ;;  %v19629_v3 = vcombine.high %v15772_v53, %v15772_v53 }
 0x5e3   :  { %v6360_v16 = vmax.f32 %v5870_v34, %v11802_v41  ;;  %v6361_v48 = vmax.f32 %v5871_v7, %v11803_v46  ;;  %v16466_v7 = vrot.slane %v6358_v1, %v15385_v2  ;;  %v19621_v34 = vld [vmem:[#allocation24_spill] sm:$0xff]  ;;  %v19622_v46 = vld [vmem:[#allocation22_spill] sm:$0xff] }
 0x5e4   :  { %v16469_v22 = vrot.slane %v6359_v38, %v15385_v2  ;;  %v16472_v63 = vrot.slane %v6362_v5, %v15385_v2  ;;  %v19623_v1 = vcombine.high %v19622_v46, %v19622_v46  ;;  %v19624_v11 = vcombine.high %v19621_v34, %v19621_v34 }
 0x5e5   :  { %v16456_v43 = vrot.slane %v6360_v16, %v15385_v2  ;;  %v16459_v14 = vrot.slane %v6361_v48, %v15385_v2  ;;  %19618 = vst [vmem:[#allocation86_spill] sm:$0xff] %v16466_v7  ;;  %v16565_v45 = vmax.f32 %v16077_v27, %v19629_v3  ;;  %v19634_v27 = vcombine.high %v19633_v24, %v19633_v24  ;;  %v19635_v3 = vld [vmem:[#allocation64_spill] sm:$0xff] }
 0x5e6   :  { %19619 = vst [vmem:[#allocation87_spill] sm:$0xff] %v16469_v22  ;;  %19620 = vst [vmem:[#allocation88_spill] sm:$0xff] %v16472_v63  ;;  %v6817_v38 = vsel %vm6698_vm14, %v16469_v22, %v16466_v7  ;;  %v16553_v16 = vmax.f32 %v19615_v28, %v19624_v11  ;;  %v19631_v11 = vcombine.high %v19526_v61, %v19526_v61 }
 0x5e7   :  { %19616 = vst [vmem:[#allocation18_spill] sm:$0xff] %v16456_v43  ;;  %19617 = vst [vmem:[#allocation66_spill] sm:$0xff] %v16459_v14  ;;  %v6818_v48 = vsel %vm6700_vm13, %v16456_v43, %v6817_v38  ;;  %v19626_v38 = vld [vmem:[#allocation23_spill] sm:$0xff] }
 0x5e8   :  { %v6819_v5 = vsel %vm6702_vm15, %v16459_v14, %v6818_v48  ;;  %v16547_v48 = vmax.f32 %v19623_v1, %v19621_v34  ;;  %v19627_v41 = vcombine.high %v19626_v38, %v19626_v38  ;;  %v19630_v1 = vcombine.high %v15784_v54, %v15784_v54  ;;  %v19651_v14 = vld [vmem:[#allocation35_spill] sm:$0xff]  ;;  %v19672_v38 = vld [vmem:[#allocation42_spill] sm:$0xff] }
 0x5e9   :  { %v16511_v36 = vsel %vm6704_vm2, %v16472_v63, %v6819_v5  ;;  %v5876_v58 = vmax.f32 %v16124_v40, %v19631_v11  ;;  %v19643_v63 = vld [vmem:[#allocation34_spill] sm:$0xff]  ;;  %v19652_v43 = vcombine.high %v19651_v14, %v19651_v14 }
 0x5ea   :  { %6855 = vrot.lane.b32.xlu0 %v16511_v36, %s12726_s2  ;;  %v16559_v5 = vmax.f32 %v19627_v41, %v19625_v9  ;;  %v16571_v34 = vmax.f32 %v19630_v1, %v19526_v61  ;;  %v19632_v41 = vcombine.high %v19523_v56, %v19523_v56  ;;  %v16585_v9 = vmax.f32 %v19635_v3, %v19634_v27  ;;  %v19647_v27 = vld [vmem:[#allocation36_spill] sm:$0xff] }
 0x5eb   :  { %v19639_v1 = vcombine.high %v19638_v35, %v19638_v35  ;;  %v19641_v61 = vcombine.high %v19637_v31, %v19637_v31  ;;  %v19648_v3 = vcombine.high %v19647_v27, %v19647_v27  ;;  %7130 = vst.msk [vmem:[#allocation3 + $0x10] sm:$0x1f] %vm6752_vm3, %v16511_v36 }
 0x5ec   :  { %19628 = vst [vmem:[#allocation24_spill] sm:$0xff] %v16559_v5  ;;  %v5879_v20 = vmax.f32 %v19632_v41, %v19527_v32  ;;  %19636 = vst [vmem:[#allocation22_spill] sm:$0xff] %v16585_v9  ;;  %v19644_v41 = vld [vmem:[#allocation32_spill] sm:$0xff] }
 0x5ed   :  { %v16591_v23 = vmax.f32 %v19639_v1, %v19637_v31  ;;  %v16597_v11 = vmax.f32 %v16159_v10, %v19641_v61  ;;  %v19645_v50 = vcombine.high %v19644_v41, %v19644_v41  ;;  %v16609_v24 = vmax.f32 %v16189_v0, %v19648_v3  ;;  %v19650_v1 = vld [vmem:[#allocation37_spill] sm:$0xff]  ;;  %v19663_v41 = vld [vmem:[#allocation39_spill] sm:$0xff] }
 0x5ee   :  { %v16615_v31 = vmax.f32 %v19652_v43, %v19650_v1  ;;  %v19654_v61 = vcombine.high %v19650_v1, %v19650_v1  ;;  %v19662_v43 = vld [vmem:[#allocation41_spill] sm:$0xff]  ;;  %v19664_v5 = vcombine.high %v19663_v41, %v19663_v41 }
 0x5ef   :  { %19640 = vst [vmem:[#allocation64_spill] sm:$0xff] %v16591_v23  ;;  %19642 = vst [vmem:[#allocation33_spill] sm:$0xff] %v16597_v11  ;;  %v16603_v53 = vmax.f32 %v19645_v50, %v19643_v63  ;;  %v19656_v50 = vld [vmem:[#allocation40_spill] sm:$0xff]  ;;  %v19657_v63 = vld [vmem:[#allocation38_spill] sm:$0xff] }
 0x5f0   :  { %19649 = vst [vmem:[#allocation89_spill] sm:$0xff] %v16609_v24  ;;  %19653 = vst [vmem:[#allocation37_spill] sm:$0xff] %v16615_v31  ;;  %v16621_v22 = vmax.f32 %v16199_v6, %v19654_v61  ;;  %v19658_v7 = vcombine.high %v19657_v63, %v19657_v63  ;;  %v19660_v3 = vcombine.high %v19656_v50, %v19656_v50 }
 0x5f1   :  { %19646 = vst [vmem:[#allocation31_spill] sm:$0xff] %v16603_v53  ;;  %v16639_v1 = vmax.f32 %v19664_v5, %v19662_v43  ;;  %v19666_v61 = vcombine.high %v19662_v43, %v19662_v43 }
 0x5f2   :  { %19655 = vst [vmem:[#allocation35_spill] sm:$0xff] %v16621_v22  ;;  %v16627_v27 = vmax.f32 %v19658_v7, %v19656_v50  ;;  %v16633_v53 = vmax.f32 %v16223_v62, %v19660_v3  ;;  %v19668_v7 = vld [vmem:[#allocation43_spill] sm:$0xff]  ;;  %v19671_v3 = vld [vmem:[#allocation44_spill] sm:$0xff] }
 0x5f3   :  { %19665 = vst [vmem:[#allocation41_spill] sm:$0xff] %v16639_v1  ;;  %v16645_v22 = vmax.f32 %v16231_v42, %v19666_v61  ;;  %v19669_v6 = vcombine.high %v19668_v7, %v19668_v7  ;;  %v19675_v5 = vcombine.high %v19671_v3, %v19671_v3  ;;  %v19677_v61 = vld [vmem:[#allocation47_spill] sm:$0xff]  ;;  %v19678_v1 = vld [vmem:[#allocation45_spill] sm:$0xff] }
 0x5f4   :  { %19659 = vst [vmem:[#allocation40_spill] sm:$0xff] %v16627_v27  ;;  %19661 = vst [vmem:[#allocation38_spill] sm:$0xff] %v16633_v53  ;;  %v19673_v53 = vcombine.high %v19672_v38, %v19672_v38  ;;  %v19679_v41 = vcombine.high %v19678_v1, %v19678_v1 }
 0x5f5   :  { %19667 = vst [vmem:[#allocation90_spill] sm:$0xff] %v16645_v22  ;;  %v16651_v50 = vmax.f32 %v16247_v39, %v19669_v6  ;;  %v16663_v43 = vmax.f32 %v16255_v60, %v19675_v5  ;;  %v19681_v6 = vcombine.high %v19677_v61, %v19677_v61  ;;  %v19687_v5 = vld [vmem:[#allocation50_spill] sm:$0xff] }
 0x5f6   :  { %v16657_v27 = vmax.f32 %v19673_v53, %v19671_v3  ;;  %v16669_v7 = vmax.f32 %v19679_v41, %v19677_v61  ;;  %v19683_v53 = vld [vmem:[#allocation48_spill] sm:$0xff]  ;;  %v19690_v41 = vld [vmem:[#allocation51_spill] sm:$0xff] }
 0x5f7   :  { %19670 = vst [vmem:[#allocation91_spill] sm:$0xff] %v16651_v50  ;;  %19676 = vst [vmem:[#allocation42_spill] sm:$0xff] %v16663_v43  ;;  %v16675_v50 = vmax.f32 %v16279_v26, %v19681_v6  ;;  %v19688_v43 = vcombine.high %v19687_v5, %v19687_v5  ;;  %v19694_v6 = vcombine.high %v19690_v41, %v19690_v41 }
 0x5f8   :  { %19674 = vst [vmem:[#allocation44_spill] sm:$0xff] %v16657_v27  ;;  %19680 = vst [vmem:[#allocation47_spill] sm:$0xff] %v16669_v7  ;;  %v19684_v27 = vld [vmem:[#allocation46_spill] sm:$0xff]  ;;  %v19691_v7 = vld [vmem:[#allocation49_spill] sm:$0xff] }
 0x5f9   :  { %19682 = vst [vmem:[#allocation45_spill] sm:$0xff] %v16675_v50  ;;  %v19685_v22 = vcombine.high %v19684_v27, %v19684_v27  ;;  %v16687_v60 = vmax.f32 %v16303_v52, %v19688_v43  ;;  %v19692_v31 = vcombine.high %v19691_v7, %v19691_v7  ;;  %v16699_v50 = vmax.f32 %v16311_v29, %v19694_v6  ;;  %v19706_v6 = vld [vmem:[#allocation57_spill] sm:$0xff] }
 0x5fb   :  { %v16681_v3 = vmax.f32 %v19685_v22, %v19683_v53  ;;  %19689 = vst [vmem:[#allocation92_spill] sm:$0xff] %v16687_v60  ;;  %v16693_v61 = vmax.f32 %v19692_v31, %v19690_v41  ;;  %19695 = vst [vmem:[#allocation49_spill] sm:$0xff] %v16699_v50  ;;  %v19696_v22 = vld [vmem:[#allocation54_spill] sm:$0xff]  ;;  %v19697_v53 = vld [vmem:[#allocation52_spill] sm:$0xff]  ;;  %v19707_v50 = vcombine.high %v19706_v6, %v19706_v6 }
 0x5fc   :  { %v19700_v43 = vcombine.high %v19696_v22, %v19696_v22  ;;  %v19702_v31 = vld [vmem:[#allocation55_spill] sm:$0xff] }
 0x5fd   :  { %19686 = vst [vmem:[#allocation46_spill] sm:$0xff] %v16681_v3  ;;  %19693 = vst [vmem:[#allocation51_spill] sm:$0xff] %v16693_v61  ;;  %v19698_v3 = vcombine.high %v19697_v53, %v19697_v53  ;;  %v19703_v61 = vld [vmem:[#allocation53_spill] sm:$0xff]  ;;  %v16723_v29 = vmax.f32 %v16359_v18, %v19707_v50 }
 0x5fe   :  { %v16711_v60 = vmax.f32 %v16335_v15, %v19700_v43  ;;  %v19704_v24 = vcombine.high %v19703_v61, %v19703_v61 }
 0x5ff   :  { %v16705_v5 = vmax.f32 %v19698_v3, %v19696_v22  ;;  %19708 = vst [vmem:[#allocation94_spill] sm:$0xff] %v16723_v29  ;;  %v19709_v3 = vld [vmem:[#allocation58_spill] sm:$0xff] }
 0x600   :  { %19701 = vst [vmem:[#allocation52_spill] sm:$0xff] %v16711_v60  ;;  %v16717_v41 = vmax.f32 %v19704_v24, %v19702_v31  ;;  %v19713_v43 = vcombine.high %v19709_v3, %v19709_v3  ;;  %v19715_v24 = vld [vmem:[#allocation61_spill] sm:$0xff]  ;;  %v19716_v31 = vld [vmem:[#allocation59_spill] sm:$0xff] }
 0x601   :  { %19699 = vst [vmem:[#allocation54_spill] sm:$0xff] %v16705_v5  ;;  %v19710_v5 = vld [vmem:[#allocation56_spill] sm:$0xff]  ;;  %v19719_v50 = vcombine.high %v19715_v24, %v19715_v24 }
 0x602   :  { %19705 = vst [vmem:[#allocation93_spill] sm:$0xff] %v16717_v41  ;;  %v19711_v11 = vcombine.high %v19710_v5, %v19710_v5  ;;  %v16735_v60 = vmax.f32 %v16367_v17, %v19713_v43  ;;  %v19717_v41 = vcombine.high %v19716_v31, %v19716_v31  ;;  %v19725_v43 = vld [vmem:[#allocation19_spill] sm:$0xff] }
 0x603   :  { %v16747_v61 = vmax.f32 %v16391_v4, %v19719_v50  ;;  %v19729_v50 = vcombine.high %v16140_v57, %v16140_v57 }
 0x604   :  { %v16729_v22 = vmax.f32 %v19711_v11, %v19709_v3  ;;  %19714 = vst [vmem:[#allocation56_spill] sm:$0xff] %v16735_v60  ;;  %v16741_v6 = vmax.f32 %v19717_v41, %v19715_v24  ;;  %v19721_v11 = vld [vmem:[#allocation62_spill] sm:$0xff]  ;;  %v19726_v60 = vcombine.high %v19725_v43, %v19725_v43  ;;  %v19728_v41 = vcombine.high %v16124_v40, %v16124_v40  ;;  %v19733_v40 = vld [vmem:[#allocation68_spill] sm:$0xff] }
 0x605   :  { %19720 = vst [vmem:[#allocation59_spill] sm:$0xff] %v16747_v61  ;;  %v5878_v61 = vmax.f32 %v19523_v56, %v19729_v50  ;;  %v11811_v43 = vrot.slane %v5879_v20, 9 }
 0x606   :  { %19712 = vst [vmem:[#allocation58_spill] sm:$0xff] %v16729_v22  ;;  %19718 = vst [vmem:[#allocation61_spill] sm:$0xff] %v16741_v6  ;;  %v19722_v22 = vld [vmem:[#allocation60_spill] sm:$0xff]  ;;  %v16759_v17 = vmax.f32 %v16415_v25, %v19726_v60  ;;  %v5877_v24 = vmax.f32 %v19728_v41, %v16140_v57  ;;  %v19731_v60 = vld [vmem:[#allocation67_spill] sm:$0xff]  ;;  %v19734_v57 = vcombine.high %v19615_v28, %v19615_v28 }
 0x607   :  { %v19723_v29 = vcombine.high %v19722_v22, %v19722_v22  ;;  %v11808_v22 = vrot.slane %v5876_v58, 9  ;;  %v11810_v50 = vrot.slane %v5878_v61, 9  ;;  %v19737_v28 = vcombine.high %v16169_v44, %v16169_v44 }
 0x608   :  { %19727 = vst [vmem:[#allocation19_spill] sm:$0xff] %v16759_v17  ;;  %v19732_v17 = vcombine.high %v19731_v60, %v19731_v60  ;;  %v16783_v41 = vmax.f32 %v19734_v57, %v19733_v40  ;;  %v11809_v56 = vrot.slane %v5877_v24, 9  ;;  %v6369_v60 = vmax.f32 %v5879_v20, %v11811_v43 }
 0x609   :  { %v16753_v3 = vmax.f32 %v19723_v29, %v19721_v11  ;;  %v19730_v29 = vcombine.high %v19527_v32, %v19527_v32  ;;  %v6366_v6 = vmax.f32 %v5876_v58, %v11808_v22  ;;  %v16799_v57 = vmax.f32 %v19638_v35, %v19737_v28 }
 0x60a   :  { %v19739_v58 = vcombine.high %v16159_v10, %v16159_v10  ;;  %v6367_v22 = vmax.f32 %v5877_v24, %v11809_v56  ;;  %v6368_v20 = vmax.f32 %v5878_v61, %v11810_v50  ;;  %v19741_v35 = vcombine.high %v16189_v0, %v16189_v0 }
 0x60b   :  { %19724 = vst [vmem:[#allocation95_spill] sm:$0xff] %v16753_v3  ;;  %v5880_v11 = vmax.f32 %v16132_v21, %v19730_v29  ;;  %v16777_v3 = vmax.f32 %v19622_v46, %v19732_v17  ;;  %v19735_v29 = vld [vmem:[#allocation16_spill] sm:$0xff]  ;;  %v19736_v17 = vcombine.high %v16132_v21, %v16132_v21  ;;  %v16808_v21 = vrot.slane %v6366_v6, %v15385_v2 }
 0x60c   :  { %7132 = vst.msk [vmem:[#allocation3 + $0x60] sm:$0x1f] %vm6752_vm3, %v19735_v29  ;;  %19738 = vst [vmem:[#allocation16_spill] sm:$0xff] %v16799_v57  ;;  %v16805_v36 = vmax.f32 %v19739_v58, %v16177_v13  ;;  %v16817_v29 = vmax.f32 %v19741_v35, %v16207_v47  ;;  %v19742_v10 = vcombine.high %v16207_v47, %v16207_v47  ;;  %v19785_v13 = vld [vmem:[#allocation51_spill] sm:$0xff] }
 0x60d   :  { %v11812_v32 = vrot.slane %v5880_v11, 9  ;;  %v16793_v46 = vmax.f32 %v15784_v54, %v19736_v17  ;;  %v16811_v54 = vrot.slane %v6369_v60, %v15385_v2  ;;  %v19744_v61 = vcombine.high %v16231_v42, %v16231_v42 }
 0x60e   :  { %v16823_v17 = vmax.f32 %v19651_v14, %v19742_v10  ;;  %v16835_v24 = vrot.slane %v6368_v20, %v15385_v2  ;;  %v19747_v47 = vcombine.high %v16223_v62, %v16223_v62  ;;  %v19749_v42 = vcombine.high %v16247_v39, %v16247_v39 }
 0x60f   :  { %v6370_v43 = vmax.f32 %v5880_v11, %v11812_v32  ;;  %19740 = vst [vmem:[#allocation96_spill] sm:$0xff] %v16811_v54  ;;  %v16829_v6 = vmax.f32 %v19657_v63, %v19744_v61  ;;  %v16832_v11 = vrot.slane %v6367_v22, %v15385_v2  ;;  %v19750_v60 = vcombine.high %v16263_v59, %v16263_v59 }
 0x610   :  { %19743 = vst [vmem:[#allocation97_spill] sm:$0xff] %v16823_v17  ;;  %19746 = vst [vmem:[#allocation99_spill] sm:$0xff] %v16835_v24  ;;  %v16842_v14 = vmax.f32 %v19747_v47, %v16239_v55  ;;  %v16848_v63 = vmax.f32 %v19749_v42, %v16263_v59  ;;  %v19752_v50 = vcombine.high %v16287_v19, %v16287_v19  ;;  %v19782_v55 = vld [vmem:[#allocation45_spill] sm:$0xff]  ;;  %v19784_v19 = vld [vmem:[#allocation92_spill] sm:$0xff]  ;;  %v11858_v40 = vrot.slane %v19785_v13, 9 }
 0x611   :  { %19745 = vst [vmem:[#allocation98_spill] sm:$0xff] %v16832_v11  ;;  %v6915_v0 = vrot.slane %v6370_v43, %v15385_v2  ;;  %v16854_v56 = vmax.f32 %v19672_v38, %v19750_v60  ;;  %v19754_v62 = vcombine.high %v16279_v26, %v16279_v26  ;;  %v6952_v39 = vsel %vm6698_vm14, %v16832_v11, %v16808_v21  ;;  %v19771_v60 = vld [vmem:[#allocation14_spill] sm:$0xff] }
 0x612   :  { %19748 = vst [vmem:[#allocation100_spill] sm:$0xff] %v16842_v14  ;;  %v16860_v32 = vmax.f32 %v19678_v1, %v19752_v50  ;;  %v19755_v59 = vcombine.high %v16295_v37, %v16295_v37  ;;  %v19757_v1 = vcombine.high %v16303_v52, %v16303_v52  ;;  %v19758_v26 = vcombine.high %v16319_v30, %v16319_v30  ;;  %v19794_v11 = vld [vmem:[#allocation22_spill] sm:$0xff] }
 0x613   :  { %19751 = vst [vmem:[#allocation101_spill] sm:$0xff] %v16854_v56  ;;  %v16866_v28 = vmax.f32 %v19754_v62, %v16295_v37  ;;  %v6953_v20 = vsel %vm6700_vm13, %v16835_v24, %v6952_v39  ;;  %v19760_v37 = vcombine.high %v16343_v51, %v16343_v51  ;;  %v19762_v52 = vcombine.high %v16335_v15, %v16335_v15  ;;  %v19780_v51 = vld [vmem:[#allocation44_spill] sm:$0xff]  ;;  %v19788_v24 = vld [vmem:[#allocation94_spill] sm:$0xff] }
 0x614   :  { %19753 = vst [vmem:[#allocation102_spill] sm:$0xff] %v16860_v32  ;;  %v16875_v38 = vmax.f32 %v19684_v27, %v19755_v59  ;;  %v16881_v58 = vmax.f32 %v19757_v1, %v16319_v30  ;;  %v16887_v22 = vmax.f32 %v19691_v7, %v19758_v26  ;;  %v19764_v30 = vcombine.high %v16359_v18, %v16359_v18  ;;  %v19774_v1 = vld [vmem:[#allocation89_spill] sm:$0xff] }
 0x615   :  { %v16895_v27 = vmax.f32 %v19697_v53, %v19760_v37  ;;  %v16901_v43 = vmax.f32 %v19762_v52, %v16351_v12  ;;  %v6954_v35 = vsel %vm6702_vm15, %v16811_v54, %v6953_v20  ;;  %v19765_v10 = vcombine.high %v16375_v8, %v16375_v8  ;;  %v19775_v20 = vld [vmem:[#allocation37_spill] sm:$0xff]  ;;  %v19776_v52 = vld [vmem:[#allocation40_spill] sm:$0xff]  ;;  %v19786_v54 = vld [vmem:[#allocation54_spill] sm:$0xff] }
 0x616   :  { %19756 = vst [vmem:[#allocation103_spill] sm:$0xff] %v16875_v38  ;;  %19759 = vst [vmem:[#allocation104_spill] sm:$0xff] %v16887_v22  ;;  %v16907_v7 = vmax.f32 %v19764_v30, %v16375_v8  ;;  %v19767_v15 = vcombine.high %v16399_v33, %v16399_v33  ;;  %v19769_v18 = vcombine.high %v16391_v4, %v16391_v4  ;;  %v11793_v50 = vrot.slane %v16547_v48, 9  ;;  %v19798_v22 = vld [vmem:[#allocation89_spill] sm:$0xff] }
 0x617   :  { %19761 = vst [vmem:[#allocation105_spill] sm:$0xff] %v16895_v27  ;;  %19763 = vst [vmem:[#allocation106_spill] sm:$0xff] %v16901_v43  ;;  %v16915_v53 = vmax.f32 %v19710_v5, %v19765_v10  ;;  %v6955_v42 = vsel %vm6704_vm2, %v6915_v0, %v6954_v35  ;;  %v19772_v8 = vcombine.high %v16415_v25, %v16415_v25  ;;  %v11794_v62 = vrot.slane %v16553_v16, 9  ;;  %v19773_v25 = vld [vmem:[#allocation33_spill] sm:$0xff]  ;;  %v19777_v35 = vld [vmem:[#allocation38_spill] sm:$0xff] }
 0x618   :  { %v16921_v61 = vmax.f32 %v19716_v31, %v19767_v15  ;;  %v16927_v47 = vmax.f32 %v19769_v18, %v16407_v49  ;;  %7160 = vrot.lane.b32.xlu1 %v6955_v42, %s12726_s2  ;;  %7332 = vst.msk [vmem:[#allocation3 + $0x20] sm:$0x1f] %vm6752_vm3, %v6955_v42  ;;  %v11799_v4 = vrot.slane %v16565_v45, 9  ;;  %v11807_v31 = vrot.slane %v16571_v34, 9  ;;  %6996 = vst.msk [vmem:[#allocation3 + $0x58] sm:$0x1f] %vm6752_vm3, %v6955_v42 }
 0x619   :  { %19766 = vst [vmem:[#allocation107_spill] sm:$0xff] %v16915_v53  ;;  %v16934_v5 = vmax.f32 %v19772_v8, %v19771_v60  ;;  %v11813_v0 = vrot.slane %v16585_v9, 9  ;;  %v11821_v39 = vrot.slane %v16591_v23, 9  ;;  %v11822_v59 = vrot.slane %v19773_v25, 9  ;;  %v19778_v15 = vld [vmem:[#allocation90_spill] sm:$0xff]  ;;  %v19779_v60 = vld [vmem:[#allocation91_spill] sm:$0xff] }
 0x61a   :  { %19768 = vst [vmem:[#allocation108_spill] sm:$0xff] %v16921_v61  ;;  %19770 = vst [vmem:[#allocation109_spill] sm:$0xff] %v16927_v47  ;;  %v11827_v26 = vrot.slane %v19774_v1, 9  ;;  %v11830_v37 = vrot.slane %v19775_v20, 9  ;;  %v11835_v30 = vrot.slane %v19776_v52, 9  ;;  %v11836_v10 = vrot.slane %v19777_v35, 9 }
 0x61b   :  { %v11840_v18 = vrot.slane %v19778_v15, 9  ;;  %v11841_v8 = vrot.slane %v19779_v60, 9  ;;  %v11844_v33 = vrot.slane %v19780_v51, 9  ;;  %v19781_v47 = vld [vmem:[#allocation47_spill] sm:$0xff]  ;;  %v11850_v42 = vrot.slane %v19782_v55, 9  ;;  %v19787_v20 = vld [vmem:[#allocation52_spill] sm:$0xff] }
 0x61c   :  { %v11849_v49 = vrot.slane %v19781_v47, 9  ;;  %v11855_v44 = vrot.slane %v19784_v19, 9  ;;  %v11863_v52 = vrot.slane %v19786_v54, 9  ;;  %v11864_v35 = vrot.slane %v19787_v20, 9  ;;  %v19789_v1 = vld [vmem:[#allocation58_spill] sm:$0xff]  ;;  %v19790_v25 = vld [vmem:[#allocation61_spill] sm:$0xff] }
 0x61d   :  { %v11869_v15 = vrot.slane %v19788_v24, 9  ;;  %v11872_v60 = vrot.slane %v19789_v1, 9  ;;  %v11877_v51 = vrot.slane %v19790_v25, 9  ;;  %v19793_v9 = vld [vmem:[#allocation19_spill] sm:$0xff]  ;;  %v11806_v12 = vrot.slane %v16793_v46, 9  ;;  %v19795_v43 = vld [vmem:[#allocation98_spill] sm:$0xff] }
 0x61e   :  { %v11883_v38 = vrot.slane %v19793_v9, 9  ;;  %v6365_v13 = vmax.f32 %v16571_v34, %v11807_v31  ;;  %v11792_v54 = vrot.slane %v16777_v3, 9  ;;  %v11828_v25 = vrot.slane %v16817_v29, 9  ;;  %v19797_v24 = vld [vmem:[#allocation33_spill] sm:$0xff] }
 0x61f   :  { %v6364_v47 = vmax.f32 %v16793_v46, %v11806_v12  ;;  %v11834_v23 = vrot.slane %v16829_v6, 9  ;;  %v11842_v31 = vrot.slane %v16848_v63, 9  ;;  %v11851_v57 = vrot.slane %v16866_v28, 9 }
 0x620   :  { %v6545_v55 = vrot.slane %v6365_v13, %v15385_v2  ;;  %v11856_v12 = vrot.slane %v16881_v58, 9  ;;  %v11870_v34 = vrot.slane %v16907_v7, 9  ;;  %v6351_v32 = vmax.f32 %v16547_v48, %v11793_v50  ;;  %v19799_v48 = vld [vmem:[#allocation99_spill] sm:$0xff] }
 0x621   :  { %v6541_v1 = vrot.slane %v6364_v47, %v15385_v2  ;;  %v11884_v47 = vrot.slane %v16934_v5, 9  ;;  %v6352_v13 = vmax.f32 %v16553_v16, %v11794_v62  ;;  %v6357_v46 = vmax.f32 %v16565_v45, %v11799_v4  ;;  %v19801_v45 = vld [vmem:[#allocation40_spill] sm:$0xff] }
 0x622   :  { %v16998_v27 = vmax.f32 %v19794_v11, %v11813_v0  ;;  %v6380_v61 = vmax.f32 %v19797_v24, %v11822_v59  ;;  %v17005_v17 = vmax.f32 %v19798_v22, %v11827_v26  ;;  %v17013_v62 = vmax.f32 %v19801_v45, %v11835_v30  ;;  %v19802_v11 = vld [vmem:[#allocation38_spill] sm:$0xff]  ;;  %v19804_v24 = vld [vmem:[#allocation91_spill] sm:$0xff] }
 0x623   :  { %v6710_v20 = vsel %vm6698_vm14, %v6545_v55, %v6541_v1  ;;  %v19796_v1 = vld [vmem:[#allocation64_spill] sm:$0xff]  ;;  %v17016_v4 = vmax.f32 %v19802_v11, %v11836_v10  ;;  %v17023_v22 = vmax.f32 %v19804_v24, %v11841_v8  ;;  %v17037_v10 = vmax.f32 %v19784_v19, %v11855_v44  ;;  %v19809_v8 = vld [vmem:[#allocation54_spill] sm:$0xff] }
 0x624   :  { %v6711_v56 = vsel %vm6700_vm13, %v16808_v21, %v6710_v20  ;;  %v6379_v53 = vmax.f32 %v19796_v1, %v11821_v39  ;;  %v19800_v20 = vld [vmem:[#allocation37_spill] sm:$0xff]  ;;  %v19805_v39 = vld [vmem:[#allocation44_spill] sm:$0xff]  ;;  %v17058_v44 = vmax.f32 %v19793_v9, %v11883_v38  ;;  %v6821_v19 = vsel %vm6698_vm14, %v16808_v21, %v6545_v55 }
 0x625   :  { %v6712_v14 = vsel %vm6702_vm15, %v19795_v43, %v6711_v56  ;;  %v17010_v16 = vmax.f32 %v19800_v20, %v11830_v37  ;;  %v19803_v56 = vld [vmem:[#allocation90_spill] sm:$0xff]  ;;  %v17026_v59 = vmax.f32 %v19805_v39, %v11844_v33  ;;  %v19807_v37 = vld [vmem:[#allocation45_spill] sm:$0xff]  ;;  %v17043_v20 = vmax.f32 %v19809_v8, %v11863_v52  ;;  %v19810_v33 = vld [vmem:[#allocation52_spill] sm:$0xff] }
 0x626   :  { %v6713_v50 = vsel %vm6704_vm2, %v19799_v48, %v6712_v14  ;;  %v17020_v0 = vmax.f32 %v19803_v56, %v11840_v18  ;;  %v19806_v14 = vld [vmem:[#allocation47_spill] sm:$0xff]  ;;  %v17034_v30 = vmax.f32 %v19807_v37, %v11850_v42  ;;  %v17046_v45 = vmax.f32 %v19810_v33, %v11864_v35  ;;  %v19812_v56 = vld [vmem:[#allocation58_spill] sm:$0xff]  ;;  %v19813_v42 = vld [vmem:[#allocation61_spill] sm:$0xff] }
 0x627   :  { %7064 = vrot.lane.b32.xlu0 %v6713_v50, %s12726_s2  ;;  %v17029_v26 = vmax.f32 %v19806_v14, %v11849_v49  ;;  %6755 = vst.msk [vmem:[#allocation3 + $0x50] sm:$0x1f] %vm6752_vm3, %v6713_v50  ;;  %7260 = vst.msk [vmem:[#allocation3 + $0x18] sm:$0x1f] %vm6752_vm3, %v6713_v50  ;;  %v19808_v18 = vld [vmem:[#allocation51_spill] sm:$0xff]  ;;  %v19811_v49 = vld [vmem:[#allocation94_spill] sm:$0xff]  ;;  %v17052_v50 = vmax.f32 %v19812_v56, %v11872_v60  ;;  %v17055_v24 = vmax.f32 %v19813_v42, %v11877_v51 }
 0x628   :  { %v17040_v1 = vmax.f32 %v19808_v18, %v11858_v40  ;;  %v17049_v11 = vmax.f32 %v19811_v49, %v11869_v15  ;;  %v17063_v40 = vmax.f32 %v16777_v3, %v11792_v54  ;;  %v17066_v52 = vmax.f32 %v16817_v29, %v11828_v25  ;;  %v19822_v39 = vld [vmem:[#allocation32_spill] sm:$0xff]  ;;  %v19823_v37 = vld [vmem:[#allocation31_spill] sm:$0xff] }
 0x629   :  { %v6822_v35 = vsel %vm6700_vm13, %v19795_v43, %v6821_v19  ;;  %v17071_v15 = vmax.f32 %v16829_v6, %v11834_v23  ;;  %v17074_v51 = vmax.f32 %v16848_v63, %v11842_v31  ;;  %v17077_v9 = vmax.f32 %v16866_v28, %v11851_v57  ;;  %v19814_v23 = vld [vmem:[#allocation96_spill] sm:$0xff]  ;;  %v19817_v28 = vld [vmem:[#allocation23_spill] sm:$0xff] }
 0x62a   :  { %v6823_v55 = vsel %vm6702_vm15, %v19799_v48, %v6822_v35  ;;  %v17082_v3 = vmax.f32 %v16881_v58, %v11856_v12  ;;  %v17085_v21 = vmax.f32 %v16907_v7, %v11870_v34  ;;  %v17088_v54 = vmax.f32 %v16934_v5, %v11884_v47  ;;  %v19815_v57 = vld [vmem:[#allocation68_spill] sm:$0xff]  ;;  %v19820_v47 = vld [vmem:[#allocation27_spill] sm:$0xff] }
 0x62b   :  { %v6824_v29 = vsel %vm6704_vm2, %v19814_v23, %v6823_v55  ;;  %v19816_v63 = vcombine.high %v19815_v57, %v19815_v57  ;;  %v19818_v43 = vld [vmem:[#allocation24_spill] sm:$0xff]  ;;  %v19819_v7 = vrot.slane %v16783_v41, 9  ;;  %v17105_v25 = vrot.slane %v6351_v32, %v15385_v2  ;;  %v19826_v42 = vld [vmem:[#allocation87_spill] sm:$0xff]  ;;  %v19827_v23 = vld [vmem:[#allocation18_spill] sm:$0xff] }
 0x62c   :  { %v11797_v58 = vrot.slane %v19818_v43, 9  ;;  %6857 = vrot.lane.b32.xlu1 %v6824_v29, %s12726_s2  ;;  %7131 = vst.msk [vmem:[#allocation3 + $0x38] sm:$0x1f] %vm6752_vm3, %v6824_v29  ;;  %v17108_v60 = vrot.slane %v6352_v13, %v15385_v2  ;;  %v6521_v34 = vrot.slane %v6357_v46, %v15385_v2  ;;  %v19821_v48 = vcombine.high %v19820_v47, %v19820_v47  ;;  %v19824_v13 = vld [vmem:[#allocation86_spill] sm:$0xff] }
 0x62d   :  { %v5864_v38 = vmax.f32 %v19817_v28, %v19816_v63  ;;  %v6353_v5 = vmax.f32 %v16783_v41, %v19819_v7  ;;  %v11825_v18 = vrot.slane %v19823_v37, 9  ;;  %v19825_v8 = vrot.slane %v16805_v36, 9  ;;  %v19828_v28 = vld [vmem:[#allocation66_spill] sm:$0xff] }
 0x62e   :  { %v6355_v12 = vmax.f32 %v19818_v43, %v11797_v58  ;;  %v5892_v14 = vmax.f32 %v19822_v39, %v19821_v48  ;;  %v6813_v32 = vsel %vm6698_vm14, %v17108_v60, %v17105_v25  ;;  %v6706_v46 = vsel %vm6698_vm14, %v19824_v13, %v6521_v34  ;;  %v19831_v39 = vld [vmem:[#allocation65_spill] sm:$0xff] }
 0x62f   :  { %v11796_v31 = vrot.slane %v5864_v38, 9  ;;  %v17118_v41 = vrot.slane %v6353_v5, %v15385_v2  ;;  %v6381_v33 = vmax.f32 %v16805_v36, %v19825_v8  ;;  %v6707_v19 = vsel %vm6700_vm13, %v19826_v42, %v6706_v46  ;;  %v19834_v46 = vld [vmem:[#allocation72_spill] sm:$0xff] }
 0x630   :  { %v17129_v56 = vrot.slane %v6355_v12, %v15385_v2  ;;  %v11824_v35 = vrot.slane %v5892_v14, 9  ;;  %v6708_v29 = vsel %vm6702_vm15, %v19827_v23, %v6707_v19  ;;  %v6383_v57 = vmax.f32 %v19823_v37, %v11825_v18  ;;  %v19833_v37 = vld [vmem:[#allocation30_spill] sm:$0xff] }
 0x631   :  { %v6354_v49 = vmax.f32 %v5864_v38, %v11796_v31  ;;  %v6814_v55 = vsel %vm6700_vm13, %v17118_v41, %v6813_v32  ;;  %v6585_v63 = vrot.slane %v6379_v53, %v15385_v2  ;;  %v6709_v38 = vsel %vm6704_vm2, %v19828_v28, %v6708_v29  ;;  %v19829_v53 = vld [vmem:[#allocation16_spill] sm:$0xff] }
 0x632   :  { %v6382_v43 = vmax.f32 %v5892_v14, %v11824_v35  ;;  %v17145_v58 = vrot.slane %v6380_v61, %v15385_v2  ;;  %7062 = vrot.lane.b32.xlu1 %v6709_v38, %s12726_s2  ;;  %6754 = vst.msk [vmem:[#allocation3 + $0x28] sm:$0x1f] %vm6752_vm3, %v6709_v38  ;;  %v17150_v7 = vrot.slane %v6381_v33, %v15385_v2  ;;  %v19830_v34 = vrot.slane %v19829_v53, 9  ;;  %v12491_v33 = vld [vmem:[%s19050_s3 + $0x40] sm:$0xff]  }
 0x633   :  { %v17140_v36 = vrot.slane %v6354_v49, %v15385_v2  ;;  %v17153_v5 = vrot.slane %v6383_v57, %v15385_v2  ;;  %v6561_v12 = vrot.slane %v16998_v27, %v15385_v2  ;;  %v19832_v14 = vcombine.high %v19831_v39, %v19831_v39  ;;  %v12492_v49 = vld [vmem:[%s19050_s3] sm:$0xff]   ;;  %12100 = vmatprep.subr.bf16.mxu1 %v12491_v33  ;;  %v19843_v33 = vld [vmem:[#allocation28_spill] sm:$0xff] }
 0x634   :  { %v6378_v31 = vmax.f32 %v19829_v53, %v19830_v34  ;;  %v17163_v47 = vrot.slane %v6382_v43, %v15385_v2  ;;  %v6829_v48 = vsel %vm6698_vm14, %v17145_v58, %v6585_v63  ;;  %v19835_v35 = vld [vmem:[#allocation73_spill] sm:$0xff]  ;;  %12101 = vmatpush3.bf16.msra.mxu1 %v12492_v49  ;;  %v19844_v49 = vcombine.high %v19843_v33, %v19843_v33 }
 0x635   :  { %v6815_v61 = vsel %vm6702_vm15, %v17140_v36, %v6814_v55  ;;  %v5887_v18 = vmax.f32 %v19833_v37, %v19832_v14  ;;  %v6830_v27 = vsel %vm6700_vm13, %v17150_v7, %v6829_v48  ;;  %v6714_v8 = vsel %vm6698_vm14, %v19834_v46, %v6561_v12  ;;  %v19836_v57 = vld [vmem:[#allocation69_spill] sm:$0xff]  ;;  %v19838_v14 = vld [vmem:[#allocation74_spill] sm:$0xff] }
 0x636   :  { %v6816_v32 = vsel %vm6704_vm2, %v17129_v56, %v6815_v61  ;;  %v6581_v13 = vrot.slane %v6378_v31, %v15385_v2  ;;  %v6831_v19 = vsel %vm6702_vm15, %v17163_v47, %v6830_v27  ;;  %v6715_v55 = vsel %vm6700_vm13, %v19835_v35, %v6714_v8  ;;  %v19837_v31 = vld [vmem:[#allocation70_spill] sm:$0xff]  ;;  %v19842_v8 = vld [vmem:[#allocation29_spill] sm:$0xff] }
 0x637   :  { %6853 = vrot.lane.b32.xlu0 %v6816_v32, %s12726_s2  ;;  %v11819_v29 = vrot.slane %v5887_v18, 9  ;;  %v6956_v38 = vsel %vm6698_vm14, %v19836_v57, %v19835_v35  ;;  %v6832_v43 = vsel %vm6704_vm2, %v17153_v5, %v6831_v19  ;;  %v6716_v34 = vsel %vm6702_vm15, %v19836_v57, %v6715_v55  ;;  %v19839_v32 = vld [vmem:[#allocation71_spill] sm:$0xff]  ;;  %v12493_v35 = vld [vmem:[%s19050_s3 + $0x48] sm:$0xff]  }
 0x638   :  { %v6718_v53 = vsel %vm6698_vm14, %v6585_v63, %v6581_v13  ;;  %v6957_v12 = vsel %vm6700_vm13, %v19837_v31, %v6956_v38  ;;  %7133 = vst.msk [vmem:[#allocation3 + $0x88] sm:$0x1f] %vm6752_vm3, %v6832_v43  ;;  %v6717_v48 = vsel %vm6704_vm2, %v19837_v31, %v6716_v34  ;;  %v19840_v27 = vcombine.high %v19839_v32, %v19839_v32  ;;  %v19841_v13 = vld [vmem:[#allocation26_spill] sm:$0xff]  ;;  %v19845_v57 = vld [vmem:[#allocation35_spill] sm:$0xff]  ;;  %v19846_v34 = vld [vmem:[#allocation88_spill] sm:$0xff] }
 0x639   :  { %v6719_v61 = vsel %vm6700_vm13, %v17145_v58, %v6718_v53  ;;  %v6377_v39 = vmax.f32 %v5887_v18, %v11819_v29  ;;  %v6958_v37 = vsel %vm6702_vm15, %v19838_v14, %v6957_v12  ;;  %6756 = vst.msk [vmem:[#allocation3 + $0x78] sm:$0x1f] %vm6752_vm3, %v6717_v48  ;;  %7261 = vst.msk [vmem:[#allocation3 + $0x40] sm:$0x1f] %vm6752_vm3, %v6717_v48  ;;  %v12494_v55 = vld [vmem:[%s19050_s3 + $0x8] sm:$0xff]   ;;  %v11831_v38 = vrot.slane %v19845_v57, 9 }
 0x63a   :  { %v6720_v63 = vsel %vm6702_vm15, %v17150_v7, %v6719_v61  ;;  %v5873_v46 = vmax.f32 %v19841_v13, %v19840_v27  ;;  %v6948_v18 = vsel %vm6698_vm14, %v19827_v23, %v19826_v42  ;;  %v5900_v19 = vmax.f32 %v19844_v49, %v19842_v8  ;;  %v19847_v12 = vld [vmem:[#allocation97_spill] sm:$0xff]  ;;  %12102 = vmatprep.subr.bf16.mxu1 %v12493_v35  ;;  %v19851_v49 = vld [vmem:[#allocation15_spill] sm:$0xff] }
 0x63b   :  { %6861 = vrot.lane.b32.xlu0 %v6832_v43, %s12726_s2  ;;  %v6721_v29 = vsel %vm6704_vm2, %v17163_v47, %v6720_v63  ;;  %v6919_v42 = vrot.slane %v6377_v39, %v15385_v2  ;;  %v6949_v23 = vsel %vm6700_vm13, %v19828_v28, %v6948_v18  ;;  %v19848_v61 = vrot.slane %v19847_v12, 9  ;;  %12103 = vmatpush3.bf16.msra.mxu1 %v12494_v55  ;;  %v19852_v55 = vld [vmem:[#allocation80_spill] sm:$0xff] }
 0x63c   :  { %7068 = vrot.lane.b32.xlu1 %v6721_v29, %s12726_s2  ;;  %6757 = vst.msk [vmem:[#allocation3 + $0xa0] sm:$0x1f] %vm6752_vm3, %v6721_v29  ;;  %7262 = vst.msk [vmem:[#allocation3 + $0x68] sm:$0x1f] %vm6752_vm3, %v6721_v29  ;;  %v11805_v53 = vrot.slane %v5873_v46, 9  ;;  %v6950_v43 = vsel %vm6702_vm15, %v19846_v34, %v6949_v23  ;;  %v11832_v31 = vrot.slane %v5900_v19, 9  ;;  %v6389_v14 = vmax.f32 %v19845_v57, %v11831_v38 }
 0x63d   :  { %v6387_v39 = vmax.f32 %v19847_v12, %v19848_v61  ;;  %v6959_v28 = vsel %vm6704_vm2, %v6919_v42, %v6958_v37  ;;  %v17246_v63 = vrot.slane %v17066_v52, %v15385_v2  ;;  %v17250_v32 = vrot.slane %v17010_v16, %v15385_v2  ;;  %v19849_v37 = vld [vmem:[#allocation34_spill] sm:$0xff]  ;;  %v19855_v42 = vld [vmem:[#allocation49_spill] sm:$0xff]  ;;  %v19856_v12 = vld [vmem:[#allocation104_spill] sm:$0xff] }
 0x63e   :  { %7333 = vst.msk [vmem:[#allocation3 + $0x48] sm:$0x1f] %vm6752_vm3, %v6959_v28  ;;  %6997 = vst.msk [vmem:[#allocation3 + $0x80] sm:$0x1f] %vm6752_vm3, %v6959_v28  ;;  %v6363_v27 = vmax.f32 %v5873_v46, %v11805_v53  ;;  %v6390_v13 = vmax.f32 %v5900_v19, %v11832_v31  ;;  %v19850_v33 = vcombine.high %v19849_v37, %v19849_v37  ;;  %v19853_v46 = vld [vmem:[#allocation79_spill] sm:$0xff]  ;;  %v11859_v23 = vrot.slane %v19855_v42, 9 }
 0x63f   :  { %v17255_v18 = vrot.slane %v6387_v39, %v15385_v2  ;;  %7066 = vrot.lane.b32.xlu0 %v6717_v48, %s12726_s2  ;;  %v17263_v16 = vrot.slane %v6389_v14, %v15385_v2  ;;  %v6960_v35 = vsel %vm6698_vm14, %v17150_v7, %v17145_v58  ;;  %v19854_v19 = vcombine.high %v19853_v46, %v19853_v46  ;;  %v12495_v58 = vld [vmem:[%s19050_s3 + $0x50] sm:$0xff]   ;;  %v19858_v46 = vld [vmem:[#allocation77_spill] sm:$0xff] }
 0x640   :  { %v5894_v52 = vmax.f32 %v19851_v49, %v19850_v33  ;;  %7162 = vrot.lane.b32.xlu1 %v6959_v28, %s12726_s2  ;;  %v6911_v57 = vrot.slane %v6363_v27, %v15385_v2  ;;  %v17276_v48 = vrot.slane %v6390_v13, %v15385_v2  ;;  %v6961_v34 = vsel %vm6700_vm13, %v17163_v47, %v6960_v35  ;;  %v12496_v28 = vld [vmem:[%s19050_s3 + $0x10] sm:$0xff]  }
 0x641   :  { %v5928_v29 = vmax.f32 %v19854_v19, %v19852_v55  ;;  %v7112_v38 = vsel %vm6698_vm14, %v17255_v18, %v17246_v63  ;;  %v19857_v61 = vrot.slane %v19856_v12, 9  ;;  %v6962_v37 = vsel %vm6702_vm15, %v17153_v5, %v6961_v34  ;;  %12104 = vmatprep.subr.bf16.mxu1 %v12495_v58  ;;  %v19859_v19 = vld [vmem:[#allocation76_spill] sm:$0xff] }
 0x642   :  { %v11826_v53 = vrot.slane %v5894_v52, 9  ;;  %v7113_v7 = vsel %vm6700_vm13, %v17250_v32, %v7112_v38  ;;  %v6951_v14 = vsel %vm6704_vm2, %v6911_v57, %v6950_v43  ;;  %v6417_v33 = vmax.f32 %v19855_v42, %v11859_v23  ;;  %v19861_v57 = vld [vmem:[#allocation42_spill] sm:$0xff]  ;;  %12105 = vmatpush3.bf16.msra.mxu1 %v12496_v28 }
 0x643   :  { %v11860_v31 = vrot.slane %v5928_v29, 9  ;;  %v6415_v39 = vmax.f32 %v19856_v12, %v19857_v61  ;;  %v7114_v27 = vsel %vm6702_vm15, %v17263_v16, %v7113_v7  ;;  %7158 = vrot.lane.b32.xlu0 %v6951_v14, %s12726_s2  ;;  %6995 = vst.msk [vmem:[#allocation3 + $0x30] sm:$0x1f] %vm6752_vm3, %v6951_v14  ;;  %v17306_v43 = vrot.slane %v17082_v3, %v15385_v2 }
 0x644   :  { %v6384_v13 = vmax.f32 %v5894_v52, %v11826_v53  ;;  %v7115_v47 = vsel %vm6704_vm2, %v17276_v48, %v7114_v27  ;;  %v17316_v35 = vrot.slane %v17040_v1, %v15385_v2  ;;  %v17323_v3 = vrot.slane %v6417_v33, %v15385_v2  ;;  %v19862_v53 = vld [vmem:[#allocation101_spill] sm:$0xff]  ;;  %v12498_v27 = vld [vmem:[%s19050_s3 + $0x18] sm:$0xff]  }
 0x645   :  { %v6418_v49 = vmax.f32 %v5928_v29, %v11860_v31  ;;  %7288 = vrot.lane.b32.xlu1 %v7115_v47, %s12726_s2  ;;  %7134 = vst.msk [vmem:[#allocation3 + $0xb0] sm:$0x1f] %vm6752_vm3, %v7115_v47  ;;  %v17312_v52 = vrot.slane %v6415_v39, %v15385_v2  ;;  %v19860_v29 = vcombine.high %v19859_v19, %v19859_v19  ;;  %v11845_v38 = vrot.slane %v19861_v57, 9  ;;  %v19864_v47 = vld [vmem:[#allocation48_spill] sm:$0xff]  ;;  %v19867_v19 = vld [vmem:[#allocation103_spill] sm:$0xff] }
 0x646   :  { %v6923_v5 = vrot.slane %v6384_v13, %v15385_v2  ;;  %v19863_v58 = vrot.slane %v19862_v53, 9  ;;  %v17338_v12 = vrot.slane %v17074_v51, %v15385_v2  ;;  %v17351_v14 = vrot.slane %v17026_v59, %v15385_v2  ;;  %v12497_v51 = vld [vmem:[%s19050_s3 + $0x58] sm:$0xff]  }
 0x647   :  { %v5914_v42 = vmax.f32 %v19860_v29, %v19858_v46  ;;  %v17326_v23 = vrot.slane %v6418_v49, %v15385_v2  ;;  %v6841_v34 = vsel %vm6698_vm14, %v17312_v52, %v17306_v43  ;;  %v6403_v39 = vmax.f32 %v19861_v57, %v11845_v38  ;;  %v19866_v49 = vld [vmem:[#allocation78_spill] sm:$0xff]  ;;  %12106 = vmatprep.subr.bf16.mxu1 %v12497_v51 }
 0x648   :  { %v6401_v7 = vmax.f32 %v19862_v53, %v19863_v58  ;;  %v6963_v1 = vsel %vm6704_vm2, %v6923_v5, %v6962_v37  ;;  %v6842_v61 = vsel %vm6700_vm13, %v17316_v35, %v6841_v34  ;;  %v19865_v33 = vcombine.high %v19864_v47, %v19864_v47  ;;  %v19868_v53 = vld [vmem:[#allocation46_spill] sm:$0xff]  ;;  %12107 = vmatpush3.bf16.msra.mxu1 %v12498_v27  ;;  %v12500_v47 = vld [vmem:[%s19050_s3 + $0x20] sm:$0xff]  }
 0x649   :  { %v11846_v31 = vrot.slane %v5914_v42, 9  ;;  %7334 = vst.msk [vmem:[#allocation3 + $0x70] sm:$0x1f] %vm6752_vm3, %v6963_v1  ;;  %7164 = vrot.lane.b32.xlu0 %v6963_v1, %s12726_s2  ;;  %6998 = vst.msk [vmem:[#allocation3 + $0xa8] sm:$0x1f] %vm6752_vm3, %v6963_v1  ;;  %v6843_v13 = vsel %vm6702_vm15, %v17323_v3, %v6842_v61  ;;  %v11852_v59 = vrot.slane %v19867_v19, 9  ;;  %v17369_v57 = vrot.slane %v6403_v39, %v15385_v2 }
 0x64a   :  { %v17347_v28 = vrot.slane %v6401_v7, %v15385_v2  ;;  %v5922_v5 = vmax.f32 %v19866_v49, %v19865_v33  ;;  %v6844_v29 = vsel %vm6704_vm2, %v17326_v23, %v6843_v13  ;;  %v19869_v58 = vrot.slane %v19868_v53, 9 }
 0x64b   :  { %v6404_v37 = vmax.f32 %v5914_v42, %v11846_v31  ;;  %6867 = vrot.lane.b32.xlu1 %v6844_v29, %s12726_s2  ;;  %7136 = vst.msk [vmem:[#allocation3 + $0x100] sm:$0x1f] %vm6752_vm3, %v6844_v29  ;;  %v6410_v31 = vmax.f32 %v19867_v19, %v11852_v59  ;;  %v6629_v39 = vrot.slane %v17034_v30, %v15385_v2  ;;  %v19870_v30 = vld [vmem:[#allocation102_spill] sm:$0xff] }
 0x64c   :  { %v6833_v38 = vsel %vm6698_vm14, %v17347_v28, %v17338_v12  ;;  %v6411_v42 = vmax.f32 %v19868_v53, %v19869_v58  ;;  %v11854_v34 = vrot.slane %v5922_v5, 9  ;;  %v6633_v51 = vrot.slane %v17077_v9, %v15385_v2  ;;  %v19874_v58 = vld [vmem:[#allocation53_spill] sm:$0xff] }
 0x64d   :  { %v17380_v7 = vrot.slane %v6404_v37, %v15385_v2  ;;  %v6834_v1 = vsel %vm6700_vm13, %v17351_v14, %v6833_v38  ;;  %v12499_v37 = vld [vmem:[%s19050_s3 + $0x60] sm:$0xff]   ;;  %v6637_v49 = vrot.slane %v6410_v31, %v15385_v2  ;;  %v19871_v19 = vrot.slane %v19870_v30, 9  ;;  %v19872_v38 = vld [vmem:[#allocation82_spill] sm:$0xff] }
 0x64e   :  { %v6835_v61 = vsel %vm6702_vm15, %v17369_v57, %v6834_v1  ;;  %v6800_v13 = vrot.slane %v6411_v42, %v15385_v2  ;;  %v6412_v33 = vmax.f32 %v5922_v5, %v11854_v34  ;;  %v6968_v59 = vsel %vm6698_vm14, %v6633_v51, %v6629_v39  ;;  %v19875_v1 = vld [vmem:[#allocation93_spill] sm:$0xff]  ;;  %12108 = vmatprep.subr.bf16.mxu1 %v12499_v37  ;;  %v12501_v37 = vld [vmem:[%s19050_s3 + $0x68] sm:$0xff]  }
 0x64f   :  { %v6836_v27 = vsel %vm6704_vm2, %v17380_v7, %v6835_v61  ;;  %v6406_v9 = vmax.f32 %v19870_v30, %v19871_v19  ;;  %v6625_v29 = vrot.slane %v17029_v26, %v15385_v2  ;;  %v19873_v53 = vcombine.high %v19872_v38, %v19872_v38  ;;  %12109 = vmatpush3.bf16.msra.mxu1 %v12500_v47 }
 0x650   :  { %6863 = vrot.lane.b32.xlu0 %v6836_v27, %s12726_s2  ;;  %v11867_v5 = vrot.slane %v19875_v1, 9  ;;  %v6931_v34 = vrot.slane %v6412_v33, %v15385_v2  ;;  %v6969_v31 = vsel %vm6700_vm13, %v6637_v49, %v6968_v59  ;;  %v19876_v27 = vld [vmem:[#allocation106_spill] sm:$0xff]  ;;  %v17435_v59 = vrot.slane %v17046_v45, %v15385_v2  ;;  %12110 = vmatprep.subr.bf16.mxu1 %v12501_v37 }
 0x651   :  { %v5934_v42 = vmax.f32 %v19874_v58, %v19873_v53  ;;  %v6621_v61 = vrot.slane %v6406_v9, %v15385_v2  ;;  %v19877_v30 = vrot.slane %v19876_v27, 9  ;;  %v6970_v26 = vsel %vm6702_vm15, %v6800_v13, %v6969_v31  ;;  %v12502_v33 = vld [vmem:[%s19050_s3 + $0x28] sm:$0xff]  }
 0x652   :  { %v6425_v38 = vmax.f32 %v19875_v1, %v11867_v5  ;;  %v17423_v53 = vrot.slane %v17043_v20, %v15385_v2  ;;  %v6971_v9 = vsel %vm6704_vm2, %v6931_v34, %v6970_v26  ;;  %v6837_v34 = vsel %vm6698_vm14, %v6629_v39, %v6625_v29 }
 0x653   :  { %v6423_v19 = vmax.f32 %v19876_v27, %v19877_v30  ;;  %v11866_v6 = vrot.slane %v5934_v42, 9  ;;  %v6726_v47 = vsel %vm6698_vm14, %v6625_v29, %v6621_v61  ;;  %7168 = vrot.lane.b32.xlu1 %v6971_v9, %s12726_s2  ;;  %7000 = vst.msk [vmem:[#allocation3 + $0xf8] sm:$0x1f] %vm6752_vm3, %v6971_v9  ;;  %v6838_v61 = vsel %vm6700_vm13, %v6633_v51, %v6837_v34 }
 0x654   :  { %v6727_v20 = vsel %vm6700_vm13, %v6629_v39, %v6726_v47  ;;  %v17444_v5 = vrot.slane %v6425_v38, %v15385_v2  ;;  %v6845_v45 = vsel %vm6698_vm14, %v17435_v59, %v17423_v53  ;;  %v6641_v27 = vrot.slane %v17037_v10, %v15385_v2  ;;  %12111 = vmatpush3.bf16.msra.mxu1 %v12502_v33  ;;  %v12504_v10 = vld [vmem:[%s19050_s3 + $0x30] sm:$0xff]   ;;  %v19879_v38 = vld [vmem:[#allocation50_spill] sm:$0xff] }
 0x655   :  { %v17438_v58 = vrot.slane %v6423_v19, %v15385_v2  ;;  %v6424_v1 = vmax.f32 %v5934_v42, %v11866_v6  ;;  %v6728_v31 = vsel %vm6702_vm15, %v6633_v51, %v6727_v20  ;;  %v6839_v29 = vsel %vm6702_vm15, %v6637_v49, %v6838_v61  ;;  %v12503_v42 = vld [vmem:[%s19050_s3 + $0x70] sm:$0xff]  }
 0x656   :  { %v6729_v30 = vsel %vm6704_vm2, %v6637_v49, %v6728_v31  ;;  %v6840_v51 = vsel %vm6704_vm2, %v6800_v13, %v6839_v29  ;;  %v6730_v19 = vsel %vm6698_vm14, %v17306_v43, %v6641_v27  ;;  %v7017_v49 = vrot.slane %v17005_v17, %v15385_v2  ;;  %v19881_v13 = vld [vmem:[#allocation36_spill] sm:$0xff]  ;;  %12112 = vmatprep.subr.bf16.mxu1 %v12503_v42  ;;  %v19883_v42 = vld [vmem:[#allocation83_spill] sm:$0xff] }
 0x657   :  { %v17456_v6 = vrot.slane %v6424_v1, %v15385_v2  ;;  %v6846_v39 = vsel %vm6700_vm13, %v17438_v58, %v6845_v45  ;;  %7072 = vrot.lane.b32.xlu0 %v6729_v30, %s12726_s2  ;;  %6759 = vst.msk [vmem:[#allocation3 + $0xf0] sm:$0x1f] %vm6752_vm3, %v6729_v30  ;;  %v19878_v26 = vcombine.high %v19852_v55, %v19852_v55  ;;  %7135 = vst.msk [vmem:[#allocation3 + $0xd8] sm:$0x1f] %vm6752_vm3, %v6840_v51  ;;  %v19882_v29 = vld [vmem:[#allocation84_spill] sm:$0xff] }
 0x658   :  { %v6731_v9 = vsel %vm6700_vm13, %v17312_v52, %v6730_v19  ;;  %v6972_v43 = vsel %vm6698_vm14, %v17316_v35, %v17312_v52  ;;  %v19880_v17 = vcombine.high %v19842_v8, %v19842_v8  ;;  %v7054_v1 = vsel %vm6698_vm14, %v17246_v63, %v7017_v49  ;;  %12113 = vmatpush3.bf16.msra.mxu1 %v12504_v10  ;;  %v19885_v19 = vld [vmem:[#allocation56_spill] sm:$0xff] }
 0x659   :  { %v5929_v37 = vmax.f32 %v19879_v38, %v19878_v26  ;;  %v6847_v33 = vsel %vm6702_vm15, %v17456_v6, %v6846_v39  ;;  %v6732_v20 = vsel %vm6702_vm15, %v17316_v35, %v6731_v9  ;;  %v7055_v52 = vsel %vm6700_vm13, %v17255_v18, %v7054_v1  ;;  %v19886_v26 = vld [vmem:[#allocation107_spill] sm:$0xff] }
 0x65a   :  { %v5901_v47 = vmax.f32 %v19881_v13, %v19880_v17  ;;  %v6848_v55 = vsel %vm6704_vm2, %v17444_v5, %v6847_v33  ;;  %v6733_v8 = vsel %vm6704_vm2, %v17323_v3, %v6732_v20  ;;  %v6973_v31 = vsel %vm6700_vm13, %v17323_v3, %v6972_v43  ;;  %v19890_v1 = vld [vmem:[#allocation39_spill] sm:$0xff] }
 0x65b   :  { %v11861_v34 = vrot.slane %v5929_v37, 9  ;;  %6869 = vrot.lane.b32.xlu1 %v6848_v55, %s12726_s2  ;;  %7137 = vst.msk [vmem:[#allocation3 + $0x128] sm:$0x1f] %vm6752_vm3, %v6848_v55  ;;  %6865 = vrot.lane.b32.xlu0 %v6840_v51, %s12726_s2  ;;  %6760 = vst.msk [vmem:[#allocation3 + $0x118] sm:$0x1f] %vm6752_vm3, %v6733_v8  ;;  %v7056_v63 = vsel %vm6702_vm15, %v17250_v32, %v7055_v52  ;;  %v6974_v61 = vsel %vm6702_vm15, %v17326_v23, %v6973_v31  ;;  %v12505_v23 = vld [vmem:[%s19050_s3 + $0x78] sm:$0xff]  }
 0x65c   :  { %v11833_v45 = vrot.slane %v5901_v47, 9  ;;  %7265 = vst.msk [vmem:[#allocation3 + $0xe0] sm:$0x1f] %vm6752_vm3, %v6733_v8  ;;  %v7150_v27 = vsel %vm6698_vm14, %v17250_v32, %v17255_v18  ;;  %v7057_v3 = vsel %vm6704_vm2, %v17263_v16, %v7056_v63  ;;  %v19884_v10 = vcombine.high %v19883_v42, %v19883_v42  ;;  %v12506_v32 = vld [vmem:[%s19050_s3 + $0x38] sm:$0xff]   ;;  %12114 = vmatprep.subr.bf16.mxu1 %v12505_v23  ;;  %v19888_v55 = vld [vmem:[#allocation75_spill] sm:$0xff] }
 0x65d   :  { %v6419_v35 = vmax.f32 %v5929_v37, %v11861_v34  ;;  %v7151_v39 = vsel %vm6700_vm13, %v17263_v16, %v7150_v27  ;;  %7263 = vst.msk [vmem:[#allocation3 + $0x90] sm:$0x1f] %vm6752_vm3, %v7057_v3  ;;  %v11873_v49 = vrot.slane %v19885_v19, 9  ;;  %v19887_v38 = vrot.slane %v19886_v26, 9  ;;  %v19892_v31 = vld [vmem:[#allocation100_spill] sm:$0xff]  ;;  %12115 = vmatpush3.bf16.msra.mxu1 %v12506_v32  ;;  %v19894_v32 = vld [vmem:[#allocation85_spill] sm:$0xff] }
 0x65e   :  { %v6391_v30 = vmax.f32 %v5901_v47, %v11833_v45  ;;  %v5942_v51 = vmax.f32 %v19884_v10, %v19882_v29  ;;  %v7152_v16 = vsel %vm6702_vm15, %v17276_v48, %v7151_v39  ;;  %v17540_v43 = vrot.slane %v17085_v21, %v15385_v2 }
 0x65f   :  { %v6935_v18 = vrot.slane %v6419_v35, %v15385_v2  ;;  %v6429_v37 = vmax.f32 %v19886_v26, %v19887_v38  ;;  %7074 = vrot.lane.b32.xlu1 %v6733_v8, %s12726_s2  ;;  %v17544_v17 = vrot.slane %v17052_v50, %v15385_v2  ;;  %7070 = vrot.lane.b32.xlu0 %v7057_v3, %s12726_s2  ;;  %v19891_v8 = vld [vmem:[#allocation41_spill] sm:$0xff]  ;;  %v19893_v45 = vrot.slane %v19892_v31, 9 }
 0x660   :  { %v7145_v33 = vrot.slane %v6391_v30, %v15385_v2  ;;  %v11874_v9 = vrot.slane %v5942_v51, 9  ;;  %v6431_v13 = vmax.f32 %v19885_v19, %v11873_v49  ;;  %v19889_v20 = vcombine.high %v19888_v55, %v19888_v55  ;;  %v19897_v38 = vld [vmem:[#allocation109_spill] sm:$0xff]  ;;  %v19898_v55 = vld [vmem:[#allocation108_spill] sm:$0xff] }
 0x661   :  { %v6975_v48 = vsel %vm6704_vm2, %v6935_v18, %v6974_v61  ;;  %v17550_v47 = vrot.slane %v6429_v37, %v15385_v2  ;;  %v11839_v52 = vrot.slane %v19891_v8, 9  ;;  %v6395_v63 = vmax.f32 %v19892_v31, %v19893_v45 }
 0x662   :  { %v5906_v21 = vmax.f32 %v19890_v1, %v19889_v20  ;;  %7337 = vst.msk [vmem:[#allocation3 + $0xe8] sm:$0x1f] %vm6752_vm3, %v6975_v48  ;;  %7001 = vst.msk [vmem:[#allocation3 + $0x120] sm:$0x1f] %vm6752_vm3, %v6975_v48  ;;  %v7153_v50 = vsel %vm6704_vm2, %v7145_v33, %v7152_v16  ;;  %v6432_v34 = vmax.f32 %v5942_v51, %v11874_v9  ;;  %v19896_v16 = vld [vmem:[#allocation60_spill] sm:$0xff]  ;;  %v11879_v37 = vrot.slane %v19897_v38, 9 }
 0x663   :  { %7335 = vst.msk [vmem:[#allocation3 + $0x98] sm:$0x1f] %vm6752_vm3, %v7153_v50  ;;  %v17565_v35 = vrot.slane %v6431_v13, %v15385_v2  ;;  %v6849_v61 = vsel %vm6698_vm14, %v17550_v47, %v17540_v43  ;;  %v17572_v3 = vrot.slane %v17013_v62, %v15385_v2  ;;  %7170 = vrot.lane.b32.xlu1 %v6975_v48, %s12726_s2  ;;  %v19899_v20 = vrot.slane %v19898_v55, 9 }
 0x664   :  { %v11838_v27 = vrot.slane %v5906_v21, 9  ;;  %v17576_v30 = vrot.slane %v6432_v34, %v15385_v2  ;;  %v6850_v39 = vsel %vm6700_vm13, %v17544_v17, %v6849_v61  ;;  %v6397_v42 = vmax.f32 %v19891_v8, %v11839_v52  ;;  %7166 = vrot.lane.b32.xlu0 %v7153_v50, %s12726_s2  ;;  %v19902_v61 = vld [vmem:[#allocation105_spill] sm:$0xff] }
 0x665   :  { %v17583_v10 = vrot.slane %v17016_v4, %v15385_v2  ;;  %v6851_v62 = vsel %vm6702_vm15, %v17565_v35, %v6850_v39  ;;  %v17589_v23 = vrot.slane %v6395_v63, %v15385_v2  ;;  %v19895_v18 = vcombine.high %v19894_v32, %v19894_v32 }
 0x666   :  { %v6396_v51 = vmax.f32 %v5906_v21, %v11838_v27  ;;  %v6852_v49 = vsel %vm6704_vm2, %v17576_v30, %v6851_v62  ;;  %v7275_v4 = vrot.slane %v6397_v42, %v15385_v2  ;;  %v6434_v1 = vmax.f32 %v19898_v55, %v19899_v20  ;;  %v19900_v21 = vld [vmem:[#allocation59_spill] sm:$0xff] }
 0x667   :  { %v5948_v19 = vmax.f32 %v19896_v16, %v19895_v18  ;;  %v7280_v26 = vsel %vm6698_vm14, %v17583_v10, %v17572_v3  ;;  %7138 = vst.msk [vmem:[#allocation3 + $0x150] sm:$0x1f] %vm6752_vm3, %v6852_v49  ;;  %v7320_v48 = vsel %vm6698_vm14, %v17589_v23, %v17583_v10  ;;  %6871 = vrot.lane.b32.xlu1 %v6852_v49, %s12726_s2  ;;  %v19901_v50 = vrot.slane %v19900_v21, 9  ;;  %v19910_v55 = vld [vmem:[#allocation55_spill] sm:$0xff] }
 0x668   :  { %v17604_v33 = vrot.slane %v6396_v51, %v15385_v2  ;;  %v7281_v9 = vsel %vm6700_vm13, %v17589_v23, %v7280_v26  ;;  %v6437_v8 = vmax.f32 %v19897_v38, %v11879_v37  ;;  %v17621_v52 = vrot.slane %v17055_v24, %v15385_v2  ;;  %v19905_v26 = vld [vmem:[#allocation62_spill] sm:$0xff]  ;;  %v19907_v38 = vld [vmem:[#allocation17_spill] sm:$0xff] }
 0x669   :  { %v11880_v13 = vrot.slane %v5948_v19, 9  ;;  %v6436_v34 = vmax.f32 %v19900_v21, %v19901_v50  ;;  %v19903_v27 = vrot.slane %v19902_v61, 9  ;;  %v7037_v51 = vrot.slane %v6434_v1, %v15385_v2  ;;  %v19912_v1 = vld [vmem:[#allocation81_spill] sm:$0xff] }
 0x66a   :  { %v7282_v31 = vsel %vm6702_vm15, %v17604_v33, %v7281_v9  ;;  %v7321_v45 = vsel %vm6700_vm13, %v17604_v33, %v7320_v48  ;;  %v19904_v32 = vrot.slane %v17020_v0, %v15385_v2  ;;  %v17642_v16 = vrot.slane %v6437_v8, %v15385_v2  ;;  %v19908_v9 = vld [vmem:[#allocation95_spill] sm:$0xff] }
 0x66b   :  { %v6438_v63 = vmax.f32 %v5948_v19, %v11880_v13  ;;  %v6420_v39 = vmax.f32 %v19902_v61, %v19903_v27  ;;  %v7283_v42 = vsel %vm6704_vm2, %v7275_v4, %v7282_v31  ;;  %v7322_v62 = vsel %vm6702_vm15, %v7275_v4, %v7321_v45 }
 0x66c   :  { %v17634_v24 = vrot.slane %v6436_v34, %v15385_v2  ;;  %v7323_v18 = vsel %vm6704_vm2, %v19904_v32, %v7322_v62  ;;  %7290 = vrot.lane.b32.xlu0 %v7283_v42, %s12726_s2  ;;  %v7058_v4 = vsel %vm6698_vm14, %v17621_v52, %v7037_v51  ;;  %v19906_v0 = vcombine.high %v19905_v26, %v19905_v26  ;;  %v19913_v26 = vld [vmem:[#allocation12_spill] sm:$0xff] }
 0x66d   :  { %v17645_v19 = vrot.slane %v6438_v63, %v15385_v2  ;;  %v6661_v49 = vrot.slane %v6420_v39, %v15385_v2  ;;  %7336 = vst.msk [vmem:[#allocation3 + $0xc0] sm:$0x1f] %vm6752_vm3, %v7323_v18  ;;  %v19909_v48 = vrot.slane %v19908_v9, 9  ;;  %v19911_v20 = vcombine.high %v19910_v55, %v19910_v55 }
 0x66e   :  { %v5950_v37 = vmax.f32 %v19907_v38, %v19906_v0  ;;  %v7059_v50 = vsel %vm6700_vm13, %v17634_v24, %v7058_v4  ;;  %v7154_v8 = vsel %vm6698_vm14, %v17642_v16, %v17634_v24  ;;  %v6976_v31 = vsel %vm6698_vm14, %v17438_v58, %v17435_v59  ;;  %v19914_v0 = vld [vmem:[#allocation11_spill] sm:$0xff] }
 0x66f   :  { %v6439_v13 = vmax.f32 %v19908_v9, %v19909_v48  ;;  %v5936_v21 = vmax.f32 %v19912_v1, %v19911_v20  ;;  %v6734_v34 = vsel %vm6698_vm14, %v17423_v53, %v6661_v49  ;;  %v7060_v45 = vsel %vm6702_vm15, %v17642_v16, %v7059_v50  ;;  %v19916_v9 = vld [vmem:[#allocation20_spill] sm:$0xff]  ;;  %v19919_v50 = vld [vmem:[#allocation21_spill] sm:$0xff] }
 0x670   :  { %v6735_v63 = vsel %vm6700_vm13, %v17435_v59, %v6734_v34  ;;  %v11882_v61 = vrot.slane %v5950_v37, 9  ;;  %v7061_v53 = vsel %vm6704_vm2, %v17645_v19, %v7060_v45  ;;  %v7155_v42 = vsel %vm6700_vm13, %v17645_v19, %v7154_v8 }
 0x671   :  { %v17677_v27 = vrot.slane %v6439_v13, %v15385_v2  ;;  %v6736_v39 = vsel %vm6702_vm15, %v17438_v58, %v6735_v63  ;;  %v11868_v62 = vrot.slane %v5936_v21, 9  ;;  %7080 = vrot.lane.b32.xlu1 %v7061_v53, %s12726_s2  ;;  %7268 = vst.msk [vmem:[#allocation3 + $0x158] sm:$0x1f] %vm6752_vm3, %v7061_v53  ;;  %v6977_v18 = vsel %vm6700_vm13, %v17456_v6, %v6976_v31  ;;  %v19917_v13 = vld [vmem:[#allocation63_spill] sm:$0xff]  ;;  %v19920_v53 = vld [vmem:[#allocation13_spill] sm:$0xff] }
 0x672   :  { %v6737_v59 = vsel %vm6704_vm2, %v17456_v6, %v6736_v39  ;;  %v6440_v51 = vmax.f32 %v5950_v37, %v11882_v61  ;;  %v6978_v49 = vsel %vm6702_vm15, %v17444_v5, %v6977_v18  ;;  %v6681_v4 = vrot.slane %v17049_v11, %v15385_v2 }
 0x673   :  { %v7156_v32 = vsel %vm6702_vm15, %v17677_v27, %v7155_v42  ;;  %7076 = vrot.lane.b32.xlu0 %v6737_v59, %s12726_s2  ;;  %6761 = vst.msk [vmem:[#allocation3 + $0x140] sm:$0x1f] %vm6752_vm3, %v6737_v59  ;;  %7266 = vst.msk [vmem:[#allocation3 + $0x108] sm:$0x1f] %vm6752_vm3, %v6737_v59  ;;  %v6426_v58 = vmax.f32 %v5936_v21, %v11868_v62  ;;  %v19915_v38 = vcombine.high %v19914_v0, %v19914_v0 }
 0x674   :  { %v7149_v6 = vrot.slane %v6440_v51, %v15385_v2  ;;  %v11887_v48 = vrot.slane %v19916_v9, 9  ;;  %v19918_v55 = vrot.slane %v19917_v13, 9  ;;  %v17711_v1 = vrot.slane %v17088_v54, %v15385_v2 }
 0x675   :  { %v5956_v37 = vmax.f32 %v19915_v38, %v19913_v26  ;;  %v6939_v5 = vrot.slane %v6426_v58, %v15385_v2  ;;  %v6738_v11 = vsel %vm6698_vm14, %v17540_v43, %v6681_v4  ;;  %v17718_v34 = vrot.slane %v19919_v50, %v15385_v2  ;;  %v19922_v4 = vld [vmem:[#allocation57_spill] sm:$0xff] }
 0x676   :  { %v6443_v20 = vmax.f32 %v19917_v13, %v19918_v55  ;;  %v7157_v8 = vsel %vm6704_vm2, %v7149_v6, %v7156_v32  ;;  %v6739_v31 = vsel %vm6700_vm13, %v17550_v47, %v6738_v11  ;;  %v6445_v45 = vmax.f32 %v19916_v9, %v11887_v48  ;;  %v6860_v9 = vpop.permute.xlu1 %6859  ;;  %v19925_v11 = vld [vmem:[#allocation67_spill] sm:$0xff] }
 0x677   :  { %v11888_v21 = vrot.slane %v5956_v37, 9  ;;  %7340 = vst.msk [vmem:[#allocation3 + $0x160] sm:$0x1f] %vm6752_vm3, %v7157_v8  ;;  %7176 = vrot.lane.b32.xlu1 %v7157_v8, %s12726_s2  ;;  %v6979_v43 = vsel %vm6704_vm2, %v6939_v5, %v6978_v49  ;;  %v6740_v63 = vsel %vm6702_vm15, %v17544_v17, %v6739_v31  ;;  %v7319_v39 = vrot.slane %v19920_v53, %v15385_v2  ;;  %v19927_v31 = vld [vmem:[#allocation43_spill] sm:$0xff] }
 0x678   :  { %v17725_v54 = vrot.slane %v6443_v20, %v15385_v2  ;;  %7338 = vst.msk [vmem:[#allocation3 + $0x110] sm:$0x1f] %vm6752_vm3, %v6979_v43  ;;  %7172 = vrot.lane.b32.xlu0 %v6979_v43, %s12726_s2  ;;  %7002 = vst.msk [vmem:[#allocation3 + $0x148] sm:$0x1f] %vm6752_vm3, %v6979_v43  ;;  %v6741_v42 = vsel %vm6704_vm2, %v17565_v35, %v6740_v63  ;;  %v17740_v62 = vrot.slane %v6445_v45, %v15385_v2 }
 0x679   :  { %v6446_v61 = vmax.f32 %v5956_v37, %v11888_v21  ;;  %6762 = vst.msk [vmem:[#allocation3 + $0x168] sm:$0x1f] %vm6752_vm3, %v6741_v42  ;;  %7267 = vst.msk [vmem:[#allocation3 + $0x130] sm:$0x1f] %vm6752_vm3, %v6741_v42  ;;  %v7116_v58 = vsel %vm6698_vm14, %v17634_v24, %v17621_v52  ;;  %v19921_v49 = vcombine.high %v19882_v29, %v19882_v29  ;;  %v6856_v52 = vpop.permute.xlu0 %6855 }
 0x67a   :  { %v7284_v59 = vsel %vm6698_vm14, %v17725_v54, %v17711_v1  ;;  %v7324_v51 = vsel %vm6698_vm14, %v17718_v34, %v17725_v54  ;;  %v7117_v37 = vsel %vm6700_vm13, %v17642_v16, %v7116_v58  ;;  %v6980_v6 = vsel %vm6698_vm14, %v17544_v17, %v17550_v47  ;;  %v12551_v47 = vld [vmem:[%s19050_s3 + $0xc0] sm:$0xff]   ;;  %6887 = vst.msk [vmem:[#allocation3 + $0x78] sm:$0x1f] %vm6883_vm6, %v6860_v9 }
 0x67b   :  { %v7279_v32 = vrot.slane %v6446_v61, %v15385_v2  ;;  %v7285_v18 = vsel %vm6700_vm13, %v17718_v34, %v7284_v59  ;;  %v5943_v26 = vmax.f32 %v19922_v4, %v19921_v49  ;;  %v7325_v38 = vsel %vm6700_vm13, %v17740_v62, %v7324_v51  ;;  %7078 = vrot.lane.b32.xlu1 %v6741_v42, %s12726_s2 }
 0x67c   :  { %v7286_v0 = vsel %vm6702_vm15, %v17740_v62, %v7285_v18  ;;  %v7118_v48 = vsel %vm6702_vm15, %v17645_v19, %v7117_v37  ;;  %v6981_v17 = vsel %vm6700_vm13, %v17565_v35, %v6980_v6  ;;  %7301 = vst.msk [vmem:[#allocation3 + $0x40] sm:$0x1f] %vm6883_vm6, %v6860_v9  ;;  %6885 = vst.msk [vmem:[#allocation3 + $0x28] sm:$0x1f] %vm6883_vm6, %v6856_v52  ;;  %12140 = vmatprep.subr.bf16.mxu1 %v12551_v47  ;;  %v7356_v52 = vld [vmem:[#allocation3 + $0x70] sm:$0x1f] }
 0x67d   :  { %v7287_v29 = vsel %vm6704_vm2, %v7279_v32, %v7286_v0  ;;  %v7326_v24 = vsel %vm6702_vm15, %v7279_v32, %v7325_v38  ;;  %v11875_v13 = vrot.slane %v5943_v26, 9  ;;  %v7119_v16 = vsel %vm6704_vm2, %v17677_v27, %v7118_v48  ;;  %v19923_v27 = vld [vmem:[#allocation25_spill] sm:$0xff]  ;;  %v7351_v48 = vld [vmem:[#allocation3 + $0x48] sm:$0x1f] }
 0x67e   :  { %v7327_v55 = vsel %vm6704_vm2, %v7319_v39, %v7326_v24  ;;  %7294 = vrot.lane.b32.xlu0 %v7287_v29, %s12726_s2  ;;  %7139 = vst.msk [vmem:[#allocation3 + $0x178] sm:$0x1f] %vm6752_vm3, %v7119_v16  ;;  %v6982_v20 = vsel %vm6702_vm15, %v17576_v30, %v6981_v17  ;;  %v6501_v35 = vrot.slane %v17063_v40, %v15385_v2 }
 0x67f   :  { %7341 = vst.msk [vmem:[#allocation3 + $0x188] sm:$0x1f] %vm6752_vm3, %v7327_v55  ;;  %v6433_v19 = vmax.f32 %v5943_v26, %v11875_v13  ;;  %v19924_v5 = vcombine.high %v19923_v27, %v19923_v27  ;;  %v6944_v50 = vsel %vm6698_vm14, %v17118_v41, %v17108_v60  ;;  %v6601_v30 = vrot.slane %v17023_v22, %v15385_v2  ;;  %v17875_v13 = vld [vmem:[#allocation3 + $0x98] sm:$0x1f] }
 0x680   :  { %v19926_v8 = vcombine.high %v19858_v46, %v19858_v46  ;;  %v6964_v40 = vsel %vm6698_vm14, %v17351_v14, %v17347_v28  ;;  %7292 = vrot.lane.b32.xlu1 %v7119_v16, %s12726_s2  ;;  %v6699_v63 = vsel %vm6698_vm14, %v17105_v25, %v6501_v35  ;;  %v6945_v22 = vsel %vm6700_vm13, %v17140_v36, %v6944_v50 }
 0x681   :  { %v5866_v21 = vmax.f32 %v19925_v11, %v19924_v5  ;;  %v6943_v43 = vrot.slane %v6433_v19, %v15385_v2  ;;  %v6701_v46 = vsel %vm6700_vm13, %v17108_v60, %v6699_v63  ;;  %v6946_v53 = vsel %vm6702_vm15, %v17129_v56, %v6945_v22 }
 0x682   :  { %v5915_v45 = vmax.f32 %v19927_v31, %v19926_v8  ;;  %v6722_v39 = vsel %vm6698_vm14, %v17338_v12, %v6601_v30  ;;  %v6703_v51 = vsel %vm6702_vm15, %v17118_v41, %v6701_v46  ;;  %v6965_v41 = vsel %vm6700_vm13, %v17369_v57, %v6964_v40 }
 0x683   :  { %v11798_v61 = vrot.slane %v5866_v21, 9  ;;  %v6983_v59 = vsel %vm6704_vm2, %v6943_v43, %v6982_v20  ;;  %v6723_v32 = vsel %vm6700_vm13, %v17347_v28, %v6722_v39  ;;  %v6705_v60 = vsel %vm6704_vm2, %v17140_v36, %v6703_v51 }
 0x684   :  { %v11847_v42 = vrot.slane %v5915_v45, 9  ;;  %7339 = vst.msk [vmem:[#allocation3 + $0x138] sm:$0x1f] %vm6752_vm3, %v6983_v59  ;;  %7174 = vrot.lane.b32.xlu0 %v6983_v59, %s12726_s2  ;;  %7003 = vst.msk [vmem:[#allocation3 + $0x170] sm:$0x1f] %vm6752_vm3, %v6983_v59  ;;  %v6724_v56 = vsel %vm6702_vm15, %v17351_v14, %v6723_v32  ;;  %v6966_v58 = vsel %vm6702_vm15, %v17380_v7, %v6965_v41 }
 0x685   :  { %v6356_v25 = vmax.f32 %v5866_v21, %v11798_v61  ;;  %6753 = vst.msk [vmem:[#allocation3] sm:$0x1f] %vm6752_vm3, %v6705_v60  ;;  %v6725_v18 = vsel %vm6704_vm2, %v17369_v57, %v6724_v56  ;;  %v7211_v36 = vrot.slane %v17071_v15, %v15385_v2  ;;  %v7231_v49 = vrot.slane %v17058_v44, %v15385_v2 }
 0x686   :  { %v6405_v12 = vmax.f32 %v5915_v45, %v11847_v42  ;;  %6758 = vst.msk [vmem:[#allocation3 + $0xc8] sm:$0x1f] %vm6752_vm3, %v6725_v18  ;;  %v7642_v24 = vcombine.high %v7356_v52, %v7356_v52  ;;  %v7544_v5 = vcombine.high %v7351_v48, %v7351_v48 }
 0x687   :  { %v6907_v28 = vrot.slane %v6356_v25, %v15385_v2  ;;  %v7248_v26 = vsel %vm6698_vm14, %v17572_v3, %v7211_v36  ;;  %v7252_v15 = vsel %vm6698_vm14, %v17711_v1, %v7231_v49 }
 0x688   :  { %v6927_v14 = vrot.slane %v6405_v12, %v15385_v2  ;;  %v7249_v7 = vsel %vm6700_vm13, %v17583_v10, %v7248_v26  ;;  %v7253_v0 = vsel %vm6700_vm13, %v17725_v54, %v7252_v15  ;;  %v19928_v54 = vld [vmem:[#allocation9_spill] sm:$0xff] }
 0x689   :  { %v6947_v4 = vsel %vm6704_vm2, %v6907_v28, %v6946_v53  ;;  %v7250_v44 = vsel %vm6702_vm15, %v17589_v23, %v7249_v7  ;;  %v7254_v38 = vsel %vm6702_vm15, %v17718_v34, %v7253_v0  ;;  %v12727_v23 = vmov 1966171168  }
 0x68a   :  { %6994 = vst.msk [vmem:[#allocation3 + $0x8] sm:$0x1f] %vm6752_vm3, %v6947_v4  ;;  %v6967_v57 = vsel %vm6704_vm2, %v6927_v14, %v6966_v58  ;;  %v7251_v3 = vsel %vm6704_vm2, %v17604_v33, %v7250_v44  ;;  %v7255_v10 = vsel %vm6704_vm2, %v17740_v62, %v7254_v38  ;;  %v7161_v1 = vpop.permute.xlu1 %7160  ;;  %v7448_v37 = vunpack.c.l.s4 %v12727_v23  ;;  %v7346_v33 = vld [vmem:[#allocation3 + $0x20] sm:$0x1f] }
 0x68b   :  { %6999 = vst.msk [vmem:[#allocation3 + $0xd0] sm:$0x1f] %vm6752_vm3, %v6967_v57  ;;  %7264 = vst.msk [vmem:[#allocation3 + $0xb8] sm:$0x1f] %vm6752_vm3, %v7251_v3  ;;  %v7446_v16 = vcombine.high %v7346_v33, %v7346_v33 }
 0x68c   :  { %7269 = vst.msk [vmem:[#allocation3 + $0x180] sm:$0x1f] %vm6752_vm3, %v7255_v10  ;;  %v7449_v6 = vunpack.c.0.s8 %v7448_v37 }
 0x68d   :  { %7189 = vst.msk [vmem:[#allocation3 + $0x38] sm:$0x1f] %vm6883_vm6, %v7161_v1 }
 0x68e   :  { %v17870_v9 = vsub.s32 %v7449_v6, %v19928_v54 }
 0x690   :  { %v7481_v34 = vrot.slane %v7346_v33, %v17870_v9  ;;  %v7677_v62 = vrot.slane %v7356_v52, %v17870_v9  ;;  %v7684_v19 = vrot.slane %v7642_v24, %v17870_v9  ;;  %v7579_v35 = vrot.slane %v7351_v48, %v17870_v9  ;;  %v7366_v24 = vld [vmem:[#allocation3 + $0xc0] sm:$0x1f] }
 0x691   :  { %v17881_v11 = vrot.slane %v17875_v13, %v17870_v9  ;;  %v7488_v30 = vrot.slane %v7446_v16, %v17870_v9  ;;  %v7586_v53 = vrot.slane %v7544_v5, %v17870_v9 }
 0x692   :  { %v7492_v17 = vcombine.high %v7481_v34, %v7481_v34  ;;  %v7688_v20 = vcombine.high %v7677_v62, %v7677_v62  ;;  %v7723_v40 = vrot.slane %v7684_v19, %v17870_v9  ;;  %v7590_v61 = vcombine.high %v7579_v35, %v7579_v35 }
 0x693   :  { %v7520_v22 = vrot.slane %v7481_v34, %v17870_v9  ;;  %v17901_v39 = vrot.slane %v17881_v11, %v17870_v9  ;;  %v7716_v42 = vrot.slane %v7677_v62, %v17870_v9  ;;  %v7527_v51 = vrot.slane %v7488_v30, %v17870_v9 }
 0x694   :  { %v12516_v55 = vld [vmem:[#allocation3 + $0x38] ss:$8 sps:$4 sm:$0xff]   ;;  %v12518_v47 = vld [vmem:[#allocation3 + $0x3c] ss:$8 sps:$4 sm:$0x11]   ;;  %v7534_v8 = vrot.slane %v7492_v17, %v17870_v9  ;;  %v7730_v43 = vrot.slane %v7688_v20, %v17870_v9  ;;  %v17913_v18 = vrot.slane %v7579_v35, %v17870_v9  ;;  %v17916_v58 = vrot.slane %v7590_v61, %v17870_v9 }
 0x695   :  { %v17886_v50 = vrot.slane %v12516_v55, %v17870_v9  ;;  %v7572_v45 = vrot.slane %v12518_v47, %v17870_v9  ;;  %v11905_v41 = vcombine.low %v7723_v40, %v17901_v39  ;;  %v7625_v14 = vrot.slane %v7586_v53, %v17870_v9  ;;  %v7371_v47 = vld [vmem:[#allocation3 + $0xe8] sm:$0x1f] }
 0x696   :  { %v11891_v25 = vcombine.low %v7520_v22, %v7534_v8  ;;  %v11893_v32 = vcombine.high %v7520_v22, %v7534_v8  ;;  %v11903_v12 = vcombine.high %v7716_v42, %v7730_v43  ;;  %v11895_v26 = vcombine.low %v7527_v51, %v17913_v18 }
 0x697   :  { %v11901_v44 = vcombine.low %v7716_v42, %v7730_v43  ;;  %v8602_v3 = vrot.slane %v11905_v41, %v17870_v9  ;;  %v7740_v35 = vcombine.high %v17875_v13, %v17875_v13  ;;  %v7873_v61 = vrot.slane %v7366_v24, %v17870_v9 }
 0x698   :  { %v8443_v57 = vrot.slane %v11891_v25, %v17870_v9  ;;  %v8457_v7 = vrot.slane %v11893_v32, %v17870_v9  ;;  %v8588_v0 = vrot.slane %v11903_v12, %v17870_v9  ;;  %v8471_v23 = vrot.slane %v11895_v26, %v17870_v9  ;;  %v17979_v25 = vld [vmem:[#allocation3 + $0x110] sm:$0x1f] }
 0x699   :  { %v7065_v29 = vpop.permute.xlu0 %7064  ;;  %v8574_v52 = vrot.slane %v11901_v44, %v17870_v9  ;;  %v17959_v13 = vrot.slane %v7740_v35, %v17870_v9  ;;  %v7786_v53 = vcombine.high %v17881_v11, %v17881_v11  ;;  %v7884_v26 = vcombine.high %v7873_v61, %v7873_v61 }
 0x69a   :  { %7093 = vst.msk [vmem:[#allocation3 + $0x30] sm:$0x1f] %vm6883_vm6, %v7065_v29  ;;  %v8488_v6 = vcombine.low %v8443_v57, %v8457_v7  ;;  %v8608_v29 = vcombine.low %v8588_v0, %v8602_v3 }
 0x69c   :  { %v8505_v55 = vrot.slane %v8488_v6, %v17870_v9  ;;  %v8643_v20 = vrot.slane %v8608_v29, %v17870_v9 }
 0x69e   :  { %v6858_v27 = vpop.permute.xlu1 %6857 }
 0x69f   :  { %6886 = vst.msk [vmem:[#allocation3 + $0x50] sm:$0x1f] %vm6883_vm6, %v6858_v27  ;;  %7300 = vst.msk [vmem:[#allocation3 + $0x18] sm:$0x1f] %vm6883_vm6, %v6858_v27  ;;  %v7838_v27 = vcombine.high %v7366_v24, %v7366_v24 }
 0x6a1   :  { %v12513_v21 = vld [vmem:[#allocation3 + $0x28] ss:$8 sps:$4 sm:$0xff]   ;;  %v12515_v31 = vld [vmem:[#allocation3 + $0x2c] ss:$8 sps:$4 sm:$0x11]   ;;  %v17962_v43 = vrot.slane %v7838_v27, %v17870_v9 }
 0x6a2   :  { %v17894_v63 = vrot.slane %v12513_v21, %v17870_v9  ;;  %v7558_v46 = vrot.slane %v12515_v31, %v17870_v9  ;;  %v7936_v31 = vcombine.high %v7371_v47, %v7371_v47 }
 0x6a3   :  { %v7919_v12 = vrot.slane %v17962_v43, %v17870_v9 }
 0x6a4   :  { %v7588_v59 = vcombine.high %v17894_v63, %v17886_v50  ;;  %v7063_v60 = vpop.permute.xlu1 %7062  ;;  %v7589_v56 = vcombine.low %v7558_v46, %v7572_v45  ;;  %v7587_v21 = vcombine.low %v17894_v63, %v17886_v50  ;;  %v17968_v63 = vrot.slane %v7371_v47, %v17870_v9 }
 0x6a5   :  { %7092 = vst.msk [vmem:[#allocation3 + $0x8] sm:$0x1f] %vm6883_vm6, %v7063_v60  ;;  %v17974_v42 = vrot.slane %v7936_v31, %v17870_v9 }
 0x6a6   :  { %v17910_v28 = vrot.slane %v7588_v59, %v17870_v9  ;;  %v17919_v36 = vrot.slane %v7589_v56, %v17870_v9  ;;  %v17965_v50 = vrot.slane %v7587_v21, %v17870_v9  ;;  %v7821_v56 = vrot.slane %v17959_v13, %v17870_v9 }
 0x6a7   :  { %v8017_v0 = vrot.slane %v17974_v42, %v17870_v9  ;;  %v12555_v42 = vld [vmem:[%s19050_s3 + $0xd0] sm:$0xff]  }
 0x6a8   :  { %v7636_v4 = vcombine.low %v17910_v28, %v17916_v58  ;;  %v7635_v15 = vcombine.low %v17919_v36, %v7625_v14  ;;  %v7637_v51 = vcombine.high %v17910_v28, %v17916_v58  ;;  %v7634_v14 = vcombine.high %v17965_v50, %v17913_v18 }
 0x6a9   :  { %v6854_v49 = vpop.permute.xlu0 %6853 }
 0x6aa   :  { %6884 = vst.msk [vmem:[#allocation3] sm:$0x1f] %vm6883_vm6, %v6854_v49  ;;  %v11897_v38 = vcombine.high %v7636_v4, %v17913_v18  ;;  %v11899_v10 = vcombine.high %v17916_v58, %v7635_v15  ;;  %v7982_v4 = vcombine.high %v17968_v63, %v17968_v63  ;;  %v17991_v58 = vrot.slane %v17968_v63, %v17870_v9 }
 0x6ab   :  { %v17998_v18 = vrot.slane %v7786_v53, %v17870_v9  ;;  %v11896_v24 = vcombine.low %v17910_v28, %v7634_v14 }
 0x6ac   :  { %v8485_v37 = vrot.slane %v11897_v38, %v17870_v9  ;;  %v8560_v33 = vrot.slane %v11899_v10, %v17870_v9  ;;  %v11898_v10 = vcombine.low %v7637_v51, %v17919_v36 }
 0x6ad   :  { %v6862_v1 = vpop.permute.xlu0 %6861 }
 0x6ae   :  { %6888 = vst.msk [vmem:[#allocation3 + $0xa0] sm:$0x1f] %vm6883_vm6, %v6862_v1  ;;  %7302 = vst.msk [vmem:[#allocation3 + $0x68] sm:$0x1f] %vm6883_vm6, %v6862_v1  ;;  %v7069_v54 = vpop.permute.xlu1 %7068  ;;  %v8491_v34 = vcombine.low %v8471_v23, %v8485_v37  ;;  %v8605_v62 = vcombine.low %v8560_v33, %v8574_v52  ;;  %v18005_v1 = vrot.slane %v7873_v61, %v17870_v9 }
 0x6af   :  { %7095 = vst.msk [vmem:[#allocation3 + $0x80] sm:$0x1f] %vm6883_vm6, %v7069_v54  ;;  %v18009_v23 = vrot.slane %v17979_v25, %v17870_v9  ;;  %v8553_v21 = vrot.slane %v11898_v10, %v17870_v9  ;;  %v8478_v10 = vrot.slane %v11896_v24, %v17870_v9 }
 0x6b0   :  { %v8526_v16 = vrot.slane %v8491_v34, %v17870_v9  ;;  %v8622_v19 = vrot.slane %v8605_v62, %v17870_v9  ;;  %v18018_v62 = vrot.slane %v7884_v26, %v17870_v9 }
 0x6b1   :  { %v7067_v48 = vpop.permute.xlu0 %7066  ;;  %v12507_v59 = vld [vmem:[#allocation3] ss:$8 sps:$4 sm:$0xff]   ;;  %v12509_v41 = vld [vmem:[#allocation3 + $0x4] ss:$8 sps:$4 sm:$0x11]  }
 0x6b2   :  { %7094 = vst.msk [vmem:[#allocation3 + $0x58] sm:$0x1f] %vm6883_vm6, %v7067_v48  ;;  %v7163_v17 = vpop.permute.xlu1 %7162  ;;  %v17948_v5 = vcombine.low %v8505_v55, %v8526_v16  ;;  %v17952_v30 = vcombine.low %v8622_v19, %v8643_v20  ;;  %v7453_v38 = vrot.slane %v12507_v59, %v17870_v9  ;;  %v7460_v29 = vrot.slane %v12509_v41, %v17870_v9 }
 0x6b3   :  { %7190 = vst.msk [vmem:[#allocation3 + $0x60] sm:$0x1f] %vm6883_vm6, %v7163_v17  ;;  %v11911_v13 = vcombine.low %v18005_v1, %v18018_v62 }
 0x6b4   :  { %v9203_v40 = vpack.c.bf16 %v17952_v30, %v17948_v5 }
 0x6b5   :  { %v7159_v8 = vpop.permute.xlu0 %7158 }
 0x6b6   :  { %7188 = vst.msk [vmem:[#allocation3 + $0x10] sm:$0x1f] %vm6883_vm6, %v7159_v8  ;;  %v12526_v44 = vld [vmem:[#allocation3 + $0x78] ss:$8 sps:$4 sm:$0xff]  }
 0x6b7   :  { %v7289_v45 = vpop.permute.xlu1 %7288  ;;  %v12528_v34 = vld [vmem:[#allocation3 + $0x7c] ss:$8 sps:$4 sm:$0x11]   ;;  %v7747_v27 = vrot.slane %v12526_v44, %v17870_v9 }
 0x6b8   :  { %7303 = vst.msk [vmem:[#allocation3 + $0x90] sm:$0x1f] %vm6883_vm6, %v7289_v45  ;;  %v7754_v53 = vrot.slane %v12528_v34, %v17870_v9 }
 0x6b9   :  { %v12520_v46 = vld [vmem:[#allocation3 + $0x50] ss:$8 sps:$4 sm:$0xff]   ;;  %v12522_v49 = vld [vmem:[#allocation3 + $0x54] ss:$8 sps:$4 sm:$0x11]  }
 0x6ba   :  { %v12523_v32 = vld [vmem:[#allocation3 + $0x60] ss:$8 sps:$4 sm:$0xff]   ;;  %v12525_v60 = vld [vmem:[#allocation3 + $0x64] ss:$8 sps:$4 sm:$0x11]   ;;  %v7649_v7 = vrot.slane %v12520_v46, %v17870_v9  ;;  %v7656_v16 = vrot.slane %v12522_v49, %v17870_v9 }
 0x6bb   :  { %v7165_v22 = vpop.permute.xlu0 %7164  ;;  %v7663_v15 = vrot.slane %v12523_v32, %v17870_v9  ;;  %v7670_v54 = vrot.slane %v12525_v60, %v17870_v9 }
 0x6bc   :  { %7191 = vst.msk [vmem:[#allocation3 + $0x88] sm:$0x1f] %vm6883_vm6, %v7165_v22 }
 0x6bd   :  { %v6868_v11 = vpop.permute.xlu1 %6867  ;;  %v12510_v57 = vld [vmem:[#allocation3 + $0x10] ss:$8 sps:$4 sm:$0xff]   ;;  %v12512_v3 = vld [vmem:[#allocation3 + $0x14] ss:$8 sps:$4 sm:$0x11]   ;;  %v7685_v33 = vcombine.low %v7649_v7, %v7663_v15  ;;  %v7686_v52 = vcombine.high %v7649_v7, %v7663_v15  ;;  %v7687_v45 = vcombine.low %v7656_v16, %v7670_v54 }
 0x6be   :  { %6891 = vst.msk [vmem:[#allocation3 + $0x118] sm:$0x1f] %vm6883_vm6, %v6868_v11  ;;  %7305 = vst.msk [vmem:[#allocation3 + $0xe0] sm:$0x1f] %vm6883_vm6, %v6868_v11  ;;  %v7467_v6 = vrot.slane %v12510_v57, %v17870_v9  ;;  %v7474_v36 = vrot.slane %v12512_v3, %v17870_v9 }
 0x6bf   :  { %v7695_v17 = vrot.slane %v7685_v33, %v17870_v9  ;;  %v7709_v20 = vrot.slane %v7686_v52, %v17870_v9  ;;  %v7702_v7 = vrot.slane %v7687_v45, %v17870_v9 }
 0x6c0   :  { %v7489_v48 = vcombine.low %v7453_v38, %v7467_v6  ;;  %v7490_v55 = vcombine.high %v7453_v38, %v7467_v6  ;;  %v7491_v19 = vcombine.low %v7460_v29, %v7474_v36 }
 0x6c1   :  { %v11900_v46 = vcombine.low %v7695_v17, %v7709_v20  ;;  %v11902_v49 = vcombine.high %v7695_v17, %v7709_v20 }
 0x6c2   :  { %v6864_v37 = vpop.permute.xlu0 %6863  ;;  %v7499_v28 = vrot.slane %v7489_v48, %v17870_v9  ;;  %v7513_v31 = vrot.slane %v7490_v55, %v17870_v9  ;;  %v7506_v22 = vrot.slane %v7491_v19, %v17870_v9 }
 0x6c3   :  { %6889 = vst.msk [vmem:[#allocation3 + $0xc8] sm:$0x1f] %vm6883_vm6, %v6864_v37  ;;  %v12529_v47 = vld [vmem:[#allocation3 + $0x88] ss:$8 sps:$4 sm:$0xff]   ;;  %v8567_v26 = vrot.slane %v11900_v46, %v17870_v9  ;;  %v8581_v24 = vrot.slane %v11902_v49, %v17870_v9 }
 0x6c4   :  { %v12531_v35 = vld [vmem:[#allocation3 + $0x8c] ss:$8 sps:$4 sm:$0x11]   ;;  %v7761_v61 = vrot.slane %v12529_v47, %v17870_v9  ;;  %v11890_v60 = vcombine.low %v7499_v28, %v7513_v31  ;;  %v11892_v11 = vcombine.high %v7499_v28, %v7513_v31  ;;  %v11894_v14 = vcombine.low %v7506_v22, %v17965_v50 }
 0x6c5   :  { %v7169_v8 = vpop.permute.xlu1 %7168  ;;  %v7768_v59 = vrot.slane %v12531_v35, %v17870_v9  ;;  %v8604_v52 = vcombine.high %v8553_v21, %v8567_v26  ;;  %v8603_v55 = vcombine.low %v8553_v21, %v8567_v26  ;;  %v8080_v28 = vcombine.high %v18009_v23, %v18009_v23 }
 0x6c6   :  { %7193 = vst.msk [vmem:[#allocation3 + $0xd8] sm:$0x1f] %vm6883_vm6, %v7169_v8  ;;  %v7783_v51 = vcombine.low %v7747_v27, %v7761_v61  ;;  %v7784_v32 = vcombine.high %v7747_v27, %v7761_v61  ;;  %v8436_v44 = vrot.slane %v11890_v60, %v17870_v9  ;;  %v8450_v3 = vrot.slane %v11892_v11, %v17870_v9 }
 0x6c7   :  { %v7785_v57 = vcombine.low %v7754_v53, %v7768_v59  ;;  %v8464_v38 = vrot.slane %v11894_v14, %v17870_v9  ;;  %v8629_v61 = vrot.slane %v8604_v52, %v17870_v9  ;;  %v8615_v59 = vrot.slane %v8603_v55, %v17870_v9 }
 0x6c8   :  { %v18037_v15 = vrot.slane %v7783_v51, %v17870_v9  ;;  %v18047_v37 = vrot.slane %v7784_v32, %v17870_v9  ;;  %v8487_v54 = vcombine.high %v8436_v44, %v8450_v3  ;;  %v8486_v29 = vcombine.low %v8436_v44, %v8450_v3 }
 0x6c9   :  { %v7073_v41 = vpop.permute.xlu0 %7072  ;;  %v18044_v50 = vrot.slane %v7785_v57, %v17870_v9  ;;  %v8490_v34 = vcombine.high %v8464_v38, %v8478_v10  ;;  %v8489_v48 = vcombine.low %v8464_v38, %v8478_v10 }
 0x6ca   :  { %7097 = vst.msk [vmem:[#allocation3 + $0xd0] sm:$0x1f] %vm6883_vm6, %v7073_v41  ;;  %v11904_v33 = vcombine.low %v7702_v7, %v18037_v15  ;;  %v8512_v16 = vrot.slane %v8487_v54, %v17870_v9  ;;  %v8498_v47 = vrot.slane %v8486_v29, %v17870_v9  ;;  %v7832_v21 = vcombine.low %v18047_v37, %v17998_v18 }
 0x6cb   :  { %v7831_v19 = vcombine.low %v18044_v50, %v7821_v56  ;;  %v8533_v35 = vrot.slane %v8490_v34, %v17870_v9  ;;  %v8519_v27 = vrot.slane %v8489_v48, %v17870_v9  ;;  %v11913_v34 = vcombine.high %v18005_v1, %v18018_v62  ;;  %v12553_v62 = vld [vmem:[%s19050_s3 + $0xc8] sm:$0xff]  }
 0x6cc   :  { %v8595_v17 = vrot.slane %v11904_v33, %v17870_v9  ;;  %v11907_v49 = vcombine.high %v7832_v21, %v17901_v39  ;;  %v11915_v1 = vcombine.low %v7919_v12, %v17991_v58 }
 0x6cd   :  { %v6870_v6 = vpop.permute.xlu1 %6869  ;;  %v6866_v36 = vpop.permute.xlu0 %6865  ;;  %v12543_v20 = vld [vmem:[#allocation3 + $0xd8] ss:$8 sps:$4 sm:$0xff]   ;;  %v12545_v8 = vld [vmem:[#allocation3 + $0xdc] ss:$8 sps:$4 sm:$0x11]   ;;  %v8537_v46 = vcombine.low %v8512_v16, %v8533_v35  ;;  %v8535_v53 = vcombine.high %v8498_v47, %v8519_v27  ;;  %v8534_v26 = vcombine.low %v8498_v47, %v8519_v27  ;;  %v11909_v7 = vcombine.high %v17998_v18, %v7831_v19 }
 0x6ce   :  { %6892 = vst.msk [vmem:[#allocation3 + $0x140] sm:$0x1f] %vm6883_vm6, %v6870_v6  ;;  %7306 = vst.msk [vmem:[#allocation3 + $0x108] sm:$0x1f] %vm6883_vm6, %v6870_v6  ;;  %v8607_v45 = vcombine.high %v8581_v24, %v8595_v17  ;;  %v8606_v22 = vcombine.low %v8581_v24, %v8595_v17  ;;  %v18073_v32 = vrot.slane %v12543_v20, %v17870_v9 }
 0x6cf   :  { %6890 = vst.msk [vmem:[#allocation3 + $0xf0] sm:$0x1f] %vm6883_vm6, %v6866_v36  ;;  %v7964_v14 = vrot.slane %v12545_v8, %v17870_v9  ;;  %v8538_v44 = vcombine.high %v8512_v16, %v8533_v35  ;;  %v8691_v29 = vrot.slane %v11909_v7, %v17870_v9  ;;  %v18090_v36 = vrot.slane %v8080_v28, %v17870_v9  ;;  %v12552_v16 = vld [vmem:[%s19050_s3 + $0x80] sm:$0xff]  }
 0x6d0   :  { %v8650_v60 = vrot.slane %v8607_v45, %v17870_v9  ;;  %v8636_v11 = vrot.slane %v8606_v22, %v17870_v9  ;;  %v18105_v19 = vrot.slane %v7982_v4, %v17870_v9  ;;  %v18116_v20 = vrot.slane %v18009_v23, %v17870_v9  ;;  %v12554_v45 = vld [vmem:[%s19050_s3 + $0x88] sm:$0xff]  }
 0x6d1   :  { %v7075_v31 = vpop.permute.xlu1 %7074  ;;  %v7071_v56 = vpop.permute.xlu0 %7070  ;;  %v12540_v51 = vld [vmem:[#allocation3 + $0xc8] ss:$8 sps:$4 sm:$0xff]   ;;  %v12542_v41 = vld [vmem:[#allocation3 + $0xcc] ss:$8 sps:$4 sm:$0x11]   ;;  %v8677_v43 = vrot.slane %v11907_v49, %v17870_v9  ;;  %v8705_v23 = vrot.slane %v11911_v13, %v17870_v9  ;;  %v8719_v21 = vrot.slane %v11913_v34, %v17870_v9  ;;  %v7830_v13 = vcombine.high %v18037_v15, %v17901_v39 }
 0x6d2   :  { %7098 = vst.msk [vmem:[#allocation3 + $0xf8] sm:$0x1f] %vm6883_vm6, %v7075_v31  ;;  %7096 = vst.msk [vmem:[#allocation3 + $0xa8] sm:$0x1f] %vm6883_vm6, %v7071_v56  ;;  %v18081_v57 = vrot.slane %v12540_v51, %v17870_v9  ;;  %v8654_v38 = vcombine.low %v8629_v61, %v8650_v60  ;;  %v8651_v10 = vcombine.low %v8615_v59, %v8636_v11 }
 0x6d3   :  { %v8652_v6 = vcombine.high %v8615_v59, %v8636_v11  ;;  %v7950_v54 = vrot.slane %v12542_v41, %v17870_v9  ;;  %v8655_v17 = vcombine.high %v8629_v61, %v8650_v60  ;;  %v11921_v8 = vcombine.low %v18116_v20, %v18090_v36 }
 0x6d4   :  { %v7980_v52 = vcombine.high %v18081_v57, %v18073_v32  ;;  %v9200_v24 = vpack.c.bf16 %v8654_v38, %v8537_v46  ;;  %v9199_v48 = vpack.c.bf16 %v8651_v10, %v8534_v26  ;;  %v8722_v61 = vcombine.low %v8677_v43, %v8691_v29  ;;  %v18167_v38 = vld [vmem:[#allocation3 + $0x138] sm:$0x1f] }
 0x6d5   :  { %v7171_v3 = vpop.permute.xlu1 %7170  ;;  %v7981_v55 = vcombine.low %v7950_v54, %v7964_v14  ;;  %v18121_v63 = vpack.c.bf16 %v8655_v17, %v8538_v44  ;;  %v18123_v4 = vpack.c.bf16 %v8652_v6, %v8535_v53  ;;  %v7833_v56 = vcombine.high %v18047_v37, %v17998_v18  ;;  %v12556_v14 = vld [vmem:[%s19050_s3 + $0x90] sm:$0xff]  }
 0x6d6   :  { %7194 = vst.msk [vmem:[#allocation3 + $0x100] sm:$0x1f] %vm6883_vm6, %v7171_v3  ;;  %v7167_v33 = vpop.permute.xlu0 %7166  ;;  %v18099_v47 = vrot.slane %v7980_v52, %v17870_v9  ;;  %9560 = vmatprep.mubr.bf16.mxu1 %v9200_v24  ;;  %v8725_v59 = vcombine.low %v8705_v23, %v8719_v21  ;;  %v8794_v51 = vrot.slane %v11915_v1, %v17870_v9 }
 0x6d7   :  { %7192 = vst.msk [vmem:[#allocation3 + $0xb0] sm:$0x1f] %vm6883_vm6, %v7167_v33  ;;  %v18119_v27 = vrot.slane %v7981_v55, %v17870_v9  ;;  %9561 = vmatmul.mubr.bf16.vlgmr.msra.gmra.mrb[0].mxu1 %v9199_v48  ;;  %v8836_v15 = vrot.slane %v11921_v8, %v17870_v9  ;;  %v7979_v18 = vcombine.low %v18081_v57, %v18073_v32  ;;  %v12557_v32 = vld [vmem:[%s19050_s3 + $0xd8] sm:$0xff]  }
 0x6d8   :  { %v8028_v12 = vcombine.low %v18099_v47, %v18105_v19  ;;  %12141 = vmatpush3.bf16.msra.mxu1 %v12552_v16  ;;  %v11906_v49 = vcombine.low %v18047_v37, %v7830_v13  ;;  %v11908_v26 = vcombine.low %v7833_v56, %v18044_v50  ;;  %v8739_v10 = vrot.slane %v8722_v61, %v17870_v9  ;;  %v12558_v55 = vld [vmem:[%s19050_s3 + $0x98] sm:$0xff]  }
 0x6d9   :  { %v6872_v35 = vpop.permute.xlu1 %6871  ;;  %v8027_v28 = vcombine.low %v18119_v27, %v8017_v0  ;;  %v12547_v31 = vld [vmem:[#allocation3 + $0xf0] ss:$8 sps:$4 sm:$0xff]   ;;  %12142 = vmatprep.subr.bf16.mxu1 %v12553_v62  ;;  %v12533_v37 = vld [vmem:[#allocation3 + $0xa0] ss:$8 sps:$4 sm:$0xff]   ;;  %v8029_v50 = vcombine.high %v18099_v47, %v18105_v19  ;;  %v8760_v33 = vrot.slane %v8725_v59, %v17870_v9  ;;  %v7989_v34 = vrot.slane %v7979_v18, %v17870_v9 }
 0x6da   :  { %6893 = vst.msk [vmem:[#allocation3 + $0x168] sm:$0x1f] %vm6883_vm6, %v6872_v35  ;;  %7307 = vst.msk [vmem:[#allocation3 + $0x130] sm:$0x1f] %vm6883_vm6, %v6872_v35  ;;  %v11917_v46 = vcombine.high %v8028_v12, %v17991_v58  ;;  %v8041_v60 = vrot.slane %v12547_v31, %v17870_v9  ;;  %v8167_v1 = vrot.slane %v18167_v38, %v17870_v9  ;;  %v12578_v62 = vld [vmem:[%s19050_s3 + $0xe0] sm:$0xff]   ;;  %v12582_v59 = vld [vmem:[%s19050_s3 + $0xe8] sm:$0xff]  }
 0x6db   :  { %v11919_v53 = vcombine.high %v18105_v19, %v8027_v28  ;;  %v12535_v29 = vld [vmem:[#allocation3 + $0xa4] ss:$8 sps:$4 sm:$0x11]   ;;  %v8670_v19 = vrot.slane %v11906_v49, %v17870_v9  ;;  %v8684_v43 = vrot.slane %v11908_v26, %v17870_v9  ;;  %v18196_v23 = vcombine.low %v8739_v10, %v8760_v33 }
 0x6dc   :  { %v8808_v39 = vrot.slane %v11917_v46, %v17870_v9  ;;  %12143 = vmatpush3.bf16.msra.mxu1 %v12554_v45  ;;  %v7845_v28 = vrot.slane %v12533_v37, %v17870_v9  ;;  %v11918_v45 = vcombine.low %v8029_v50, %v18119_v27  ;;  %v8026_v56 = vcombine.high %v7989_v34, %v17991_v58  ;;  %v12579_v46 = vld [vmem:[%s19050_s3 + $0xa0] sm:$0xff]   ;;  %v12583_v49 = vld [vmem:[%s19050_s3 + $0xa8] sm:$0xff]   ;;  %v12584_v37 = vld [vmem:[%s19050_s3 + $0xf0] sm:$0xff]  }
 0x6dd   :  { %v12549_v0 = vld [vmem:[#allocation3 + $0x100] ss:$8 sps:$4 sm:$0xff]   ;;  %v8822_v41 = vrot.slane %v11919_v53, %v17870_v9  ;;  %12144 = vmatprep.subr.bf16.mxu1 %v12555_v42 }
 0x6de   :  { %v7291_v22 = vpop.permute.xlu0 %7290  ;;  %v8055_v11 = vrot.slane %v12549_v0, %v17870_v9  ;;  %v8839_v57 = vcombine.low %v8794_v51, %v8808_v39  ;;  %v8721_v51 = vcombine.high %v8670_v19, %v8684_v43  ;;  %v8178_v39 = vcombine.high %v8167_v1, %v8167_v1 }
 0x6df   :  { %7304 = vst.msk [vmem:[#allocation3 + $0xb8] sm:$0x1f] %vm6883_vm6, %v7291_v22  ;;  %v8842_v6 = vcombine.low %v8822_v41, %v8836_v15  ;;  %v7852_v22 = vrot.slane %v12535_v29, %v17870_v9  ;;  %v8720_v41 = vcombine.low %v8670_v19, %v8684_v43 }
 0x6e0   :  { %v8077_v44 = vcombine.low %v8041_v60, %v8055_v11  ;;  %v8078_v3 = vcombine.high %v8041_v60, %v8055_v11  ;;  %v8856_v52 = vrot.slane %v8839_v57, %v17870_v9  ;;  %12145 = vmatpush3.bf16.msra.mxu1 %v12556_v14  ;;  %v8815_v11 = vrot.slane %v11918_v45, %v17870_v9  ;;  %v18220_v14 = vld [vmem:[#allocation3 + $0x188] sm:$0x1f] }
 0x6e1   :  { %v8877_v16 = vrot.slane %v8842_v6, %v17870_v9  ;;  %12146 = vmatprep.subr.bf16.mxu1 %v12557_v32  ;;  %v11916_v57 = vcombine.low %v18099_v47, %v8026_v56  ;;  %v18236_v47 = vrot.slane %v8178_v39, %v17870_v9  ;;  %v18240_v29 = vrot.slane %v18220_v14, %v17870_v9  ;;  %v12586_v56 = vld [vmem:[%s19050_s3 + $0xf8] sm:$0xff]  }
 0x6e2   :  { %v18178_v24 = vrot.slane %v8077_v44, %v17870_v9  ;;  %v18181_v48 = vrot.slane %v8078_v3, %v17870_v9  ;;  %v12560_v44 = vld [vmem:[#allocation3 + $0x104] ss:$8 sps:$4 sm:$0x11]   ;;  %v18245_v19 = vrot.slane %v8721_v51, %v17870_v9 }
 0x6e3   :  { %v7081_v7 = vpop.permute.xlu1 %7080  ;;  %v18198_v21 = vcombine.low %v8856_v52, %v8877_v16  ;;  %v18233_v52 = vrot.slane %v8167_v1, %v17870_v9 }
 0x6e4   :  { %7101 = vst.msk [vmem:[#allocation3 + $0x170] sm:$0x1f] %vm6883_vm6, %v7081_v7  ;;  %v11920_v12 = vcombine.low %v18178_v24, %v18181_v48  ;;  %12147 = vmatpush3.bf16.msra.mxu1 %v12558_v55  ;;  %v12559_v7 = vld [vmem:[#allocation3 + $0xf4] ss:$8 sps:$4 sm:$0x11]  }
 0x6e5   :  { %v7077_v54 = vpop.permute.xlu0 %7076  ;;  %v9208_v42 = vpack.c.bf16 %v18198_v21, %v18196_v23  ;;  %12148 = vmatprep.subr.bf16.mxu1 %v12578_v62  ;;  %v8048_v43 = vrot.slane %v12559_v7, %v17870_v9 }
 0x6e6   :  { %7099 = vst.msk [vmem:[#allocation3 + $0x120] sm:$0x1f] %vm6883_vm6, %v7077_v54  ;;  %v12536_v17 = vld [vmem:[#allocation3 + $0xb0] ss:$8 sps:$4 sm:$0xff]   ;;  %v8829_v53 = vrot.slane %v11920_v12, %v17870_v9  ;;  %v8062_v12 = vrot.slane %v12560_v44, %v17870_v9 }
 0x6e7   :  { %v12538_v35 = vld [vmem:[#allocation3 + $0xb4] ss:$8 sps:$4 sm:$0x11]   ;;  %v7859_v31 = vrot.slane %v12536_v17, %v17870_v9 }
 0x6e8   :  { %v7866_v13 = vrot.slane %v12538_v35, %v17870_v9  ;;  %12149 = vmatpush3.bf16.msra.mxu1 %v12579_v46  ;;  %v8841_v6 = vcombine.high %v8815_v11, %v8829_v53  ;;  %v8840_v54 = vcombine.low %v8815_v11, %v8829_v53  ;;  %v8801_v35 = vrot.slane %v11916_v57, %v17870_v9 }
 0x6e9   :  { %v7177_v8 = vpop.permute.xlu1 %7176  ;;  %v7881_v27 = vcombine.low %v7845_v28, %v7859_v31  ;;  %v7882_v0 = vcombine.high %v7845_v28, %v7859_v31  ;;  %12150 = vmatprep.subr.bf16.mxu1 %v12582_v59  ;;  %v12585_v28 = vld [vmem:[%s19050_s3 + $0xb0] sm:$0xff]   ;;  %v8079_v7 = vcombine.low %v8048_v43, %v8062_v12 }
 0x6ea   :  { %7197 = vst.msk [vmem:[#allocation3 + $0x178] sm:$0x1f] %vm6883_vm6, %v7177_v8  ;;  %v7173_v61 = vpop.permute.xlu0 %7172  ;;  %v7883_v58 = vcombine.low %v7852_v22, %v7866_v13  ;;  %v18259_v45 = vrot.slane %v8841_v6, %v17870_v9  ;;  %v18262_v22 = vrot.slane %v8840_v54, %v17870_v9  ;;  %v18294_v6 = vld [vmem:[%s19050_s3 + $0x100] sm:$0xff]  }
 0x6eb   :  { %7195 = vst.msk [vmem:[#allocation3 + $0x128] sm:$0x1f] %vm6883_vm6, %v7173_v61  ;;  %v7891_v18 = vrot.slane %v7881_v27, %v17870_v9  ;;  %v7905_v60 = vrot.slane %v7882_v0, %v17870_v9 }
 0x6ec   :  { %v7898_v32 = vrot.slane %v7883_v58, %v17870_v9  ;;  %12151 = vmatpush3.bf16.msra.mxu1 %v12583_v49 }
 0x6ed   :  { %v7079_v15 = vpop.permute.xlu1 %7078  ;;  %v11910_v3 = vcombine.low %v7891_v18, %v7905_v60  ;;  %v11912_v10 = vcombine.high %v7891_v18, %v7905_v60  ;;  %v12561_v33 = vld [vmem:[#allocation3 + $0x118] ss:$8 sps:$4 sm:$0xff]   ;;  %v12563_v1 = vld [vmem:[#allocation3 + $0x11c] ss:$8 sps:$4 sm:$0x11]   ;;  %12152 = vmatprep.subr.bf16.mxu1 %v12584_v37 }
 0x6ee   :  { %7100 = vst.msk [vmem:[#allocation3 + $0x148] sm:$0x1f] %vm6883_vm6, %v7079_v15  ;;  %v11914_v50 = vcombine.low %v7898_v32, %v7989_v34  ;;  %v18248_v34 = vrot.slane %v8720_v41, %v17870_v9  ;;  %v8139_v53 = vrot.slane %v12561_v33, %v17870_v9  ;;  %v8146_v39 = vrot.slane %v12563_v1, %v17870_v9  ;;  %v12574_v18 = vld [vmem:[#allocation3 + $0x168] ss:$8 sps:$4 sm:$0xff]  }
 0x6ef   :  { %v8698_v16 = vrot.slane %v11910_v3, %v17870_v9  ;;  %v8712_v17 = vrot.slane %v11912_v10, %v17870_v9  ;;  %v12580_v1 = vld [vmem:[#allocation3 + $0x16c] ss:$8 sps:$4 sm:$0x11]  }
 0x6f0   :  { %v7295_v26 = vpop.permute.xlu0 %7294  ;;  %v8787_v62 = vrot.slane %v11914_v50, %v17870_v9  ;;  %12153 = vmatpush3.bf16.msra.mxu1 %v12585_v28 }
 0x6f1   :  { %7309 = vst.msk [vmem:[#allocation3 + $0x180] sm:$0x1f] %vm6883_vm6, %v7295_v26  ;;  %v8724_v31 = vcombine.high %v8698_v16, %v8712_v17  ;;  %v8723_v61 = vcombine.low %v8698_v16, %v8712_v17  ;;  %v12587_v26 = vld [vmem:[%s19050_s3 + $0xb8] sm:$0xff]   ;;  %12154 = vmatprep.subr.bf16.mxu1 %v12586_v56  ;;  %v8335_v16 = vrot.slane %v12574_v18, %v17870_v9 }
 0x6f2   :  { %v7293_v55 = vpop.permute.xlu1 %7292  ;;  %v12564_v8 = vld [vmem:[#allocation3 + $0x128] ss:$8 sps:$4 sm:$0xff]   ;;  %v12566_v13 = vld [vmem:[#allocation3 + $0x12c] ss:$8 sps:$4 sm:$0x11]   ;;  %v8838_v27 = vcombine.high %v8787_v62, %v8801_v35  ;;  %v8837_v0 = vcombine.low %v8787_v62, %v8801_v35  ;;  %v8094_v56 = vrot.slane %v8079_v7, %v17870_v9  ;;  %v8342_v18 = vrot.slane %v12580_v1, %v17870_v9 }
 0x6f3   :  { %7308 = vst.msk [vmem:[#allocation3 + $0x158] sm:$0x1f] %vm6883_vm6, %v7293_v55  ;;  %v8153_v59 = vrot.slane %v12564_v8, %v17870_v9  ;;  %v18271_v58 = vrot.slane %v8724_v31, %v17870_v9  ;;  %v18274_v51 = vrot.slane %v8723_v61, %v17870_v9  ;;  %v8160_v15 = vrot.slane %v12566_v13, %v17870_v9 }
 0x6f4   :  { %v18279_v60 = vrot.slane %v8838_v27, %v17870_v9  ;;  %v18282_v11 = vrot.slane %v8837_v0, %v17870_v9  ;;  %12155 = vmatpush3.bf16.msra.mxu1 %v12587_v26  ;;  %v18317_v27 = vrot.slane %v18240_v29, %v17870_v9 }
 0x6f5   :  { %v8175_v41 = vcombine.low %v8139_v53, %v8153_v59  ;;  %v8176_v49 = vcombine.high %v8139_v53, %v8153_v59  ;;  %v8771_v32 = vcombine.low %v18245_v19, %v18271_v58  ;;  %v8768_v57 = vcombine.low %v18248_v34, %v18274_v51  ;;  %v12568_v8 = vld [vmem:[#allocation3 + $0x140] ss:$8 sps:$4 sm:$0xff]   ;;  %v12570_v28 = vld [vmem:[#allocation3 + $0x144] ss:$8 sps:$4 sm:$0x11]   ;;  %12390 = vmatprep.subr.bf16.mxu1 %v18294_v6 }
 0x6f6   :  { %v7175_v46 = vpop.permute.xlu0 %7174  ;;  %v8177_v44 = vcombine.low %v8146_v39, %v8160_v15  ;;  %v8888_v54 = vcombine.low %v18279_v60, %v18259_v45  ;;  %v8885_v37 = vcombine.low %v18282_v11, %v18262_v22  ;;  %v11922_v15 = vcombine.high %v18178_v24, %v18181_v48 }
 0x6f7   :  { %7196 = vst.msk [vmem:[#allocation3 + $0x150] sm:$0x1f] %vm6883_vm6, %v7175_v46  ;;  %v8185_v50 = vrot.slane %v8175_v41, %v17870_v9  ;;  %v18302_v33 = vrot.slane %v8176_v49, %v17870_v9  ;;  %v8374_v41 = vcombine.high %v18240_v29, %v18240_v29  ;;  %v8237_v49 = vrot.slane %v12568_v8, %v17870_v9 }
 0x6f8   :  { %v12576_v3 = vld [vmem:[#allocation3 + $0x178] ss:$8 sps:$4 sm:$0xff]   ;;  %v12581_v10 = vld [vmem:[#allocation3 + $0x17c] ss:$8 sps:$4 sm:$0x11]   ;;  %v18305_v55 = vrot.slane %v8177_v44, %v17870_v9  ;;  %v9205_v62 = vpack.c.bf16 %v8888_v54, %v8771_v32  ;;  %v9204_v35 = vpack.c.bf16 %v8885_v37, %v8768_v57  ;;  %v8244_v26 = vrot.slane %v12570_v28, %v17870_v9 }
 0x6f9   :  { %v8349_v17 = vrot.slane %v12576_v3, %v17870_v9  ;;  %v8222_v43 = vcombine.high %v8185_v50, %v18233_v52  ;;  %v8225_v12 = vcombine.high %v18302_v33, %v18236_v47  ;;  %v8356_v13 = vrot.slane %v12581_v10, %v17870_v9 }
 0x6fa   :  { %9568 = vmatprep.mubr.bf16.mxu1 %v9205_v62  ;;  %v11924_v57 = vcombine.low %v8094_v56, %v8185_v50  ;;  %v8904_v8 = vrot.slane %v11922_v15, %v17870_v9 }
 0x6fb   :  { %v8371_v31 = vcombine.low %v8335_v16, %v8349_v17  ;;  %v8372_v61 = vcombine.high %v8335_v16, %v8349_v17  ;;  %v11926_v0 = vcombine.low %v18302_v33, %v8222_v43  ;;  %v11928_v53 = vcombine.low %v8225_v12, %v18305_v55  ;;  %9569 = vmatmul.mubr.bf16.gmra.mrb[4].mxu1 %v9204_v35 }
 0x6fc   :  { %v8373_v24 = vcombine.low %v8342_v18, %v8356_v13  ;;  %v18338_v16 = vrot.slane %v8374_v41, %v17870_v9  ;;  %v8918_v1 = vrot.slane %v11924_v57, %v17870_v9 }
 0x6fd   :  { %v8381_v39 = vrot.slane %v8371_v31, %v17870_v9  ;;  %v18332_v44 = vrot.slane %v8372_v61, %v17870_v9  ;;  %v8932_v54 = vrot.slane %v11926_v0, %v17870_v9  ;;  %v8946_v29 = vrot.slane %v11928_v53, %v17870_v9 }
 0x6fe   :  { %v12571_v46 = vld [vmem:[#allocation3 + $0x150] ss:$8 sps:$4 sm:$0xff]   ;;  %v12573_v59 = vld [vmem:[#allocation3 + $0x154] ss:$8 sps:$4 sm:$0x11]   ;;  %v18346_v43 = vrot.slane %v8373_v24, %v17870_v9  ;;  %v8955_v0 = vcombine.high %v8904_v8, %v8918_v1 }
 0x6ff   :  { %v8251_v32 = vrot.slane %v12571_v46, %v17870_v9  ;;  %v8258_v7 = vrot.slane %v12573_v59, %v17870_v9  ;;  %v8418_v3 = vcombine.high %v8381_v39, %v18317_v27  ;;  %v8421_v12 = vcombine.high %v18332_v44, %v18338_v16 }
 0x700   :  { %v8958_v28 = vcombine.high %v8932_v54, %v8946_v29  ;;  %v8957_v56 = vcombine.low %v8932_v54, %v8946_v29 }
 0x701   :  { %v8273_v48 = vcombine.low %v8237_v49, %v8251_v32  ;;  %v8274_v10 = vcombine.high %v8237_v49, %v8251_v32  ;;  %v8275_v37 = vcombine.low %v8244_v26, %v8258_v7  ;;  %v11936_v35 = vcombine.low %v18332_v44, %v8418_v3 }
 0x702   :  { %v11938_v46 = vcombine.low %v8421_v12, %v18346_v43  ;;  %v8954_v49 = vcombine.low %v8904_v8, %v8918_v1  ;;  %v9001_v15 = vrot.slane %v8958_v28, %v17870_v9  ;;  %v18359_v7 = vrot.slane %v8957_v56, %v17870_v9 }
 0x703   :  { %v8283_v50 = vrot.slane %v8273_v48, %v17870_v9  ;;  %v8297_v17 = vrot.slane %v8274_v10, %v17870_v9  ;;  %v8290_v62 = vrot.slane %v8275_v37, %v17870_v9  ;;  %v9063_v41 = vrot.slane %v11936_v35, %v17870_v9 }
 0x704   :  { %v9132_v26 = vrot.slane %v11938_v46, %v17870_v9  ;;  %v8980_v48 = vrot.slane %v8955_v0, %v17870_v9  ;;  %v18368_v37 = vrot.slane %v8954_v49, %v17870_v9  ;;  %v8772_v56 = vcombine.high %v18245_v19, %v18271_v58  ;;  %v7386_v0 = vld [vmem:[#allocation3 + $0x160] sm:$0x1f] }
 0x705   :  { %v11930_v31 = vcombine.low %v8283_v50, %v8297_v17  ;;  %v11932_v61 = vcombine.high %v8283_v50, %v8297_v17  ;;  %v11934_v13 = vcombine.low %v8290_v62, %v8381_v39  ;;  %v8889_v46 = vcombine.high %v18279_v60, %v18259_v45 }
 0x706   :  { %v9140_v24 = vcombine.high %v9132_v26, %v9132_v26  ;;  %v9005_v17 = vcombine.low %v8980_v48, %v9001_v15  ;;  %v9002_v62 = vcombine.low %v18368_v37, %v18359_v7  ;;  %v8769_v19 = vcombine.high %v18248_v34, %v18274_v51  ;;  %v12591_v34 = vld [vmem:[%s19050_s3 + $0x118] sm:$0xff]  }
 0x707   :  { %v9021_v53 = vrot.slane %v11930_v31, %v17870_v9  ;;  %v9035_v59 = vrot.slane %v11932_v61, %v17870_v9  ;;  %v9049_v18 = vrot.slane %v11934_v13, %v17870_v9  ;;  %v18379_v61 = vrot.slane %v9132_v26, %v17870_v9 }
 0x708   :  { %v9161_v12 = vrot.slane %v9140_v24, %v17870_v9  ;;  %v8886_v45 = vcombine.high %v18282_v11, %v18262_v22  ;;  %v8034_v60 = vcombine.high %v17979_v25, %v17979_v25  ;;  %v9006_v49 = vcombine.high %v8980_v48, %v9001_v15 }
 0x709   :  { %v9072_v32 = vcombine.high %v9021_v53, %v9035_v59  ;;  %v9071_v57 = vcombine.low %v9021_v53, %v9035_v59  ;;  %v9075_v39 = vcombine.high %v9049_v18, %v9063_v41  ;;  %v9074_v3 = vcombine.low %v9049_v18, %v9063_v41  ;;  %v12589_v53 = vld [vmem:[%s19050_s3 + $0x108] sm:$0xff]  }
 0x70a   :  { %v9215_v31 = vpack.c.bf16 %v9161_v12, %v9161_v12  ;;  %v9214_v13 = vpack.c.bf16 %v18379_v61, %v18379_v61  ;;  %v8132_v59 = vcombine.high %v18167_v38, %v18167_v38  ;;  %v9207_v18 = vpack.c.bf16 %v8889_v46, %v8772_v56  ;;  %v12590_v38 = vld [vmem:[%s19050_s3 + $0x110] sm:$0xff]  }
 0x70b   :  { %v9097_v10 = vrot.slane %v9072_v32, %v17870_v9  ;;  %v18364_v54 = vrot.slane %v9071_v57, %v17870_v9  ;;  %v9118_v29 = vrot.slane %v9075_v39, %v17870_v9  ;;  %v18371_v50 = vrot.slane %v9074_v3, %v17870_v9 }
 0x70c   :  { %v8230_v41 = vcombine.high %v7386_v0, %v7386_v0  ;;  %v8174_v58 = vrot.slane %v8132_v59, %v17870_v9  ;;  %v9206_v32 = vpack.c.bf16 %v8886_v45, %v8769_v19  ;;  %v8076_v11 = vrot.slane %v8034_v60, %v17870_v9 }
 0x70d   :  { %v9122_v1 = vcombine.low %v9097_v10, %v9118_v29  ;;  %v9119_v35 = vcombine.low %v18364_v54, %v18371_v50  ;;  %v8420_v57 = vcombine.low %v18332_v44, %v18338_v16  ;;  %v8224_v39 = vcombine.low %v18302_v33, %v18236_v47 }
 0x70e   :  { %v8213_v22 = vrot.slane %v8174_v58, %v17870_v9  ;;  %v9120_v24 = vcombine.high %v18364_v54, %v18371_v50  ;;  %v9163_v48 = vcombine.high %v9161_v12, %v9161_v12  ;;  %v8328_v33 = vcombine.high %v18220_v14, %v18220_v14 }
 0x70f   :  { %v9210_v8 = vpack.c.bf16 %v9122_v1, %v9005_v17  ;;  %v9209_v28 = vpack.c.bf16 %v9119_v35, %v9002_v62  ;;  %v11927_v1 = vcombine.high %v8224_v39, %v18233_v52 }
 0x710   :  { %v8223_v15 = vcombine.low %v18305_v55, %v8213_v22  ;;  %v9003_v55 = vcombine.high %v18368_v37, %v18359_v7  ;;  %v9217_v12 = vpack.c.bf16 %v9163_v48, %v9163_v48  ;;  %v8370_v14 = vrot.slane %v8328_v33, %v17870_v9 }
 0x711   :  { %9576 = vmatprep.mubr.bf16.mxu1 %v9210_v8  ;;  %v11923_v8 = vcombine.high %v18116_v20, %v18090_v36  ;;  %v8939_v37 = vrot.slane %v11927_v1, %v17870_v9  ;;  %v9162_v36 = vcombine.high %v18379_v61, %v18379_v61 }
 0x712   :  { %9577 = vmatmul.mubr.bf16.gmra.mrb[8].mxu1 %v9209_v28  ;;  %v11929_v54 = vcombine.high %v18236_v47, %v8223_v15  ;;  %v9211_v35 = vpack.c.bf16 %v9120_v24, %v9003_v55  ;;  %v8409_v46 = vrot.slane %v8370_v14, %v17870_v9  ;;  %v11940_v55 = vld [vmem:[%s19051_s4] ss:$0 sm:$0xff] }
 0x713   :  { %9584 = vmatprep.mubr.bf16.mxu1 %v9215_v31  ;;  %v8911_v20 = vrot.slane %v11923_v8, %v17870_v9  ;;  %v9216_v59 = vpack.c.bf16 %v9162_v36, %v9162_v36 }
 0x714   :  { %v8953_v47 = vrot.slane %v11929_v54, %v17870_v9 }
 0x71a   :  { %9585 = vmatmul.mubr.bf16.gmra.mrb[12].mxu1 %v9214_v13 }
 0x71b   :  { %9624 = vmatprep.mubr.bf16.mxu1 %v18121_v63  ;;  %v8265_v63 = vrot.slane %v7386_v0, %v17870_v9  ;;  %v8959_v0 = vcombine.low %v8939_v37, %v8953_v47 }
 0x71d   :  { %v8276_v26 = vcombine.high %v8265_v63, %v8265_v63  ;;  %v8304_v44 = vrot.slane %v8265_v63, %v17870_v9  ;;  %v8994_v61 = vrot.slane %v8959_v0, %v17870_v9 }
 0x71f   :  { %v8318_v3 = vrot.slane %v8276_v26, %v17870_v9 }
 0x721   :  { %v11931_v50 = vcombine.low %v8304_v44, %v8318_v3  ;;  %v11933_v62 = vcombine.high %v8304_v44, %v8318_v3 }
 0x722   :  { %9625 = vmatmul.mubr.bf16.vlgmr.msra.gmra.mrb[16].mxu1 %v18123_v4  ;;  %v9123_v4 = vcombine.high %v9097_v10, %v9118_v29  ;;  %v8115_v10 = vrot.slane %v8076_v11, %v17870_v9  ;;  %v11937_v29 = vcombine.high %v8420_v57, %v18317_v27 }
 0x723   :  { %12391 = vmatpush3.bf16.msra.mxu1 %v18294_v6  ;;  %9632 = vmatprep.mubr.bf16.mxu1 %v9207_v18  ;;  %v8272_v6 = vrot.slane %v8230_v41, %v17870_v9  ;;  %v9028_v31 = vrot.slane %v11931_v50, %v17870_v9  ;;  %v9042_v13 = vrot.slane %v11933_v62, %v17870_v9 }
 0x724   :  { %12392 = vmatprep.subr.bf16.mxu1 %v12589_v53  ;;  %v9212_v51 = vpack.c.bf16 %v9123_v4, %v9006_v49  ;;  %v11925_v28 = vcombine.low %v8115_v10, %v18233_v52  ;;  %v9070_v7 = vrot.slane %v11937_v29, %v17870_v9  ;;  %v8419_v18 = vcombine.low %v18346_v43, %v8409_v46 }
 0x725   :  { %v8311_v25 = vrot.slane %v8272_v6, %v17870_v9  ;;  %v19929_v46 = vmov 0.0  }
 0x726   :  { %v8925_v52 = vrot.slane %v11925_v28, %v17870_v9  ;;  %v11939_v45 = vcombine.high %v18338_v16, %v8419_v18  ;;  %10119 = vst.msk [vmem:[#allocation5 + $0x14] sm:$0xf] %vm10113_vm0, %v19929_v46  ;;  %10120 = vst.msk [vmem:[#allocation5 + $0x18] sm:$0xf] %vm10113_vm0, %v19929_v46 }
 0x727   :  { %12393 = vmatpush3.bf16.msra.mxu1 %v12589_v53  ;;  %v11935_v17 = vcombine.low %v8311_v25, %v18317_v27  ;;  %v9073_v53 = vcombine.low %v9028_v31, %v9042_v13  ;;  %10114 = vst.msk [vmem:[#allocation5] sm:$0xf] %vm10113_vm0, %v19929_v46  ;;  %10115 = vst.msk [vmem:[#allocation5 + $0x4] sm:$0xf] %vm10113_vm0, %v19929_v46 }
 0x728   :  { %12394 = vmatprep.subr.bf16.mxu1 %v12590_v38  ;;  %v8956_v41 = vcombine.low %v8911_v20, %v8925_v52  ;;  %v9139_v43 = vrot.slane %v11939_v45, %v17870_v9  ;;  %10116 = vst.msk [vmem:[#allocation5 + $0x8] sm:$0xf] %vm10113_vm0, %v19929_v46  ;;  %10117 = vst.msk [vmem:[#allocation5 + $0xc] sm:$0xf] %vm10113_vm0, %v19929_v46 }
 0x729   :  { %v9056_v27 = vrot.slane %v11935_v17, %v17870_v9  ;;  %v9090_v19 = vrot.slane %v9073_v53, %v17870_v9  ;;  %10118 = vst.msk [vmem:[#allocation5 + $0x10] sm:$0xf] %vm10113_vm0, %v19929_v46  ;;  %10121 = vst.msk [vmem:[#allocation5 + $0x1c] sm:$0xf] %vm10113_vm0, %v19929_v46 }
 0x72a   :  { %9633 = vmatmul.mubr.bf16.gmra.mrb[20].mxu1 %v9206_v32  ;;  %v9154_v5 = vrot.slane %v9139_v43, %v17870_v9  ;;  %v19930_v43 = vld [vmem:[#allocation10_spill] sm:$0xff] }
 0x72b   :  { %9640 = vmatprep.mubr.bf16.mxu1 %v9212_v51  ;;  %12395 = vmatpush3.bf16.msra.mxu1 %v12590_v38  ;;  %v9076_v56 = vcombine.low %v9056_v27, %v9070_v7  ;;  %v8973_v38 = vrot.slane %v8956_v41, %v17870_v9 }
 0x72c   :  { %12396 = vmatprep.subr.bf16.mxu1 %v12591_v34  ;;  %v9218_v30 = vpack.c.bf16 %v9154_v5, %v9154_v5 }
 0x72d   :  { %v9111_v63 = vrot.slane %v9076_v56, %v17870_v9  ;;  %v9004_v4 = vcombine.low %v8973_v38, %v8994_v61 }
 0x72e   :  { %v10199_v38 = vld [vmem:[#allocation5] sm:$0xf] }
 0x72f   :  { %12397 = vmatpush3.bf16.msra.mxu1 %v12591_v34  ;;  %v9121_v58 = vcombine.low %v9090_v19, %v9111_v63  ;;  %10207 = vst.msk [vmem:[#allocation4] sm:$0x3] %vm9731_vm1, %v10199_v38 }
 0x731   :  { %v9213_v60 = vpack.c.bf16 %v9121_v58, %v9004_v4  ;;  %v10202_v58 = vld [vmem:[#allocation5 + $0xc] sm:$0xf] }
 0x732   :  { %9641 = vmatmul.mubr.bf16.gmra.mrb[24].mxu1 %v9211_v35  ;;  %v10371_v5 = vrot.slane %v10202_v58, %v19930_v43  ;;  %10360 = vst.msk [vmem:[#allocation4 + $0x10] sm:$0x3] %vm9731_vm1, %v10202_v58 }
 0x733   :  { %9648 = vmatprep.mubr.bf16.mxu1 %v9217_v12 }
 0x73a   :  { %9649 = vmatmul.mubr.bf16.gmra.mrb[28].mxu1 %v9216_v59 }
 0x73b   :  { %12398 = vmatprep.mubr.msk.bf16.mxu1 %vm4310_vm4, %v9203_v40 }
 0x742   :  { %12399 = vmatmul.mubr.msk.bf16.vlgmr.msra.gmra.mrb[32].mxu1 %vm4310_vm4, %v9208_v42 }
 0x743   :  { %12402 = vmatprep.mubr.msk.bf16.mxu1 %vm4310_vm4, %v9213_v60  ;;  %v10221_v60 = vrot.slane %v10199_v38, %v19930_v43 }
 0x74a   :  { %12403 = vmatmul.mubr.msk.bf16.gmra.mrb[36].mxu1 %vm4310_vm4, %v9218_v30  ;;  %v10203_v30 = vld [vmem:[#allocation5 + $0x10] sm:$0xf] }
 0x74b   :  { %10209 = vst.msk [vmem:[#allocation4 + $0x14] sm:$0x3] %vm9731_vm1, %v10203_v30 }
 0x7aa   :  { %v12116_v40 = vpop.f32.mrb[0].mxu1 }
 0x7ab   :  { %v12117_v16 = vpop.f32.mrb[1].mxu1 }
 0x7ac   :  { %v12118_v6 = vadd.f32 %v12117_v16, %v12116_v40  ;;  %v12119_v49 = vpop.f32.mrb[2].mxu1 }
 0x7ad   :  { %v12120_v26 = vpop.f32.mrb[3].mxu1 }
 0x7ae   :  { %v12121_v32 = vadd.f32 %v12120_v26, %v12119_v49  ;;  %v9563_v1 = vadd.f32 %v12118_v6, %v11940_v55  ;;  %v10237_v6 = vrot.slane %v10203_v30, %v19930_v43 }
 0x7b0   :  { %v9566_v35 = vadd.f32 %v12121_v32, %v11940_v55  ;;  %v10222_v32 = vcombine.high %v10221_v60, %v10221_v60 }
 0x7b2   :  { %10289 = vst.msk [vmem:[#allocation4 + $0x2] sm:$0x3] %vm9731_vm1, %v10222_v32 }
 0x7ce   :  { %v12122_v34 = vpop.f32.mrb[4].mxu1 }
 0x7cf   :  { %v12123_v22 = vpop.f32.mrb[5].mxu1 }
 0x7d0   :  { %v12124_v51 = vadd.f32 %v12123_v22, %v12122_v34  ;;  %v12125_v11 = vpop.f32.mrb[6].mxu1  ;;  %v11981_v34 = vrot.slane %v10221_v60, 9  ;;  %v10372_v22 = vcombine.high %v10371_v5, %v10371_v5 }
 0x7d1   :  { %v12126_v23 = vpop.f32.mrb[7].mxu1 }
 0x7d2   :  { %v12127_v21 = vadd.f32 %v12126_v23, %v12125_v11  ;;  %v9571_v14 = vadd.f32 %v12124_v51, %v11940_v55  ;;  %v11987_v23 = vrot.slane %v10371_v5, 9  ;;  %10410 = vst.msk [vmem:[#allocation4 + $0x12] sm:$0x3] %vm9731_vm1, %v10372_v22  ;;  %v12662_v11 = vld [vmem:[%s19054_s7 + $0xe0] sm:$0xff]  }
 0x7d4   :  { %v9574_v13 = vadd.f32 %v12127_v21, %v11940_v55  ;;  %v10238_v21 = vcombine.high %v10237_v6, %v10237_v6 }
 0x7d6   :  { %10291 = vst.msk [vmem:[#allocation4 + $0x16] sm:$0x3] %vm9731_vm1, %v10238_v21 }
 0x7e5   :  { %v12128_v42 = vpop.f32.mrb[8].mxu1 }
 0x7e6   :  { %v12129_v57 = vpop.f32.mrb[9].mxu1 }
 0x7e7   :  { %v12130_v25 = vadd.f32 %v12129_v57, %v12128_v42  ;;  %v12131_v15 = vpop.f32.mrb[10].mxu1  ;;  %v10254_v57 = vrot.slane %v10222_v32, 7 }
 0x7e8   :  { %v12132_v39 = vpop.f32.mrb[11].mxu1 }
 0x7e9   :  { %v12133_v3 = vadd.f32 %v12132_v39, %v12131_v15  ;;  %v9579_v53 = vadd.f32 %v12130_v25, %v11940_v55  ;;  %v10383_v25 = vrot.slane %v10372_v22, 7  ;;  %v11983_v15 = vrot.slane %v10237_v6, 9 }
 0x7ea   :  { %v10262_v39 = vrot.slane %v10238_v21, 7 }
 0x7eb   :  { %v9582_v63 = vadd.f32 %v12133_v3, %v11940_v55  ;;  %v10255_v3 = vsel %vm18492_vm11, %v11981_v34, %v10254_v57 }
 0x7ec   :  { %10268 = vrot.lane.b32.xlu0 %v10255_v3, %s12726_s2 }
 0x7ed   :  { %v12134_v24 = vpop.f32.mrb[12].mxu1 }
 0x7ee   :  { %v12135_v48 = vpop.f32.mrb[13].mxu1 }
 0x7ef   :  { %v12136_v10 = vadd.f32 %v12135_v48, %v12134_v24  ;;  %v12137_v44 = vpop.f32.mrb[14].mxu1  ;;  %v10384_v24 = vsel %vm18492_vm11, %v11987_v23, %v10383_v25 }
 0x7f0   :  { %v12138_v29 = vpop.f32.mrb[15].mxu1  ;;  %10391 = vrot.lane.b32.xlu1 %v10384_v24, %s12726_s2 }
 0x7f1   :  { %v9587_v40 = vadd.f32 %v12136_v10, %v11940_v55  ;;  %v10263_v10 = vsel %vm18492_vm11, %v11983_v15, %v10262_v39 }
 0x7f2   :  { %10272 = vrot.lane.b32.xlu0 %v10263_v10, %s12726_s2 }
 0x7f5   :  { %v12156_v17 = vpop.f32.mrb[16].mxu1 }
 0x7f6   :  { %v12157_v33 = vpop.f32.mrb[17].mxu1 }
 0x7f7   :  { %v12158_v54 = vadd.f32 %v12157_v33, %v12156_v17  ;;  %v12159_v50 = vpop.f32.mrb[18].mxu1 }
 0x7f8   :  { %v12160_v62 = vpop.f32.mrb[19].mxu1 }
 0x7f9   :  { %v12161_v12 = vadd.f32 %v12160_v62, %v12159_v50  ;;  %v18467_v8 = vadd.f32 %v12158_v54, %v9563_v1 }
 0x7fb   :  { %v18469_v28 = vadd.f32 %v12161_v12, %v9566_v35 }
 0x7fd   :  { %v12162_v7 = vpop.f32.mrb[20].mxu1 }
 0x7fe   :  { %v12163_v27 = vpop.f32.mrb[21].mxu1 }
 0x7ff   :  { %v12164_v37 = vadd.f32 %v12163_v27, %v12162_v7  ;;  %v12165_v47 = vpop.f32.mrb[22].mxu1 }
 0x800   :  { %v12166_v31 = vpop.f32.mrb[23].mxu1 }
 0x801   :  { %v12167_v36 = vadd.f32 %v12166_v31, %v12165_v47  ;;  %v9635_v20 = vadd.f32 %v12164_v37, %v9571_v14 }
 0x803   :  { %v18471_v52 = vadd.f32 %v12167_v36, %v9574_v13 }
 0x805   :  { %v12168_v56 = vpop.f32.mrb[24].mxu1 }
 0x806   :  { %v12169_v0 = vpop.f32.mrb[25].mxu1 }
 0x807   :  { %v12170_v59 = vadd.f32 %v12169_v0, %v12168_v56  ;;  %v12171_v18 = vpop.f32.mrb[26].mxu1 }
 0x808   :  { %v12172_v41 = vpop.f32.mrb[27].mxu1 }
 0x809   :  { %v12173_v61 = vadd.f32 %v12172_v41, %v12171_v18  ;;  %v9643_v19 = vadd.f32 %v12170_v59, %v9579_v53 }
 0x80b   :  { %v18481_v45 = vadd.f32 %v12173_v61, %v9582_v63  ;;  %v10206_v63 = vld [vmem:[#allocation5 + $0x1c] sm:$0xf] }
 0x80c   :  { %v10379_v61 = vrot.slane %v10206_v63, %v19930_v43  ;;  %10362 = vst.msk [vmem:[#allocation4 + $0x24] sm:$0x3] %vm9731_vm1, %v10206_v63 }
 0x80d   :  { %v12174_v4 = vpop.f32.mrb[28].mxu1 }
 0x80e   :  { %v12175_v16 = vpop.f32.mrb[29].mxu1  ;;  %v10380_v38 = vcombine.high %v10379_v61, %v10379_v61  ;;  %v11988_v58 = vrot.slane %v10379_v61, 9 }
 0x80f   :  { %v12176_v49 = vadd.f32 %v12175_v16, %v12174_v4  ;;  %v12177_v26 = vpop.f32.mrb[30].mxu1 }
 0x810   :  { %v12178_v51 = vpop.f32.mrb[31].mxu1  ;;  %v10387_v4 = vrot.slane %v10380_v38, 7  ;;  %10412 = vst.msk [vmem:[#allocation4 + $0x26] sm:$0x3] %vm9731_vm1, %v10380_v38 }
 0x811   :  { %v9651_v42 = vadd.f32 %v12176_v49, %v9587_v40 }
 0x812   :  { %v18542_v5 = vsel %vm18492_vm11, %v11988_v58, %v10387_v4 }
 0x815   :  { %v12400_v48 = vpop.f32.mrb[32].mxu1 }
 0x816   :  { %v18507_v44 = vadd.f32 %v12400_v48, %v9635_v20  ;;  %v9690_v29 = vpop.f32.mrb[33].mxu1 }
 0x817   :  { %v18510_v55 = vadd.f32 %v9690_v29, %v18467_v8  ;;  %v12401_v17 = vpop.f32.mrb[34].mxu1 }
 0x818   :  { %v18513_v33 = vadd.f32 %v12401_v17, %v18471_v52  ;;  %v9693_v1 = vpop.f32.mrb[35].mxu1  ;;  %v9723_v12 = vsel %vm4310_vm4, %v18507_v44, 0.0 }
 0x819   :  { %v18517_v54 = vadd.f32 %v9693_v1, %v18469_v28  ;;  %v9720_v50 = vsel %vm4310_vm4, %v18510_v55, 0.0 }
 0x81a   :  { %v9725_v37 = vsel %vm4310_vm4, %v18513_v33, 0.0 }
 0x81b   :  { %v9721_v62 = vsel %vm4310_vm4, %v18517_v54, 0.0 }
 0x81c   :  { %v9722_v35 = vadd.f32 %v9721_v62, %v9720_v50 }
 0x81d   :  { %v12404_v8 = vpop.f32.mrb[36].mxu1 }
 0x81e   :  { %v9724_v7 = vadd.f32 %v9723_v12, %v9722_v35  ;;  %v9715_v27 = vadd.f32 %v12404_v8, %v9651_v42  ;;  %v9706_v14 = vpop.f32.mrb[37].mxu1 }
 0x81f   :  { %v18527_v47 = vadd.f32 %v9706_v14, %v9643_v19  ;;  %v12405_v28 = vpop.f32.mrb[38].mxu1 }
 0x820   :  { %v9726_v31 = vadd.f32 %v9725_v37, %v9724_v7  ;;  %v9709_v13 = vpop.f32.mrb[39].mxu1  ;;  %v9732_v53 = vsel %vm9731_vm1, %v9715_v27, 0.0 }
 0x821   :  { %v9727_v36 = vsel %vm4310_vm4, %v18527_v47, 0.0  ;;  %v18532_v20 = vadd.f32 %v9709_v13, %v18481_v45 }
 0x822   :  { %v9728_v52 = vadd.f32 %v9727_v36, %v9726_v31 }
 0x823   :  { %v9729_v56 = vsel %vm4310_vm4, %v18532_v20, 0.0 }
 0x824   :  { %v9730_v0 = vadd.f32 %v9729_v56, %v9728_v52  ;;  %v9292_v52 = vld [vmem:[%s19051_s4 + $0x1] sm:$0x1] }
 0x826   :  { %v9733_v59 = vadd.f32 %v9732_v53, %v9730_v0  ;;  %v9293_v53 = vld [vmem:[%s19051_s4 + $0x2] sm:$0x1]  ;;  %s11753_s4 = sshll.u32 %s12728_s18, 4  ;;  %s11754_s4 = int_to_ptr.vmem [resolvable:$true] %s11753_s4 }
 0x827   :  { %p12695_p1 = scmp.lt.s32.totalorder %s11754_s4, %s11754_s4 }
 0x828   :  { %v9734_v18 = vrot.slane %v9733_v59, 4 }
 0x82a   :  { %v9735_v41 = vadd.f32 %v9734_v18, %v9733_v59 }
 0x82c   :  { %v9736_v19 = vrot.slane %v9735_v41, 2 }
 0x82e   :  { %v9737_v45 = vadd.f32 %v9736_v19, %v9735_v41 }
 0x830   :  { %v9738_v60 = vrot.slane %v9737_v45, 1 }
 0x832   :  { %v9739_v30 = vadd.f32 %v9738_v60, %v9737_v45 }
 0x834   :  { %v9741_v40 = vmul.f32 0.02, %v9739_v30 }
 0x836   :  { %v9742_v16 = vsub.f32 %v18510_v55, %v9741_v40  ;;  %v9743_v6 = vsub.f32 %v18517_v54, %v9741_v40  ;;  %v9744_v49 = vsub.f32 %v18507_v44, %v9741_v40  ;;  %v9745_v26 = vsub.f32 %v18513_v33, %v9741_v40 }
 0x837   :  { %v9746_v32 = vsub.f32 %v18527_v47, %v9741_v40  ;;  %v9747_v23 = vsub.f32 %v18532_v20, %v9741_v40  ;;  %v9748_v15 = vsub.f32 %v9715_v27, %v9741_v40 }
 0x838   :  { %v9749_v34 = vmul.f32 %v9742_v16, %v9742_v16  ;;  %v9750_v22 = vmul.f32 %v9743_v6, %v9743_v6  ;;  %v9751_v51 = vmul.f32 %v9744_v49, %v9744_v49  ;;  %v9752_v21 = vmul.f32 %v9745_v26, %v9745_v26 }
 0x839   :  { %v9753_v39 = vmul.f32 %v9746_v32, %v9746_v32  ;;  %v9754_v48 = vmul.f32 %v9747_v23, %v9747_v23  ;;  %v9755_v17 = vmul.f32 %v9748_v15, %v9748_v15 }
 0x83a   :  { %v9756_v42 = vsel %vm4310_vm4, %v9749_v34, 0.0  ;;  %v9757_v57 = vsel %vm4310_vm4, %v9750_v22, 0.0  ;;  %v9759_v3 = vsel %vm4310_vm4, %v9751_v51, 0.0  ;;  %v9761_v10 = vsel %vm4310_vm4, %v9752_v21, 0.0 }
 0x83b   :  { %v9758_v25 = vadd.f32 %v9757_v57, %v9756_v42  ;;  %v9763_v1 = vsel %vm4310_vm4, %v9753_v39, 0.0  ;;  %v9765_v62 = vsel %vm4310_vm4, %v9754_v48, 0.0  ;;  %v9767_v12 = vsel %vm9731_vm1, %v9755_v17, 0.0 }
 0x83d   :  { %v9760_v24 = vadd.f32 %v9759_v3, %v9758_v25 }
 0x83f   :  { %v9762_v29 = vadd.f32 %v9761_v10, %v9760_v24 }
 0x841   :  { %v9764_v50 = vadd.f32 %v9763_v1, %v9762_v29 }
 0x843   :  { %v9766_v35 = vadd.f32 %v9765_v62, %v9764_v50 }
 0x845   :  { %v9768_v8 = vadd.f32 %v9767_v12, %v9766_v35 }
 0x847   :  { %v9769_v7 = vrot.slane %v9768_v8, 4 }
 0x849   :  { %v9770_v27 = vadd.f32 %v9769_v7, %v9768_v8 }
 0x84b   :  { %v9771_v14 = vrot.slane %v9770_v27, 2 }
 0x84d   :  { %v9772_v37 = vadd.f32 %v9771_v14, %v9770_v27 }
 0x84f   :  { %v9773_v28 = vrot.slane %v9772_v37, 1 }
 0x851   :  { %v9774_v31 = vadd.f32 %v9773_v28, %v9772_v37 }
 0x853   :  { %v9775_v13 = vmul.f32 0.02, %v9774_v31 }
 0x855   :  { %v9776_v36 = vadd.f32 1e-05, %v9775_v13 }
 0x857   :  { %12684 = vrsqrt.f32 %v9776_v36 }
 0x861   :  { %v12685_v56 = vpop.eup %12684 }
 0x862   :  { %v9778_v0 = vmul.f32 %v12685_v56, %v9292_v52 }
 0x864   :  { %v9779_v59 = vmul.f32 %v9778_v0, %v9741_v40  ;;  %v9785_v18 = vrot.slane %v9778_v0, %v15385_v2 }
 0x866   :  { %v9780_v41 = vsub.f32 %v9293_v53, %v9779_v59  ;;  %v9787_v63 = vmul.f32 %v9785_v18, %v18510_v55  ;;  %v9788_v61 = vmul.f32 %v9785_v18, %v18517_v54  ;;  %v9789_v19 = vmul.f32 %v9785_v18, %v18507_v44 }
 0x867   :  { %v9790_v38 = vmul.f32 %v9785_v18, %v18513_v33  ;;  %v9791_v45 = vmul.f32 %v9785_v18, %v18527_v47  ;;  %v9792_v4 = vmul.f32 %v9785_v18, %v18532_v20 }
 0x868   :  { %v9797_v58 = vrot.slane %v9780_v41, %v15385_v2 }
 0x86a   :  { %v9799_v60 = vadd.f32 %v9797_v58, %v9787_v63  ;;  %v9800_v30 = vadd.f32 %v9797_v58, %v9788_v61  ;;  %v9801_v40 = vadd.f32 %v9797_v58, %v9789_v19  ;;  %v9802_v16 = vadd.f32 %v9797_v58, %v9790_v38 }
 0x86b   :  { %v9803_v6 = vadd.f32 %v9797_v58, %v9791_v45  ;;  %v9804_v49 = vadd.f32 %v9797_v58, %v9792_v4 }
 0x86c   :  { %v9805_v26 = vmax.f32 %v9799_v60, 0.0  ;;  %v9806_v55 = vmax.f32 %v9800_v30, 0.0  ;;  %v9807_v32 = vmax.f32 %v9801_v40, 0.0  ;;  %v9808_v54 = vmax.f32 %v9802_v16, 0.0 }
 0x86d   :  { %v9809_v34 = vmax.f32 %v9803_v6, 0.0  ;;  %v9810_v44 = vmax.f32 %v9804_v49, 0.0 }
 0x86e   :  { %v9817_v22 = vcombine.high %v9805_v26, %v9805_v26  ;;  %v9824_v33 = vrot.slane %v9805_v26, %v17870_v9  ;;  %v9866_v51 = vcombine.high %v9806_v55, %v9806_v55  ;;  %v9873_v47 = vrot.slane %v9806_v55, %v17870_v9 }
 0x86f   :  { %v9920_v20 = vrot.slane %v9807_v32, %v17870_v9  ;;  %v9937_v23 = vcombine.high %v9808_v54, %v9808_v54  ;;  %v9944_v21 = vrot.slane %v9808_v54, %v17870_v9  ;;  %v9986_v42 = vcombine.high %v9809_v34, %v9809_v34 }
 0x870   :  { %v9831_v57 = vrot.slane %v9817_v22, %v17870_v9  ;;  %v9832_v25 = vcombine.high %v9824_v33, %v9824_v33  ;;  %v18577_v15 = vrot.slane %v9824_v33, %v17870_v9  ;;  %v9880_v39 = vrot.slane %v9866_v51, %v17870_v9 }
 0x871   :  { %v9881_v3 = vcombine.high %v9873_v47, %v9873_v47  ;;  %v9889_v24 = vrot.slane %v9873_v47, %v17870_v9  ;;  %v9921_v48 = vcombine.high %v9920_v20, %v9920_v20  ;;  %v9928_v10 = vrot.slane %v9920_v20, %v17870_v9 }
 0x872   :  { %v9833_v29 = vcombine.high %v9831_v57, %v9831_v57  ;;  %v9847_v17 = vrot.slane %v9831_v57, %v17870_v9  ;;  %v9854_v1 = vrot.slane %v9832_v25, %v17870_v9  ;;  %v9862_v50 = vcombine.high %v18577_v15, %v18577_v15 }
 0x873   :  { %v9882_v62 = vcombine.high %v9880_v39, %v9880_v39  ;;  %v9896_v35 = vrot.slane %v9880_v39, %v17870_v9  ;;  %v9903_v12 = vrot.slane %v9881_v3, %v17870_v9  ;;  %v9911_v8 = vcombine.high %v9889_v24, %v9889_v24 }
 0x874   :  { %v9861_v7 = vrot.slane %v9833_v29, %v17870_v9  ;;  %v9863_v27 = vcombine.high %v9847_v17, %v9847_v17  ;;  %v9864_v14 = vcombine.high %v9854_v1, %v9854_v1  ;;  %v9935_v37 = vrot.slane %v9921_v48, %v17870_v9 }
 0x875   :  { %v9910_v28 = vrot.slane %v9882_v62, %v17870_v9  ;;  %v9912_v31 = vcombine.high %v9903_v12, %v9903_v12  ;;  %v9936_v13 = vcombine.high %v9928_v10, %v9928_v10  ;;  %v9951_v36 = vrot.slane %v9937_v23, %v17870_v9 }
 0x876   :  { %v9865_v52 = vcombine.high %v9861_v7, %v9861_v7  ;;  %v9952_v56 = vcombine.high %v9944_v21, %v9944_v21  ;;  %v9960_v0 = vrot.slane %v9944_v21, %v17870_v9  ;;  %v9993_v53 = vrot.slane %v9809_v34, %v17870_v9 }
 0x877   :  { %v9913_v59 = vcombine.high %v9910_v28, %v9910_v28  ;;  %v9953_v18 = vcombine.high %v9951_v36, %v9951_v36  ;;  %v9967_v41 = vrot.slane %v9951_v36, %v17870_v9  ;;  %v10000_v63 = vrot.slane %v9986_v42, %v17870_v9 }
 0x878   :  { %v9974_v61 = vrot.slane %v9952_v56, %v17870_v9  ;;  %v9982_v19 = vcombine.high %v9960_v0, %v9960_v0  ;;  %v10001_v38 = vcombine.high %v9993_v53, %v9993_v53  ;;  %v10009_v58 = vrot.slane %v9993_v53, %v17870_v9  ;;  %v10269_v56 = vpop.permute.xlu0 %10268  ;;  %v10392_v0 = vpop.permute.xlu1 %10391 }
 0x879   :  { %v9981_v45 = vrot.slane %v9953_v18, %v17870_v9  ;;  %v9983_v4 = vcombine.high %v9967_v41, %v9967_v41  ;;  %v10002_v60 = vcombine.high %v10000_v63, %v10000_v63  ;;  %v10016_v30 = vrot.slane %v10000_v63, %v17870_v9  ;;  %10281 = vst.msk [vmem:[#allocation4] sm:$0x3] %vm10280_vm12, %v10269_v56 }
 0x87a   :  { %v9984_v40 = vcombine.high %v9974_v61, %v9974_v61  ;;  %v10023_v16 = vrot.slane %v10001_v38, %v17870_v9  ;;  %v10039_v6 = vrot.slane %v9810_v44, %v17870_v9  ;;  %v10089_v49 = vmax.f32 %v18577_v15, %v9861_v7  ;;  %10402 = vst.msk [vmem:[#allocation4 + $0x10] sm:$0x3] %vm10280_vm12, %v10392_v0 }
 0x87b   :  { %v9985_v26 = vcombine.high %v9981_v45, %v9981_v45  ;;  %v10030_v55 = vrot.slane %v10002_v60, %v17870_v9  ;;  %v10031_v32 = vcombine.high %v10016_v30, %v10016_v30  ;;  %v10090_v54 = vmax.f32 %v9854_v1, %v9863_v27  ;;  %v12598_v60 = vld [vmem:[%s19052_s5] sm:$0xff]  }
 0x87c   :  { %v10032_v34 = vcombine.high %v10023_v16, %v10023_v16  ;;  %v10040_v22 = vcombine.high %v10039_v6, %v10039_v6  ;;  %v10047_v33 = vrot.slane %v10039_v6, %v17870_v9  ;;  %v10091_v51 = vmax.f32 %v9862_v50, %v9865_v52 }
 0x87d   :  { %v10092_v47 = vmax.f32 %v9864_v14, %v9889_v24  ;;  %v10093_v20 = vmax.f32 %v9911_v8, %v9913_v59  ;;  %v10094_v23 = vmax.f32 %v9912_v31, %v9928_v10  ;;  %v10095_v21 = vmax.f32 %v9896_v35, %v9935_v37 }
 0x87e   :  { %v10054_v42 = vrot.slane %v10040_v22, %v17870_v9  ;;  %v10055_v57 = vcombine.high %v10047_v33, %v10047_v33  ;;  %v10096_v44 = vmax.f32 %v9910_v28, %v9936_v13  ;;  %v10097_v25 = vmax.f32 %v9974_v61, %v9983_v4  ;;  %v10273_v61 = vpop.permute.xlu0 %10272  ;;  %v12599_v22 = vld [vmem:[%s19052_s5 + $0x48] sm:$0xff]  }
 0x87f   :  { %v10098_v15 = vmax.f32 %v9982_v19, %v9985_v26  ;;  %v10099_v39 = vmax.f32 %v9984_v40, %v10009_v58  ;;  %v10100_v3 = vmax.f32 %v9967_v41, %v10023_v16  ;;  %v10101_v48 = vmax.f32 %v10032_v34, %v10047_v33  ;;  %10283 = vst.msk [vmem:[#allocation4 + $0x14] sm:$0x3] %vm10280_vm12, %v10273_v61  ;;  %v12600_v33 = vld [vmem:[%s19052_s5 + $0x8] sm:$0xff]  }
 0x880   :  { %v10056_v29 = vcombine.high %v10054_v42, %v10054_v42  ;;  %v10102_v17 = vmax.f32 %v10016_v30, %v10054_v42  ;;  %v10103_v1 = vmax.f32 %v10030_v55, %v10055_v57  ;;  %v10105_v62 = vmax.f32 %v10089_v49, %v10090_v54 }
 0x881   :  { %v10106_v12 = vmax.f32 %v10091_v51, %v10092_v47  ;;  %v10107_v7 = vmax.f32 %v10093_v20, %v10094_v23  ;;  %v10109_v50 = vmax.f32 %v10097_v25, %v10098_v15  ;;  %v10110_v24 = vmax.f32 %v10099_v39, %v10100_v3  ;;  %v12601_v25 = vld [vmem:[%s19052_s5 + $0x50] sm:$0xff]   ;;  %v12603_v3 = vld [vmem:[%s19052_s5 + $0x58] sm:$0xff]  }
 0x882   :  { %v10104_v8 = vmax.f32 %v10031_v32, %v10056_v29  ;;  %v10111_v10 = vmax.f32 %v10101_v48, %v10102_v17  ;;  %v10108_v35 = vmax.f32 %v10095_v21, %v10096_v44  ;;  %v12602_v15 = vld [vmem:[%s19052_s5 + $0x10] sm:$0xff]   ;;  %v12604_v48 = vld [vmem:[%s19052_s5 + $0x18] sm:$0xff]   ;;  %v12605_v29 = vld [vmem:[%s19052_s5 + $0x60] sm:$0xff]  }
 0x883   :  { %v10160_v27 = vcombine.low %v10109_v50, %v10110_v24  ;;  %v10130_v14 = vcombine.low %v10105_v62, %v10106_v12  ;;  %v12606_v17 = vld [vmem:[%s19052_s5 + $0x20] sm:$0xff]   ;;  %v12608_v62 = vld [vmem:[%s19052_s5 + $0x28] sm:$0xff]   ;;  %v12609_v12 = vld [vmem:[%s19052_s5 + $0x70] sm:$0xff]  }
 0x884   :  { %v10112_v37 = vmax.f32 %v10103_v1, %v10104_v8  ;;  %v10145_v28 = vcombine.low %v10107_v7, %v10108_v35  ;;  %v12607_v1 = vld [vmem:[%s19052_s5 + $0x68] sm:$0xff]   ;;  %v12610_v7 = vld [vmem:[%s19052_s5 + $0x30] sm:$0xff]   ;;  %v12611_v50 = vld [vmem:[%s19052_s5 + $0x78] sm:$0xff]  }
 0x885   :  { %v10167_v31 = vrot.slane %v10160_v27, %v17870_v9  ;;  %v10137_v13 = vrot.slane %v10130_v14, %v17870_v9  ;;  %v12612_v24 = vld [vmem:[%s19052_s5 + $0x38] sm:$0xff]  }
 0x886   :  { %v10175_v36 = vcombine.low %v10111_v10, %v10112_v37  ;;  %v10152_v52 = vrot.slane %v10145_v28, %v17870_v9 }
 0x887   :  { %v10174_v53 = vrot.slane %v10167_v31, %v17870_v9  ;;  %v10144_v59 = vrot.slane %v10137_v13, %v17870_v9 }
 0x888   :  { %v10182_v18 = vrot.slane %v10175_v36, %v17870_v9  ;;  %v10159_v41 = vrot.slane %v10152_v52, %v17870_v9 }
 0x889   :  { %10197 = vst.msk [vmem:[#allocation5 + $0x15] sm:$0x3] %vm9731_vm1, %v10174_v53  ;;  %10195 = vst.msk [vmem:[#allocation5 + $0x5] sm:$0x3] %vm9731_vm1, %v10144_v59 }
 0x88a   :  { %v10189_v63 = vrot.slane %v10182_v18, %v17870_v9  ;;  %10196 = vst.msk [vmem:[#allocation5 + $0x9] sm:$0x3] %vm9731_vm1, %v10159_v41  ;;  %v12597_v9 = vld [vmem:[%s19052_s5 + $0x40] sm:$0xff]   ;;  %v18723_v18 = vld [vmem:[#allocation5 + $0x1c] sm:$0xf] }
 0x88b   :  { %12188 = vmatprep.subr.bf16.mxu1 %v12597_v9 }
 0x88c   :  { %10198 = vst.msk [vmem:[#allocation5 + $0x19] sm:$0x3] %vm9731_vm1, %v10189_v63  ;;  %12189 = vmatpush3.bf16.msra.mxu1 %v12598_v60 }
 0x88d   :  { %12190 = vmatprep.subr.bf16.mxu1 %v12599_v22  ;;  %v12623_v22 = vld [vmem:[%s19052_s5 + $0x98] sm:$0xff]  }
 0x890   :  { %v10200_v19 = vld [vmem:[#allocation5 + $0x4] sm:$0xf]  ;;  %v10204_v38 = vld [vmem:[#allocation5 + $0x14] sm:$0xf]  ;;  %12191 = vmatpush3.bf16.msra.mxu1 %v12600_v33  ;;  %v12624_v33 = vld [vmem:[%s19052_s5 + $0xe0] sm:$0xff]  }
 0x891   :  { %v10229_v58 = vrot.slane %v10200_v19, %v19930_v43  ;;  %10208 = vst.msk [vmem:[#allocation4 + $0xa] sm:$0x3] %vm9731_vm1, %v10200_v19  ;;  %v10201_v45 = vld [vmem:[#allocation5 + $0x8] sm:$0xf]  ;;  %v10245_v4 = vrot.slane %v10204_v38, %v19930_v43  ;;  %10210 = vst.msk [vmem:[#allocation4 + $0x1e] sm:$0x3] %vm9731_vm1, %v10204_v38  ;;  %12192 = vmatprep.subr.bf16.mxu1 %v12601_v25 }
 0x892   :  { %v10301_v30 = vrot.slane %v10201_v45, %v19930_v43  ;;  %10359 = vst.msk [vmem:[#allocation4 + $0x6] sm:$0x3] %vm9731_vm1, %v10201_v45  ;;  %v12632_v25 = vld [vmem:[%s19052_s5 + $0x100] sm:$0xff]  }
 0x893   :  { %v10205_v40 = vld [vmem:[#allocation5 + $0x18] sm:$0xf]  ;;  %10309 = vrot.lane.b32.xlu0 %v10229_v58, %s12726_s2  ;;  %v10230_v16 = vcombine.high %v10229_v58, %v10229_v58  ;;  %v10246_v6 = vcombine.high %v10245_v4, %v10245_v4  ;;  %v11982_v55 = vrot.slane %v10229_v58, 9  ;;  %v11984_v54 = vrot.slane %v10245_v4, 9 }
 0x894   :  { %v10308_v49 = vrot.slane %v10205_v40, %v19930_v43  ;;  %10361 = vst.msk [vmem:[#allocation4 + $0x1a] sm:$0x3] %vm9731_vm1, %v10205_v40  ;;  %v10325_v26 = vcombine.high %v10301_v30, %v10301_v30  ;;  %v11985_v47 = vrot.slane %v10301_v30, 9  ;;  %12193 = vmatpush3.bf16.msra.mxu1 %v12602_v15 }
 0x895   :  { %10290 = vst.msk [vmem:[#allocation4 + $0xc] sm:$0x3] %vm9731_vm1, %v10230_v16  ;;  %10292 = vst.msk [vmem:[#allocation4 + $0x20] sm:$0x3] %vm9731_vm1, %v10246_v6  ;;  %v10258_v32 = vrot.slane %v10230_v16, 7  ;;  %v10266_v34 = vrot.slane %v10246_v6, 7  ;;  %12194 = vmatprep.subr.bf16.mxu1 %v12603_v3 }
 0x896   :  { %10315 = vrot.lane.b32.xlu1 %v10308_v49, %s12726_s2  ;;  %v10326_v51 = vcombine.high %v10308_v49, %v10308_v49  ;;  %10409 = vst.msk [vmem:[#allocation4 + $0x8] sm:$0x3] %vm9731_vm1, %v10325_v26  ;;  %v10329_v20 = vrot.slane %v10325_v26, 7  ;;  %v11986_v57 = vrot.slane %v10308_v49, 9  ;;  %v12618_v49 = vld [vmem:[%s19052_s5 + $0xc8] sm:$0xff]  }
 0x897   :  { %10313 = vrot.lane.b32.xlu0 %v10245_v4, %s12726_s2  ;;  %v10259_v23 = vsel %vm18492_vm11, %v11982_v55, %v10258_v32  ;;  %v10267_v21 = vsel %vm18492_vm11, %v11984_v54, %v10266_v34  ;;  %v12619_v55 = vld [vmem:[%s19052_s5 + $0x88] sm:$0xff]   ;;  %v12620_v32 = vld [vmem:[%s19052_s5 + $0xd0] sm:$0xff]   ;;  %v12622_v34 = vld [vmem:[%s19052_s5 + $0xd8] sm:$0xff]  }
 0x898   :  { %10411 = vst.msk [vmem:[#allocation4 + $0x1c] sm:$0x3] %vm9731_vm1, %v10326_v51  ;;  %10339 = vst.msk [vmem:[#allocation4 + $0x4] sm:$0x3] %vm9731_vm1, %v10259_v23  ;;  %v10330_v42 = vsel %vm18492_vm11, %v11985_v47, %v10329_v20  ;;  %v10333_v44 = vrot.slane %v10326_v51, 7  ;;  %12195 = vmatpush3.bf16.msra.mxu1 %v12604_v48  ;;  %v12621_v54 = vld [vmem:[%s19052_s5 + $0x90] sm:$0xff]  }
 0x899   :  { %10341 = vst.msk [vmem:[#allocation4 + $0x18] sm:$0x3] %vm9731_vm1, %v10267_v21  ;;  %10340 = vst.msk [vmem:[#allocation4 + $0xe] sm:$0x3] %vm9731_vm1, %v10330_v42  ;;  %12196 = vmatprep.subr.bf16.mxu1 %v12605_v29  ;;  %v12626_v47 = vld [vmem:[%s19052_s5 + $0xe8] sm:$0xff]   ;;  %v12634_v29 = vld [vmem:[%s19052_s5 + $0x110] sm:$0xff]  }
 0x89a   :  { %10311 = vrot.lane.b32.xlu1 %v10301_v30, %s12726_s2  ;;  %v10334_v39 = vsel %vm18492_vm11, %v11986_v57, %v10333_v44  ;;  %v12627_v20 = vld [vmem:[%s19052_s5 + $0xa8] sm:$0xff]   ;;  %v12631_v57 = vld [vmem:[%s19052_s5 + $0xb8] sm:$0xff]  }
 0x89b   :  { %10343 = vrot.lane.b32.xlu0 %v10230_v16, %s12726_s2  ;;  %10342 = vst.msk [vmem:[#allocation4 + $0x22] sm:$0x3] %vm9731_vm1, %v10334_v39 }
 0x89c   :  { %12197 = vmatpush3.bf16.msra.mxu1 %v12606_v17 }
 0x89d   :  { %12198 = vmatprep.subr.bf16.mxu1 %v12607_v1  ;;  %v12636_v3 = vld [vmem:[#allocation4 + $0x8] ss:$10 sps:$4 sm:$0x33]  }
 0x89e   :  { %10349 = vrot.lane.b32.xlu1 %v10326_v51, %s12726_s2  ;;  %v12625_v51 = vld [vmem:[%s19052_s5 + $0xa0] sm:$0xff]   ;;  %v10473_v17 = vrot.slane %v12636_v3, %v19930_v43 }
 0x89f   :  { %10347 = vrot.lane.b32.xlu0 %v10246_v6, %s12726_s2  ;;  %v12616_v6 = vld [vmem:[%s19052_s5 + $0x80] sm:$0xff]   ;;  %v12637_v48 = vld [vmem:[#allocation4 + $0x1c] ss:$10 sps:$4 sm:$0x33]  }
 0x8a0   :  { %12199 = vmatpush3.bf16.msra.mxu1 %v12608_v62  ;;  %v10480_v1 = vrot.slane %v12637_v48, %v19930_v43  ;;  %v12635_v62 = vld [vmem:[%s19052_s5 + $0x118] sm:$0xff]  }
 0x8a1   :  { %12200 = vmatprep.subr.bf16.mxu1 %v12609_v12 }
 0x8a2   :  { %10345 = vrot.lane.b32.xlu1 %v10325_v26, %s12726_s2  ;;  %v10481_v12 = vcombine.low %v10473_v17, %v10480_v1 }
 0x8a3   :  { %10389 = vrot.lane.b32.xlu0 %v10330_v42, %s12726_s2  ;;  %v12630_v42 = vld [vmem:[%s19052_s5 + $0xf8] sm:$0xff]  }
 0x8a4   :  { %12201 = vmatpush3.bf16.msra.mxu1 %v12610_v7  ;;  %v10491_v7 = vpack.c.bf16 %v10481_v12, %v10481_v12 }
 0x8a5   :  { %12202 = vmatprep.subr.bf16.mxu1 %v12611_v50  ;;  %v12638_v50 = vld [vmem:[%s19054_s7 + $0x40] sm:$0xff]  }
 0x8a6   :  { %10270 = vrot.lane.b32.xlu1 %v10259_v23, %s12726_s2  ;;  %v12628_v23 = vld [vmem:[%s19052_s5 + $0xf0] sm:$0xff]   ;;  %12237 = vmatprep.subr.bf16.mxu0 %v12638_v50 }
 0x8a7   :  { %10393 = vrot.lane.b32.xlu0 %v10334_v39, %s12726_s2  ;;  %v12633_v39 = vld [vmem:[%s19052_s5 + $0x108] sm:$0xff]  }
 0x8a8   :  { %12203 = vmatpush3.bf16.msra.mxu1 %v12612_v24  ;;  %v12639_v24 = vld [vmem:[%s19054_s7] sm:$0xff]  }
 0x8a9   :  { %12238 = vmatpush3.bf16.msra.mxu0 %v12639_v24 }
 0x8aa   :  { %10274 = vrot.lane.b32.xlu1 %v10267_v21, %s12726_s2  ;;  %v12629_v21 = vld [vmem:[%s19052_s5 + $0xb0] sm:$0xff]  }
 0x8ae   :  { %10395 = vrot.lane.b32.xlu1 %v18542_v5, %s12726_s2  ;;  %v12615_v5 = vld [vmem:[%s19052_s5 + $0xc0] sm:$0xff]  }
 0x8af   :  { %12210 = vmatprep.subr.bf16.mxu1 %v12615_v5  ;;  %v12640_v5 = vld [vmem:[%s19054_s7 + $0x48] sm:$0xff]  }
 0x8b0   :  { %12239 = vmatprep.subr.bf16.mxu0 %v12640_v5 }
 0x905   :  { %v10310_v8 = vpop.permute.xlu0 %10309 }
 0x906   :  { %10321 = vst.msk [vmem:[#allocation4 + $0x2] sm:$0x3] %vm10280_vm12, %v10310_v8  ;;  %v10977_v8 = vld [vmem:[#allocation5] sm:$0xf] }
 0x908   :  { %v10316_v10 = vpop.permute.xlu1 %10315 }
 0x909   :  { %10324 = vst.msk [vmem:[#allocation4 + $0x20] sm:$0x3] %vm10280_vm12, %v10316_v10  ;;  %v10314_v35 = vpop.permute.xlu0 %10313  ;;  %v10981_v10 = vld [vmem:[#allocation5 + $0x10] sm:$0xf] }
 0x90a   :  { %10323 = vst.msk [vmem:[#allocation4 + $0x16] sm:$0x3] %vm10280_vm12, %v10314_v35  ;;  %v10999_v35 = vrot.slane %v10977_v8, %v19930_v43 }
 0x90c   :  { %v10312_v27 = vpop.permute.xlu1 %10311 }
 0x90d   :  { %10322 = vst.msk [vmem:[#allocation4 + $0xc] sm:$0x3] %vm10280_vm12, %v10312_v27  ;;  %v10344_v14 = vpop.permute.xlu0 %10343  ;;  %v11015_v27 = vrot.slane %v10981_v10, %v19930_v43 }
 0x90e   :  { %10355 = vst.msk [vmem:[#allocation4 + $0x4] sm:$0x3] %vm10280_vm12, %v10344_v14  ;;  %v10980_v14 = vld [vmem:[#allocation5 + $0xc] sm:$0xf] }
 0x910   :  { %v10350_v37 = vpop.permute.xlu1 %10349 }
 0x911   :  { %10358 = vst.msk [vmem:[#allocation4 + $0x22] sm:$0x3] %vm10280_vm12, %v10350_v37  ;;  %v10348_v28 = vpop.permute.xlu0 %10347  ;;  %v12641_v37 = vld [vmem:[%s19054_s7 + $0x8] sm:$0xff]  }
 0x912   :  { %10357 = vst.msk [vmem:[#allocation4 + $0x18] sm:$0x3] %vm10280_vm12, %v10348_v28  ;;  %v11143_v28 = vrot.slane %v10980_v14, %v19930_v43  ;;  %12240 = vmatpush3.bf16.msra.mxu0 %v12641_v37 }
 0x914   :  { %v10346_v31 = vpop.permute.xlu1 %10345 }
 0x915   :  { %10356 = vst.msk [vmem:[#allocation4 + $0xe] sm:$0x3] %vm10280_vm12, %v10346_v31  ;;  %v10390_v13 = vpop.permute.xlu0 %10389  ;;  %v11000_v31 = vcombine.high %v10999_v35, %v10999_v35 }
 0x916   :  { %10401 = vst.msk [vmem:[#allocation4 + $0x6] sm:$0x3] %vm10280_vm12, %v10390_v13  ;;  %v12027_v13 = vrot.slane %v10999_v35, 9 }
 0x918   :  { %v10271_v36 = vpop.permute.xlu1 %10270 }
 0x919   :  { %10282 = vst.msk [vmem:[#allocation4 + $0xa] sm:$0x3] %vm10280_vm12, %v10271_v36  ;;  %v10394_v52 = vpop.permute.xlu0 %10393  ;;  %v11016_v36 = vcombine.high %v11015_v27, %v11015_v27 }
 0x91a   :  { %10403 = vst.msk [vmem:[#allocation4 + $0x1a] sm:$0x3] %vm10280_vm12, %v10394_v52  ;;  %v11144_v52 = vcombine.high %v11143_v28, %v11143_v28 }
 0x91c   :  { %v10275_v56 = vpop.permute.xlu1 %10274  ;;  %11182 = vst.msk [vmem:[#allocation4 + $0x12] sm:$0x3] %vm9731_vm1, %v11144_v52 }
 0x91d   :  { %10284 = vst.msk [vmem:[#allocation4 + $0x1e] sm:$0x3] %vm10280_vm12, %v10275_v56  ;;  %v12617_v59 = vld [vmem:[#allocation4 + $0x4] ss:$10 sps:$4 sm:$0xff]   ;;  %v12033_v56 = vrot.slane %v11143_v28, 9 }
 0x91e   :  { %v10446_v45 = vrot.slane %v12617_v59, %v19930_v43  ;;  %11132 = vst.msk [vmem:[#allocation4 + $0x10] sm:$0x3] %vm9731_vm1, %v10980_v14  ;;  %v11035_v59 = vrot.slane %v11016_v36, 7 }
 0x920   :  { %v10396_v0 = vpop.permute.xlu1 %10395  ;;  %v12613_v53 = vld [vmem:[#allocation4] ss:$10 sps:$4 sm:$0xff]  }
 0x921   :  { %10404 = vst.msk [vmem:[#allocation4 + $0x24] sm:$0x3] %vm10280_vm12, %v10396_v0  ;;  %v10417_v63 = vld [vmem:[#allocation4 + $0x14] sm:$0xff]  ;;  %v10439_v38 = vrot.slane %v12613_v53, %v19930_v43  ;;  %v11027_v0 = vrot.slane %v11000_v31, 7  ;;  %v12029_v53 = vrot.slane %v11015_v27, 9 }
 0x922   :  { %10985 = vst.msk [vmem:[#allocation4] sm:$0x3] %vm9731_vm1, %v10977_v8  ;;  %10987 = vst.msk [vmem:[#allocation4 + $0x14] sm:$0x3] %vm9731_vm1, %v10981_v10 }
 0x923   :  { %11061 = vst.msk [vmem:[#allocation4 + $0x2] sm:$0x3] %vm9731_vm1, %v11000_v31  ;;  %11063 = vst.msk [vmem:[#allocation4 + $0x16] sm:$0x3] %vm9731_vm1, %v11016_v36 }
 0x928   :  { %v10419_v41 = vld [vmem:[#allocation4 + $0x1e] sm:$0xff] }
 0x929   :  { %11134 = vst.msk [vmem:[#allocation4 + $0x24] sm:$0x3] %vm9731_vm1, %v18723_v18  ;;  %v10431_v61 = vcombine.low %v10417_v63, %v10419_v41  ;;  %v10432_v19 = vcombine.high %v10417_v63, %v10419_v41  ;;  %v11155_v41 = vrot.slane %v11144_v52, 7  ;;  %v11028_v63 = vsel %vm18492_vm11, %v12027_v13, %v11027_v0 }
 0x92a   :  { %11041 = vrot.lane.b32.xlu0 %v11028_v63, %s12726_s2 }
 0x92b   :  { %v10453_v58 = vrot.slane %v10431_v61, %v19930_v43  ;;  %v10460_v4 = vrot.slane %v10432_v19, %v19930_v43  ;;  %v11156_v61 = vsel %vm18492_vm11, %v12033_v56, %v11155_v41  ;;  %v11036_v19 = vsel %vm18492_vm11, %v12029_v53, %v11035_v59  ;;  %v10565_v56 = vld [vmem:[%s19053_s6 + $0x1] sm:$0x1]  ;;  %v10566_v59 = vld [vmem:[%s19053_s6 + $0x2] sm:$0x1] }
 0x92c   :  { %11163 = vrot.lane.b32.xlu1 %v11156_v61, %s12726_s2 }
 0x92d   :  { %v10461_v9 = vcombine.low %v10439_v38, %v10453_v58  ;;  %v10462_v60 = vcombine.high %v10439_v38, %v10453_v58  ;;  %v10464_v30 = vcombine.high %v10446_v45, %v10460_v4  ;;  %v10463_v44 = vcombine.low %v10446_v45, %v10460_v4  ;;  %v12642_v58 = vld [vmem:[%s19054_s7 + $0x50] sm:$0xff]  }
 0x92e   :  { %v12643_v45 = vld [vmem:[%s19054_s7 + $0x10] sm:$0xff]   ;;  %11045 = vrot.lane.b32.xlu0 %v11036_v19, %s12726_s2  ;;  %12241 = vmatprep.subr.bf16.mxu0 %v12642_v58 }
 0x92f   :  { %v10487_v40 = vpack.c.bf16 %v10461_v9, %v10461_v9  ;;  %v10488_v16 = vpack.c.bf16 %v10462_v60, %v10462_v60  ;;  %v10490_v26 = vpack.c.bf16 %v10464_v30, %v10464_v30  ;;  %v10489_v15 = vpack.c.bf16 %v10463_v44, %v10463_v44  ;;  %12242 = vmatpush3.bf16.msra.mxu0 %v12643_v45 }
 0x931   :  { %10824 = vmatprep.mubr.bf16.mxu1 %v10488_v16 }
 0x932   :  { %10825 = vmatmul.mubr.bf16.vlgmr.msra.gmra.mrb[40].mxu1 %v10487_v40  ;;  %v11151_v40 = vrot.slane %v18723_v18, %v19930_v43 }
 0x933   :  { %12211 = vmatpush3.bf16.msra.mxu1 %v12616_v6  ;;  %10864 = vmatprep.mubr.bf16.mxu1 %v10490_v26  ;;  %v12644_v26 = vld [vmem:[%s19054_s7 + $0x58] sm:$0xff]  }
 0x934   :  { %12212 = vmatprep.subr.bf16.mxu1 %v12618_v49  ;;  %v11152_v16 = vcombine.high %v11151_v40, %v11151_v40  ;;  %v12034_v6 = vrot.slane %v11151_v40, 9  ;;  %12243 = vmatprep.subr.bf16.mxu0 %v12644_v26 }
 0x936   :  { %v11159_v49 = vrot.slane %v11152_v16, 7  ;;  %11184 = vst.msk [vmem:[#allocation4 + $0x26] sm:$0x3] %vm9731_vm1, %v11152_v16 }
 0x937   :  { %12213 = vmatpush3.bf16.msra.mxu1 %v12619_v55  ;;  %v12645_v55 = vld [vmem:[%s19054_s7 + $0x18] sm:$0xff]  }
 0x938   :  { %12214 = vmatprep.subr.bf16.mxu1 %v12620_v32  ;;  %v12646_v32 = vld [vmem:[%s19054_s7 + $0x60] sm:$0xff]   ;;  %v18847_v18 = vsel %vm18492_vm11, %v12034_v6, %v11159_v49  ;;  %12244 = vmatpush3.bf16.msra.mxu0 %v12645_v55 }
 0x939   :  { %12245 = vmatprep.subr.bf16.mxu0 %v12646_v32  ;;  %v12652_v55 = vld [vmem:[%s19054_s7 + $0xc0] sm:$0xff]  }
 0x93b   :  { %12215 = vmatpush3.bf16.msra.mxu1 %v12621_v54  ;;  %v12647_v54 = vld [vmem:[%s19054_s7 + $0x20] sm:$0xff]  }
 0x93c   :  { %12216 = vmatprep.subr.bf16.mxu1 %v12622_v34  ;;  %v12648_v34 = vld [vmem:[%s19054_s7 + $0x68] sm:$0xff]   ;;  %12246 = vmatpush3.bf16.msra.mxu0 %v12647_v54 }
 0x93d   :  { %12247 = vmatprep.subr.bf16.mxu0 %v12648_v34 }
 0x93f   :  { %12217 = vmatpush3.bf16.msra.mxu1 %v12623_v22  ;;  %v12649_v22 = vld [vmem:[%s19054_s7 + $0x28] sm:$0xff]  }
 0x940   :  { %12218 = vmatprep.subr.bf16.mxu1 %v12624_v33  ;;  %v12650_v33 = vld [vmem:[%s19054_s7 + $0x70] sm:$0xff]   ;;  %12248 = vmatpush3.bf16.msra.mxu0 %v12649_v22  ;;  %v12653_v22 = vld [vmem:[%s19054_s7 + $0x80] sm:$0xff]  }
 0x941   :  { %12249 = vmatprep.subr.bf16.mxu0 %v12650_v33 }
 0x943   :  { %12219 = vmatpush3.bf16.msra.mxu1 %v12625_v51  ;;  %v11989_v51 = vld [vmem:[%s19053_s6] ss:$0 sm:$0xff] }
 0x944   :  { %12220 = vmatprep.subr.bf16.mxu1 %v12626_v47  ;;  %v12651_v47 = vld [vmem:[%s19054_s7 + $0x30] sm:$0xff]  }
 0x945   :  { %12250 = vmatpush3.bf16.msra.mxu0 %v12651_v47 }
 0x947   :  { %12221 = vmatpush3.bf16.msra.mxu1 %v12627_v20 }
 0x948   :  { %12222 = vmatprep.subr.bf16.mxu1 %v12628_v23 }
 0x94b   :  { %12223 = vmatpush3.bf16.msra.mxu1 %v12629_v21 }
 0x94c   :  { %12224 = vmatprep.subr.bf16.mxu1 %v12630_v42 }
 0x94f   :  { %12225 = vmatpush3.bf16.msra.mxu1 %v12631_v57 }
 0x950   :  { %12406 = vmatprep.subr.bf16.mxu1 %v19929_v46 }
 0x952   :  { %10865 = vmatmul.mubr.bf16.vlgmr.msra.gmra.mrb[44].mxu1 %v10489_v15 }
 0x953   :  { %12407 = vmatpush3.bf16.msra.mxu1 %v12632_v25  ;;  %12414 = vmatprep.mubr.msk.bf16.mxu1 %vm19274_vm8, %v19929_v46 }
 0x954   :  { %12408 = vmatprep.subr.bf16.mxu1 %v19929_v46 }
 0x957   :  { %12409 = vmatpush3.bf16.msra.mxu1 %v12633_v39 }
 0x958   :  { %12410 = vmatprep.subr.bf16.mxu1 %v19929_v46 }
 0x95b   :  { %12411 = vmatpush3.bf16.msra.mxu1 %v12634_v29 }
 0x95c   :  { %12412 = vmatprep.subr.bf16.mxu1 %v19929_v46 }
 0x95f   :  { %12413 = vmatpush3.bf16.msra.mxu1 %v12635_v62 }
 0x960   :  { %12259 = vmatprep.subr.bf16.mxu1 %v12652_v55 }
 0x962   :  { %12415 = vmatmul.mubr.msk.bf16.vlgmr.msra.gmra.mrb[48].mxu1 %vm4310_vm4, %v10491_v7 }
 0x963   :  { %12260 = vmatpush3.bf16.msra.mxu1 %v12653_v22 }
 0x99e   :  { %v11164_v16 = vpop.permute.xlu1 %11163 }
 0x99f   :  { %11174 = vst.msk [vmem:[#allocation4 + $0x10] sm:$0x3] %vm10280_vm12, %v11164_v16 }
 0xa05   :  { %v12204_v38 = vpop.f32.mrb[40].mxu1 }
 0xa06   :  { %v12205_v4 = vpop.f32.mrb[41].mxu1 }
 0xa07   :  { %v12206_v9 = vadd.f32 %v12205_v4, %v12204_v38  ;;  %v12207_v60 = vpop.f32.mrb[42].mxu1 }
 0xa08   :  { %v12208_v30 = vpop.f32.mrb[43].mxu1  ;;  %v11042_v60 = vpop.permute.xlu0 %11041 }
 0xa09   :  { %v10827_v21 = vadd.f32 %v12206_v9, %v11989_v51  ;;  %11053 = vst.msk [vmem:[#allocation4] sm:$0x3] %vm10280_vm12, %v11042_v60 }
 0xa0c   :  { %v11046_v49 = vpop.permute.xlu0 %11045 }
 0xa0d   :  { %11055 = vst.msk [vmem:[#allocation4 + $0x14] sm:$0x3] %vm10280_vm12, %v11046_v49 }
 0xa25   :  { %v12226_v20 = vpop.f32.mrb[44].mxu1 }
 0xa26   :  { %v12227_v23 = vpop.f32.mrb[45].mxu1 }
 0xa27   :  { %v12228_v42 = vadd.f32 %v12227_v23, %v12226_v20  ;;  %v12229_v57 = vpop.f32.mrb[46].mxu1 }
 0xa28   :  { %v12230_v44 = vpop.f32.mrb[47].mxu1 }
 0xa29   :  { %v10867_v25 = vadd.f32 %v12228_v42, %v10827_v21  ;;  %v12654_v21 = vld [vmem:[%s19054_s7 + $0xc8] sm:$0xff]  }
 0xa2a   :  { %12261 = vmatprep.subr.bf16.mxu1 %v12654_v21  ;;  %v12677_v21 = vld [vmem:[%s19054_s7 + $0x108] sm:$0xff]  }
 0xa35   :  { %v10906_v15 = vpop.f32.mrb[48].mxu1 }
 0xa36   :  { %v10907_v39 = vadd.f32 %v10906_v15, %v10867_v25  ;;  %v12416_v3 = vpop.f32.mrb[49].mxu1  ;;  %v12655_v15 = vld [vmem:[%s19054_s7 + $0x88] sm:$0xff]  }
 0xa37   :  { %v10909_v48 = vpop.f32.mrb[50].mxu1  ;;  %12262 = vmatpush3.bf16.msra.mxu1 %v12655_v15 }
 0xa38   :  { %v10912_v29 = vsel %vm4310_vm4, %v10907_v39, 0.0  ;;  %v12417_v17 = vpop.f32.mrb[51].mxu1 }
 0xa39   :  { %v10913_v1 = vrot.slane %v10912_v29, 4 }
 0xa3b   :  { %v10914_v62 = vadd.f32 %v10913_v1, %v10912_v29 }
 0xa3d   :  { %v10915_v12 = vrot.slane %v10914_v62, 2 }
 0xa3f   :  { %v10916_v7 = vadd.f32 %v10915_v12, %v10914_v62  ;;  %v12657_v12 = vld [vmem:[%s19054_s7 + $0x38] sm:$0xff]  }
 0xa41   :  { %v10917_v50 = vrot.slane %v10916_v7, 1 }
 0xa43   :  { %v10918_v24 = vadd.f32 %v10917_v50, %v10916_v7  ;;  %v12658_v7 = vld [vmem:[%s19054_s7 + $0xd0] sm:$0xff]  }
 0xa44   :  { %12263 = vmatprep.subr.bf16.mxu1 %v12658_v7 }
 0xa45   :  { %v10920_v5 = vmul.f32 0.125, %v10918_v24 }
 0xa47   :  { %v10921_v8 = vsub.f32 %v10907_v39, %v10920_v5 }
 0xa49   :  { %v10922_v10 = vmul.f32 %v10921_v8, %v10921_v8 }
 0xa4b   :  { %v10923_v35 = vsel %vm4310_vm4, %v10922_v10, 0.0  ;;  %v12659_v10 = vld [vmem:[%s19054_s7 + $0x90] sm:$0xff]  }
 0xa4c   :  { %v10924_v27 = vrot.slane %v10923_v35, 4  ;;  %12264 = vmatpush3.bf16.msra.mxu1 %v12659_v10 }
 0xa4e   :  { %v10925_v14 = vadd.f32 %v10924_v27, %v10923_v35  ;;  %v12660_v27 = vld [vmem:[%s19054_s7 + $0xd8] sm:$0xff]  }
 0xa4f   :  { %12265 = vmatprep.subr.bf16.mxu1 %v12660_v27 }
 0xa50   :  { %v10926_v37 = vrot.slane %v10925_v14, 2 }
 0xa52   :  { %v10927_v28 = vadd.f32 %v10926_v37, %v10925_v14  ;;  %v12661_v14 = vld [vmem:[%s19054_s7 + $0x98] sm:$0xff]   ;;  %v12663_v37 = vld [vmem:[%s19054_s7 + $0xa0] sm:$0xff]  }
 0xa53   :  { %12266 = vmatpush3.bf16.msra.mxu1 %v12661_v14 }
 0xa54   :  { %v10928_v31 = vrot.slane %v10927_v28, 1  ;;  %12267 = vmatprep.subr.bf16.mxu1 %v12662_v11 }
 0xa56   :  { %v10929_v13 = vadd.f32 %v10928_v31, %v10927_v28  ;;  %v12664_v28 = vld [vmem:[%s19054_s7 + $0xe8] sm:$0xff]  }
 0xa57   :  { %12268 = vmatpush3.bf16.msra.mxu1 %v12663_v37  ;;  %v12665_v31 = vld [vmem:[%s19054_s7 + $0xa8] sm:$0xff]  }
 0xa58   :  { %v10930_v36 = vmul.f32 0.125, %v10929_v13  ;;  %12269 = vmatprep.subr.bf16.mxu1 %v12664_v28  ;;  %v12666_v13 = vld [vmem:[%s19054_s7 + $0xf0] sm:$0xff]  }
 0xa5a   :  { %v10931_v52 = vadd.f32 1e-05, %v10930_v36  ;;  %v12667_v36 = vld [vmem:[%s19054_s7 + $0xb0] sm:$0xff]  }
 0xa5b   :  { %12270 = vmatpush3.bf16.msra.mxu1 %v12665_v31 }
 0xa5c   :  { %12686 = vrsqrt.f32 %v10931_v52  ;;  %12271 = vmatprep.subr.bf16.mxu1 %v12666_v13  ;;  %v12668_v52 = vld [vmem:[%s19054_s7 + $0xf8] sm:$0xff]  }
 0xa5f   :  { %12272 = vmatpush3.bf16.msra.mxu1 %v12667_v36 }
 0xa60   :  { %12273 = vmatprep.subr.bf16.mxu1 %v12668_v52 }
 0xa66   :  { %v12687_v0 = vpop.eup %12686 }
 0xa67   :  { %v10933_v53 = vmul.f32 %v12687_v0, %v10565_v56  ;;  %v12669_v56 = vld [vmem:[%s19054_s7 + $0xb8] sm:$0xff]  }
 0xa68   :  { %12274 = vmatpush3.bf16.msra.mxu1 %v12669_v56 }
 0xa69   :  { %v10934_v41 = vmul.f32 %v10933_v53, %v10920_v5  ;;  %v10940_v63 = vrot.slane %v10933_v53, %v15385_v2 }
 0xa6b   :  { %v10935_v61 = vsub.f32 %v10566_v59, %v10934_v41  ;;  %v10942_v19 = vmul.f32 %v10940_v63, %v10907_v39  ;;  %v12656_v39 = vld [vmem:[%s19054_s7 + $0x78] sm:$0xff]  }
 0xa6c   :  { %12251 = vmatprep.subr.bf16.mxu0 %v12656_v39  ;;  %v12679_v39 = vld [vmem:[%s19054_s7 + $0x118] sm:$0xff]  }
 0xa6d   :  { %v10947_v38 = vrot.slane %v10935_v61, %v15385_v2  ;;  %12252 = vmatpush3.bf16.msra.mxu0 %v12657_v12 }
 0xa6e   :  { %12418 = vmatprep.subr.bf16.mxu0 %v19929_v46 }
 0xa6f   :  { %v10949_v58 = vadd.f32 %v10947_v38, %v10942_v19 }
 0xa71   :  { %v10950_v45 = vmax.f32 %v10949_v58, 0.0 }
 0xa73   :  { %v10952_v4 = vcombine.high %v10950_v45, %v10950_v45  ;;  %v10959_v9 = vrot.slane %v10950_v45, %v19930_v43 }
 0xa75   :  { %v10966_v30 = vrot.slane %v10952_v4, %v19930_v43  ;;  %v10967_v40 = vcombine.high %v10959_v9, %v10959_v9  ;;  %10973 = vst.msk [vmem:[#allocation5 + $0x5] sm:$0x3] %vm9731_vm1, %v10959_v9 }
 0xa77   :  { %v10968_v6 = vcombine.high %v10966_v30, %v10966_v30  ;;  %10974 = vst.msk [vmem:[#allocation5 + $0x9] sm:$0x3] %vm9731_vm1, %v10967_v40  ;;  %10975 = vst.msk [vmem:[#allocation5 + $0x15] sm:$0x3] %vm9731_vm1, %v10966_v30 }
 0xa79   :  { %10976 = vst.msk [vmem:[#allocation5 + $0x19] sm:$0x3] %vm9731_vm1, %v10968_v6 }
 0xa7c   :  { %v10978_v26 = vld [vmem:[#allocation5 + $0x4] sm:$0xf] }
 0xa7d   :  { %v11007_v32 = vrot.slane %v10978_v26, %v19930_v43  ;;  %10986 = vst.msk [vmem:[#allocation4 + $0xa] sm:$0x3] %vm9731_vm1, %v10978_v26 }
 0xa7e   :  { %v10979_v54 = vld [vmem:[#allocation5 + $0x8] sm:$0xf]  ;;  %v10982_v34 = vld [vmem:[#allocation5 + $0x14] sm:$0xf] }
 0xa7f   :  { %11081 = vrot.lane.b32.xlu0 %v11007_v32, %s12726_s2  ;;  %v11073_v33 = vrot.slane %v10979_v54, %v19930_v43  ;;  %11131 = vst.msk [vmem:[#allocation4 + $0x6] sm:$0x3] %vm9731_vm1, %v10979_v54  ;;  %v11023_v51 = vrot.slane %v10982_v34, %v19930_v43  ;;  %10988 = vst.msk [vmem:[#allocation4 + $0x1e] sm:$0x3] %vm9731_vm1, %v10982_v34  ;;  %v11008_v47 = vcombine.high %v11007_v32, %v11007_v32 }
 0xa80   :  { %v10983_v20 = vld [vmem:[#allocation5 + $0x18] sm:$0xf]  ;;  %v12028_v23 = vrot.slane %v11007_v32, 9 }
 0xa81   :  { %11083 = vrot.lane.b32.xlu1 %v11073_v33, %s12726_s2  ;;  %v11080_v42 = vrot.slane %v10983_v20, %v19930_v43  ;;  %11133 = vst.msk [vmem:[#allocation4 + $0x1a] sm:$0x3] %vm9731_vm1, %v10983_v20  ;;  %11062 = vst.msk [vmem:[#allocation4 + $0xc] sm:$0x3] %vm9731_vm1, %v11008_v47  ;;  %v11097_v57 = vcombine.high %v11073_v33, %v11073_v33  ;;  %v11024_v44 = vcombine.high %v11023_v51, %v11023_v51 }
 0xa82   :  { %v11031_v25 = vrot.slane %v11008_v47, 7  ;;  %v12031_v48 = vrot.slane %v11073_v33, 9  ;;  %v12030_v1 = vrot.slane %v11023_v51, 9 }
 0xa83   :  { %11085 = vrot.lane.b32.xlu0 %v11023_v51, %s12726_s2  ;;  %11181 = vst.msk [vmem:[#allocation4 + $0x8] sm:$0x3] %vm9731_vm1, %v11097_v57  ;;  %11064 = vst.msk [vmem:[#allocation4 + $0x20] sm:$0x3] %vm9731_vm1, %v11024_v44  ;;  %v11101_v29 = vrot.slane %v11097_v57, 7  ;;  %v11098_v17 = vcombine.high %v11080_v42, %v11080_v42  ;;  %v11039_v62 = vrot.slane %v11024_v44, 7 }
 0xa84   :  { %v11032_v3 = vsel %vm18492_vm11, %v12028_v23, %v11031_v25  ;;  %v12032_v24 = vrot.slane %v11080_v42, 9  ;;  %v12676_v23 = vld [vmem:[%s19054_s7 + $0x100] sm:$0xff]  }
 0xa85   :  { %11111 = vst.msk [vmem:[#allocation4 + $0x4] sm:$0x3] %vm9731_vm1, %v11032_v3  ;;  %11087 = vrot.lane.b32.xlu1 %v11080_v42, %s12726_s2  ;;  %v11102_v50 = vsel %vm18492_vm11, %v12031_v48, %v11101_v29  ;;  %11183 = vst.msk [vmem:[#allocation4 + $0x1c] sm:$0x3] %vm9731_vm1, %v11098_v17  ;;  %v11105_v5 = vrot.slane %v11098_v17, 7  ;;  %v11040_v8 = vsel %vm18492_vm11, %v12030_v1, %v11039_v62 }
 0xa86   :  { %11112 = vst.msk [vmem:[#allocation4 + $0xe] sm:$0x3] %vm9731_vm1, %v11102_v50  ;;  %11113 = vst.msk [vmem:[#allocation4 + $0x18] sm:$0x3] %vm9731_vm1, %v11040_v8  ;;  %v12035_v1 = vld [vmem:[%s19055_s8] ss:$0 sm:$0xff] }
 0xa87   :  { %11115 = vrot.lane.b32.xlu0 %v11008_v47, %s12726_s2  ;;  %v11106_v35 = vsel %vm18492_vm11, %v12032_v24, %v11105_v5 }
 0xa88   :  { %11114 = vst.msk [vmem:[#allocation4 + $0x22] sm:$0x3] %vm9731_vm1, %v11106_v35 }
 0xa89   :  { %11117 = vrot.lane.b32.xlu1 %v11097_v57, %s12726_s2 }
 0xa8a   :  { %v12680_v57 = vld [vmem:[#allocation4 + $0x8] ss:$10 sps:$4 sm:$0x33]  }
 0xa8b   :  { %11119 = vrot.lane.b32.xlu0 %v11024_v44, %s12726_s2  ;;  %v12678_v44 = vld [vmem:[%s19054_s7 + $0x110] sm:$0xff]   ;;  %v11245_v15 = vrot.slane %v12680_v57, %v19930_v43 }
 0xa8c   :  { %v12681_v42 = vld [vmem:[#allocation4 + $0x1c] ss:$10 sps:$4 sm:$0x33]  }
 0xa8d   :  { %11043 = vrot.lane.b32.xlu1 %v11032_v3, %s12726_s2  ;;  %v11252_v25 = vrot.slane %v12681_v42, %v19930_v43 }
 0xa8f   :  { %11161 = vrot.lane.b32.xlu0 %v11102_v50, %s12726_s2  ;;  %v11253_v3 = vcombine.low %v11245_v15, %v11252_v25 }
 0xa91   :  { %11121 = vrot.lane.b32.xlu1 %v11098_v17, %s12726_s2  ;;  %v11263_v48 = vpack.c.bf16 %v11253_v3, %v11253_v3 }
 0xa93   :  { %11165 = vrot.lane.b32.xlu0 %v11106_v35, %s12726_s2 }
 0xa95   :  { %11047 = vrot.lane.b32.xlu1 %v11040_v8, %s12726_s2 }
 0xa99   :  { %11167 = vrot.lane.b32.xlu1 %v18847_v18, %s12726_s2 }
 0xaf1   :  { %v11082_v0 = vpop.permute.xlu0 %11081 }
 0xaf2   :  { %11093 = vst.msk [vmem:[#allocation4 + $0x2] sm:$0x3] %vm10280_vm12, %v11082_v0 }
 0xaf3   :  { %v11084_v53 = vpop.permute.xlu1 %11083 }
 0xaf4   :  { %11094 = vst.msk [vmem:[#allocation4 + $0xc] sm:$0x3] %vm10280_vm12, %v11084_v53 }
 0xaf5   :  { %v11086_v59 = vpop.permute.xlu0 %11085 }
 0xaf6   :  { %11095 = vst.msk [vmem:[#allocation4 + $0x16] sm:$0x3] %vm10280_vm12, %v11086_v59 }
 0xaf7   :  { %v11088_v41 = vpop.permute.xlu1 %11087 }
 0xaf8   :  { %11096 = vst.msk [vmem:[#allocation4 + $0x20] sm:$0x3] %vm10280_vm12, %v11088_v41 }
 0xaf9   :  { %v11116_v63 = vpop.permute.xlu0 %11115 }
 0xafa   :  { %11127 = vst.msk [vmem:[#allocation4 + $0x4] sm:$0x3] %vm10280_vm12, %v11116_v63 }
 0xafb   :  { %v11118_v61 = vpop.permute.xlu1 %11117 }
 0xafc   :  { %11128 = vst.msk [vmem:[#allocation4 + $0xe] sm:$0x3] %vm10280_vm12, %v11118_v61 }
 0xafd   :  { %v11120_v18 = vpop.permute.xlu0 %11119 }
 0xafe   :  { %11129 = vst.msk [vmem:[#allocation4 + $0x18] sm:$0x3] %vm10280_vm12, %v11120_v18 }
 0xaff   :  { %v11044_v19 = vpop.permute.xlu1 %11043 }
 0xb00   :  { %11054 = vst.msk [vmem:[#allocation4 + $0xa] sm:$0x3] %vm10280_vm12, %v11044_v19 }
 0xb01   :  { %v11162_v38 = vpop.permute.xlu0 %11161 }
 0xb02   :  { %11173 = vst.msk [vmem:[#allocation4 + $0x6] sm:$0x3] %vm10280_vm12, %v11162_v38 }
 0xb03   :  { %v11122_v58 = vpop.permute.xlu1 %11121 }
 0xb04   :  { %11130 = vst.msk [vmem:[#allocation4 + $0x22] sm:$0x3] %vm10280_vm12, %v11122_v58 }
 0xb05   :  { %v11166_v45 = vpop.permute.xlu0 %11165 }
 0xb06   :  { %11175 = vst.msk [vmem:[#allocation4 + $0x1a] sm:$0x3] %vm10280_vm12, %v11166_v45 }
 0xb07   :  { %v11048_v4 = vpop.permute.xlu1 %11047  ;;  %v12670_v60 = vld [vmem:[#allocation4] ss:$10 sps:$4 sm:$0xff]  }
 0xb08   :  { %11056 = vst.msk [vmem:[#allocation4 + $0x1e] sm:$0x3] %vm10280_vm12, %v11048_v4  ;;  %v11211_v6 = vrot.slane %v12670_v60, %v19930_v43 }
 0xb09   :  { %v12674_v30 = vld [vmem:[#allocation4 + $0x4] ss:$10 sps:$4 sm:$0xff]  }
 0xb0a   :  { %v11218_v26 = vrot.slane %v12674_v30, %v19930_v43  ;;  %v11337_v30 = vld [vmem:[%s19055_s8 + $0x1] sm:$0x1] }
 0xb0b   :  { %v11168_v9 = vpop.permute.xlu1 %11167 }
 0xb0c   :  { %11176 = vst.msk [vmem:[#allocation4 + $0x24] sm:$0x3] %vm10280_vm12, %v11168_v9 }
 0xb0f   :  { %v12672_v40 = vld [vmem:[#allocation4 + $0x14] ss:$10 sps:$4 sm:$0xff]  }
 0xb10   :  { %v11225_v49 = vrot.slane %v12672_v40, %v19930_v43 }
 0xb12   :  { %v11233_v32 = vcombine.low %v11211_v6, %v11225_v49  ;;  %v11234_v54 = vcombine.high %v11211_v6, %v11225_v49  ;;  %v11338_v6 = vld [vmem:[%s19055_s8 + $0x2] sm:$0x1]  ;;  %s12690_s8 = scalar_lea.vmem %s11754_s4, 128 }
 0xb13   :  { %v12675_v16 = vld [vmem:[#allocation4 + $0x18] ss:$10 sps:$4 sm:$0xff]   ;;  %p12691_p0 = scmp.ne.s32.totalorder %s11754_s4, %s12690_s8  ;;  %p12696_p2 = scmp.lt.s32.totalorder %s12690_s8, %s12690_s8 }
 0xb14   :  { %v11232_v55 = vrot.slane %v12675_v16, %v19930_v43  ;;  %v11259_v33 = vpack.c.bf16 %v11233_v32, %v11233_v32  ;;  %v11260_v51 = vpack.c.bf16 %v11234_v54, %v11234_v54 }
 0xb15   :  { %p12697_p3 = por %p12696_p2, %p12695_p1 }
 0xb16   :  { %v11236_v34 = vcombine.high %v11218_v26, %v11232_v55  ;;  %v11235_v22 = vcombine.low %v11218_v26, %v11232_v55  ;;  %11596 = vmatprep.mubr.bf16.mxu0 %v11260_v51 }
 0xb17   :  { %11597 = vmatmul.mubr.bf16.vlgmr.msra.gmra.mrb[100].mxu0 %v11259_v33  ;;  %p12698_p4 = pnand %p12697_p3, %p12691_p0 }
 0xb18   :  { %v11262_v47 = vpack.c.bf16 %v11236_v34, %v11236_v34  ;;  %v11261_v20 = vpack.c.bf16 %v11235_v22, %v11235_v22  ;;  %12419 = vmatpush3.bf16.msra.mxu0 %v12676_v23  ;;  %12426 = vmatprep.mubr.msk.bf16.mxu0 %vm19274_vm8, %v19929_v46 }
 0xb19   :  { %12420 = vmatprep.subr.bf16.mxu0 %v19929_v46 }
 0xb1a   :  { %11636 = vmatprep.mubr.bf16.mxu1 %v11262_v47 }
 0xb1b   :  { %11637 = vmatmul.mubr.bf16.vlgmr.msra.gmra.mrb[52].mxu1 %v11261_v20 }
 0xb1c   :  { %12421 = vmatpush3.bf16.msra.mxu0 %v12677_v21 }
 0xb1d   :  { %12422 = vmatprep.subr.bf16.mxu0 %v19929_v46 }
 0xb20   :  { %12423 = vmatpush3.bf16.msra.mxu0 %v12678_v44 }
 0xb21   :  { %12424 = vmatprep.subr.bf16.mxu0 %v19929_v46 }
 0xb24   :  { %12425 = vmatpush3.bf16.msra.mxu0 %v12679_v39 }
 0xb27   :  { %12427 = vmatmul.mubr.msk.bf16.vlgmr.msra.gmra.mrb[104].mxu0 %vm4310_vm4, %v11263_v48 }
 0xbea   :  { %v12253_v29 = vpop.f32.mrb[100].mxu0 }
 0xbeb   :  { %v12254_v62 = vpop.f32.mrb[101].mxu0 }
 0xbec   :  { %v12255_v7 = vadd.f32 %v12254_v62, %v12253_v29  ;;  %v12256_v24 = vpop.f32.mrb[102].mxu0 }
 0xbed   :  { %v12257_v8 = vpop.f32.mrb[103].mxu0 }
 0xbee   :  { %v12275_v17 = vpop.f32.mrb[52].mxu1  ;;  %v11599_v46 = vadd.f32 %v12255_v7, %v12035_v1 }
 0xbef   :  { %v12276_v12 = vpop.f32.mrb[53].mxu1 }
 0xbf0   :  { %v12277_v50 = vadd.f32 %v12276_v12, %v12275_v17  ;;  %v12278_v5 = vpop.f32.mrb[54].mxu1 }
 0xbf1   :  { %v12279_v10 = vpop.f32.mrb[55].mxu1 }
 0xbf2   :  { %v11639_v35 = vadd.f32 %v12277_v50, %v11599_v46 }
 0xbfa   :  { %v11678_v27 = vpop.f32.mrb[104].mxu0 }
 0xbfb   :  { %v11679_v14 = vadd.f32 %v11678_v27, %v11639_v35  ;;  %v12428_v11 = vpop.f32.mrb[105].mxu0 }
 0xbfc   :  { %v11681_v37 = vpop.f32.mrb[106].mxu0 }
 0xbfd   :  { %v11684_v28 = vsel %vm4310_vm4, %v11679_v14, 0.0  ;;  %v12429_v31 = vpop.f32.mrb[107].mxu0 }
 0xbfe   :  { %v11685_v13 = vrot.slane %v11684_v28, 4 }
 0xc00   :  { %v11686_v36 = vadd.f32 %v11685_v13, %v11684_v28 }
 0xc02   :  { %v11687_v52 = vrot.slane %v11686_v36, 2 }
 0xc04   :  { %v11688_v56 = vadd.f32 %v11687_v52, %v11686_v36 }
 0xc06   :  { %v11689_v0 = vrot.slane %v11688_v56, 1 }
 0xc08   :  { %v11690_v53 = vadd.f32 %v11689_v0, %v11688_v56 }
 0xc0a   :  { %v11691_v59 = vmul.f32 0.125, %v11690_v53 }
 0xc0c   :  { %v11692_v41 = vsub.f32 %v11679_v14, %v11691_v59 }
 0xc0e   :  { %v11693_v63 = vmul.f32 %v11692_v41, %v11692_v41 }
 0xc10   :  { %v11694_v61 = vsel %vm4310_vm4, %v11693_v63, 0.0 }
 0xc11   :  { %v11695_v18 = vrot.slane %v11694_v61, 4 }
 0xc13   :  { %v11696_v19 = vadd.f32 %v11695_v18, %v11694_v61 }
 0xc15   :  { %v11697_v38 = vrot.slane %v11696_v19, 2 }
 0xc17   :  { %v11698_v58 = vadd.f32 %v11697_v38, %v11696_v19 }
 0xc19   :  { %v11699_v45 = vrot.slane %v11698_v58, 1 }
 0xc1b   :  { %v11700_v4 = vadd.f32 %v11699_v45, %v11698_v58 }
 0xc1d   :  { %v11701_v9 = vmul.f32 0.125, %v11700_v4 }
 0xc1f   :  { %v11702_v60 = vadd.f32 1e-05, %v11701_v9 }
 0xc21   :  { %12688 = vrsqrt.f32 %v11702_v60 }
 0xc2b   :  { %v12689_v40 = vpop.eup %12688 }
 0xc2c   :  { %v11704_v16 = vmul.f32 %v12689_v40, %v11337_v30 }
 0xc2e   :  { %v11705_v49 = vmul.f32 %v11704_v16, %v11691_v59  ;;  %v11711_v26 = vrot.slane %v11704_v16, %v15385_v2 }
 0xc30   :  { %v11706_v55 = vsub.f32 %v11338_v6, %v11705_v49  ;;  %v11713_v32 = vmul.f32 %v11711_v26, %v11679_v14 }
 0xc32   :  { %v11718_v54 = vrot.slane %v11706_v55, %v15385_v2 }
 0xc34   :  { %v11720_v34 = vadd.f32 %v11718_v54, %v11713_v32 }
 0xc36   :  { %v11721_v22 = vmax.f32 %v11720_v34, 0.0 }
 0xc38   :  { %v11723_v33 = vcombine.high %v11721_v22, %v11721_v22  ;;  %v11730_v51 = vrot.slane %v11721_v22, %v19930_v43 }
 0xc3a   :  { %v11737_v47 = vrot.slane %v11723_v33, %v19930_v43  ;;  %v11738_v20 = vcombine.high %v11730_v51, %v11730_v51  ;;  %11744 = vst.msk [vmem:[#allocation6] sm:$0x3] %vm9731_vm1, %v11730_v51 }
 0xc3c   :  { %v11739_v23 = vcombine.high %v11737_v47, %v11737_v47  ;;  %11745 = vst.msk [vmem:[#allocation6 + $0x2] sm:$0x3] %vm9731_vm1, %v11738_v20  ;;  %11746 = vst.msk [vmem:[#allocation6 + $0x4] sm:$0x3] %vm9731_vm1, %v11737_v47 }
 0xc3e   :  { %11747 = vst.msk [vmem:[#allocation6 + $0x6] sm:$0x3] %vm9731_vm1, %v11739_v23 }
 0xc3f   :  { %12701 = shalt.err (!%p12698_p4)
}
 0xc40   :  { %s12702_s5 = scalar_lea.hbm %s19056_s9, 128 }
 0xc41   :  { %p12703_p5 = scmp.ne.s32.totalorder %s19056_s9, %s12702_s5  ;;  %p12706_p6 = scmp.lt.u32.totalorder %s12702_s5, %s19056_s9 }
 0xc43   :  { %p12708_p7 = pnand %p12706_p6, %p12703_p5 }
 0xc45   :  { %12711 = shalt.err (!%p12708_p7)
}
 0xc46   :  { %s12729_s15 = smov 32   ;;  %s12730_s16 = smov 2  }
 0xc47   :  { %11759 = dma.vmem_to_hbm [thread:$0]  %s11754_s4, 128, %s19056_s9, [#allocation7], %s12729_s15, %s12729_s15, %s12730_s16  }
 0xc48   :  { %12712 = dma.done.wait [#allocation7], 128  }
 0xc49   :  { %12713 = vsyncadd [#allocation7], 4294967168 }
 0xc4a   :  { %11763 = vsyncpa [#allocation7], 1 }

</bundles_post_ra>
